<compile_context>
chip_gen: v7x
topology: tpu7x:2x2x1
jax: 0.10.0
libtpu: 0.0.40
codegen_flags: <defaults>
</compile_context>

<pallas_src>
import functools
import math

import jax
import jax.numpy as jnp
from jax.experimental import pallas as pl
from jax.experimental.pallas import tpu as pltpu

_EPS = 1e-5                 # nn.BatchNorm1d default eps
_NEG = -1e30                # additive mask bias for padded keys
TILE_ROWS = 512             # voxel rows per grid step for the fused attention blocks
ROW_GRAN = 32               # row-padding granularity (keeps all block sublanes % 8)
KEY_DTYPE = jnp.bfloat16    # storage dtype for the VMEM-resident K/V source tables


# ----------------------------------------------------------------------------
# small helpers
# ----------------------------------------------------------------------------
def _round_up(x, m):
    return ((x + m - 1) // m) * m


def _pad_rows(a, target, value=0):
    if a.shape[0] == target:
        return a
    pad = [(0, target - a.shape[0])] + [(0, 0)] * (a.ndim - 1)
    return jnp.pad(a, pad, constant_values=value)


def _tiled_spec(arr, t):
    nd = arr.ndim
    block = (t,) + arr.shape[1:]
    return pl.BlockSpec(block, lambda i, _nd=nd: (i,) + (0,) * (_nd - 1))


def _resident_spec(arr):
    # constant index_map -> Pallas skips the re-copy, array stays VMEM resident.
    nd = arr.ndim
    return pl.BlockSpec(arr.shape, lambda i, _nd=nd: (0,) * _nd)


@functools.lru_cache(maxsize=None)
def _vmem_limit_bytes():
    # Per-generation VMEM budget (v5e/v6e: 128 MiB, v7x: 64 MiB) with headroom.
    cap = 64 * 1024 * 1024
    try:
        info = pltpu.get_tpu_info()
        cap = int(getattr(info, "vmem_capacity_bytes", cap))
    except Exception:
        pass
    return int(cap * 3 // 4)


def _pick_tile(m_rows, gran, cap):
    """Pick (tile_rows, padded_rows): tile multiple of gran, padded multiple of tile."""
    cap = max(gran, (cap // gran) * gran)
    mp = _round_up(max(m_rows, 1), gran)
    t = min(cap, mp)
    mp = _round_up(mp, t)
    # v7x has 2 TensorCores: prefer >=2 "parallel" grid steps when there is enough work.
    if mp == t and mp >= 2 * gran:
        t = _round_up(mp // 2, gran)
        mp = _round_up(max(m_rows, 1), t)
    return t, mp


def _fold_bn(bn):
    # BatchNorm1d (eval) folded to y * s + t
    s = bn['g'] * jax.lax.rsqrt(bn['var'] + _EPS)
    t = bn['b'] - bn['mu'] * s
    return s, t


def _head_mat(c, num_heads):
    # Block-diagonal within-head sum matrix: hmat[c, c'] = 1 iff head(c) == head(c').
    head = jnp.arange(c, dtype=jnp.int32) // (c // num_heads)
    return (head[:, None] == head[None, :]).astype(jnp.bfloat16)


def _pack_vecs(rows, total=8):
    # Pack tiny (1, C) bias / BN vectors into one resident [total, C] array.
    v = jnp.concatenate(rows, axis=0)
    if v.shape[0] < total:
        v = jnp.pad(v, ((0, total - v.shape[0]), (0, 0)))
    return v


# ----------------------------------------------------------------------------
# Pallas kernels
# ----------------------------------------------------------------------------
def _linear_relu_kernel(x_ref, w_ref, b_ref, o_ref):
    # Input transform: Linear + (folded) BatchNorm + ReLU, bf16 MXU operands.
    y = jnp.dot(x_ref[...].astype(jnp.bfloat16), w_ref[...],
                preferred_element_type=jnp.float32) + b_ref[...]
    o_ref[...] = jnp.maximum(y, 0.0)


def _fused_block_kernel(*refs, num_heads, with_query_features):
    """Fused attention block (DADA3d when with_query_features else SparseAttention3d)."""
    if with_query_features:
        (feat_ref, qc_ref, kidx_ref, valid_ref,
         ktab_ref, vtab_ref, qpw_ref, wq_ref, hmat_ref, wo_ref,
         w1_ref, w2_ref, wout_ref, vec_ref, b1_ref, bout_ref, o_ref) = refs
    else:
        (qc_ref, kidx_ref, valid_ref,
         ktab_ref, vtab_ref, qpw_ref, wq_ref, hmat_ref, wo_ref,
         w1_ref, w2_ref, wout_ref, vec_ref, b1_ref, bout_ref, o_ref) = refs
        feat_ref = None

    f32, bf16 = jnp.float32, jnp.bfloat16
    T = qc_ref.shape[0]
    K = kidx_ref.shape[1]
    Np, C = ktab_ref.shape
    scale = 1.0 / math.sqrt(C // num_heads)

    vec = vec_ref[...]                       # packed small params, rows:
    qpb, bq, bo = vec[0:1], vec[1:2], vec[2:3]      # q_pos bias | q bias | out-proj bias
    b2, n2s, n2t = vec[3:4], vec[4:5], vec[5:6]     # lin2 bias  | norm2 scale/shift

    # ---- query path: positional embedding (+ features), Q projection --------
    qpos = jnp.maximum(
        jnp.dot(qc_ref[...].astype(bf16), qpw_ref[...],
                preferred_element_type=f32) + qpb, 0.0)
    if with_query_features:
        x = feat_ref[...]
        q_in = x + qpos
    else:
        q_in = qpos
    qp = (jnp.dot(q_in.astype(bf16), wq_ref[...],
                  preferred_element_type=f32) + bq) * scale            # [T, C]

    # ---- in-kernel gather of pre-projected K / V rows from the VMEM-resident
    #      bf16 tables.  One-hot row selection runs on the MXU (guaranteed
    #      lowering); no [N,K,C]/[N,K,3] tensor ever goes through HBM.
    # TODO(synk): for source tables with many thousands of rows the [K*T, Np]
    #      one-hot exceeds VMEM; switch to a chunked gather loop or a DMA gather.
    valid = valid_ref[...]                                             # [T, 1] int32
    src_iota = jax.lax.broadcasted_iota(jnp.int32, (T, Np), 1)
    onehots, biases = [], []
    for k in range(K):                                                 # K static (=16)
        eq = kidx_ref[:, k:k + 1] == src_iota                          # [T, Np]
        onehots.append(jnp.where(eq, 1.0, 0.0).astype(bf16))
        biases.append(jnp.where(valid > k, 0.0, _NEG))                 # key padding mask
    oh = jnp.concatenate(onehots, axis=0)                              # [K*T, Np] bf16
    bias = jnp.concatenate(biases, axis=0)                             # [K*T, 1]  f32

    kp = jnp.dot(oh, ktab_ref[...], preferred_element_type=f32)        # [K*T, C]
    vp = jnp.dot(oh, vtab_ref[...], preferred_element_type=f32)        # [K*T, C]

    # ---- per-head scores via a block-diagonal within-head-sum matmul --------
    # scores stay broadcast at C-lane width, directly reusable for P*V.
    prod = (kp.reshape(K, T, C) * qp[None, :, :]).reshape(K * T, C)
    s = jnp.dot(prod.astype(bf16), hmat_ref[...], preferred_element_type=f32)
    s = (s + bias).reshape(K, T, C)

    # ---- softmax over the K key slots (leading axis) -------------------------
    m = jnp.max(s, axis=0, keepdims=True)
    e = jnp.exp(s - m)
    p = e * pl.reciprocal(jnp.sum(e, axis=0, keepdims=True), approx=True)
    o_att = jnp.sum(p * vp.reshape(K, T, C), axis=0)                   # [T, C]

    attn = jnp.dot(o_att.astype(bf16), wo_ref[...],
                   preferred_element_type=f32) + bo

    # ---- residual / norm / FFN / output layer --------------------------------
    if with_query_features:
        n1s, n1t = vec[6:7], vec[7:8]
        y = (x + attn) * n1s + n1t               # norm1(x + attn), BN(eval) folded
    else:
        y = attn

    h1 = jnp.maximum(
        jnp.dot(y.astype(bf16), w1_ref[...], preferred_element_type=f32)
        + b1_ref[...], 0.0)
    a2 = jnp.dot(h1.astype(bf16), w2_ref[...], preferred_element_type=f32) + b2
    y2 = (y + a2) * n2s + n2t                    # norm2(y + FFN(y))

    out = jnp.dot(y2.astype(bf16), wout_ref[...],
                  preferred_element_type=f32) + bout_ref[...]          # BN folded in
    # NOTE: output stays [T, out_c]; rows are HBM-contiguous, and a lane-dense
    # [T, out_c] -> [T*out_c/128, 128] repack would need a minor-dim reshape.
    o_ref[...] = jnp.maximum(out, 0.0)


# ----------------------------------------------------------------------------
# pallas_call wrappers
# ----------------------------------------------------------------------------
def linear_bn_relu(x, w, b, bn):
    s, t = _fold_bn(bn)
    wf = (w * s).astype(jnp.bfloat16)            # fold BN scale into weights
    bf = b * s + t                               # and BN shift into bias
    M = x.shape[0]
    T, Mp = _pick_tile(M, ROW_GRAN, 1024)
    xp = _pad_rows(x, Mp)
    out = pl.pallas_call(
        _linear_relu_kernel,
        out_shape=jax.ShapeDtypeStruct((Mp, w.shape[1]), jnp.float32),
        grid=(Mp // T,),
        in_specs=[_tiled_spec(xp, T), _resident_spec(wf), _resident_spec(bf)],
        out_specs=pl.BlockSpec((T, w.shape[1]), lambda i: (i, 0)),
        compiler_params=pltpu.CompilerParams(
            dimension_semantics=("parallel",),
            vmem_limit_bytes=_vmem_limit_bytes()),
    )(xp, wf, bf)
    return out[:M]


def _run_fused_block(row_inputs, tables, mats, small, *, out_c, num_heads,
                     with_query_features):
    M = row_inputs[0].shape[0]
    T, Mp = _pick_tile(M, ROW_GRAN, TILE_ROWS)

    padded = []
    for idx, a in enumerate(row_inputs):
        is_valid_counts = (idx == len(row_inputs) - 1)
        padded.append(_pad_rows(a, Mp, value=1 if is_valid_counts else 0))

    resident = tables + mats + small
    in_specs = ([_tiled_spec(a, T) for a in padded]
                + [_resident_spec(a) for a in resident])
    kern = functools.partial(_fused_block_kernel, num_heads=num_heads,
                             with_query_features=with_query_features)
    out = pl.pallas_call(
        kern,
        out_shape=jax.ShapeDtypeStruct((Mp, out_c), jnp.float32),
        grid=(Mp // T,),
        in_specs=in_specs,
        out_specs=pl.BlockSpec((T, out_c), lambda i: (i, 0)),
        compiler_params=pltpu.CompilerParams(
            dimension_semantics=("parallel",),
            vmem_limit_bytes=_vmem_limit_bytes()),
    )(*(padded + resident))
    return out[:M]


# ----------------------------------------------------------------------------
# glue: coords, synthetic neighbour indices, table precompute
# ----------------------------------------------------------------------------
def with_coords(indices, pc_range, voxel_size):
    vs = jnp.asarray(voxel_size, jnp.float32)[None, :]
    mn = jnp.asarray(pc_range[0:3], jnp.float32)[None, :]
    xyz = indices[:, jnp.array([3, 2, 1])].astype(jnp.float32)
    return (xyz + 0.5) * vs + mn


def _pad_to8(x):
    # pad the 3-wide coord dim to 8 lanes (zeros) for an MXU-friendly contraction
    return jnp.pad(x, ((0, 0), (0, 8 - x.shape[-1])))


def make_keys(num_queries, num_src, K):
    # TODO(synk): votr_utils.{subm,sparse}_{local,strided}_attention_hash_indices are
    # custom CUDA hash-table ops; replaced by a deterministic synthetic neighbour
    # pattern + per-row valid counts (>=1 valid key per query).
    q = jnp.arange(num_queries, dtype=jnp.int32)[:, None]
    j = jnp.arange(K, dtype=jnp.int32)[None, :]
    idx = (q * 3 + j * 5) % num_src
    valid = (1 + (q % K)).astype(jnp.int32)          # [Nq, 1], always >= 1
    return idx, valid


def _build_kv_tables(features, src_coords8, p):
    # Key positional embedding depends only on the source voxel -> fold it into the
    # source table, and pre-apply the K / V projections once per *source* row
    # (instead of once per (query, key) pair inside the kernel).
    kpos = jnp.maximum(src_coords8 @ p['k_pos_w'] + p['k_pos_b'], 0.0)
    base = features + kpos
    k_tab = base @ p['mha']['wk'] + p['mha']['bk']
    v_tab = base @ p['mha']['wv'] + p['mha']['bv']
    n = _round_up(base.shape[0], 16)                 # bf16 sublane packing
    return (_pad_rows(k_tab.astype(KEY_DTYPE), n),
            _pad_rows(v_tab.astype(KEY_DTYPE), n))


def _module_weights(p, cfg, c, norm_rows):
    n2s, n2t = _fold_bn(p['norm2'] if 'norm2' in p else p['norm'])
    obs, obt = _fold_bn(p['out_bn'])
    mats = [p['q_pos_w'].astype(jnp.bfloat16),
            p['mha']['wq'].astype(jnp.bfloat16),
            _head_mat(c, cfg['num_heads']),
            p['mha']['wo'].astype(jnp.bfloat16),
            p['lin1_w'].astype(jnp.bfloat16),
            p['lin2_w'].astype(jnp.bfloat16),
            (p['out_w'] * obs).astype(jnp.bfloat16)]          # out BN folded in
    vec = _pack_vecs([p['q_pos_b'], p['mha']['bq'], p['mha']['bo'], p['lin2_b'],
                      n2s, n2t] + norm_rows)
    small = [vec, p['lin1_b'], p['out_b'] * obs + obt]
    return mats, small


# ----------------------------------------------------------------------------
# module forwards
# ----------------------------------------------------------------------------
def dada3d_forward(p, cfg, features, indices, voxel_size, pc_range):
    N, C = features.shape
    K = cfg['num_keys']
    # TODO(synk): randperm-based reference/adjacent-voxel density rebalancing skipped.
    key_idx, valid = make_keys(N, N, K)
    coords8 = _pad_to8(with_coords(indices, pc_range, voxel_size))       # [N, 8]

    k_tab, v_tab = _build_kv_tables(features, coords8, p)
    n1s, n1t = _fold_bn(p['norm1'])
    mats, small = _module_weights(p, cfg, C, norm_rows=[n1s, n1t])

    return _run_fused_block([features, coords8, key_idx, valid],
                            [k_tab, v_tab], mats, small,
                            out_c=p['out_w'].shape[1],
                            num_heads=cfg['num_heads'],
                            with_query_features=True)


def sparse_attn_forward(p, cfg, features, indices, spatial_shape, voxel_size, pc_range):
    N, C = features.shape
    strides = cfg['strides']
    K = cfg['num_keys']

    # TODO(synk): votr_utils.hash_table_down_sample replaced by a deterministic static
    # downsample (first N//2 voxels, integer-divided spatial coords).
    M = N // 2
    new_spatial_shape = [spatial_shape[i] // strides[i] for i in range(3)]
    new_voxel_size = [voxel_size[i] * strides[i] for i in range(3)]
    # indices columns are [b, z, y, x]; strides are ordered [sx, sy, sz].
    new_indices = jnp.concatenate(
        [indices[:M, 0:1],
         indices[:M, 1:2] // strides[2],   # z
         indices[:M, 2:3] // strides[1],   # y
         indices[:M, 3:4] // strides[0]],  # x
        axis=1)

    key_idx, valid = make_keys(M, N, K)
    src_coords8 = _pad_to8(with_coords(indices, pc_range, voxel_size))
    query_coords8 = _pad_to8(with_coords(new_indices, pc_range, new_voxel_size))

    k_tab, v_tab = _build_kv_tables(features, src_coords8, p)
    mats, small = _module_weights(p, cfg, C, norm_rows=[])

    new_f = _run_fused_block([query_coords8, key_idx, valid],
                             [k_tab, v_tab], mats, small,
                             out_c=p['out_w'].shape[1],
                             num_heads=cfg['num_heads'],
                             with_query_features=False)
    return new_f, new_indices, new_spatial_shape, new_voxel_size


def res_block_forward(p, cfg, features, indices, spatial_shape, voxel_size, pc_range):
    features, indices, spatial_shape, voxel_size = sparse_attn_forward(
        p['sp'], cfg['sp'], features, indices, spatial_shape, voxel_size, pc_range)
    identity = features
    for sub_p in p['subm']:
        features = dada3d_forward(sub_p, cfg['subm'], features, indices,
                                  voxel_size, pc_range)
    features = features + identity
    return features, indices, spatial_shape, voxel_size


def dada_transformer_forward(params, cfg, batch_dict):
    feats = batch_dict['voxel_features']
    indices = batch_dict['voxel_coords'].astype(jnp.int32)
    feats = linear_bn_relu(feats, params['in_w'], params['in_b'], params['in_bn'])
    spatial_shape = list(cfg['grid_size'])
    voxel_size = list(cfg['voxel_size'])
    pc_range = cfg['point_cloud_range']
    for bp, bc in zip(params['blocks'], cfg['blocks']):
        feats, indices, spatial_shape, voxel_size = res_block_forward(
            bp, bc, feats, indices, spatial_shape, voxel_size, pc_range)
    out = dict(batch_dict)
    out['encoded_spconv_tensor'] = dict(features=feats, indices=indices,
                                        spatial_shape=spatial_shape,
                                        voxel_size=voxel_size)
    out['encoded_spconv_tensor_stride'] = 8
    return out


# ----------------------------------------------------------------------------
# deterministic parameter init
# ----------------------------------------------------------------------------
def _dense(key, cin, cout, scale=0.1):
    # NOTE: weights stored as [in, out] (real checkpoints would need a transpose
    # of PyTorch's [out, in] and zero-padding of the 3->8 coord rows).
    kw, kb = jax.random.split(key)
    w = scale * jax.random.normal(kw, (cin, cout), jnp.float32)
    b = scale * jax.random.normal(kb, (1, cout), jnp.float32)
    return w, b


def _bn(c):
    return dict(g=jnp.ones((1, c), jnp.float32), b=jnp.zeros((1, c), jnp.float32),
                mu=jnp.zeros((1, c), jnp.float32), var=jnp.ones((1, c), jnp.float32))


def _mha_params(key, c):
    ks = jax.random.split(key, 4)
    wq, bq = _dense(ks[0], c, c)
    wk, bk = _dense(ks[1], c, c)
    wv, bv = _dense(ks[2], c, c)
    wo, bo = _dense(ks[3], c, c)
    return dict(wq=wq, bq=bq, wk=wk, bk=bk, wv=wv, bv=bv, wo=wo, bo=bo)


def init_dada3d_params(key, cin, cff, cout):
    ks = jax.random.split(key, 6)
    q_pos_w, q_pos_b = _dense(ks[0], 8, cin)   # Linear(3, C) with coord dim padded to 8
    k_pos_w, k_pos_b = _dense(ks[1], 8, cin)   # Conv1d(3, C, 1) == per-key Linear(3, C)
    lin1_w, lin1_b = _dense(ks[2], cin, cff)
    lin2_w, lin2_b = _dense(ks[3], cff, cin)
    out_w, out_b = _dense(ks[4], cin, cout)
    return dict(q_pos_w=q_pos_w, q_pos_b=q_pos_b, k_pos_w=k_pos_w, k_pos_b=k_pos_b,
                mha=_mha_params(ks[5], cin), norm1=_bn(cin), norm2=_bn(cin),
                lin1_w=lin1_w, lin1_b=lin1_b, lin2_w=lin2_w, lin2_b=lin2_b,
                out_w=out_w, out_b=out_b, out_bn=_bn(cout))


def init_sparse_params(key, cin, cff, cout):
    ks = jax.random.split(key, 6)
    q_pos_w, q_pos_b = _dense(ks[0], 8, cin)
    k_pos_w, k_pos_b = _dense(ks[1], 8, cin)
    lin1_w, lin1_b = _dense(ks[2], cin, cff)
    lin2_w, lin2_b = _dense(ks[3], cff, cin)
    out_w, out_b = _dense(ks[4], cin, cout)
    return dict(q_pos_w=q_pos_w, q_pos_b=q_pos_b, k_pos_w=k_pos_w, k_pos_b=k_pos_b,
                mha=_mha_params(ks[5], cin), norm=_bn(cin),
                lin1_w=lin1_w, lin1_b=lin1_b, lin2_w=lin2_w, lin2_b=lin2_b,
                out_w=out_w, out_b=out_b, out_bn=_bn(cout))


IN_CH = 8          # raw voxel feature channels
CFG = dict(
    grid_size=[16, 16, 8],                   # (x, y, z)
    voxel_size=[0.2, 0.2, 0.25],
    point_cloud_range=[0.0, 0.0, 0.0, 3.2, 3.2, 2.0],
    blocks=[dict(
        sp=dict(num_heads=4, num_keys=16, strides=[2, 2, 2]),   # SP_CFGS: CHANNELS [16,32,32]
        subm=dict(num_heads=4, num_keys=16),                    # SUBM_CFGS: CHANNELS [32,64,32]
    )],
)


def init_params(key):
    ks = jax.random.split(key, 3)
    in_w, in_b = _dense(ks[0], IN_CH, 16)
    block = dict(
        sp=init_sparse_params(ks[1], 16, 32, 32),
        subm=[init_dada3d_params(k, 32, 64, 32)
              for k in jax.random.split(ks[2], 2)],              # NUM_BLOCKS = 2
    )
    return dict(in_w=in_w, in_b=in_b, in_bn=_bn(16), blocks=[block])


@jax.jit
def run_model(params, voxel_features, voxel_coords):
    batch_dict = dict(voxel_features=voxel_features, voxel_coords=voxel_coords,
                      batch_size=2)
    out = dada_transformer_forward(params, CFG, batch_dict)
    sp = out['encoded_spconv_tensor']
    return sp['features'], sp['indices']


if __name__ == "__main__":
    key = jax.random.PRNGKey(0)
    kf, kc, kp = jax.random.split(key, 3)

    N = 64          # number of sparse voxels (batch_size = 2)
    feats = jax.random.normal(kf, (N, IN_CH), jnp.float32)
    b_idx = (jnp.arange(N, dtype=jnp.int32) % 2)[:, None]
    zyx = jax.random.randint(kc, (N, 3), 0, 8, dtype=jnp.int32)
    voxel_coords = jnp.concatenate([b_idx, zyx], axis=1).astype(jnp.float32)

    params = init_params(kp)

    res, new_indices = run_model(params, feats, voxel_coords)
    res = jax.block_until_ready(res)

    assert res.shape == (N // 2, 32), res.shape
    assert bool(jnp.all(jnp.isfinite(res)))
    print("KERNEL_OK")
</pallas_src>

<mosaic_0001>
module attributes {stable_mosaic.version = 11 : i64} {
  func.func @_linear_relu_kernel(%arg0: i32, %arg1: memref<32x8xf32, #tpu.memory_space<vmem>>, %arg2: memref<8x16xbf16, #tpu.memory_space<vmem>>, %arg3: memref<1x16xf32, #tpu.memory_space<vmem>>, %arg4: memref<32x16xf32, #tpu.memory_space<vmem>>) attributes {dimension_semantics = [#tpu.dimension_semantics<parallel>], iteration_bounds = array<i64: 2>, scalar_prefetch = 0 : i64, scratch_operands = 0 : i64, tpu.core_type = #tpu.core_type<tc>, window_params = [{transform_indices = @transform_0, window_bounds = array<i64: 32, 8>}, {pipeline_mode = #tpu.pipeline_mode<synchronous>, transform_indices = @transform_1, window_bounds = array<i64: 8, 16>}, {pipeline_mode = #tpu.pipeline_mode<synchronous>, transform_indices = @transform_2, window_bounds = array<i64: 1, 16>}, {transform_indices = @transform_3, window_bounds = array<i64: 32, 16>}]} {
    %c0 = arith.constant 0 : index
    %c0_0 = arith.constant 0 : index
    %0 = vector.load %arg1[%c0, %c0_0] : memref<32x8xf32, #tpu.memory_space<vmem>>, vector<32x8xf32>
    %1 = arith.truncf %0 : vector<32x8xf32> to vector<32x8xbf16>
    %c0_1 = arith.constant 0 : index
    %c0_2 = arith.constant 0 : index
    %2 = vector.load %arg2[%c0_1, %c0_2] : memref<8x16xbf16, #tpu.memory_space<vmem>>, vector<8x16xbf16>
    %cst = arith.constant dense<0.000000e+00> : vector<32x16xf32>
    %3 = tpu.matmul %1, %2, %cst {dimension_numbers = #tpu.dot_dimension_numbers<[1], [0], [0], [1], [0, 0, 1, 1], [], []>} : vector<32x8xbf16>, vector<8x16xbf16>, vector<32x16xf32> -> vector<32x16xf32>
    %c0_3 = arith.constant 0 : index
    %c0_4 = arith.constant 0 : index
    %4 = vector.load %arg3[%c0_3, %c0_4] : memref<1x16xf32, #tpu.memory_space<vmem>>, vector<1x16xf32>
    %5 = vector.broadcast %4 : vector<1x16xf32> to vector<32x16xf32>
    %6 = arith.addf %3, %5 : vector<32x16xf32>
    %cst_5 = arith.constant 0.000000e+00 : f32
    %7 = vector.broadcast %cst_5 : f32 to vector<32x16xf32>
    %8 = arith.maximumf %6, %7 : vector<32x16xf32>
    %c0_6 = arith.constant 0 : index
    %c0_7 = arith.constant 0 : index
    %9 = vector.load %arg4[%c0_6, %c0_7] : memref<32x16xf32, #tpu.memory_space<vmem>>, vector<32x16xf32>
    tpu.vector_store %arg4[%c0_6, %c0_7], %8 {strides = array<i32>} : memref<32x16xf32, #tpu.memory_space<vmem>>, vector<32x16xf32>,
    return
  }
  func.func @transform_0(%arg0: i32) -> (i32, i32) {
    %c0_i32 = arith.constant 0 : i32
    %c0_i32_0 = arith.constant 0 : i32
    return %arg0, %c0_i32 : i32, i32
  }
  func.func @transform_1(%arg0: i32) -> (i32, i32) {
    %c0_i32 = arith.constant 0 : i32
    %c0_i32_0 = arith.constant 0 : i32
    %c0_i32_1 = arith.constant 0 : i32
    return %c0_i32, %c0_i32_0 : i32, i32
  }
  func.func @transform_2(%arg0: i32) -> (i32, i32) {
    %c0_i32 = arith.constant 0 : i32
    %c0_i32_0 = arith.constant 0 : i32
    %c0_i32_1 = arith.constant 0 : i32
    return %c0_i32, %c0_i32_0 : i32, i32
  }
  func.func @transform_3(%arg0: i32) -> (i32, i32) {
    %c0_i32 = arith.constant 0 : i32
    %c0_i32_0 = arith.constant 0 : i32
    return %arg0, %c0_i32 : i32, i32
  }
}

module attributes {stable_mosaic.version = 11 : i64} {
  func.func @_fused_block_kernel(%arg0: i32, %arg1: memref<32x8xf32, #tpu.memory_space<vmem>>, %arg2: memref<32x16xi32, #tpu.memory_space<vmem>>, %arg3: memref<32x1xi32, #tpu.memory_space<vmem>>, %arg4: memref<64x16xbf16, #tpu.memory_space<vmem>>, %arg5: memref<64x16xbf16, #tpu.memory_space<vmem>>, %arg6: memref<8x16xbf16, #tpu.memory_space<vmem>>, %arg7: memref<16x16xbf16, #tpu.memory_space<vmem>>, %arg8: memref<16x16xbf16, #tpu.memory_space<vmem>>, %arg9: memref<16x16xbf16, #tpu.memory_space<vmem>>, %arg10: memref<16x32xbf16, #tpu.memory_space<vmem>>, %arg11: memref<32x16xbf16, #tpu.memory_space<vmem>>, %arg12: memref<16x32xbf16, #tpu.memory_space<vmem>>, %arg13: memref<8x16xf32, #tpu.memory_space<vmem>>, %arg14: memref<1x32xf32, #tpu.memory_space<vmem>>, %arg15: memref<1x32xf32, #tpu.memory_space<vmem>>, %arg16: memref<32x32xf32, #tpu.memory_space<vmem>>) attributes {dimension_semantics = [#tpu.dimension_semantics<parallel>], iteration_bounds = array<i64: 1>, scalar_prefetch = 0 : i64, scratch_operands = 0 : i64, tpu.core_type = #tpu.core_type<tc>, window_params = [{transform_indices = @transform_0, window_bounds = array<i64: 32, 8>}, {transform_indices = @transform_1, window_bounds = array<i64: 32, 16>}, {transform_indices = @transform_2, window_bounds = array<i64: 32, 1>}, {pipeline_mode = #tpu.pipeline_mode<synchronous>, transform_indices = @transform_3, window_bounds = array<i64: 64, 16>}, {pipeline_mode = #tpu.pipeline_mode<synchronous>, transform_indices = @transform_4, window_bounds = array<i64: 64, 16>}, {pipeline_mode = #tpu.pipeline_mode<synchronous>, transform_indices = @transform_5, window_bounds = array<i64: 8, 16>}, {pipeline_mode = #tpu.pipeline_mode<synchronous>, transform_indices = @transform_6, window_bounds = array<i64: 16, 16>}, {pipeline_mode = #tpu.pipeline_mode<synchronous>, transform_indices = @transform_7, window_bounds = array<i64: 16, 16>}, {pipeline_mode = #tpu.pipeline_mode<synchronous>, transform_indices = @transform_8, window_bounds = array<i64: 16, 16>}, {pipeline_mode = #tpu.pipeline_mode<synchronous>, transform_indices = @transform_9, window_bounds = array<i64: 16, 32>}, {pipeline_mode = #tpu.pipeline_mode<synchronous>, transform_indices = @transform_10, window_bounds = array<i64: 32, 16>}, {pipeline_mode = #tpu.pipeline_mode<synchronous>, transform_indices = @transform_11, window_bounds = array<i64: 16, 32>}, {pipeline_mode = #tpu.pipeline_mode<synchronous>, transform_indices = @transform_12, window_bounds = array<i64: 8, 16>}, {pipeline_mode = #tpu.pipeline_mode<synchronous>, transform_indices = @transform_13, window_bounds = array<i64: 1, 32>}, {pipeline_mode = #tpu.pipeline_mode<synchronous>, transform_indices = @transform_14, window_bounds = array<i64: 1, 32>}, {transform_indices = @transform_15, window_bounds = array<i64: 32, 32>}]} {
    %c0 = arith.constant 0 : index
    %c0_0 = arith.constant 0 : index
    %0 = vector.load %arg13[%c0, %c0_0] : memref<8x16xf32, #tpu.memory_space<vmem>>, vector<8x16xf32>
    %1 = vector.extract_strided_slice %0 {offsets = [0, 0], sizes = [1, 16], strides = [1, 1]} : vector<8x16xf32> to vector<1x16xf32>
    %2 = vector.extract_strided_slice %0 {offsets = [1, 0], sizes = [1, 16], strides = [1, 1]} : vector<8x16xf32> to vector<1x16xf32>
    %3 = vector.extract_strided_slice %0 {offsets = [2, 0], sizes = [1, 16], strides = [1, 1]} : vector<8x16xf32> to vector<1x16xf32>
    %4 = vector.extract_strided_slice %0 {offsets = [3, 0], sizes = [1, 16], strides = [1, 1]} : vector<8x16xf32> to vector<1x16xf32>
    %5 = vector.extract_strided_slice %0 {offsets = [4, 0], sizes = [1, 16], strides = [1, 1]} : vector<8x16xf32> to vector<1x16xf32>
    %6 = vector.extract_strided_slice %0 {offsets = [5, 0], sizes = [1, 16], strides = [1, 1]} : vector<8x16xf32> to vector<1x16xf32>
    %c0_1 = arith.constant 0 : index
    %c0_2 = arith.constant 0 : index
    %7 = vector.load %arg1[%c0_1, %c0_2] : memref<32x8xf32, #tpu.memory_space<vmem>>, vector<32x8xf32>
    %8 = arith.truncf %7 : vector<32x8xf32> to vector<32x8xbf16>
    %c0_3 = arith.constant 0 : index
    %c0_4 = arith.constant 0 : index
    %9 = vector.load %arg6[%c0_3, %c0_4] : memref<8x16xbf16, #tpu.memory_space<vmem>>, vector<8x16xbf16>
    %cst = arith.constant dense<0.000000e+00> : vector<32x16xf32>
    %10 = tpu.matmul %8, %9, %cst {dimension_numbers = #tpu.dot_dimension_numbers<[1], [0], [0], [1], [0, 0, 1, 1], [], []>} : vector<32x8xbf16>, vector<8x16xbf16>, vector<32x16xf32> -> vector<32x16xf32>
    %11 = vector.broadcast %1 : vector<1x16xf32> to vector<32x16xf32>
    %12 = arith.addf %10, %11 : vector<32x16xf32>
    %cst_5 = arith.constant 0.000000e+00 : f32
    %13 = vector.broadcast %cst_5 : f32 to vector<32x16xf32>
    %14 = arith.maximumf %12, %13 : vector<32x16xf32>
    %15 = arith.truncf %14 : vector<32x16xf32> to vector<32x16xbf16>
    %c0_6 = arith.constant 0 : index
    %c0_7 = arith.constant 0 : index
    %16 = vector.load %arg7[%c0_6, %c0_7] : memref<16x16xbf16, #tpu.memory_space<vmem>>, vector<16x16xbf16>
    %cst_8 = arith.constant dense<0.000000e+00> : vector<32x16xf32>
    %17 = tpu.matmul %15, %16, %cst_8 {dimension_numbers = #tpu.dot_dimension_numbers<[1], [0], [0], [1], [0, 0, 1, 1], [], []>} : vector<32x16xbf16>, vector<16x16xbf16>, vector<32x16xf32> -> vector<32x16xf32>
    %18 = vector.broadcast %2 : vector<1x16xf32> to vector<32x16xf32>
    %19 = arith.addf %17, %18 : vector<32x16xf32>
    %cst_9 = arith.constant 5.000000e-01 : f32
    %20 = vector.broadcast %cst_9 : f32 to vector<32x16xf32>
    %21 = arith.mulf %19, %20 : vector<32x16xf32>
    %c0_10 = arith.constant 0 : index
    %c0_11 = arith.constant 0 : index
    %22 = vector.load %arg3[%c0_10, %c0_11] : memref<32x1xi32, #tpu.memory_space<vmem>>, vector<32x1xi32>
    %23 = tpu.iota {dimensions = array<i32: 1>} : vector<32x64xi32>
    %c0_12 = arith.constant 0 : index
    %c0_13 = arith.constant 0 : index
    %24 = vector.load %arg2[%c0_12, %c0_13] : memref<32x16xi32, #tpu.memory_space<vmem>>, vector<32x1xi32>
    %25 = vector.broadcast %24 : vector<32x1xi32> to vector<32x64xi32>
    %26 = arith.cmpi eq, %25, %23 : vector<32x64xi32>
    %cst_14 = arith.constant 1.000000e+00 : f32
    %cst_15 = arith.constant 0.000000e+00 : f32
    %27 = vector.broadcast %cst_14 : f32 to vector<32x64xf32>
    %28 = vector.broadcast %cst_15 : f32 to vector<32x64xf32>
    %29 = arith.select %26, %27, %28 : vector<32x64xi1>, vector<32x64xf32>
    %30 = arith.truncf %29 : vector<32x64xf32> to vector<32x64xbf16>
    %c0_i32 = arith.constant 0 : i32
    %31 = vector.broadcast %c0_i32 : i32 to vector<32x1xi32>
    %32 = arith.cmpi sgt, %22, %31 : vector<32x1xi32>
    %cst_16 = arith.constant 0.000000e+00 : f32
    %cst_17 = arith.constant -1.000000e+30 : f32
    %33 = vector.broadcast %cst_16 : f32 to vector<32x1xf32>
    %34 = vector.broadcast %cst_17 : f32 to vector<32x1xf32>
    %35 = arith.select %32, %33, %34 : vector<32x1xi1>, vector<32x1xf32>
    %c0_18 = arith.constant 0 : index
    %c1 = arith.constant 1 : index
    %36 = vector.load %arg2[%c0_18, %c1] : memref<32x16xi32, #tpu.memory_space<vmem>>, vector<32x1xi32>
    %37 = vector.broadcast %36 : vector<32x1xi32> to vector<32x64xi32>
    %38 = arith.cmpi eq, %37, %23 : vector<32x64xi32>
    %cst_19 = arith.constant 1.000000e+00 : f32
    %cst_20 = arith.constant 0.000000e+00 : f32
    %39 = vector.broadcast %cst_19 : f32 to vector<32x64xf32>
    %40 = vector.broadcast %cst_20 : f32 to vector<32x64xf32>
    %41 = arith.select %38, %39, %40 : vector<32x64xi1>, vector<32x64xf32>
    %42 = arith.truncf %41 : vector<32x64xf32> to vector<32x64xbf16>
    %c1_i32 = arith.constant 1 : i32
    %43 = vector.broadcast %c1_i32 : i32 to vector<32x1xi32>
    %44 = arith.cmpi sgt, %22, %43 : vector<32x1xi32>
    %cst_21 = arith.constant 0.000000e+00 : f32
    %cst_22 = arith.constant -1.000000e+30 : f32
    %45 = vector.broadcast %cst_21 : f32 to vector<32x1xf32>
    %46 = vector.broadcast %cst_22 : f32 to vector<32x1xf32>
    %47 = arith.select %44, %45, %46 : vector<32x1xi1>, vector<32x1xf32>
    %c0_23 = arith.constant 0 : index
    %c2 = arith.constant 2 : index
    %48 = vector.load %arg2[%c0_23, %c2] : memref<32x16xi32, #tpu.memory_space<vmem>>, vector<32x1xi32>
    %49 = vector.broadcast %48 : vector<32x1xi32> to vector<32x64xi32>
    %50 = arith.cmpi eq, %49, %23 : vector<32x64xi32>
    %cst_24 = arith.constant 1.000000e+00 : f32
    %cst_25 = arith.constant 0.000000e+00 : f32
    %51 = vector.broadcast %cst_24 : f32 to vector<32x64xf32>
    %52 = vector.broadcast %cst_25 : f32 to vector<32x64xf32>
    %53 = arith.select %50, %51, %52 : vector<32x64xi1>, vector<32x64xf32>
    %54 = arith.truncf %53 : vector<32x64xf32> to vector<32x64xbf16>
    %c2_i32 = arith.constant 2 : i32
    %55 = vector.broadcast %c2_i32 : i32 to vector<32x1xi32>
    %56 = arith.cmpi sgt, %22, %55 : vector<32x1xi32>
    %cst_26 = arith.constant 0.000000e+00 : f32
    %cst_27 = arith.constant -1.000000e+30 : f32
    %57 = vector.broadcast %cst_26 : f32 to vector<32x1xf32>
    %58 = vector.broadcast %cst_27 : f32 to vector<32x1xf32>
    %59 = arith.select %56, %57, %58 : vector<32x1xi1>, vector<32x1xf32>
    %c0_28 = arith.constant 0 : index
    %c3 = arith.constant 3 : index
    %60 = vector.load %arg2[%c0_28, %c3] : memref<32x16xi32, #tpu.memory_space<vmem>>, vector<32x1xi32>
    %61 = vector.broadcast %60 : vector<32x1xi32> to vector<32x64xi32>
    %62 = arith.cmpi eq, %61, %23 : vector<32x64xi32>
    %cst_29 = arith.constant 1.000000e+00 : f32
    %cst_30 = arith.constant 0.000000e+00 : f32
    %63 = vector.broadcast %cst_29 : f32 to vector<32x64xf32>
    %64 = vector.broadcast %cst_30 : f32 to vector<32x64xf32>
    %65 = arith.select %62, %63, %64 : vector<32x64xi1>, vector<32x64xf32>
    %66 = arith.truncf %65 : vector<32x64xf32> to vector<32x64xbf16>
    %c3_i32 = arith.constant 3 : i32
    %67 = vector.broadcast %c3_i32 : i32 to vector<32x1xi32>
    %68 = arith.cmpi sgt, %22, %67 : vector<32x1xi32>
    %cst_31 = arith.constant 0.000000e+00 : f32
    %cst_32 = arith.constant -1.000000e+30 : f32
    %69 = vector.broadcast %cst_31 : f32 to vector<32x1xf32>
    %70 = vector.broadcast %cst_32 : f32 to vector<32x1xf32>
    %71 = arith.select %68, %69, %70 : vector<32x1xi1>, vector<32x1xf32>
    %c0_33 = arith.constant 0 : index
    %c4 = arith.constant 4 : index
    %72 = vector.load %arg2[%c0_33, %c4] : memref<32x16xi32, #tpu.memory_space<vmem>>, vector<32x1xi32>
    %73 = vector.broadcast %72 : vector<32x1xi32> to vector<32x64xi32>
    %74 = arith.cmpi eq, %73, %23 : vector<32x64xi32>
    %cst_34 = arith.constant 1.000000e+00 : f32
    %cst_35 = arith.constant 0.000000e+00 : f32
    %75 = vector.broadcast %cst_34 : f32 to vector<32x64xf32>
    %76 = vector.broadcast %cst_35 : f32 to vector<32x64xf32>
    %77 = arith.select %74, %75, %76 : vector<32x64xi1>, vector<32x64xf32>
    %78 = arith.truncf %77 : vector<32x64xf32> to vector<32x64xbf16>
    %c4_i32 = arith.constant 4 : i32
    %79 = vector.broadcast %c4_i32 : i32 to vector<32x1xi32>
    %80 = arith.cmpi sgt, %22, %79 : vector<32x1xi32>
    %cst_36 = arith.constant 0.000000e+00 : f32
    %cst_37 = arith.constant -1.000000e+30 : f32
    %81 = vector.broadcast %cst_36 : f32 to vector<32x1xf32>
    %82 = vector.broadcast %cst_37 : f32 to vector<32x1xf32>
    %83 = arith.select %80, %81, %82 : vector<32x1xi1>, vector<32x1xf32>
    %c0_38 = arith.constant 0 : index
    %c5 = arith.constant 5 : index
    %84 = vector.load %arg2[%c0_38, %c5] : memref<32x16xi32, #tpu.memory_space<vmem>>, vector<32x1xi32>
    %85 = vector.broadcast %84 : vector<32x1xi32> to vector<32x64xi32>
    %86 = arith.cmpi eq, %85, %23 : vector<32x64xi32>
    %cst_39 = arith.constant 1.000000e+00 : f32
    %cst_40 = arith.constant 0.000000e+00 : f32
    %87 = vector.broadcast %cst_39 : f32 to vector<32x64xf32>
    %88 = vector.broadcast %cst_40 : f32 to vector<32x64xf32>
    %89 = arith.select %86, %87, %88 : vector<32x64xi1>, vector<32x64xf32>
    %90 = arith.truncf %89 : vector<32x64xf32> to vector<32x64xbf16>
    %c5_i32 = arith.constant 5 : i32
    %91 = vector.broadcast %c5_i32 : i32 to vector<32x1xi32>
    %92 = arith.cmpi sgt, %22, %91 : vector<32x1xi32>
    %cst_41 = arith.constant 0.000000e+00 : f32
    %cst_42 = arith.constant -1.000000e+30 : f32
    %93 = vector.broadcast %cst_41 : f32 to vector<32x1xf32>
    %94 = vector.broadcast %cst_42 : f32 to vector<32x1xf32>
    %95 = arith.select %92, %93, %94 : vector<32x1xi1>, vector<32x1xf32>
    %c0_43 = arith.constant 0 : index
    %c6 = arith.constant 6 : index
    %96 = vector.load %arg2[%c0_43, %c6] : memref<32x16xi32, #tpu.memory_space<vmem>>, vector<32x1xi32>
    %97 = vector.broadcast %96 : vector<32x1xi32> to vector<32x64xi32>
    %98 = arith.cmpi eq, %97, %23 : vector<32x64xi32>
    %cst_44 = arith.constant 1.000000e+00 : f32
    %cst_45 = arith.constant 0.000000e+00 : f32
    %99 = vector.broadcast %cst_44 : f32 to vector<32x64xf32>
    %100 = vector.broadcast %cst_45 : f32 to vector<32x64xf32>
    %101 = arith.select %98, %99, %100 : vector<32x64xi1>, vector<32x64xf32>
    %102 = arith.truncf %101 : vector<32x64xf32> to vector<32x64xbf16>
    %c6_i32 = arith.constant 6 : i32
    %103 = vector.broadcast %c6_i32 : i32 to vector<32x1xi32>
    %104 = arith.cmpi sgt, %22, %103 : vector<32x1xi32>
    %cst_46 = arith.constant 0.000000e+00 : f32
    %cst_47 = arith.constant -1.000000e+30 : f32
    %105 = vector.broadcast %cst_46 : f32 to vector<32x1xf32>
    %106 = vector.broadcast %cst_47 : f32 to vector<32x1xf32>
    %107 = arith.select %104, %105, %106 : vector<32x1xi1>, vector<32x1xf32>
    %c0_48 = arith.constant 0 : index
    %c7 = arith.constant 7 : index
    %108 = vector.load %arg2[%c0_48, %c7] : memref<32x16xi32, #tpu.memory_space<vmem>>, vector<32x1xi32>
    %109 = vector.broadcast %108 : vector<32x1xi32> to vector<32x64xi32>
    %110 = arith.cmpi eq, %109, %23 : vector<32x64xi32>
    %cst_49 = arith.constant 1.000000e+00 : f32
    %cst_50 = arith.constant 0.000000e+00 : f32
    %111 = vector.broadcast %cst_49 : f32 to vector<32x64xf32>
    %112 = vector.broadcast %cst_50 : f32 to vector<32x64xf32>
    %113 = arith.select %110, %111, %112 : vector<32x64xi1>, vector<32x64xf32>
    %114 = arith.truncf %113 : vector<32x64xf32> to vector<32x64xbf16>
    %c7_i32 = arith.constant 7 : i32
    %115 = vector.broadcast %c7_i32 : i32 to vector<32x1xi32>
    %116 = arith.cmpi sgt, %22, %115 : vector<32x1xi32>
    %cst_51 = arith.constant 0.000000e+00 : f32
    %cst_52 = arith.constant -1.000000e+30 : f32
    %117 = vector.broadcast %cst_51 : f32 to vector<32x1xf32>
    %118 = vector.broadcast %cst_52 : f32 to vector<32x1xf32>
    %119 = arith.select %116, %117, %118 : vector<32x1xi1>, vector<32x1xf32>
    %c0_53 = arith.constant 0 : index
    %c8 = arith.constant 8 : index
    %120 = vector.load %arg2[%c0_53, %c8] : memref<32x16xi32, #tpu.memory_space<vmem>>, vector<32x1xi32>
    %121 = vector.broadcast %120 : vector<32x1xi32> to vector<32x64xi32>
    %122 = arith.cmpi eq, %121, %23 : vector<32x64xi32>
    %cst_54 = arith.constant 1.000000e+00 : f32
    %cst_55 = arith.constant 0.000000e+00 : f32
    %123 = vector.broadcast %cst_54 : f32 to vector<32x64xf32>
    %124 = vector.broadcast %cst_55 : f32 to vector<32x64xf32>
    %125 = arith.select %122, %123, %124 : vector<32x64xi1>, vector<32x64xf32>
    %126 = arith.truncf %125 : vector<32x64xf32> to vector<32x64xbf16>
    %c8_i32 = arith.constant 8 : i32
    %127 = vector.broadcast %c8_i32 : i32 to vector<32x1xi32>
    %128 = arith.cmpi sgt, %22, %127 : vector<32x1xi32>
    %cst_56 = arith.constant 0.000000e+00 : f32
    %cst_57 = arith.constant -1.000000e+30 : f32
    %129 = vector.broadcast %cst_56 : f32 to vector<32x1xf32>
    %130 = vector.broadcast %cst_57 : f32 to vector<32x1xf32>
    %131 = arith.select %128, %129, %130 : vector<32x1xi1>, vector<32x1xf32>
    %c0_58 = arith.constant 0 : index
    %c9 = arith.constant 9 : index
    %132 = vector.load %arg2[%c0_58, %c9] : memref<32x16xi32, #tpu.memory_space<vmem>>, vector<32x1xi32>
    %133 = vector.broadcast %132 : vector<32x1xi32> to vector<32x64xi32>
    %134 = arith.cmpi eq, %133, %23 : vector<32x64xi32>
    %cst_59 = arith.constant 1.000000e+00 : f32
    %cst_60 = arith.constant 0.000000e+00 : f32
    %135 = vector.broadcast %cst_59 : f32 to vector<32x64xf32>
    %136 = vector.broadcast %cst_60 : f32 to vector<32x64xf32>
    %137 = arith.select %134, %135, %136 : vector<32x64xi1>, vector<32x64xf32>
    %138 = arith.truncf %137 : vector<32x64xf32> to vector<32x64xbf16>
    %c9_i32 = arith.constant 9 : i32
    %139 = vector.broadcast %c9_i32 : i32 to vector<32x1xi32>
    %140 = arith.cmpi sgt, %22, %139 : vector<32x1xi32>
    %cst_61 = arith.constant 0.000000e+00 : f32
    %cst_62 = arith.constant -1.000000e+30 : f32
    %141 = vector.broadcast %cst_61 : f32 to vector<32x1xf32>
    %142 = vector.broadcast %cst_62 : f32 to vector<32x1xf32>
    %143 = arith.select %140, %141, %142 : vector<32x1xi1>, vector<32x1xf32>
    %c0_63 = arith.constant 0 : index
    %c10 = arith.constant 10 : index
    %144 = vector.load %arg2[%c0_63, %c10] : memref<32x16xi32, #tpu.memory_space<vmem>>, vector<32x1xi32>
    %145 = vector.broadcast %144 : vector<32x1xi32> to vector<32x64xi32>
    %146 = arith.cmpi eq, %145, %23 : vector<32x64xi32>
    %cst_64 = arith.constant 1.000000e+00 : f32
    %cst_65 = arith.constant 0.000000e+00 : f32
    %147 = vector.broadcast %cst_64 : f32 to vector<32x64xf32>
    %148 = vector.broadcast %cst_65 : f32 to vector<32x64xf32>
    %149 = arith.select %146, %147, %148 : vector<32x64xi1>, vector<32x64xf32>
    %150 = arith.truncf %149 : vector<32x64xf32> to vector<32x64xbf16>
    %c10_i32 = arith.constant 10 : i32
    %151 = vector.broadcast %c10_i32 : i32 to vector<32x1xi32>
    %152 = arith.cmpi sgt, %22, %151 : vector<32x1xi32>
    %cst_66 = arith.constant 0.000000e+00 : f32
    %cst_67 = arith.constant -1.000000e+30 : f32
    %153 = vector.broadcast %cst_66 : f32 to vector<32x1xf32>
    %154 = vector.broadcast %cst_67 : f32 to vector<32x1xf32>
    %155 = arith.select %152, %153, %154 : vector<32x1xi1>, vector<32x1xf32>
    %c0_68 = arith.constant 0 : index
    %c11 = arith.constant 11 : index
    %156 = vector.load %arg2[%c0_68, %c11] : memref<32x16xi32, #tpu.memory_space<vmem>>, vector<32x1xi32>
    %157 = vector.broadcast %156 : vector<32x1xi32> to vector<32x64xi32>
    %158 = arith.cmpi eq, %157, %23 : vector<32x64xi32>
    %cst_69 = arith.constant 1.000000e+00 : f32
    %cst_70 = arith.constant 0.000000e+00 : f32
    %159 = vector.broadcast %cst_69 : f32 to vector<32x64xf32>
    %160 = vector.broadcast %cst_70 : f32 to vector<32x64xf32>
    %161 = arith.select %158, %159, %160 : vector<32x64xi1>, vector<32x64xf32>
    %162 = arith.truncf %161 : vector<32x64xf32> to vector<32x64xbf16>
    %c11_i32 = arith.constant 11 : i32
    %163 = vector.broadcast %c11_i32 : i32 to vector<32x1xi32>
    %164 = arith.cmpi sgt, %22, %163 : vector<32x1xi32>
    %cst_71 = arith.constant 0.000000e+00 : f32
    %cst_72 = arith.constant -1.000000e+30 : f32
    %165 = vector.broadcast %cst_71 : f32 to vector<32x1xf32>
    %166 = vector.broadcast %cst_72 : f32 to vector<32x1xf32>
    %167 = arith.select %164, %165, %166 : vector<32x1xi1>, vector<32x1xf32>
    %c0_73 = arith.constant 0 : index
    %c12 = arith.constant 12 : index
    %168 = vector.load %arg2[%c0_73, %c12] : memref<32x16xi32, #tpu.memory_space<vmem>>, vector<32x1xi32>
    %169 = vector.broadcast %168 : vector<32x1xi32> to vector<32x64xi32>
    %170 = arith.cmpi eq, %169, %23 : vector<32x64xi32>
    %cst_74 = arith.constant 1.000000e+00 : f32
    %cst_75 = arith.constant 0.000000e+00 : f32
    %171 = vector.broadcast %cst_74 : f32 to vector<32x64xf32>
    %172 = vector.broadcast %cst_75 : f32 to vector<32x64xf32>
    %173 = arith.select %170, %171, %172 : vector<32x64xi1>, vector<32x64xf32>
    %174 = arith.truncf %173 : vector<32x64xf32> to vector<32x64xbf16>
    %c12_i32 = arith.constant 12 : i32
    %175 = vector.broadcast %c12_i32 : i32 to vector<32x1xi32>
    %176 = arith.cmpi sgt, %22, %175 : vector<32x1xi32>
    %cst_76 = arith.constant 0.000000e+00 : f32
    %cst_77 = arith.constant -1.000000e+30 : f32
    %177 = vector.broadcast %cst_76 : f32 to vector<32x1xf32>
    %178 = vector.broadcast %cst_77 : f32 to vector<32x1xf32>
    %179 = arith.select %176, %177, %178 : vector<32x1xi1>, vector<32x1xf32>
    %c0_78 = arith.constant 0 : index
    %c13 = arith.constant 13 : index
    %180 = vector.load %arg2[%c0_78, %c13] : memref<32x16xi32, #tpu.memory_space<vmem>>, vector<32x1xi32>
    %181 = vector.broadcast %180 : vector<32x1xi32> to vector<32x64xi32>
    %182 = arith.cmpi eq, %181, %23 : vector<32x64xi32>
    %cst_79 = arith.constant 1.000000e+00 : f32
    %cst_80 = arith.constant 0.000000e+00 : f32
    %183 = vector.broadcast %cst_79 : f32 to vector<32x64xf32>
    %184 = vector.broadcast %cst_80 : f32 to vector<32x64xf32>
    %185 = arith.select %182, %183, %184 : vector<32x64xi1>, vector<32x64xf32>
    %186 = arith.truncf %185 : vector<32x64xf32> to vector<32x64xbf16>
    %c13_i32 = arith.constant 13 : i32
    %187 = vector.broadcast %c13_i32 : i32 to vector<32x1xi32>
    %188 = arith.cmpi sgt, %22, %187 : vector<32x1xi32>
    %cst_81 = arith.constant 0.000000e+00 : f32
    %cst_82 = arith.constant -1.000000e+30 : f32
    %189 = vector.broadcast %cst_81 : f32 to vector<32x1xf32>
    %190 = vector.broadcast %cst_82 : f32 to vector<32x1xf32>
    %191 = arith.select %188, %189, %190 : vector<32x1xi1>, vector<32x1xf32>
    %c0_83 = arith.constant 0 : index
    %c14 = arith.constant 14 : index
    %192 = vector.load %arg2[%c0_83, %c14] : memref<32x16xi32, #tpu.memory_space<vmem>>, vector<32x1xi32>
    %193 = vector.broadcast %192 : vector<32x1xi32> to vector<32x64xi32>
    %194 = arith.cmpi eq, %193, %23 : vector<32x64xi32>
    %cst_84 = arith.constant 1.000000e+00 : f32
    %cst_85 = arith.constant 0.000000e+00 : f32
    %195 = vector.broadcast %cst_84 : f32 to vector<32x64xf32>
    %196 = vector.broadcast %cst_85 : f32 to vector<32x64xf32>
    %197 = arith.select %194, %195, %196 : vector<32x64xi1>, vector<32x64xf32>
    %198 = arith.truncf %197 : vector<32x64xf32> to vector<32x64xbf16>
    %c14_i32 = arith.constant 14 : i32
    %199 = vector.broadcast %c14_i32 : i32 to vector<32x1xi32>
    %200 = arith.cmpi sgt, %22, %199 : vector<32x1xi32>
    %cst_86 = arith.constant 0.000000e+00 : f32
    %cst_87 = arith.constant -1.000000e+30 : f32
    %201 = vector.broadcast %cst_86 : f32 to vector<32x1xf32>
    %202 = vector.broadcast %cst_87 : f32 to vector<32x1xf32>
    %203 = arith.select %200, %201, %202 : vector<32x1xi1>, vector<32x1xf32>
    %c0_88 = arith.constant 0 : index
    %c15 = arith.constant 15 : index
    %204 = vector.load %arg2[%c0_88, %c15] : memref<32x16xi32, #tpu.memory_space<vmem>>, vector<32x1xi32>
    %205 = vector.broadcast %204 : vector<32x1xi32> to vector<32x64xi32>
    %206 = arith.cmpi eq, %205, %23 : vector<32x64xi32>
    %cst_89 = arith.constant 1.000000e+00 : f32
    %cst_90 = arith.constant 0.000000e+00 : f32
    %207 = vector.broadcast %cst_89 : f32 to vector<32x64xf32>
    %208 = vector.broadcast %cst_90 : f32 to vector<32x64xf32>
    %209 = arith.select %206, %207, %208 : vector<32x64xi1>, vector<32x64xf32>
    %210 = arith.truncf %209 : vector<32x64xf32> to vector<32x64xbf16>
    %c15_i32 = arith.constant 15 : i32
    %211 = vector.broadcast %c15_i32 : i32 to vector<32x1xi32>
    %212 = arith.cmpi sgt, %22, %211 : vector<32x1xi32>
    %cst_91 = arith.constant 0.000000e+00 : f32
    %cst_92 = arith.constant -1.000000e+30 : f32
    %213 = vector.broadcast %cst_91 : f32 to vector<32x1xf32>
    %214 = vector.broadcast %cst_92 : f32 to vector<32x1xf32>
    %215 = arith.select %212, %213, %214 : vector<32x1xi1>, vector<32x1xf32>
    %216 = tpu.concatenate %30, %42, %54, %66, %78, %90, %102, %114, %126, %138, %150, %162, %174, %186, %198, %210 in 0 : vector<32x64xbf16>, vector<32x64xbf16>, vector<32x64xbf16>, vector<32x64xbf16>, vector<32x64xbf16>, vector<32x64xbf16>, vector<32x64xbf16>, vector<32x64xbf16>, vector<32x64xbf16>, vector<32x64xbf16>, vector<32x64xbf16>, vector<32x64xbf16>, vector<32x64xbf16>, vector<32x64xbf16>, vector<32x64xbf16>, vector<32x64xbf16> -> vector<512x64xbf16>
    %217 = tpu.concatenate %35, %47, %59, %71, %83, %95, %107, %119, %131, %143, %155, %167, %179, %191, %203, %215 in 0 : vector<32x1xf32>, vector<32x1xf32>, vector<32x1xf32>, vector<32x1xf32>, vector<32x1xf32>, vector<32x1xf32>, vector<32x1xf32>, vector<32x1xf32>, vector<32x1xf32>, vector<32x1xf32>, vector<32x1xf32>, vector<32x1xf32>, vector<32x1xf32>, vector<32x1xf32>, vector<32x1xf32>, vector<32x1xf32> -> vector<512x1xf32>
    %c0_93 = arith.constant 0 : index
    %c0_94 = arith.constant 0 : index
    %218 = vector.load %arg4[%c0_93, %c0_94] : memref<64x16xbf16, #tpu.memory_space<vmem>>, vector<64x16xbf16>
    %cst_95 = arith.constant dense<0.000000e+00> : vector<512x16xf32>
    %219 = tpu.matmul %216, %218, %cst_95 {dimension_numbers = #tpu.dot_dimension_numbers<[1], [0], [0], [1], [0, 0, 1, 1], [], []>} : vector<512x64xbf16>, vector<64x16xbf16>, vector<512x16xf32> -> vector<512x16xf32>
    %c0_96 = arith.constant 0 : index
    %c0_97 = arith.constant 0 : index
    %220 = vector.load %arg5[%c0_96, %c0_97] : memref<64x16xbf16, #tpu.memory_space<vmem>>, vector<64x16xbf16>
    %cst_98 = arith.constant dense<0.000000e+00> : vector<512x16xf32>
    %221 = tpu.matmul %216, %220, %cst_98 {dimension_numbers = #tpu.dot_dimension_numbers<[1], [0], [0], [1], [0, 0, 1, 1], [], []>} : vector<512x64xbf16>, vector<64x16xbf16>, vector<512x16xf32> -> vector<512x16xf32>
    %222 = vector.shape_cast %219 : vector<512x16xf32> to vector<16x32x16xf32>
    %223 = vector.shape_cast %21 : vector<32x16xf32> to vector<1x32x16xf32>
    %224 = vector.broadcast %223 : vector<1x32x16xf32> to vector<16x32x16xf32>
    %225 = arith.mulf %222, %224 : vector<16x32x16xf32>
    %226 = vector.shape_cast %225 : vector<16x32x16xf32> to vector<512x16xf32>
    %227 = arith.truncf %226 : vector<512x16xf32> to vector<512x16xbf16>
    %c0_99 = arith.constant 0 : index
    %c0_100 = arith.constant 0 : index
    %228 = vector.load %arg8[%c0_99, %c0_100] : memref<16x16xbf16, #tpu.memory_space<vmem>>, vector<16x16xbf16>
    %cst_101 = arith.constant dense<0.000000e+00> : vector<512x16xf32>
    %229 = tpu.matmul %227, %228, %cst_101 {dimension_numbers = #tpu.dot_dimension_numbers<[1], [0], [0], [1], [0, 0, 1, 1], [], []>} : vector<512x16xbf16>, vector<16x16xbf16>, vector<512x16xf32> -> vector<512x16xf32>
    %230 = vector.broadcast %217 : vector<512x1xf32> to vector<512x16xf32>
    %231 = arith.addf %229, %230 : vector<512x16xf32>
    %232 = vector.shape_cast %231 : vector<512x16xf32> to vector<16x32x16xf32>
    %cst_102 = arith.constant dense<0xFF800000> : vector<32x16xf32>
    %233 = vector.multi_reduction <maximumf>, %232, %cst_102 [0] : vector<16x32x16xf32> to vector<32x16xf32>
    %234 = vector.shape_cast %233 : vector<32x16xf32> to vector<1x32x16xf32>
    %235 = vector.broadcast %234 : vector<1x32x16xf32> to vector<16x32x16xf32>
    %236 = arith.subf %232, %235 : vector<16x32x16xf32>
    %237 = math.exp %236 : vector<16x32x16xf32>
    %cst_103 = arith.constant dense<0.000000e+00> : vector<32x16xf32>
    %238 = vector.multi_reduction <add>, %237, %cst_103 [0] : vector<16x32x16xf32> to vector<32x16xf32>
    %239 = vector.shape_cast %238 : vector<32x16xf32> to vector<1x32x16xf32>
    %240 = tpu.reciprocal %239 {approx = true} : vector<1x32x16xf32> -> vector<1x32x16xf32>
    %241 = vector.broadcast %240 : vector<1x32x16xf32> to vector<16x32x16xf32>
    %242 = arith.mulf %237, %241 : vector<16x32x16xf32>
    %243 = vector.shape_cast %221 : vector<512x16xf32> to vector<16x32x16xf32>
    %244 = arith.mulf %242, %243 : vector<16x32x16xf32>
    %cst_104 = arith.constant dense<0.000000e+00> : vector<32x16xf32>
    %245 = vector.multi_reduction <add>, %244, %cst_104 [0] : vector<16x32x16xf32> to vector<32x16xf32>
    %246 = arith.truncf %245 : vector<32x16xf32> to vector<32x16xbf16>
    %c0_105 = arith.constant 0 : index
    %c0_106 = arith.constant 0 : index
    %247 = vector.load %arg9[%c0_105, %c0_106] : memref<16x16xbf16, #tpu.memory_space<vmem>>, vector<16x16xbf16>
    %cst_107 = arith.constant dense<0.000000e+00> : vector<32x16xf32>
    %248 = tpu.matmul %246, %247, %cst_107 {dimension_numbers = #tpu.dot_dimension_numbers<[1], [0], [0], [1], [0, 0, 1, 1], [], []>} : vector<32x16xbf16>, vector<16x16xbf16>, vector<32x16xf32> -> vector<32x16xf32>
    %249 = vector.broadcast %3 : vector<1x16xf32> to vector<32x16xf32>
    %250 = arith.addf %248, %249 : vector<32x16xf32>
    %251 = arith.truncf %250 : vector<32x16xf32> to vector<32x16xbf16>
    %c0_108 = arith.constant 0 : index
    %c0_109 = arith.constant 0 : index
    %252 = vector.load %arg10[%c0_108, %c0_109] : memref<16x32xbf16, #tpu.memory_space<vmem>>, vector<16x32xbf16>
    %cst_110 = arith.constant dense<0.000000e+00> : vector<32x32xf32>
    %253 = tpu.matmul %251, %252, %cst_110 {dimension_numbers = #tpu.dot_dimension_numbers<[1], [0], [0], [1], [0, 0, 1, 1], [], []>} : vector<32x16xbf16>, vector<16x32xbf16>, vector<32x32xf32> -> vector<32x32xf32>
    %c0_111 = arith.constant 0 : index
    %c0_112 = arith.constant 0 : index
    %254 = vector.load %arg14[%c0_111, %c0_112] : memref<1x32xf32, #tpu.memory_space<vmem>>, vector<1x32xf32>
    %255 = vector.broadcast %254 : vector<1x32xf32> to vector<32x32xf32>
    %256 = arith.addf %253, %255 : vector<32x32xf32>
    %cst_113 = arith.constant 0.000000e+00 : f32
    %257 = vector.broadcast %cst_113 : f32 to vector<32x32xf32>
    %258 = arith.maximumf %256, %257 : vector<32x32xf32>
    %259 = arith.truncf %258 : vector<32x32xf32> to vector<32x32xbf16>
    %c0_114 = arith.constant 0 : index
    %c0_115 = arith.constant 0 : index
    %260 = vector.load %arg11[%c0_114, %c0_115] : memref<32x16xbf16, #tpu.memory_space<vmem>>, vector<32x16xbf16>
    %cst_116 = arith.constant dense<0.000000e+00> : vector<32x16xf32>
    %261 = tpu.matmul %259, %260, %cst_116 {dimension_numbers = #tpu.dot_dimension_numbers<[1], [0], [0], [1], [0, 0, 1, 1], [], []>} : vector<32x32xbf16>, vector<32x16xbf16>, vector<32x16xf32> -> vector<32x16xf32>
    %262 = vector.broadcast %4 : vector<1x16xf32> to vector<32x16xf32>
    %263 = arith.addf %261, %262 : vector<32x16xf32>
    %264 = arith.addf %250, %263 : vector<32x16xf32>
    %265 = vector.broadcast %5 : vector<1x16xf32> to vector<32x16xf32>
    %266 = arith.mulf %264, %265 : vector<32x16xf32>
    %267 = vector.broadcast %6 : vector<1x16xf32> to vector<32x16xf32>
    %268 = arith.addf %266, %267 : vector<32x16xf32>
    %269 = arith.truncf %268 : vector<32x16xf32> to vector<32x16xbf16>
    %c0_117 = arith.constant 0 : index
    %c0_118 = arith.constant 0 : index
    %270 = vector.load %arg12[%c0_117, %c0_118] : memref<16x32xbf16, #tpu.memory_space<vmem>>, vector<16x32xbf16>
    %cst_119 = arith.constant dense<0.000000e+00> : vector<32x32xf32>
    %271 = tpu.matmul %269, %270, %cst_119 {dimension_numbers = #tpu.dot_dimension_numbers<[1], [0], [0], [1], [0, 0, 1, 1], [], []>} : vector<32x16xbf16>, vector<16x32xbf16>, vector<32x32xf32> -> vector<32x32xf32>
    %c0_120 = arith.constant 0 : index
    %c0_121 = arith.constant 0 : index
    %272 = vector.load %arg15[%c0_120, %c0_121] : memref<1x32xf32, #tpu.memory_space<vmem>>, vector<1x32xf32>
    %273 = vector.broadcast %272 : vector<1x32xf32> to vector<32x32xf32>
    %274 = arith.addf %271, %273 : vector<32x32xf32>
    %cst_122 = arith.constant 0.000000e+00 : f32
    %275 = vector.broadcast %cst_122 : f32 to vector<32x32xf32>
    %276 = arith.maximumf %274, %275 : vector<32x32xf32>
    %c0_123 = arith.constant 0 : index
    %c0_124 = arith.constant 0 : index
    %277 = vector.load %arg16[%c0_123, %c0_124] : memref<32x32xf32, #tpu.memory_space<vmem>>, vector<32x32xf32>
    tpu.vector_store %arg16[%c0_123, %c0_124], %276 {strides = array<i32>} : memref<32x32xf32, #tpu.memory_space<vmem>>, vector<32x32xf32>,
    return
  }
  func.func @transform_0(%arg0: i32) -> (i32, i32) {
    %c0_i32 = arith.constant 0 : i32
    %c0_i32_0 = arith.constant 0 : i32
    return %arg0, %c0_i32 : i32, i32
  }
  func.func @transform_1(%arg0: i32) -> (i32, i32) {
    %c0_i32 = arith.constant 0 : i32
    %c0_i32_0 = arith.constant 0 : i32
    return %arg0, %c0_i32 : i32, i32
  }
  func.func @transform_2(%arg0: i32) -> (i32, i32) {
    %c0_i32 = arith.constant 0 : i32
    %c0_i32_0 = arith.constant 0 : i32
    return %arg0, %c0_i32 : i32, i32
  }
  func.func @transform_3(%arg0: i32) -> (i32, i32) {
    %c0_i32 = arith.constant 0 : i32
    %c0_i32_0 = arith.constant 0 : i32
    %c0_i32_1 = arith.constant 0 : i32
    return %c0_i32, %c0_i32_0 : i32, i32
  }
  func.func @transform_4(%arg0: i32) -> (i32, i32) {
    %c0_i32 = arith.constant 0 : i32
    %c0_i32_0 = arith.constant 0 : i32
    %c0_i32_1 = arith.constant 0 : i32
    return %c0_i32, %c0_i32_0 : i32, i32
  }
  func.func @transform_5(%arg0: i32) -> (i32, i32) {
    %c0_i32 = arith.constant 0 : i32
    %c0_i32_0 = arith.constant 0 : i32
    %c0_i32_1 = arith.constant 0 : i32
    return %c0_i32, %c0_i32_0 : i32, i32
  }
  func.func @transform_6(%arg0: i32) -> (i32, i32) {
    %c0_i32 = arith.constant 0 : i32
    %c0_i32_0 = arith.constant 0 : i32
    %c0_i32_1 = arith.constant 0 : i32
    return %c0_i32, %c0_i32_0 : i32, i32
  }
  func.func @transform_7(%arg0: i32) -> (i32, i32) {
    %c0_i32 = arith.constant 0 : i32
    %c0_i32_0 = arith.constant 0 : i32
    %c0_i32_1 = arith.constant 0 : i32
    return %c0_i32, %c0_i32_0 : i32, i32
  }
  func.func @transform_8(%arg0: i32) -> (i32, i32) {
    %c0_i32 = arith.constant 0 : i32
    %c0_i32_0 = arith.constant 0 : i32
    %c0_i32_1 = arith.constant 0 : i32
    return %c0_i32, %c0_i32_0 : i32, i32
  }
  func.func @transform_9(%arg0: i32) -> (i32, i32) {
    %c0_i32 = arith.constant 0 : i32
    %c0_i32_0 = arith.constant 0 : i32
    %c0_i32_1 = arith.constant 0 : i32
    return %c0_i32, %c0_i32_0 : i32, i32
  }
  func.func @transform_10(%arg0: i32) -> (i32, i32) {
    %c0_i32 = arith.constant 0 : i32
    %c0_i32_0 = arith.constant 0 : i32
    %c0_i32_1 = arith.constant 0 : i32
    return %c0_i32, %c0_i32_0 : i32, i32
  }
  func.func @transform_11(%arg0: i32) -> (i32, i32) {
    %c0_i32 = arith.constant 0 : i32
    %c0_i32_0 = arith.constant 0 : i32
    %c0_i32_1 = arith.constant 0 : i32
    return %c0_i32, %c0_i32_0 : i32, i32
  }
  func.func @transform_12(%arg0: i32) -> (i32, i32) {
    %c0_i32 = arith.constant 0 : i32
    %c0_i32_0 = arith.constant 0 : i32
    %c0_i32_1 = arith.constant 0 : i32
    return %c0_i32, %c0_i32_0 : i32, i32
  }
  func.func @transform_13(%arg0: i32) -> (i32, i32) {
    %c0_i32 = arith.constant 0 : i32
    %c0_i32_0 = arith.constant 0 : i32
    %c0_i32_1 = arith.constant 0 : i32
    return %c0_i32, %c0_i32_0 : i32, i32
  }
  func.func @transform_14(%arg0: i32) -> (i32, i32) {
    %c0_i32 = arith.constant 0 : i32
    %c0_i32_0 = arith.constant 0 : i32
    %c0_i32_1 = arith.constant 0 : i32
    return %c0_i32, %c0_i32_0 : i32, i32
  }
  func.func @transform_15(%arg0: i32) -> (i32, i32) {
    %c0_i32 = arith.constant 0 : i32
    %c0_i32_0 = arith.constant 0 : i32
    return %arg0, %c0_i32 : i32, i32
  }
}

module attributes {stable_mosaic.version = 11 : i64} {
  func.func @_fused_block_kernel(%arg0: i32, %arg1: memref<32x32xf32, #tpu.memory_space<vmem>>, %arg2: memref<32x8xf32, #tpu.memory_space<vmem>>, %arg3: memref<32x16xi32, #tpu.memory_space<vmem>>, %arg4: memref<32x1xi32, #tpu.memory_space<vmem>>, %arg5: memref<32x32xbf16, #tpu.memory_space<vmem>>, %arg6: memref<32x32xbf16, #tpu.memory_space<vmem>>, %arg7: memref<8x32xbf16, #tpu.memory_space<vmem>>, %arg8: memref<32x32xbf16, #tpu.memory_space<vmem>>, %arg9: memref<32x32xbf16, #tpu.memory_space<vmem>>, %arg10: memref<32x32xbf16, #tpu.memory_space<vmem>>, %arg11: memref<32x64xbf16, #tpu.memory_space<vmem>>, %arg12: memref<64x32xbf16, #tpu.memory_space<vmem>>, %arg13: memref<32x32xbf16, #tpu.memory_space<vmem>>, %arg14: memref<8x32xf32, #tpu.memory_space<vmem>>, %arg15: memref<1x64xf32, #tpu.memory_space<vmem>>, %arg16: memref<1x32xf32, #tpu.memory_space<vmem>>, %arg17: memref<32x32xf32, #tpu.memory_space<vmem>>) attributes {dimension_semantics = [#tpu.dimension_semantics<parallel>], iteration_bounds = array<i64: 1>, scalar_prefetch = 0 : i64, scratch_operands = 0 : i64, tpu.core_type = #tpu.core_type<tc>, window_params = [{transform_indices = @transform_0, window_bounds = array<i64: 32, 32>}, {transform_indices = @transform_1, window_bounds = array<i64: 32, 8>}, {transform_indices = @transform_2, window_bounds = array<i64: 32, 16>}, {transform_indices = @transform_3, window_bounds = array<i64: 32, 1>}, {pipeline_mode = #tpu.pipeline_mode<synchronous>, transform_indices = @transform_4, window_bounds = array<i64: 32, 32>}, {pipeline_mode = #tpu.pipeline_mode<synchronous>, transform_indices = @transform_5, window_bounds = array<i64: 32, 32>}, {pipeline_mode = #tpu.pipeline_mode<synchronous>, transform_indices = @transform_6, window_bounds = array<i64: 8, 32>}, {pipeline_mode = #tpu.pipeline_mode<synchronous>, transform_indices = @transform_7, window_bounds = array<i64: 32, 32>}, {pipeline_mode = #tpu.pipeline_mode<synchronous>, transform_indices = @transform_8, window_bounds = array<i64: 32, 32>}, {pipeline_mode = #tpu.pipeline_mode<synchronous>, transform_indices = @transform_9, window_bounds = array<i64: 32, 32>}, {pipeline_mode = #tpu.pipeline_mode<synchronous>, transform_indices = @transform_10, window_bounds = array<i64: 32, 64>}, {pipeline_mode = #tpu.pipeline_mode<synchronous>, transform_indices = @transform_11, window_bounds = array<i64: 64, 32>}, {pipeline_mode = #tpu.pipeline_mode<synchronous>, transform_indices = @transform_12, window_bounds = array<i64: 32, 32>}, {pipeline_mode = #tpu.pipeline_mode<synchronous>, transform_indices = @transform_13, window_bounds = array<i64: 8, 32>}, {pipeline_mode = #tpu.pipeline_mode<synchronous>, transform_indices = @transform_14, window_bounds = array<i64: 1, 64>}, {pipeline_mode = #tpu.pipeline_mode<synchronous>, transform_indices = @transform_15, window_bounds = array<i64: 1, 32>}, {transform_indices = @transform_16, window_bounds = array<i64: 32, 32>}]} {
    %c0 = arith.constant 0 : index
    %c0_0 = arith.constant 0 : index
    %0 = vector.load %arg14[%c0, %c0_0] : memref<8x32xf32, #tpu.memory_space<vmem>>, vector<8x32xf32>
    %1 = vector.extract_strided_slice %0 {offsets = [0, 0], sizes = [1, 32], strides = [1, 1]} : vector<8x32xf32> to vector<1x32xf32>
    %2 = vector.extract_strided_slice %0 {offsets = [1, 0], sizes = [1, 32], strides = [1, 1]} : vector<8x32xf32> to vector<1x32xf32>
    %3 = vector.extract_strided_slice %0 {offsets = [2, 0], sizes = [1, 32], strides = [1, 1]} : vector<8x32xf32> to vector<1x32xf32>
    %4 = vector.extract_strided_slice %0 {offsets = [3, 0], sizes = [1, 32], strides = [1, 1]} : vector<8x32xf32> to vector<1x32xf32>
    %5 = vector.extract_strided_slice %0 {offsets = [4, 0], sizes = [1, 32], strides = [1, 1]} : vector<8x32xf32> to vector<1x32xf32>
    %6 = vector.extract_strided_slice %0 {offsets = [5, 0], sizes = [1, 32], strides = [1, 1]} : vector<8x32xf32> to vector<1x32xf32>
    %c0_1 = arith.constant 0 : index
    %c0_2 = arith.constant 0 : index
    %7 = vector.load %arg2[%c0_1, %c0_2] : memref<32x8xf32, #tpu.memory_space<vmem>>, vector<32x8xf32>
    %8 = arith.truncf %7 : vector<32x8xf32> to vector<32x8xbf16>
    %c0_3 = arith.constant 0 : index
    %c0_4 = arith.constant 0 : index
    %9 = vector.load %arg7[%c0_3, %c0_4] : memref<8x32xbf16, #tpu.memory_space<vmem>>, vector<8x32xbf16>
    %cst = arith.constant dense<0.000000e+00> : vector<32x32xf32>
    %10 = tpu.matmul %8, %9, %cst {dimension_numbers = #tpu.dot_dimension_numbers<[1], [0], [0], [1], [0, 0, 1, 1], [], []>} : vector<32x8xbf16>, vector<8x32xbf16>, vector<32x32xf32> -> vector<32x32xf32>
    %11 = vector.broadcast %1 : vector<1x32xf32> to vector<32x32xf32>
    %12 = arith.addf %10, %11 : vector<32x32xf32>
    %cst_5 = arith.constant 0.000000e+00 : f32
    %13 = vector.broadcast %cst_5 : f32 to vector<32x32xf32>
    %14 = arith.maximumf %12, %13 : vector<32x32xf32>
    %c0_6 = arith.constant 0 : index
    %c0_7 = arith.constant 0 : index
    %15 = vector.load %arg1[%c0_6, %c0_7] : memref<32x32xf32, #tpu.memory_space<vmem>>, vector<32x32xf32>
    %16 = arith.addf %15, %14 : vector<32x32xf32>
    %17 = arith.truncf %16 : vector<32x32xf32> to vector<32x32xbf16>
    %c0_8 = arith.constant 0 : index
    %c0_9 = arith.constant 0 : index
    %18 = vector.load %arg8[%c0_8, %c0_9] : memref<32x32xbf16, #tpu.memory_space<vmem>>, vector<32x32xbf16>
    %cst_10 = arith.constant dense<0.000000e+00> : vector<32x32xf32>
    %19 = tpu.matmul %17, %18, %cst_10 {dimension_numbers = #tpu.dot_dimension_numbers<[1], [0], [0], [1], [0, 0, 1, 1], [], []>} : vector<32x32xbf16>, vector<32x32xbf16>, vector<32x32xf32> -> vector<32x32xf32>
    %20 = vector.broadcast %2 : vector<1x32xf32> to vector<32x32xf32>
    %21 = arith.addf %19, %20 : vector<32x32xf32>
    %cst_11 = arith.constant 0.353553385 : f32
    %22 = vector.broadcast %cst_11 : f32 to vector<32x32xf32>
    %23 = arith.mulf %21, %22 : vector<32x32xf32>
    %c0_12 = arith.constant 0 : index
    %c0_13 = arith.constant 0 : index
    %24 = vector.load %arg4[%c0_12, %c0_13] : memref<32x1xi32, #tpu.memory_space<vmem>>, vector<32x1xi32>
    %25 = tpu.iota {dimensions = array<i32: 1>} : vector<32x32xi32>
    %c0_14 = arith.constant 0 : index
    %c0_15 = arith.constant 0 : index
    %26 = vector.load %arg3[%c0_14, %c0_15] : memref<32x16xi32, #tpu.memory_space<vmem>>, vector<32x1xi32>
    %27 = vector.broadcast %26 : vector<32x1xi32> to vector<32x32xi32>
    %28 = arith.cmpi eq, %27, %25 : vector<32x32xi32>
    %cst_16 = arith.constant 1.000000e+00 : f32
    %cst_17 = arith.constant 0.000000e+00 : f32
    %29 = vector.broadcast %cst_16 : f32 to vector<32x32xf32>
    %30 = vector.broadcast %cst_17 : f32 to vector<32x32xf32>
    %31 = arith.select %28, %29, %30 : vector<32x32xi1>, vector<32x32xf32>
    %32 = arith.truncf %31 : vector<32x32xf32> to vector<32x32xbf16>
    %c0_i32 = arith.constant 0 : i32
    %33 = vector.broadcast %c0_i32 : i32 to vector<32x1xi32>
    %34 = arith.cmpi sgt, %24, %33 : vector<32x1xi32>
    %cst_18 = arith.constant 0.000000e+00 : f32
    %cst_19 = arith.constant -1.000000e+30 : f32
    %35 = vector.broadcast %cst_18 : f32 to vector<32x1xf32>
    %36 = vector.broadcast %cst_19 : f32 to vector<32x1xf32>
    %37 = arith.select %34, %35, %36 : vector<32x1xi1>, vector<32x1xf32>
    %c0_20 = arith.constant 0 : index
    %c1 = arith.constant 1 : index
    %38 = vector.load %arg3[%c0_20, %c1] : memref<32x16xi32, #tpu.memory_space<vmem>>, vector<32x1xi32>
    %39 = vector.broadcast %38 : vector<32x1xi32> to vector<32x32xi32>
    %40 = arith.cmpi eq, %39, %25 : vector<32x32xi32>
    %cst_21 = arith.constant 1.000000e+00 : f32
    %cst_22 = arith.constant 0.000000e+00 : f32
    %41 = vector.broadcast %cst_21 : f32 to vector<32x32xf32>
    %42 = vector.broadcast %cst_22 : f32 to vector<32x32xf32>
    %43 = arith.select %40, %41, %42 : vector<32x32xi1>, vector<32x32xf32>
    %44 = arith.truncf %43 : vector<32x32xf32> to vector<32x32xbf16>
    %c1_i32 = arith.constant 1 : i32
    %45 = vector.broadcast %c1_i32 : i32 to vector<32x1xi32>
    %46 = arith.cmpi sgt, %24, %45 : vector<32x1xi32>
    %cst_23 = arith.constant 0.000000e+00 : f32
    %cst_24 = arith.constant -1.000000e+30 : f32
    %47 = vector.broadcast %cst_23 : f32 to vector<32x1xf32>
    %48 = vector.broadcast %cst_24 : f32 to vector<32x1xf32>
    %49 = arith.select %46, %47, %48 : vector<32x1xi1>, vector<32x1xf32>
    %c0_25 = arith.constant 0 : index
    %c2 = arith.constant 2 : index
    %50 = vector.load %arg3[%c0_25, %c2] : memref<32x16xi32, #tpu.memory_space<vmem>>, vector<32x1xi32>
    %51 = vector.broadcast %50 : vector<32x1xi32> to vector<32x32xi32>
    %52 = arith.cmpi eq, %51, %25 : vector<32x32xi32>
    %cst_26 = arith.constant 1.000000e+00 : f32
    %cst_27 = arith.constant 0.000000e+00 : f32
    %53 = vector.broadcast %cst_26 : f32 to vector<32x32xf32>
    %54 = vector.broadcast %cst_27 : f32 to vector<32x32xf32>
    %55 = arith.select %52, %53, %54 : vector<32x32xi1>, vector<32x32xf32>
    %56 = arith.truncf %55 : vector<32x32xf32> to vector<32x32xbf16>
    %c2_i32 = arith.constant 2 : i32
    %57 = vector.broadcast %c2_i32 : i32 to vector<32x1xi32>
    %58 = arith.cmpi sgt, %24, %57 : vector<32x1xi32>
    %cst_28 = arith.constant 0.000000e+00 : f32
    %cst_29 = arith.constant -1.000000e+30 : f32
    %59 = vector.broadcast %cst_28 : f32 to vector<32x1xf32>
    %60 = vector.broadcast %cst_29 : f32 to vector<32x1xf32>
    %61 = arith.select %58, %59, %60 : vector<32x1xi1>, vector<32x1xf32>
    %c0_30 = arith.constant 0 : index
    %c3 = arith.constant 3 : index
    %62 = vector.load %arg3[%c0_30, %c3] : memref<32x16xi32, #tpu.memory_space<vmem>>, vector<32x1xi32>
    %63 = vector.broadcast %62 : vector<32x1xi32> to vector<32x32xi32>
    %64 = arith.cmpi eq, %63, %25 : vector<32x32xi32>
    %cst_31 = arith.constant 1.000000e+00 : f32
    %cst_32 = arith.constant 0.000000e+00 : f32
    %65 = vector.broadcast %cst_31 : f32 to vector<32x32xf32>
    %66 = vector.broadcast %cst_32 : f32 to vector<32x32xf32>
    %67 = arith.select %64, %65, %66 : vector<32x32xi1>, vector<32x32xf32>
    %68 = arith.truncf %67 : vector<32x32xf32> to vector<32x32xbf16>
    %c3_i32 = arith.constant 3 : i32
    %69 = vector.broadcast %c3_i32 : i32 to vector<32x1xi32>
    %70 = arith.cmpi sgt, %24, %69 : vector<32x1xi32>
    %cst_33 = arith.constant 0.000000e+00 : f32
    %cst_34 = arith.constant -1.000000e+30 : f32
    %71 = vector.broadcast %cst_33 : f32 to vector<32x1xf32>
    %72 = vector.broadcast %cst_34 : f32 to vector<32x1xf32>
    %73 = arith.select %70, %71, %72 : vector<32x1xi1>, vector<32x1xf32>
    %c0_35 = arith.constant 0 : index
    %c4 = arith.constant 4 : index
    %74 = vector.load %arg3[%c0_35, %c4] : memref<32x16xi32, #tpu.memory_space<vmem>>, vector<32x1xi32>
    %75 = vector.broadcast %74 : vector<32x1xi32> to vector<32x32xi32>
    %76 = arith.cmpi eq, %75, %25 : vector<32x32xi32>
    %cst_36 = arith.constant 1.000000e+00 : f32
    %cst_37 = arith.constant 0.000000e+00 : f32
    %77 = vector.broadcast %cst_36 : f32 to vector<32x32xf32>
    %78 = vector.broadcast %cst_37 : f32 to vector<32x32xf32>
    %79 = arith.select %76, %77, %78 : vector<32x32xi1>, vector<32x32xf32>
    %80 = arith.truncf %79 : vector<32x32xf32> to vector<32x32xbf16>
    %c4_i32 = arith.constant 4 : i32
    %81 = vector.broadcast %c4_i32 : i32 to vector<32x1xi32>
    %82 = arith.cmpi sgt, %24, %81 : vector<32x1xi32>
    %cst_38 = arith.constant 0.000000e+00 : f32
    %cst_39 = arith.constant -1.000000e+30 : f32
    %83 = vector.broadcast %cst_38 : f32 to vector<32x1xf32>
    %84 = vector.broadcast %cst_39 : f32 to vector<32x1xf32>
    %85 = arith.select %82, %83, %84 : vector<32x1xi1>, vector<32x1xf32>
    %c0_40 = arith.constant 0 : index
    %c5 = arith.constant 5 : index
    %86 = vector.load %arg3[%c0_40, %c5] : memref<32x16xi32, #tpu.memory_space<vmem>>, vector<32x1xi32>
    %87 = vector.broadcast %86 : vector<32x1xi32> to vector<32x32xi32>
    %88 = arith.cmpi eq, %87, %25 : vector<32x32xi32>
    %cst_41 = arith.constant 1.000000e+00 : f32
    %cst_42 = arith.constant 0.000000e+00 : f32
    %89 = vector.broadcast %cst_41 : f32 to vector<32x32xf32>
    %90 = vector.broadcast %cst_42 : f32 to vector<32x32xf32>
    %91 = arith.select %88, %89, %90 : vector<32x32xi1>, vector<32x32xf32>
    %92 = arith.truncf %91 : vector<32x32xf32> to vector<32x32xbf16>
    %c5_i32 = arith.constant 5 : i32
    %93 = vector.broadcast %c5_i32 : i32 to vector<32x1xi32>
    %94 = arith.cmpi sgt, %24, %93 : vector<32x1xi32>
    %cst_43 = arith.constant 0.000000e+00 : f32
    %cst_44 = arith.constant -1.000000e+30 : f32
    %95 = vector.broadcast %cst_43 : f32 to vector<32x1xf32>
    %96 = vector.broadcast %cst_44 : f32 to vector<32x1xf32>
    %97 = arith.select %94, %95, %96 : vector<32x1xi1>, vector<32x1xf32>
    %c0_45 = arith.constant 0 : index
    %c6 = arith.constant 6 : index
    %98 = vector.load %arg3[%c0_45, %c6] : memref<32x16xi32, #tpu.memory_space<vmem>>, vector<32x1xi32>
    %99 = vector.broadcast %98 : vector<32x1xi32> to vector<32x32xi32>
    %100 = arith.cmpi eq, %99, %25 : vector<32x32xi32>
    %cst_46 = arith.constant 1.000000e+00 : f32
    %cst_47 = arith.constant 0.000000e+00 : f32
    %101 = vector.broadcast %cst_46 : f32 to vector<32x32xf32>
    %102 = vector.broadcast %cst_47 : f32 to vector<32x32xf32>
    %103 = arith.select %100, %101, %102 : vector<32x32xi1>, vector<32x32xf32>
    %104 = arith.truncf %103 : vector<32x32xf32> to vector<32x32xbf16>
    %c6_i32 = arith.constant 6 : i32
    %105 = vector.broadcast %c6_i32 : i32 to vector<32x1xi32>
    %106 = arith.cmpi sgt, %24, %105 : vector<32x1xi32>
    %cst_48 = arith.constant 0.000000e+00 : f32
    %cst_49 = arith.constant -1.000000e+30 : f32
    %107 = vector.broadcast %cst_48 : f32 to vector<32x1xf32>
    %108 = vector.broadcast %cst_49 : f32 to vector<32x1xf32>
    %109 = arith.select %106, %107, %108 : vector<32x1xi1>, vector<32x1xf32>
    %c0_50 = arith.constant 0 : index
    %c7 = arith.constant 7 : index
    %110 = vector.load %arg3[%c0_50, %c7] : memref<32x16xi32, #tpu.memory_space<vmem>>, vector<32x1xi32>
    %111 = vector.broadcast %110 : vector<32x1xi32> to vector<32x32xi32>
    %112 = arith.cmpi eq, %111, %25 : vector<32x32xi32>
    %cst_51 = arith.constant 1.000000e+00 : f32
    %cst_52 = arith.constant 0.000000e+00 : f32
    %113 = vector.broadcast %cst_51 : f32 to vector<32x32xf32>
    %114 = vector.broadcast %cst_52 : f32 to vector<32x32xf32>
    %115 = arith.select %112, %113, %114 : vector<32x32xi1>, vector<32x32xf32>
    %116 = arith.truncf %115 : vector<32x32xf32> to vector<32x32xbf16>
    %c7_i32 = arith.constant 7 : i32
    %117 = vector.broadcast %c7_i32 : i32 to vector<32x1xi32>
    %118 = arith.cmpi sgt, %24, %117 : vector<32x1xi32>
    %cst_53 = arith.constant 0.000000e+00 : f32
    %cst_54 = arith.constant -1.000000e+30 : f32
    %119 = vector.broadcast %cst_53 : f32 to vector<32x1xf32>
    %120 = vector.broadcast %cst_54 : f32 to vector<32x1xf32>
    %121 = arith.select %118, %119, %120 : vector<32x1xi1>, vector<32x1xf32>
    %c0_55 = arith.constant 0 : index
    %c8 = arith.constant 8 : index
    %122 = vector.load %arg3[%c0_55, %c8] : memref<32x16xi32, #tpu.memory_space<vmem>>, vector<32x1xi32>
    %123 = vector.broadcast %122 : vector<32x1xi32> to vector<32x32xi32>
    %124 = arith.cmpi eq, %123, %25 : vector<32x32xi32>
    %cst_56 = arith.constant 1.000000e+00 : f32
    %cst_57 = arith.constant 0.000000e+00 : f32
    %125 = vector.broadcast %cst_56 : f32 to vector<32x32xf32>
    %126 = vector.broadcast %cst_57 : f32 to vector<32x32xf32>
    %127 = arith.select %124, %125, %126 : vector<32x32xi1>, vector<32x32xf32>
    %128 = arith.truncf %127 : vector<32x32xf32> to vector<32x32xbf16>
    %c8_i32 = arith.constant 8 : i32
    %129 = vector.broadcast %c8_i32 : i32 to vector<32x1xi32>
    %130 = arith.cmpi sgt, %24, %129 : vector<32x1xi32>
    %cst_58 = arith.constant 0.000000e+00 : f32
    %cst_59 = arith.constant -1.000000e+30 : f32
    %131 = vector.broadcast %cst_58 : f32 to vector<32x1xf32>
    %132 = vector.broadcast %cst_59 : f32 to vector<32x1xf32>
    %133 = arith.select %130, %131, %132 : vector<32x1xi1>, vector<32x1xf32>
    %c0_60 = arith.constant 0 : index
    %c9 = arith.constant 9 : index
    %134 = vector.load %arg3[%c0_60, %c9] : memref<32x16xi32, #tpu.memory_space<vmem>>, vector<32x1xi32>
    %135 = vector.broadcast %134 : vector<32x1xi32> to vector<32x32xi32>
    %136 = arith.cmpi eq, %135, %25 : vector<32x32xi32>
    %cst_61 = arith.constant 1.000000e+00 : f32
    %cst_62 = arith.constant 0.000000e+00 : f32
    %137 = vector.broadcast %cst_61 : f32 to vector<32x32xf32>
    %138 = vector.broadcast %cst_62 : f32 to vector<32x32xf32>
    %139 = arith.select %136, %137, %138 : vector<32x32xi1>, vector<32x32xf32>
    %140 = arith.truncf %139 : vector<32x32xf32> to vector<32x32xbf16>
    %c9_i32 = arith.constant 9 : i32
    %141 = vector.broadcast %c9_i32 : i32 to vector<32x1xi32>
    %142 = arith.cmpi sgt, %24, %141 : vector<32x1xi32>
    %cst_63 = arith.constant 0.000000e+00 : f32
    %cst_64 = arith.constant -1.000000e+30 : f32
    %143 = vector.broadcast %cst_63 : f32 to vector<32x1xf32>
    %144 = vector.broadcast %cst_64 : f32 to vector<32x1xf32>
    %145 = arith.select %142, %143, %144 : vector<32x1xi1>, vector<32x1xf32>
    %c0_65 = arith.constant 0 : index
    %c10 = arith.constant 10 : index
    %146 = vector.load %arg3[%c0_65, %c10] : memref<32x16xi32, #tpu.memory_space<vmem>>, vector<32x1xi32>
    %147 = vector.broadcast %146 : vector<32x1xi32> to vector<32x32xi32>
    %148 = arith.cmpi eq, %147, %25 : vector<32x32xi32>
    %cst_66 = arith.constant 1.000000e+00 : f32
    %cst_67 = arith.constant 0.000000e+00 : f32
    %149 = vector.broadcast %cst_66 : f32 to vector<32x32xf32>
    %150 = vector.broadcast %cst_67 : f32 to vector<32x32xf32>
    %151 = arith.select %148, %149, %150 : vector<32x32xi1>, vector<32x32xf32>
    %152 = arith.truncf %151 : vector<32x32xf32> to vector<32x32xbf16>
    %c10_i32 = arith.constant 10 : i32
    %153 = vector.broadcast %c10_i32 : i32 to vector<32x1xi32>
    %154 = arith.cmpi sgt, %24, %153 : vector<32x1xi32>
    %cst_68 = arith.constant 0.000000e+00 : f32
    %cst_69 = arith.constant -1.000000e+30 : f32
    %155 = vector.broadcast %cst_68 : f32 to vector<32x1xf32>
    %156 = vector.broadcast %cst_69 : f32 to vector<32x1xf32>
    %157 = arith.select %154, %155, %156 : vector<32x1xi1>, vector<32x1xf32>
    %c0_70 = arith.constant 0 : index
    %c11 = arith.constant 11 : index
    %158 = vector.load %arg3[%c0_70, %c11] : memref<32x16xi32, #tpu.memory_space<vmem>>, vector<32x1xi32>
    %159 = vector.broadcast %158 : vector<32x1xi32> to vector<32x32xi32>
    %160 = arith.cmpi eq, %159, %25 : vector<32x32xi32>
    %cst_71 = arith.constant 1.000000e+00 : f32
    %cst_72 = arith.constant 0.000000e+00 : f32
    %161 = vector.broadcast %cst_71 : f32 to vector<32x32xf32>
    %162 = vector.broadcast %cst_72 : f32 to vector<32x32xf32>
    %163 = arith.select %160, %161, %162 : vector<32x32xi1>, vector<32x32xf32>
    %164 = arith.truncf %163 : vector<32x32xf32> to vector<32x32xbf16>
    %c11_i32 = arith.constant 11 : i32
    %165 = vector.broadcast %c11_i32 : i32 to vector<32x1xi32>
    %166 = arith.cmpi sgt, %24, %165 : vector<32x1xi32>
    %cst_73 = arith.constant 0.000000e+00 : f32
    %cst_74 = arith.constant -1.000000e+30 : f32
    %167 = vector.broadcast %cst_73 : f32 to vector<32x1xf32>
    %168 = vector.broadcast %cst_74 : f32 to vector<32x1xf32>
    %169 = arith.select %166, %167, %168 : vector<32x1xi1>, vector<32x1xf32>
    %c0_75 = arith.constant 0 : index
    %c12 = arith.constant 12 : index
    %170 = vector.load %arg3[%c0_75, %c12] : memref<32x16xi32, #tpu.memory_space<vmem>>, vector<32x1xi32>
    %171 = vector.broadcast %170 : vector<32x1xi32> to vector<32x32xi32>
    %172 = arith.cmpi eq, %171, %25 : vector<32x32xi32>
    %cst_76 = arith.constant 1.000000e+00 : f32
    %cst_77 = arith.constant 0.000000e+00 : f32
    %173 = vector.broadcast %cst_76 : f32 to vector<32x32xf32>
    %174 = vector.broadcast %cst_77 : f32 to vector<32x32xf32>
    %175 = arith.select %172, %173, %174 : vector<32x32xi1>, vector<32x32xf32>
    %176 = arith.truncf %175 : vector<32x32xf32> to vector<32x32xbf16>
    %c12_i32 = arith.constant 12 : i32
    %177 = vector.broadcast %c12_i32 : i32 to vector<32x1xi32>
    %178 = arith.cmpi sgt, %24, %177 : vector<32x1xi32>
    %cst_78 = arith.constant 0.000000e+00 : f32
    %cst_79 = arith.constant -1.000000e+30 : f32
    %179 = vector.broadcast %cst_78 : f32 to vector<32x1xf32>
    %180 = vector.broadcast %cst_79 : f32 to vector<32x1xf32>
    %181 = arith.select %178, %179, %180 : vector<32x1xi1>, vector<32x1xf32>
    %c0_80 = arith.constant 0 : index
    %c13 = arith.constant 13 : index
    %182 = vector.load %arg3[%c0_80, %c13] : memref<32x16xi32, #tpu.memory_space<vmem>>, vector<32x1xi32>
    %183 = vector.broadcast %182 : vector<32x1xi32> to vector<32x32xi32>
    %184 = arith.cmpi eq, %183, %25 : vector<32x32xi32>
    %cst_81 = arith.constant 1.000000e+00 : f32
    %cst_82 = arith.constant 0.000000e+00 : f32
    %185 = vector.broadcast %cst_81 : f32 to vector<32x32xf32>
    %186 = vector.broadcast %cst_82 : f32 to vector<32x32xf32>
    %187 = arith.select %184, %185, %186 : vector<32x32xi1>, vector<32x32xf32>
    %188 = arith.truncf %187 : vector<32x32xf32> to vector<32x32xbf16>
    %c13_i32 = arith.constant 13 : i32
    %189 = vector.broadcast %c13_i32 : i32 to vector<32x1xi32>
    %190 = arith.cmpi sgt, %24, %189 : vector<32x1xi32>
    %cst_83 = arith.constant 0.000000e+00 : f32
    %cst_84 = arith.constant -1.000000e+30 : f32
    %191 = vector.broadcast %cst_83 : f32 to vector<32x1xf32>
    %192 = vector.broadcast %cst_84 : f32 to vector<32x1xf32>
    %193 = arith.select %190, %191, %192 : vector<32x1xi1>, vector<32x1xf32>
    %c0_85 = arith.constant 0 : index
    %c14 = arith.constant 14 : index
    %194 = vector.load %arg3[%c0_85, %c14] : memref<32x16xi32, #tpu.memory_space<vmem>>, vector<32x1xi32>
    %195 = vector.broadcast %194 : vector<32x1xi32> to vector<32x32xi32>
    %196 = arith.cmpi eq, %195, %25 : vector<32x32xi32>
    %cst_86 = arith.constant 1.000000e+00 : f32
    %cst_87 = arith.constant 0.000000e+00 : f32
    %197 = vector.broadcast %cst_86 : f32 to vector<32x32xf32>
    %198 = vector.broadcast %cst_87 : f32 to vector<32x32xf32>
    %199 = arith.select %196, %197, %198 : vector<32x32xi1>, vector<32x32xf32>
    %200 = arith.truncf %199 : vector<32x32xf32> to vector<32x32xbf16>
    %c14_i32 = arith.constant 14 : i32
    %201 = vector.broadcast %c14_i32 : i32 to vector<32x1xi32>
    %202 = arith.cmpi sgt, %24, %201 : vector<32x1xi32>
    %cst_88 = arith.constant 0.000000e+00 : f32
    %cst_89 = arith.constant -1.000000e+30 : f32
    %203 = vector.broadcast %cst_88 : f32 to vector<32x1xf32>
    %204 = vector.broadcast %cst_89 : f32 to vector<32x1xf32>
    %205 = arith.select %202, %203, %204 : vector<32x1xi1>, vector<32x1xf32>
    %c0_90 = arith.constant 0 : index
    %c15 = arith.constant 15 : index
    %206 = vector.load %arg3[%c0_90, %c15] : memref<32x16xi32, #tpu.memory_space<vmem>>, vector<32x1xi32>
    %207 = vector.broadcast %206 : vector<32x1xi32> to vector<32x32xi32>
    %208 = arith.cmpi eq, %207, %25 : vector<32x32xi32>
    %cst_91 = arith.constant 1.000000e+00 : f32
    %cst_92 = arith.constant 0.000000e+00 : f32
    %209 = vector.broadcast %cst_91 : f32 to vector<32x32xf32>
    %210 = vector.broadcast %cst_92 : f32 to vector<32x32xf32>
    %211 = arith.select %208, %209, %210 : vector<32x32xi1>, vector<32x32xf32>
    %212 = arith.truncf %211 : vector<32x32xf32> to vector<32x32xbf16>
    %c15_i32 = arith.constant 15 : i32
    %213 = vector.broadcast %c15_i32 : i32 to vector<32x1xi32>
    %214 = arith.cmpi sgt, %24, %213 : vector<32x1xi32>
    %cst_93 = arith.constant 0.000000e+00 : f32
    %cst_94 = arith.constant -1.000000e+30 : f32
    %215 = vector.broadcast %cst_93 : f32 to vector<32x1xf32>
    %216 = vector.broadcast %cst_94 : f32 to vector<32x1xf32>
    %217 = arith.select %214, %215, %216 : vector<32x1xi1>, vector<32x1xf32>
    %218 = tpu.concatenate %32, %44, %56, %68, %80, %92, %104, %116, %128, %140, %152, %164, %176, %188, %200, %212 in 0 : vector<32x32xbf16>, vector<32x32xbf16>, vector<32x32xbf16>, vector<32x32xbf16>, vector<32x32xbf16>, vector<32x32xbf16>, vector<32x32xbf16>, vector<32x32xbf16>, vector<32x32xbf16>, vector<32x32xbf16>, vector<32x32xbf16>, vector<32x32xbf16>, vector<32x32xbf16>, vector<32x32xbf16>, vector<32x32xbf16>, vector<32x32xbf16> -> vector<512x32xbf16>
    %219 = tpu.concatenate %37, %49, %61, %73, %85, %97, %109, %121, %133, %145, %157, %169, %181, %193, %205, %217 in 0 : vector<32x1xf32>, vector<32x1xf32>, vector<32x1xf32>, vector<32x1xf32>, vector<32x1xf32>, vector<32x1xf32>, vector<32x1xf32>, vector<32x1xf32>, vector<32x1xf32>, vector<32x1xf32>, vector<32x1xf32>, vector<32x1xf32>, vector<32x1xf32>, vector<32x1xf32>, vector<32x1xf32>, vector<32x1xf32> -> vector<512x1xf32>
    %c0_95 = arith.constant 0 : index
    %c0_96 = arith.constant 0 : index
    %220 = vector.load %arg5[%c0_95, %c0_96] : memref<32x32xbf16, #tpu.memory_space<vmem>>, vector<32x32xbf16>
    %cst_97 = arith.constant dense<0.000000e+00> : vector<512x32xf32>
    %221 = tpu.matmul %218, %220, %cst_97 {dimension_numbers = #tpu.dot_dimension_numbers<[1], [0], [0], [1], [0, 0, 1, 1], [], []>} : vector<512x32xbf16>, vector<32x32xbf16>, vector<512x32xf32> -> vector<512x32xf32>
    %c0_98 = arith.constant 0 : index
    %c0_99 = arith.constant 0 : index
    %222 = vector.load %arg6[%c0_98, %c0_99] : memref<32x32xbf16, #tpu.memory_space<vmem>>, vector<32x32xbf16>
    %cst_100 = arith.constant dense<0.000000e+00> : vector<512x32xf32>
    %223 = tpu.matmul %218, %222, %cst_100 {dimension_numbers = #tpu.dot_dimension_numbers<[1], [0], [0], [1], [0, 0, 1, 1], [], []>} : vector<512x32xbf16>, vector<32x32xbf16>, vector<512x32xf32> -> vector<512x32xf32>
    %224 = vector.shape_cast %221 : vector<512x32xf32> to vector<16x32x32xf32>
    %225 = vector.shape_cast %23 : vector<32x32xf32> to vector<1x32x32xf32>
    %226 = vector.broadcast %225 : vector<1x32x32xf32> to vector<16x32x32xf32>
    %227 = arith.mulf %224, %226 : vector<16x32x32xf32>
    %228 = vector.shape_cast %227 : vector<16x32x32xf32> to vector<512x32xf32>
    %229 = arith.truncf %228 : vector<512x32xf32> to vector<512x32xbf16>
    %c0_101 = arith.constant 0 : index
    %c0_102 = arith.constant 0 : index
    %230 = vector.load %arg9[%c0_101, %c0_102] : memref<32x32xbf16, #tpu.memory_space<vmem>>, vector<32x32xbf16>
    %cst_103 = arith.constant dense<0.000000e+00> : vector<512x32xf32>
    %231 = tpu.matmul %229, %230, %cst_103 {dimension_numbers = #tpu.dot_dimension_numbers<[1], [0], [0], [1], [0, 0, 1, 1], [], []>} : vector<512x32xbf16>, vector<32x32xbf16>, vector<512x32xf32> -> vector<512x32xf32>
    %232 = vector.broadcast %219 : vector<512x1xf32> to vector<512x32xf32>
    %233 = arith.addf %231, %232 : vector<512x32xf32>
    %234 = vector.shape_cast %233 : vector<512x32xf32> to vector<16x32x32xf32>
    %cst_104 = arith.constant dense<0xFF800000> : vector<32x32xf32>
    %235 = vector.multi_reduction <maximumf>, %234, %cst_104 [0] : vector<16x32x32xf32> to vector<32x32xf32>
    %236 = vector.shape_cast %235 : vector<32x32xf32> to vector<1x32x32xf32>
    %237 = vector.broadcast %236 : vector<1x32x32xf32> to vector<16x32x32xf32>
    %238 = arith.subf %234, %237 : vector<16x32x32xf32>
    %239 = math.exp %238 : vector<16x32x32xf32>
    %cst_105 = arith.constant dense<0.000000e+00> : vector<32x32xf32>
    %240 = vector.multi_reduction <add>, %239, %cst_105 [0] : vector<16x32x32xf32> to vector<32x32xf32>
    %241 = vector.shape_cast %240 : vector<32x32xf32> to vector<1x32x32xf32>
    %242 = tpu.reciprocal %241 {approx = true} : vector<1x32x32xf32> -> vector<1x32x32xf32>
    %243 = vector.broadcast %242 : vector<1x32x32xf32> to vector<16x32x32xf32>
    %244 = arith.mulf %239, %243 : vector<16x32x32xf32>
    %245 = vector.shape_cast %223 : vector<512x32xf32> to vector<16x32x32xf32>
    %246 = arith.mulf %244, %245 : vector<16x32x32xf32>
    %cst_106 = arith.constant dense<0.000000e+00> : vector<32x32xf32>
    %247 = vector.multi_reduction <add>, %246, %cst_106 [0] : vector<16x32x32xf32> to vector<32x32xf32>
    %248 = arith.truncf %247 : vector<32x32xf32> to vector<32x32xbf16>
    %c0_107 = arith.constant 0 : index
    %c0_108 = arith.constant 0 : index
    %249 = vector.load %arg10[%c0_107, %c0_108] : memref<32x32xbf16, #tpu.memory_space<vmem>>, vector<32x32xbf16>
    %cst_109 = arith.constant dense<0.000000e+00> : vector<32x32xf32>
    %250 = tpu.matmul %248, %249, %cst_109 {dimension_numbers = #tpu.dot_dimension_numbers<[1], [0], [0], [1], [0, 0, 1, 1], [], []>} : vector<32x32xbf16>, vector<32x32xbf16>, vector<32x32xf32> -> vector<32x32xf32>
    %251 = vector.broadcast %3 : vector<1x32xf32> to vector<32x32xf32>
    %252 = arith.addf %250, %251 : vector<32x32xf32>
    %253 = vector.extract_strided_slice %0 {offsets = [6, 0], sizes = [1, 32], strides = [1, 1]} : vector<8x32xf32> to vector<1x32xf32>
    %254 = vector.extract_strided_slice %0 {offsets = [7, 0], sizes = [1, 32], strides = [1, 1]} : vector<8x32xf32> to vector<1x32xf32>
    %255 = arith.addf %15, %252 : vector<32x32xf32>
    %256 = vector.broadcast %253 : vector<1x32xf32> to vector<32x32xf32>
    %257 = arith.mulf %255, %256 : vector<32x32xf32>
    %258 = vector.broadcast %254 : vector<1x32xf32> to vector<32x32xf32>
    %259 = arith.addf %257, %258 : vector<32x32xf32>
    %260 = arith.truncf %259 : vector<32x32xf32> to vector<32x32xbf16>
    %c0_110 = arith.constant 0 : index
    %c0_111 = arith.constant 0 : index
    %261 = vector.load %arg11[%c0_110, %c0_111] : memref<32x64xbf16, #tpu.memory_space<vmem>>, vector<32x64xbf16>
    %cst_112 = arith.constant dense<0.000000e+00> : vector<32x64xf32>
    %262 = tpu.matmul %260, %261, %cst_112 {dimension_numbers = #tpu.dot_dimension_numbers<[1], [0], [0], [1], [0, 0, 1, 1], [], []>} : vector<32x32xbf16>, vector<32x64xbf16>, vector<32x64xf32> -> vector<32x64xf32>
    %c0_113 = arith.constant 0 : index
    %c0_114 = arith.constant 0 : index
    %263 = vector.load %arg15[%c0_113, %c0_114] : memref<1x64xf32, #tpu.memory_space<vmem>>, vector<1x64xf32>
    %264 = vector.broadcast %263 : vector<1x64xf32> to vector<32x64xf32>
    %265 = arith.addf %262, %264 : vector<32x64xf32>
    %cst_115 = arith.constant 0.000000e+00 : f32
    %266 = vector.broadcast %cst_115 : f32 to vector<32x64xf32>
    %267 = arith.maximumf %265, %266 : vector<32x64xf32>
    %268 = arith.truncf %267 : vector<32x64xf32> to vector<32x64xbf16>
    %c0_116 = arith.constant 0 : index
    %c0_117 = arith.constant 0 : index
    %269 = vector.load %arg12[%c0_116, %c0_117] : memref<64x32xbf16, #tpu.memory_space<vmem>>, vector<64x32xbf16>
    %cst_118 = arith.constant dense<0.000000e+00> : vector<32x32xf32>
    %270 = tpu.matmul %268, %269, %cst_118 {dimension_numbers = #tpu.dot_dimension_numbers<[1], [0], [0], [1], [0, 0, 1, 1], [], []>} : vector<32x64xbf16>, vector<64x32xbf16>, vector<32x32xf32> -> vector<32x32xf32>
    %271 = vector.broadcast %4 : vector<1x32xf32> to vector<32x32xf32>
    %272 = arith.addf %270, %271 : vector<32x32xf32>
    %273 = arith.addf %259, %272 : vector<32x32xf32>
    %274 = vector.broadcast %5 : vector<1x32xf32> to vector<32x32xf32>
    %275 = arith.mulf %273, %274 : vector<32x32xf32>
    %276 = vector.broadcast %6 : vector<1x32xf32> to vector<32x32xf32>
    %277 = arith.addf %275, %276 : vector<32x32xf32>
    %278 = arith.truncf %277 : vector<32x32xf32> to vector<32x32xbf16>
    %c0_119 = arith.constant 0 : index
    %c0_120 = arith.constant 0 : index
    %279 = vector.load %arg13[%c0_119, %c0_120] : memref<32x32xbf16, #tpu.memory_space<vmem>>, vector<32x32xbf16>
    %cst_121 = arith.constant dense<0.000000e+00> : vector<32x32xf32>
    %280 = tpu.matmul %278, %279, %cst_121 {dimension_numbers = #tpu.dot_dimension_numbers<[1], [0], [0], [1], [0, 0, 1, 1], [], []>} : vector<32x32xbf16>, vector<32x32xbf16>, vector<32x32xf32> -> vector<32x32xf32>
    %c0_122 = arith.constant 0 : index
    %c0_123 = arith.constant 0 : index
    %281 = vector.load %arg16[%c0_122, %c0_123] : memref<1x32xf32, #tpu.memory_space<vmem>>, vector<1x32xf32>
    %282 = vector.broadcast %281 : vector<1x32xf32> to vector<32x32xf32>
    %283 = arith.addf %280, %282 : vector<32x32xf32>
    %cst_124 = arith.constant 0.000000e+00 : f32
    %284 = vector.broadcast %cst_124 : f32 to vector<32x32xf32>
    %285 = arith.maximumf %283, %284 : vector<32x32xf32>
    %c0_125 = arith.constant 0 : index
    %c0_126 = arith.constant 0 : index
    %286 = vector.load %arg17[%c0_125, %c0_126] : memref<32x32xf32, #tpu.memory_space<vmem>>, vector<32x32xf32>
    tpu.vector_store %arg17[%c0_125, %c0_126], %285 {strides = array<i32>} : memref<32x32xf32, #tpu.memory_space<vmem>>, vector<32x32xf32>,
    return
  }
  func.func @transform_0(%arg0: i32) -> (i32, i32) {
    %c0_i32 = arith.constant 0 : i32
    %c0_i32_0 = arith.constant 0 : i32
    return %arg0, %c0_i32 : i32, i32
  }
  func.func @transform_1(%arg0: i32) -> (i32, i32) {
    %c0_i32 = arith.constant 0 : i32
    %c0_i32_0 = arith.constant 0 : i32
    return %arg0, %c0_i32 : i32, i32
  }
  func.func @transform_2(%arg0: i32) -> (i32, i32) {
    %c0_i32 = arith.constant 0 : i32
    %c0_i32_0 = arith.constant 0 : i32
    return %arg0, %c0_i32 : i32, i32
  }
  func.func @transform_3(%arg0: i32) -> (i32, i32) {
    %c0_i32 = arith.constant 0 : i32
    %c0_i32_0 = arith.constant 0 : i32
    return %arg0, %c0_i32 : i32, i32
  }
  func.func @transform_4(%arg0: i32) -> (i32, i32) {
    %c0_i32 = arith.constant 0 : i32
    %c0_i32_0 = arith.constant 0 : i32
    %c0_i32_1 = arith.constant 0 : i32
    return %c0_i32, %c0_i32_0 : i32, i32
  }
  func.func @transform_5(%arg0: i32) -> (i32, i32) {
    %c0_i32 = arith.constant 0 : i32
    %c0_i32_0 = arith.constant 0 : i32
    %c0_i32_1 = arith.constant 0 : i32
    return %c0_i32, %c0_i32_0 : i32, i32
  }
  func.func @transform_6(%arg0: i32) -> (i32, i32) {
    %c0_i32 = arith.constant 0 : i32
    %c0_i32_0 = arith.constant 0 : i32
    %c0_i32_1 = arith.constant 0 : i32
    return %c0_i32, %c0_i32_0 : i32, i32
  }
  func.func @transform_7(%arg0: i32) -> (i32, i32) {
    %c0_i32 = arith.constant 0 : i32
    %c0_i32_0 = arith.constant 0 : i32
    %c0_i32_1 = arith.constant 0 : i32
    return %c0_i32, %c0_i32_0 : i32, i32
  }
  func.func @transform_8(%arg0: i32) -> (i32, i32) {
    %c0_i32 = arith.constant 0 : i32
    %c0_i32_0 = arith.constant 0 : i32
    %c0_i32_1 = arith.constant 0 : i32
    return %c0_i32, %c0_i32_0 : i32, i32
  }
  func.func @transform_9(%arg0: i32) -> (i32, i32) {
    %c0_i32 = arith.constant 0 : i32
    %c0_i32_0 = arith.constant 0 : i32
    %c0_i32_1 = arith.constant 0 : i32
    return %c0_i32, %c0_i32_0 : i32, i32
  }
  func.func @transform_10(%arg0: i32) -> (i32, i32) {
    %c0_i32 = arith.constant 0 : i32
    %c0_i32_0 = arith.constant 0 : i32
    %c0_i32_1 = arith.constant 0 : i32
    return %c0_i32, %c0_i32_0 : i32, i32
  }
  func.func @transform_11(%arg0: i32) -> (i32, i32) {
    %c0_i32 = arith.constant 0 : i32
    %c0_i32_0 = arith.constant 0 : i32
    %c0_i32_1 = arith.constant 0 : i32
    return %c0_i32, %c0_i32_0 : i32, i32
  }
  func.func @transform_12(%arg0: i32) -> (i32, i32) {
    %c0_i32 = arith.constant 0 : i32
    %c0_i32_0 = arith.constant 0 : i32
    %c0_i32_1 = arith.constant 0 : i32
    return %c0_i32, %c0_i32_0 : i32, i32
  }
  func.func @transform_13(%arg0: i32) -> (i32, i32) {
    %c0_i32 = arith.constant 0 : i32
    %c0_i32_0 = arith.constant 0 : i32
    %c0_i32_1 = arith.constant 0 : i32
    return %c0_i32, %c0_i32_0 : i32, i32
  }
  func.func @transform_14(%arg0: i32) -> (i32, i32) {
    %c0_i32 = arith.constant 0 : i32
    %c0_i32_0 = arith.constant 0 : i32
    %c0_i32_1 = arith.constant 0 : i32
    return %c0_i32, %c0_i32_0 : i32, i32
  }
  func.func @transform_15(%arg0: i32) -> (i32, i32) {
    %c0_i32 = arith.constant 0 : i32
    %c0_i32_0 = arith.constant 0 : i32
    %c0_i32_1 = arith.constant 0 : i32
    return %c0_i32, %c0_i32_0 : i32, i32
  }
  func.func @transform_16(%arg0: i32) -> (i32, i32) {
    %c0_i32 = arith.constant 0 : i32
    %c0_i32_0 = arith.constant 0 : i32
    return %arg0, %c0_i32 : i32, i32
  }
}

</mosaic_0001>

<bundles_post_ra>
// kernel: run_model.4
= control target key start
LH: loop header
LB: loop body
LE: loop exit
PB: predicated region body
PF: predicated region fallthrough
CT: control target
= control target key end

     0   :  { %s374_s12 = smov 0   ;;  %s397_s0 = inlined_call_operand.vmem [shape: f32[64,8], index: 0, kind: input, shape index: {}]   ;;  %s398_s1 = inlined_call_operand.vmem [shape: bf16[8,16], index: 1, kind: input, shape index: {}]   ;;  %s399_s2 = inlined_call_operand.vmem [shape: f32[1,16], index: 2, kind: input, shape index: {}]   ;;  %s400_s3 = inlined_call_operand.vmem [shape: f32[64,16], index: 3, kind: output, shape index: {}]  }
   0x1 LB: > { %s314_s13 = sadd.s32 4294967295, %s352_s12   ;;  %p318_p0 = scmp.ge.s32.totalorder %s352_s12, 1  ;;  %s352_s12 = sphi %s374_s12, %s13_s12  }
   0x2   : > { %p138_p1 = scmp.lt.s32.totalorder %s352_s12, 3 }
   0x4   : > { %p139_p2 = pnand %p318_p0, %p138_p1 }
   0x5   : > { %v181_v0 = vld [vmem:[%s398_s1] sm:$0xf] (!%p139_p2)  ;;  %vm196_vm0 = vcmask (!%p139_p2), 1043456   ;;  %s319_s16 = sshll.u32 (!%p139_p2), %s314_s13, 2  ;;  %vm189_vm1 = vcmask (!%p139_p2), 64512   ;;  %vm253_vm2 = vcmask (!%p139_p2), 130048  }
   0x6   : > { %142 = sbr.rel (%p139_p2) target bundleno = 240 (0xf0), region = 32  ;;  %337 = vmatprep.subr.msk.bf16.mxu0 (!%p139_p2), %vm196_vm0, %v181_v0  ;;  %v198_v1 = vsel (!%p139_p2), %vm196_vm0, %v181_v0, 0  ;;  %p163_p3 = scmp.lt.s32.totalorder (!%p139_p2), %s319_s16, 7  ;;  %v323_v8 = vld [vmem:[%s399_s2] ss:$0 sm:$0xff] (!%p139_p2) }
   0x7   : > { %332 = vmatpush3.bf16.msra.mxu0 (!%p139_p2), %v198_v1 }
   0xd   : > { %s402_s16 = smov (!%p163_p3, %s319_s16), 7 }
   0xe   : > { %s320_s17 = sshll.u32 %s402_s16, 3 }
   0xf   : > { %s166_s20 = scalar_lea.vmem %s397_s0, %s320_s17  ;;  %s172_s25 = scalar_lea.vmem %s400_s3, %s320_s17 }
  0x10   : > { %v175_v2 = vld [vmem:[%s166_s20] sm:$0xff]  ;;  %v176_v3 = vld [vmem:[%s166_s20 + $0x8] sm:$0xff]  ;;  %v177_v4 = vld [vmem:[%s166_s20 + $0x10] sm:$0xff] }
  0x11   : > { %v179_v5 = vpack.c.bf16 %v176_v3, %v175_v2  ;;  %v178_v6 = vld [vmem:[%s166_s20 + $0x18] sm:$0xff] }
  0x12   : > { %v180_v7 = vpack.c.bf16 %v178_v6, %v177_v4 }
  0x13   : > { %333 = vmatprep.mubr.msk.bf16.mxu0 %vm189_vm1, %v179_v5 }
  0x14   : > { %334 = vmatmul.mubr.msk.bf16.vlgmr.msra.gmra.mrb[0].mxu0 %vm189_vm1, %v180_v7 }
  0xe7   : > { %v335_v9 = vpop.f32.mrb[0].mxu0 }
  0xe8   : > { %v234_v10 = vpop.f32.mrb[1].mxu0  ;;  %v243_v13 = vadd.f32 %v335_v9, %v323_v8 }
  0xe9   : > { %v235_v11 = vadd.f32 %v323_v8, %v234_v10  ;;  %v336_v12 = vpop.f32.mrb[2].mxu0 }
  0xea   : > { %v237_v14 = vpop.f32.mrb[3].mxu0  ;;  %v246_v16 = vadd.f32 %v336_v12, %v323_v8  ;;  %v251_v19 = vmax.f32 %v243_v13, 0.0 }
  0xeb   : > { %v249_v15 = vmax.f32 %v235_v11, 0.0  ;;  %v238_v17 = vadd.f32 %v323_v8, %v237_v14 }
  0xec   : > { %v252_v20 = vmax.f32 %v246_v16, 0.0  ;;  %256 = vst.msk [vmem:[%s172_s25 + $0x10] sm:$0xff] %vm253_vm2, %v251_v19 }
  0xed   : > { %254 = vst.msk [vmem:[%s172_s25] sm:$0xff] %vm253_vm2, %v249_v15  ;;  %v250_v18 = vmax.f32 %v238_v17, 0.0 }
  0xee   : > { %257 = vst.msk [vmem:[%s172_s25 + $0x18] sm:$0xff] %vm253_vm2, %v252_v20 }
  0xef   : > { %255 = vst.msk [vmem:[%s172_s25 + $0x8] sm:$0xff] %vm253_vm2, %v250_v18 }
  0xf0 PF: > { %s13_s12 = sadd.s32 1, %s352_s12  }
  0xf1   : > { %p10_p4 = scmp.ge.s32.totalorder %s13_s12, 4  }
  0xf3   :  { %12 = sbr.rel (!%p10_p4) target bundleno = 1 (0x1), region = 62 }

// kernel: run_model.5
= control target key start
LH: loop header
LB: loop body
LE: loop exit
PB: predicated region body
PF: predicated region fallthrough
CT: control target
= control target key end

     0   :  { %vm70_vm0 = vcmask 1043456   ;;  %v3972_v0 = vmov 0   ;;  %vm63_vm1 = vcmask 64512   ;;  %v3973_v13 = vmov 1   ;;  %s6335_s5 = inlined_call_operand.vmem [shape: bf16[8,16], index: 5, kind: input, shape index: {}]   ;;  %s6336_s1 = inlined_call_operand.vmem [shape: s32[32,16], index: 1, kind: input, shape index: {}]   ;;  %s6337_s0 = inlined_call_operand.vmem [shape: f32[32,8], index: 0, kind: input, shape index: {}]   ;;  %s6338_s3 = inlined_call_operand.vmem [shape: bf16[64,16], index: 3, kind: input, shape index: {}]   ;;  %s6339_s6 = inlined_call_operand.vmem [shape: bf16[16,16], index: 6, kind: input, shape index: {}]   ;;  %s6340_s4 = inlined_call_operand.vmem [shape: bf16[64,16], index: 4, kind: input, shape index: {}]   ;;  %s6341_s12 = inlined_call_operand.vmem [shape: f32[8,16], index: 12, kind: input, shape index: {}]   ;;  %s6342_s7 = inlined_call_operand.vmem [shape: bf16[16,16], index: 7, kind: input, shape index: {}]   ;;  %s6343_s2 = inlined_call_operand.vmem [shape: s32[32,1], index: 2, kind: input, shape index: {}]   ;;  %s6344_s8 = inlined_call_operand.vmem [shape: bf16[16,16], index: 8, kind: input, shape index: {}]   ;;  %s6345_s9 = inlined_call_operand.vmem [shape: bf16[16,32], index: 9, kind: input, shape index: {}]   ;;  %s6346_s10 = inlined_call_operand.vmem [shape: bf16[32,16], index: 10, kind: input, shape index: {}]   ;;  %s6347_s13 = inlined_call_operand.vmem [shape: f32[1,32], index: 13, kind: input, shape index: {}]   ;;  %s6348_s11 = inlined_call_operand.vmem [shape: bf16[16,32], index: 11, kind: input, shape index: {}]   ;;  %s6349_s14 = inlined_call_operand.vmem [shape: f32[1,32], index: 14, kind: input, shape index: {}]   ;;  %s6350_s15 = inlined_call_operand.vmem [shape: f32[32,32], index: 15, kind: output, shape index: {}]  }
   0x1   :  { %3787 = vset.pattern.permute.xlu1 %v3972_v0  ;;  %v58_v1 = vld [vmem:[%s6335_s5] sm:$0xf]  ;;  %v4077_v2 = vld [vmem:[%s6336_s1 + $0x10] sm:$0xff]  ;;  %3786 = vset.pattern.permute.xlu0 %v3972_v0  ;;  %v53_v5 = vld [vmem:[%s6337_s0 + $0x8] sm:$0xff]  ;;  %v3974_v15 = vmov 2   ;;  %v3975_v18 = vmov 3   ;;  %v59_v33 = vlaneseq }
   0x2   :  { %v52_v3 = vld [vmem:[%s6337_s0] sm:$0xff]  ;;  %3767 = vmatprep.subr.msk.bf16.mxu0 %vm70_vm0, %v58_v1  ;;  %218 = vperm.xlu1 %3787, %v4077_v2   ;;  %v72_v4 = vsel %vm70_vm0, %v58_v1, 0  ;;  %v54_v6 = vld [vmem:[%s6337_s0 + $0x10] sm:$0xff]  ;;  %v4093_v8 = vld [vmem:[%s6336_s1 + $0x18] sm:$0xff]  ;;  %v3976_v20 = vmov 4   ;;  %v3977_v21 = vmov 5  }
   0x3   :  { %3512 = vmatpush3.bf16.msra.mxu0 %v72_v4  ;;  %v56_v7 = vpack.c.bf16 %v53_v5, %v52_v3  ;;  %v55_v9 = vld [vmem:[%s6337_s0 + $0x18] sm:$0xff]  ;;  %v4101_v10 = vld [vmem:[%s6336_s1] sm:$0xff]  ;;  %v4108_v12 = vld [vmem:[%s6336_s1 + $0x8] sm:$0xff]  ;;  %v3978_v22 = vmov 6   ;;  %v3979_v23 = vmov 7   ;;  %v3980_v24 = vmov 8  }
   0x4   :  { %v57_v11 = vpack.c.bf16 %v55_v9, %v54_v6  ;;  %212 = vperm.xlu0 %3786, %v4101_v10   ;;  %v4117_v14 = vld [vmem:[%s6338_s3] sm:$0xff]   ;;  %v4126_v16 = vld [vmem:[%s6338_s3 + $0x8] sm:$0xff]   ;;  %v4135_v17 = vld [vmem:[%s6338_s3 + $0x10] sm:$0xff]   ;;  %v3981_v25 = vmov 9   ;;  %v3982_v26 = vmov 10   ;;  %v3983_v27 = vmov 11  }
   0x5   :  { %3513 = vmatprep.mubr.msk.bf16.mxu0 %vm63_vm1, %v56_v7  ;;  %3523 = vmatprep.subr.bf16.mxu0 %v4117_v14  ;;  %v4144_v19 = vld [vmem:[%s6338_s3 + $0x18] sm:$0xff]   ;;  %v3984_v28 = vmov 12   ;;  %v3824_v29 = vld [vmem:[%s6339_s6] sm:$0xff]   ;;  %v3985_v30 = vmov 13   ;;  %v3986_v31 = vmov 14   ;;  %v3987_v32 = vmov 15  }
   0x6   :  { %221 = vperm.xlu1 %3787, %v4093_v8   ;;  %3514 = vmatmul.mubr.msk.bf16.vlgmr.msra.gmra.mrb[0].mxu0 %vm63_vm1, %v57_v11  ;;  %v4197_v34 = vand.u32 127, %v59_v33  ;;  %v3988_v38 = vmov 0.0   ;;  %vm723_vm6 = vcmask 523264  }
   0x7   :  { %3524 = vmatpush3.bf16.msra.mxu0 %v4117_v14  ;;  %3517 = vmatprep.subr.bf16.mxu1 %v3824_v29 }
   0x8   :  { %215 = vperm.xlu0 %3786, %v4108_v12   ;;  %3525 = vmatprep.subr.bf16.mxu0 %v4126_v16 }
   0x9   :  { %3518 = vmatpush3.bf16.msra.mxu1 %v3824_v29 }
   0xa   :  { %3789 = vset.pattern.permute.xlu1 %v3973_v13  ;;  %3759 = vmatprep.subr.bf16.mxu1 %v4117_v14 }
   0xb   :  { %245 = vperm.xlu1 %3789, %v4108_v12   ;;  %3526 = vmatpush3.bf16.msra.mxu0 %v4126_v16 }
   0xc   :  { %3788 = vset.pattern.permute.xlu0 %v3973_v13  ;;  %3527 = vmatprep.subr.bf16.mxu0 %v4135_v17 }
   0xd   :  { %242 = vperm.xlu0 %3788, %v4101_v10  }
   0xf   :  { %248 = vperm.xlu1 %3789, %v4077_v2   ;;  %3528 = vmatpush3.bf16.msra.mxu0 %v4135_v17 }
  0x10   :  { %3529 = vmatprep.subr.bf16.mxu0 %v4144_v19 }
  0x11   :  { %251 = vperm.xlu0 %3788, %v4093_v8  }
  0x13   :  { %3790 = vset.pattern.permute.xlu1 %v3974_v15  ;;  %3530 = vmatpush3.bf16.msra.mxu0 %v4144_v19 }
  0x14   :  { %272 = vperm.xlu1 %3790, %v4101_v10  }
  0x15   :  { %3791 = vset.pattern.permute.xlu0 %v3974_v15 }
  0x16   :  { %275 = vperm.xlu0 %3791, %v4108_v12  }
  0x18   :  { %278 = vperm.xlu1 %3790, %v4077_v2  }
  0x1a   :  { %3792 = vset.pattern.permute.xlu0 %v3975_v18 }
  0x1b   :  { %302 = vperm.xlu0 %3792, %v4101_v10  }
  0x1c   :  { %281 = vperm.xlu1 %3790, %v4093_v8  }
  0x1f   :  { %311 = vperm.xlu0 %3792, %v4093_v8  }
  0x20   :  { %3793 = vset.pattern.permute.xlu1 %v3975_v18 }
  0x21   :  { %305 = vperm.xlu1 %3793, %v4108_v12  }
  0x23   :  { %3795 = vset.pattern.permute.xlu0 %v3976_v20 }
  0x24   :  { %335 = vperm.xlu0 %3795, %v4108_v12  }
  0x25   :  { %308 = vperm.xlu1 %3793, %v4077_v2  }
  0x28   :  { %3796 = vset.pattern.permute.xlu0 %v3977_v21 }
  0x29   :  { %3794 = vset.pattern.permute.xlu1 %v3976_v20  ;;  %362 = vperm.xlu0 %3796, %v4101_v10  }
  0x2a   :  { %332 = vperm.xlu1 %3794, %v4101_v10  }
  0x2d   :  { %371 = vperm.xlu0 %3796, %v4093_v8  }
  0x2e   :  { %338 = vperm.xlu1 %3794, %v4077_v2  }
  0x31   :  { %3799 = vset.pattern.permute.xlu0 %v3978_v22 }
  0x32   :  { %341 = vperm.xlu1 %3794, %v4093_v8   ;;  %395 = vperm.xlu0 %3799, %v4108_v12  }
  0x36   :  { %3797 = vset.pattern.permute.xlu1 %v3977_v21  ;;  %3800 = vset.pattern.permute.xlu0 %v3979_v23 }
  0x37   :  { %365 = vperm.xlu1 %3797, %v4108_v12   ;;  %422 = vperm.xlu0 %3800, %v4101_v10  }
  0x3b   :  { %368 = vperm.xlu1 %3797, %v4077_v2   ;;  %431 = vperm.xlu0 %3800, %v4093_v8  }
  0x3f   :  { %3798 = vset.pattern.permute.xlu1 %v3978_v22  ;;  %3803 = vset.pattern.permute.xlu0 %v3980_v24 }
  0x40   :  { %392 = vperm.xlu1 %3798, %v4101_v10   ;;  %455 = vperm.xlu0 %3803, %v4108_v12  }
  0x44   :  { %398 = vperm.xlu1 %3798, %v4077_v2   ;;  %3804 = vset.pattern.permute.xlu0 %v3981_v25 }
  0x45   :  { %482 = vperm.xlu0 %3804, %v4101_v10  }
  0x48   :  { %401 = vperm.xlu1 %3798, %v4093_v8  }
  0x49   :  { %491 = vperm.xlu0 %3804, %v4093_v8  }
  0x4c   :  { %3801 = vset.pattern.permute.xlu1 %v3979_v23 }
  0x4d   :  { %425 = vperm.xlu1 %3801, %v4108_v12   ;;  %3807 = vset.pattern.permute.xlu0 %v3982_v26 }
  0x4e   :  { %515 = vperm.xlu0 %3807, %v4108_v12  }
  0x51   :  { %428 = vperm.xlu1 %3801, %v4077_v2  }
  0x52   :  { %3808 = vset.pattern.permute.xlu0 %v3983_v27 }
  0x53   :  { %542 = vperm.xlu0 %3808, %v4101_v10  }
  0x55   :  { %3802 = vset.pattern.permute.xlu1 %v3980_v24 }
  0x56   :  { %452 = vperm.xlu1 %3802, %v4101_v10  }
  0x57   :  { %551 = vperm.xlu0 %3808, %v4093_v8  }
  0x5a   :  { %458 = vperm.xlu1 %3802, %v4077_v2  }
  0x5b   :  { %3811 = vset.pattern.permute.xlu0 %v3984_v28 }
  0x5c   :  { %575 = vperm.xlu0 %3811, %v4108_v12  }
  0x5e   :  { %461 = vperm.xlu1 %3802, %v4093_v8  }
  0x60   :  { %3812 = vset.pattern.permute.xlu0 %v3985_v30 }
  0x61   :  { %602 = vperm.xlu0 %3812, %v4101_v10  }
  0x62   :  { %3805 = vset.pattern.permute.xlu1 %v3981_v25 }
  0x63   :  { %485 = vperm.xlu1 %3805, %v4108_v12  }
  0x65   :  { %611 = vperm.xlu0 %3812, %v4093_v8  }
  0x67   :  { %488 = vperm.xlu1 %3805, %v4077_v2  }
  0x69   :  { %3815 = vset.pattern.permute.xlu0 %v3986_v31 }
  0x6a   :  { %635 = vperm.xlu0 %3815, %v4108_v12  }
  0x6b   :  { %3806 = vset.pattern.permute.xlu1 %v3982_v26 }
  0x6c   :  { %512 = vperm.xlu1 %3806, %v4101_v10  }
  0x6e   :  { %3816 = vset.pattern.permute.xlu0 %v3987_v32 }
  0x6f   :  { %662 = vperm.xlu0 %3816, %v4101_v10  }
  0x70   :  { %518 = vperm.xlu1 %3806, %v4077_v2  }
  0x73   :  { %671 = vperm.xlu0 %3816, %v4093_v8  }
  0x74   :  { %521 = vperm.xlu1 %3806, %v4093_v8  }
  0x77   :  { %3819 = vset.pattern.permute.xlu0 %v3972_v0 }
  0x78   :  { %3809 = vset.pattern.permute.xlu1 %v3983_v27 }
  0x79   :  { %545 = vperm.xlu1 %3809, %v4108_v12  }
  0x7d   :  { %548 = vperm.xlu1 %3809, %v4077_v2  }
  0x81   :  { %3810 = vset.pattern.permute.xlu1 %v3984_v28  ;;  %v219_v35 = vpop.permute.xlu1 %218 }
  0x82   :  { %572 = vperm.xlu1 %3810, %v4101_v10   ;;  %vm225_vm2 = vcmp.eq.s32.totalorder %v219_v35, %v4197_v34 }
  0x83   :  { %v213_v36 = vpop.permute.xlu0 %212  ;;  %v229_v39 = vsel %vm225_vm2, 1.0, %v3988_v38 }
  0x84   :  { %vm223_vm3 = vcmp.eq.s32.totalorder %v213_v36, %v4197_v34 }
  0x85   :  { %v222_v37 = vpop.permute.xlu1 %221  ;;  %v227_v41 = vsel %vm223_vm3, 1.0, %v3988_v38 }
  0x86   :  { %578 = vperm.xlu1 %3810, %v4077_v2   ;;  %vm226_vm4 = vcmp.eq.s32.totalorder %v222_v37, %v4197_v34 }
  0x87   :  { %v230_v40 = vsel %vm226_vm4, 1.0, %v3988_v38  ;;  %v216_v42 = vpop.permute.xlu0 %215 }
  0x88   :  { %vm224_vm5 = vcmp.eq.s32.totalorder %v216_v42, %v4197_v34  ;;  %v4208_v43 = vpack.c.bf16 %v230_v40, %v229_v39 }
  0x89   :  { %v228_v44 = vsel %vm224_vm5, 1.0, %v3988_v38 }
  0x8a   :  { %581 = vperm.xlu1 %3810, %v4093_v8   ;;  %v246_v45 = vpop.permute.xlu1 %245  ;;  %v4212_v46 = vpack.c.bf16 %v228_v44, %v227_v41 }
  0x8b   :  { %vm254_vm7 = vcmp.eq.s32.totalorder %v246_v45, %v4197_v34 }
  0x8c   :  { %v258_v47 = vsel %vm254_vm7, 1.0, %v3988_v38  ;;  %v243_v48 = vpop.permute.xlu0 %242  ;;  %3531 = vmatprep.mubr.msk.bf16.mxu0 %vm723_vm6, %v4212_v46 }
  0x8d   :  { %vm253_vm8 = vcmp.eq.s32.totalorder %v243_v48, %v4197_v34  ;;  %3532 = vmatmul.mubr.msk.bf16.vlgmr.msra.gmra.mrb[4].mxu0 %vm723_vm6, %v4208_v43 }
  0x8e   :  { %3813 = vset.pattern.permute.xlu1 %v3985_v30  ;;  %v249_v49 = vpop.permute.xlu1 %248  ;;  %v257_v50 = vsel %vm253_vm8, 1.0, %v3988_v38 }
  0x8f   :  { %605 = vperm.xlu1 %3813, %v4108_v12   ;;  %vm255_vm9 = vcmp.eq.s32.totalorder %v249_v49, %v4197_v34  ;;  %v4224_v51 = vpack.c.bf16 %v258_v47, %v257_v50 }
  0x90   :  { %v259_v52 = vsel %vm255_vm9, 1.0, %v3988_v38  ;;  %v252_v53 = vpop.permute.xlu0 %251 }
  0x91   :  { %vm256_vm10 = vcmp.eq.s32.totalorder %v252_v53, %v4197_v34  ;;  %3535 = vmatprep.mubr.msk.bf16.mxu0 %vm723_vm6, %v4224_v51 }
  0x92   :  { %v260_v54 = vsel %vm256_vm10, 1.0, %v3988_v38 }
  0x93   :  { %608 = vperm.xlu1 %3813, %v4077_v2   ;;  %v273_v55 = vpop.permute.xlu1 %272  ;;  %v4232_v56 = vpack.c.bf16 %v260_v54, %v259_v52 }
  0x94   :  { %vm283_vm11 = vcmp.eq.s32.totalorder %v273_v55, %v4197_v34 }
  0x95   :  { %v287_v57 = vsel %vm283_vm11, 1.0, %v3988_v38  ;;  %3536 = vmatmul.mubr.msk.bf16.gmra.mrb[8].mxu0 %vm723_vm6, %v4232_v56  ;;  %v276_v58 = vpop.permute.xlu0 %275 }
  0x96   :  { %vm284_vm12 = vcmp.eq.s32.totalorder %v276_v58, %v4197_v34  ;;  %v4330_v58 = vshrl.u32 %v59_v33, 7  ;;  %v4346_v33 = vld [vmem:[%s6341_s12] sm:$0xff] }
  0x97   :  { %3814 = vset.pattern.permute.xlu1 %v3986_v31  ;;  %v279_v59 = vpop.permute.xlu1 %278  ;;  %v288_v60 = vsel %vm284_vm12, 1.0, %v3988_v38 }
  0x98   :  { %632 = vperm.xlu1 %3814, %v4101_v10   ;;  %vm285_vm13 = vcmp.eq.s32.totalorder %v279_v59, %v4197_v34  ;;  %v4243_v61 = vpack.c.bf16 %v288_v60, %v287_v57  ;;  %6399 = vst [vmem:[#allocation2_spill] sm:$0xff] %v4330_v58 }
  0x99   :  { %v289_v63 = vsel %vm285_vm13, 1.0, %v3988_v38 }
  0x9a   :  { %v303_v62 = vpop.permute.xlu0 %302  ;;  %3539 = vmatprep.mubr.msk.bf16.mxu0 %vm723_vm6, %v4243_v61 }
  0x9b   :  { %v282_v1 = vpop.permute.xlu1 %281  ;;  %vm313_vm15 = vcmp.eq.s32.totalorder %v303_v62, %v4197_v34 }
  0x9c   :  { %638 = vperm.xlu1 %3814, %v4077_v2   ;;  %vm286_vm14 = vcmp.eq.s32.totalorder %v282_v1, %v4197_v34  ;;  %v317_v7 = vsel %vm313_vm15, 1.0, %v3988_v38 }
  0x9d   :  { %v290_v3 = vsel %vm286_vm14, 1.0, %v3988_v38 }
  0x9e   :  { %v4252_v4 = vpack.c.bf16 %v290_v3, %v289_v63  ;;  %v312_v5 = vpop.permute.xlu0 %311  ;;  %v61_v3 = vsub.s32 0, %v4330_v58 }
  0x9f   :  { %vm316_vm0 = vcmp.eq.s32.totalorder %v312_v5, %v4197_v34 }
  0xa0   :  { %641 = vperm.xlu1 %3814, %v4093_v8   ;;  %v306_v6 = vpop.permute.xlu1 %305  ;;  %3540 = vmatmul.mubr.msk.bf16.gmra.mrb[12].mxu0 %vm723_vm6, %v4252_v4  ;;  %v320_v11 = vsel %vm316_vm0, 1.0, %v3988_v38 }
  0xa1   :  { %vm314_vm1 = vcmp.eq.s32.totalorder %v306_v6, %v4197_v34 }
  0xa2   :  { %v318_v9 = vsel %vm314_vm1, 1.0, %v3988_v38 }
  0xa3   :  { %v4261_v10 = vpack.c.bf16 %v318_v9, %v317_v7  ;;  %v336_v13 = vpop.permute.xlu0 %335  ;;  %v62_v9 = vrot.slane %v4346_v33, %v61_v3  ;;  %v3829_v3 = vld [vmem:[%s6342_s7] sm:$0xff]  }
  0xa4   :  { %3817 = vset.pattern.permute.xlu1 %v3987_v32  ;;  %v309_v8 = vpop.permute.xlu1 %308  ;;  %vm344_vm3 = vcmp.eq.s32.totalorder %v336_v13, %v4197_v34  ;;  %3667 = vmatprep.subr.bf16.mxu0 %v3829_v3 }
  0xa5   :  { %665 = vperm.xlu1 %3817, %v4108_v12   ;;  %vm315_vm2 = vcmp.eq.s32.totalorder %v309_v8, %v4197_v34  ;;  %3543 = vmatprep.mubr.msk.bf16.mxu0 %vm723_vm6, %v4261_v10  ;;  %v348_v21 = vsel %vm344_vm3, 1.0, %v3988_v38 }
  0xa6   :  { %v319_v15 = vsel %vm315_vm2, 1.0, %v3988_v38  ;;  %3668 = vmatpush3.bf16.msra.mxu0 %v3829_v3 }
  0xa7   :  { %v4271_v18 = vpack.c.bf16 %v320_v11, %v319_v15 }
  0xa8   :  { %v363_v24 = vpop.permute.xlu0 %362 }
  0xa9   :  { %668 = vperm.xlu1 %3817, %v4077_v2   ;;  %v333_v20 = vpop.permute.xlu1 %332  ;;  %3544 = vmatmul.mubr.msk.bf16.gmra.mrb[16].mxu0 %vm723_vm6, %v4271_v18  ;;  %vm373_vm8 = vcmp.eq.s32.totalorder %v363_v24, %v4197_v34 }
  0xaa   :  { %vm343_vm4 = vcmp.eq.s32.totalorder %v333_v20, %v4197_v34 }
  0xab   :  { %v347_v12 = vsel %vm343_vm4, 1.0, %v3988_v38 }
  0xac   :  { %v4279_v22 = vpack.c.bf16 %v348_v21, %v347_v12  ;;  %v372_v28 = vpop.permute.xlu0 %371 }
  0xad   :  { %v339_v23 = vpop.permute.xlu1 %338  ;;  %3818 = vset.pattern.permute.xlu1 %v3972_v0  ;;  %v377_v0 = vsel %vm373_vm8, 1.0, %v3988_v38  ;;  %vm376_vm10 = vcmp.eq.s32.totalorder %v372_v28, %v4197_v34 }
  0xae   :  { %vm345_vm5 = vcmp.eq.s32.totalorder %v339_v23, %v4197_v34  ;;  %3547 = vmatprep.mubr.msk.bf16.mxu0 %vm723_vm6, %v4279_v22  ;;  %v380_v36 = vsel %vm376_vm10, 1.0, %v3988_v38  ;;  %vm141_vm10 = vcmask 130048  }
  0xaf   :  { %v349_v2 = vsel %vm345_vm5, 1.0, %v3988_v38 }
  0xb1   :  { %v342_v25 = vpop.permute.xlu1 %341  ;;  %v396_v32 = vpop.permute.xlu0 %395 }
  0xb2   :  { %vm346_vm7 = vcmp.eq.s32.totalorder %v342_v25, %v4197_v34  ;;  %vm404_vm12 = vcmp.eq.s32.totalorder %v396_v32, %v4197_v34 }
  0xb3   :  { %v350_v26 = vsel %vm346_vm7, 1.0, %v3988_v38  ;;  %v408_v41 = vsel %vm404_vm12, 1.0, %v3988_v38 }
  0xb4   :  { %v4289_v27 = vpack.c.bf16 %v350_v26, %v349_v2 }
  0xb6   :  { %v366_v29 = vpop.permute.xlu1 %365  ;;  %3548 = vmatmul.mubr.msk.bf16.gmra.mrb[20].mxu0 %vm723_vm6, %v4289_v27  ;;  %v423_v47 = vpop.permute.xlu0 %422 }
  0xb7   :  { %vm374_vm9 = vcmp.eq.s32.totalorder %v366_v29, %v4197_v34  ;;  %vm433_vm0 = vcmp.eq.s32.totalorder %v423_v47, %v4197_v34 }
  0xb8   :  { %v378_v30 = vsel %vm374_vm9, 1.0, %v3988_v38  ;;  %v437_v55 = vsel %vm433_vm0, 1.0, %v3988_v38 }
  0xb9   :  { %v4297_v31 = vpack.c.bf16 %v378_v30, %v377_v0 }
  0xba   :  { %v369_v35 = vpop.permute.xlu1 %368  ;;  %v432_v53 = vpop.permute.xlu0 %431 }
  0xbb   :  { %vm375_vm11 = vcmp.eq.s32.totalorder %v369_v35, %v4197_v34  ;;  %3551 = vmatprep.mubr.msk.bf16.mxu0 %vm723_vm6, %v4297_v31  ;;  %vm436_vm2 = vcmp.eq.s32.totalorder %v432_v53, %v4197_v34 }
  0xbc   :  { %v379_v37 = vsel %vm375_vm11, 1.0, %v3988_v38  ;;  %v440_v63 = vsel %vm436_vm2, 1.0, %v3988_v38 }
  0xbd   :  { %v4305_v39 = vpack.c.bf16 %v380_v36, %v379_v37 }
  0xbf   :  { %v393_v40 = vpop.permute.xlu1 %392  ;;  %3552 = vmatmul.mubr.msk.bf16.gmra.mrb[24].mxu0 %vm723_vm6, %v4305_v39  ;;  %v456_v60 = vpop.permute.xlu0 %455 }
  0xc0   :  { %vm403_vm13 = vcmp.eq.s32.totalorder %v393_v40, %v4197_v34  ;;  %vm464_vm4 = vcmp.eq.s32.totalorder %v456_v60, %v4197_v34 }
  0xc1   :  { %v407_v42 = vsel %vm403_vm13, 1.0, %v3988_v38  ;;  %v468_v7 = vsel %vm464_vm4, 1.0, %v3988_v38 }
  0xc2   :  { %v4312_v44 = vpack.c.bf16 %v408_v41, %v407_v42 }
  0xc3   :  { %v399_v45 = vpop.permute.xlu1 %398 }
  0xc4   :  { %vm405_vm14 = vcmp.eq.s32.totalorder %v399_v45, %v4197_v34  ;;  %3555 = vmatprep.mubr.msk.bf16.mxu0 %vm723_vm6, %v4312_v44  ;;  %v483_v12 = vpop.permute.xlu0 %482 }
  0xc5   :  { %v409_v48 = vsel %vm405_vm14, 1.0, %v3988_v38  ;;  %vm493_vm9 = vcmp.eq.s32.totalorder %v483_v12, %v4197_v34  ;;  %v3827_v12 = vld [vmem:[%s6340_s4 + $0x10] sm:$0xff]  }
  0xc6   :  { %v497_v47 = vsel %vm493_vm9, 1.0, %v3988_v38 }
  0xc7   :  { %v402_v49 = vpop.permute.xlu1 %401 }
  0xc8   :  { %vm406_vm15 = vcmp.eq.s32.totalorder %v402_v49, %v4197_v34  ;;  %v492_v41 = vpop.permute.xlu0 %491 }
  0xc9   :  { %v410_v50 = vsel %vm406_vm15, 1.0, %v3988_v38  ;;  %vm496_vm12 = vcmp.eq.s32.totalorder %v492_v41, %v4197_v34 }
  0xca   :  { %v4321_v52 = vpack.c.bf16 %v410_v50, %v409_v48 }
  0xcc   :  { %v426_v54 = vpop.permute.xlu1 %425  ;;  %3556 = vmatmul.mubr.msk.bf16.gmra.mrb[28].mxu0 %vm723_vm6, %v4321_v52 }
  0xcd   :  { %vm434_vm1 = vcmp.eq.s32.totalorder %v426_v54, %v4197_v34  ;;  %v516_v50 = vpop.permute.xlu0 %515  ;;  %v500_v54 = vsel %vm496_vm12, 1.0, %v3988_v38 }
  0xce   :  { %v438_v57 = vsel %vm434_vm1, 1.0, %v3988_v38  ;;  %vm524_vm14 = vcmp.eq.s32.totalorder %v516_v50, %v4197_v34 }
  0xcf   :  { %v4332_v59 = vpack.c.bf16 %v438_v57, %v437_v55  ;;  %v528_v60 = vsel %vm524_vm14, 1.0, %v3988_v38 }
  0xd0   :  { %v429_v62 = vpop.permute.xlu1 %428 }
  0xd1   :  { %vm435_vm3 = vcmp.eq.s32.totalorder %v429_v62, %v4197_v34  ;;  %3559 = vmatprep.mubr.msk.bf16.mxu0 %vm723_vm6, %v4332_v59 }
  0xd2   :  { %v439_v1 = vsel %vm435_vm3, 1.0, %v3988_v38 }
  0xd3   :  { %v4341_v5 = vpack.c.bf16 %v440_v63, %v439_v1 }
  0xd5   :  { %v453_v6 = vpop.permute.xlu1 %452  ;;  %3560 = vmatmul.mubr.msk.bf16.gmra.mrb[32].mxu0 %vm723_vm6, %v4341_v5 }
  0xd6   :  { %vm463_vm5 = vcmp.eq.s32.totalorder %v453_v6, %v4197_v34  ;;  %v543_v6 = vpop.permute.xlu0 %542 }
  0xd7   :  { %v467_v11 = vsel %vm463_vm5, 1.0, %v3988_v38  ;;  %vm553_vm2 = vcmp.eq.s32.totalorder %v543_v6, %v4197_v34 }
  0xd8   :  { %v4354_v13 = vpack.c.bf16 %v468_v7, %v467_v11 }
  0xd9   :  { %v3515_v8 = vpop.f32.mrb[0].mxu0  ;;  %v459_v15 = vpop.permute.xlu1 %458 }
  0xda   :  { %v117_v20 = vadd.f32 %v3515_v8, %v62_v9  ;;  %vm465_vm7 = vcmp.eq.s32.totalorder %v459_v15, %v4197_v34  ;;  %v108_v21 = vpop.f32.mrb[1].mxu0  ;;  %3563 = vmatprep.mubr.msk.bf16.mxu0 %vm723_vm6, %v4354_v13  ;;  %v552_v8 = vpop.permute.xlu0 %551  ;;  %v3826_v15 = vld [vmem:[%s6340_s4 + $0x8] sm:$0xff]  }
  0xdb   :  { %v109_v23 = vadd.f32 %v108_v21, %v62_v9  ;;  %v3516_v24 = vpop.f32.mrb[2].mxu0  ;;  %v469_v26 = vsel %vm465_vm7, 1.0, %v3988_v38  ;;  %vm556_vm4 = vcmp.eq.s32.totalorder %v552_v8, %v4197_v34 }
  0xdc   :  { %v120_v2 = vadd.f32 %v3516_v24, %v62_v9  ;;  %v111_v25 = vpop.f32.mrb[3].mxu0  ;;  %v125_v0 = vmax.f32 %v117_v20, 0.0  ;;  %v557_v20 = vsel %vm553_vm2, 1.0, %v3988_v38 }
  0xdd   :  { %v112_v28 = vadd.f32 %v111_v25, %v62_v9  ;;  %v462_v29 = vpop.permute.xlu1 %461  ;;  %v123_v32 = vmax.f32 %v109_v23, 0.0  ;;  %v560_v25 = vsel %vm556_vm4, 1.0, %v3988_v38 }
  0xde   :  { %v126_v30 = vmax.f32 %v120_v2, 0.0  ;;  %vm466_vm8 = vcmp.eq.s32.totalorder %v462_v29, %v4197_v34  ;;  %v576_v24 = vpop.permute.xlu0 %575  ;;  %v3828_v29 = vld [vmem:[%s6340_s4 + $0x18] sm:$0xff]  }
  0xdf   :  { %v124_v35 = vmax.f32 %v112_v28, 0.0  ;;  %v470_v36 = vsel %vm466_vm8, 1.0, %v3988_v38  ;;  %vm584_vm7 = vcmp.eq.s32.totalorder %v576_v24, %v4197_v34 }
  0xe0   :  { %v128_v37 = vpack.c.bf16 %v126_v30, %v125_v0  ;;  %v4363_v40 = vpack.c.bf16 %v470_v36, %v469_v26  ;;  %v588_v30 = vsel %vm584_vm7, 1.0, %v3988_v38 }
  0xe1   :  { %v127_v42 = vpack.c.bf16 %v124_v35, %v123_v32 }
  0xe2   :  { %v486_v45 = vpop.permute.xlu1 %485  ;;  %3564 = vmatmul.mubr.msk.bf16.gmra.mrb[36].mxu0 %vm723_vm6, %v4363_v40 }
  0xe3   :  { %vm494_vm11 = vcmp.eq.s32.totalorder %v486_v45, %v4197_v34  ;;  %3519 = vmatprep.mubr.msk.bf16.mxu1 %vm141_vm10, %v127_v42 }
  0xe4   :  { %v498_v48 = vsel %vm494_vm11, 1.0, %v3988_v38  ;;  %3520 = vmatmul.mubr.msk.bf16.vlgmr.msra.gmra.mrb[0].mxu1 %vm141_vm10, %v128_v37  ;;  %v603_v37 = vpop.permute.xlu0 %602 }
  0xe5   :  { %v4373_v49 = vpack.c.bf16 %v498_v48, %v497_v47  ;;  %3763 = vmatpush3.bf16.msra.mxu1 %v4117_v14  ;;  %vm613_vm12 = vcmp.eq.s32.totalorder %v603_v37, %v4197_v34 }
  0xe6   :  { %v489_v53 = vpop.permute.xlu1 %488  ;;  %3760 = vmatprep.subr.bf16.mxu1 %v4126_v16 }
  0xe7   :  { %vm495_vm13 = vcmp.eq.s32.totalorder %v489_v53, %v4197_v34  ;;  %3567 = vmatprep.mubr.msk.bf16.mxu0 %vm723_vm6, %v4373_v49  ;;  %v617_v53 = vsel %vm613_vm12, 1.0, %v3988_v38 }
  0xe8   :  { %v499_v55 = vsel %vm495_vm13, 1.0, %v3988_v38  ;;  %v612_v48 = vpop.permute.xlu0 %611 }
  0xe9   :  { %v4383_v57 = vpack.c.bf16 %v500_v54, %v499_v55  ;;  %3764 = vmatpush3.bf16.msra.mxu1 %v4126_v16  ;;  %v3825_v16 = vld [vmem:[%s6340_s4] sm:$0xff]   ;;  %vm616_vm14 = vcmp.eq.s32.totalorder %v612_v48, %v4197_v34 }
  0xea   :  { %3761 = vmatprep.subr.bf16.mxu1 %v4135_v17  ;;  %v4461_v54 = vld [vmem:[%s6343_s2] sm:$0xff]  ;;  %v620_v3 = vsel %vm616_vm14, 1.0, %v3988_v38 }
  0xeb   :  { %v513_v14 = vpop.permute.xlu1 %512  ;;  %3568 = vmatmul.mubr.msk.bf16.gmra.mrb[40].mxu0 %vm723_vm6, %v4383_v57  ;;  %vm263_vm2 = vcmp.gt.s32.totalorder %v4461_v54, 1 }
  0xec   :  { %vm523_vm15 = vcmp.eq.s32.totalorder %v513_v14, %v4197_v34 }
  0xed   :  { %v527_v62 = vsel %vm523_vm15, 1.0, %v3988_v38  ;;  %3765 = vmatpush3.bf16.msra.mxu1 %v4135_v17  ;;  %vm233_vm15 = vcmp.gt.s32.totalorder %v4461_v54, 0 }
  0xee   :  { %v4393_v63 = vpack.c.bf16 %v528_v60, %v527_v62  ;;  %3762 = vmatprep.subr.bf16.mxu1 %v4144_v19  ;;  %v636_v60 = vpop.permute.xlu0 %635  ;;  %v3989_v62 = vmov -1e+30  }
  0xef   :  { %v519_v1 = vpop.permute.xlu1 %518 }
  0xf0   :  { %vm525_vm0 = vcmp.eq.s32.totalorder %v519_v1, %v4197_v34  ;;  %3571 = vmatprep.mubr.msk.bf16.mxu1 %vm723_vm6, %v4393_v63 }
  0xf1   :  { %3766 = vmatpush3.bf16.msra.mxu1 %v4144_v19  ;;  %v529_v17 = vsel %vm525_vm0, 1.0, %v3988_v38 }
  0xf2   :  { %3595 = vmatprep.subr.bf16.mxu1 %v3825_v16  ;;  %v663_v24 = vpop.permute.xlu0 %662 }
  0xf3   :  { %v522_v7 = vpop.permute.xlu1 %521  ;;  %vm673_vm12 = vcmp.eq.s32.totalorder %v663_v24, %v4197_v34 }
  0xf4   :  { %vm526_vm1 = vcmp.eq.s32.totalorder %v522_v7, %v4197_v34  ;;  %v4480_v7 = vld [vmem:[%s6343_s2 + $0x8] sm:$0xff] }
  0xf5   :  { %v530_v9 = vsel %vm526_vm1, 1.0, %v3988_v38  ;;  %vm644_vm1 = vcmp.eq.s32.totalorder %v636_v60, %v4197_v34 }
  0xf6   :  { %v4410_v11 = vpack.c.bf16 %v530_v9, %v529_v17  ;;  %v648_v8 = vsel %vm644_vm1, 1.0, %v3988_v38  ;;  %v672_v37 = vpop.permute.xlu0 %671 }
  0xf7   :  { %vm676_vm14 = vcmp.eq.s32.totalorder %v672_v37, %v4197_v34 }
  0xf8   :  { %v546_v19 = vpop.permute.xlu1 %545  ;;  %3572 = vmatmul.mubr.msk.bf16.vlgmr.msra.gmra.mrb[4].mxu1 %vm723_vm6, %v4410_v11 }
  0xf9   :  { %vm554_vm3 = vcmp.eq.s32.totalorder %v546_v19, %v4197_v34  ;;  %3596 = vmatpush3.bf16.msra.mxu1 %v3825_v16  ;;  %v237_v16 = vsel %vm233_vm15, 0.0, %v3989_v62  ;;  %vm294_vm15 = vcmp.gt.s32.totalorder %v4480_v7, 2 }
  0xfa   :  { %v558_v21 = vsel %vm554_vm3, 1.0, %v3988_v38  ;;  %3597 = vmatprep.subr.bf16.mxu1 %v3826_v15  ;;  %1530 = vperm.xlu1 %3818, %v237_v16   ;;  %vm264_vm3 = vcmp.gt.s32.totalorder %v4480_v7, 1  ;;  %v680_v16 = vsel %vm676_vm14, 1.0, %v3988_v38  ;;  %vm384_vm14 = vcmp.gt.s32.totalorder %v4480_v7, 5 }
  0xfb   :  { %v4424_v23 = vpack.c.bf16 %v558_v21, %v557_v20  ;;  %v268_v20 = vsel %vm264_vm3, 0.0, %v3989_v62 }
  0xfc   :  { %v549_v2 = vpop.permute.xlu1 %548 }
  0xfd   :  { %vm555_vm5 = vcmp.eq.s32.totalorder %v549_v2, %v4197_v34  ;;  %3575 = vmatprep.mubr.msk.bf16.mxu1 %vm723_vm6, %v4424_v23  ;;  %3598 = vmatpush3.bf16.msra.mxu1 %v3826_v15  ;;  %v267_v15 = vsel %vm263_vm2, 0.0, %v3989_v62  ;;  %v4498_v2 = vld [vmem:[%s6343_s2 + $0x18] sm:$0xff] }
  0xfe   :  { %v559_v26 = vsel %vm555_vm5, 1.0, %v3988_v38  ;;  %3599 = vmatprep.subr.bf16.mxu1 %v3827_v12  ;;  %1550 = vperm.xlu1 %3818, %v267_v15   ;;  %vm236_vm7 = vcmp.gt.s32.totalorder %v4498_v2, 0  ;;  %vm296_vm1 = vcmp.gt.s32.totalorder %v4498_v2, 2 }
  0xff   :  { %v4432_v28 = vpack.c.bf16 %v560_v25, %v559_v26 }
 0x101   :  { %v573_v0 = vpop.permute.xlu1 %572  ;;  %3576 = vmatmul.mubr.msk.bf16.gmra.mrb[8].mxu1 %vm723_vm6, %v4432_v28 }
 0x102   :  { %vm583_vm8 = vcmp.eq.s32.totalorder %v573_v0, %v4197_v34  ;;  %3600 = vmatpush3.bf16.msra.mxu1 %v3827_v12  ;;  %1555 = vperm.xlu1 %3818, %v268_v20  }
 0x103   :  { %v587_v32 = vsel %vm583_vm8, 1.0, %v3988_v38  ;;  %3601 = vmatprep.subr.bf16.mxu1 %v3828_v29  ;;  %vm266_vm8 = vcmp.gt.s32.totalorder %v4498_v2, 1 }
 0x104   :  { %v4442_v35 = vpack.c.bf16 %v588_v30, %v587_v32  ;;  %v270_v32 = vsel %vm266_vm8, 0.0, %v3989_v62 }
 0x105   :  { %v579_v36 = vpop.permute.xlu1 %578 }
 0x106   :  { %vm585_vm9 = vcmp.eq.s32.totalorder %v579_v36, %v4197_v34  ;;  %3579 = vmatprep.mubr.msk.bf16.mxu1 %vm723_vm6, %v4442_v35  ;;  %3602 = vmatpush3.bf16.msra.mxu1 %v3828_v29  ;;  %v240_v29 = vsel %vm236_vm7, 0.0, %v3989_v62  ;;  %vm326_vm7 = vcmp.gt.s32.totalorder %v4498_v2, 3 }
 0x107   :  { %v589_v41 = vsel %vm585_vm9, 1.0, %v3988_v38  ;;  %vm234_vm9 = vcmp.gt.s32.totalorder %v4480_v7, 0  ;;  %1545 = vperm.xlu1 %3818, %v240_v29  }
 0x108   :  { %v238_v0 = vsel %vm234_vm9, 0.0, %v3989_v62  ;;  %vm354_vm9 = vcmp.gt.s32.totalorder %v4480_v7, 4 }
 0x109   :  { %v582_v42 = vpop.permute.xlu1 %581  ;;  %1535 = vperm.xlu0 %3819, %v238_v0  }
 0x10a   :  { %vm586_vm11 = vcmp.eq.s32.totalorder %v582_v42, %v4197_v34  ;;  %v677_v42 = vsel %vm673_vm12, 1.0, %v3988_v38  ;;  %vm356_vm12 = vcmp.gt.s32.totalorder %v4498_v2, 4 }
 0x10b   :  { %v590_v45 = vsel %vm586_vm11, 1.0, %v3988_v38  ;;  %1565 = vperm.xlu1 %3818, %v270_v32   ;;  %v360_v20 = vsel %vm356_vm12, 0.0, %v3989_v62  ;;  %vm474_vm12 = vcmp.gt.s32.totalorder %v4480_v7, 8 }
 0x10c   :  { %v4451_v47 = vpack.c.bf16 %v590_v45, %v589_v41  ;;  %v4520_v45 = vld [vmem:[%s6343_s2 + $0x10] sm:$0xff] }
 0x10d   :  { %vm265_vm2 = vcmp.gt.s32.totalorder %v4520_v45, 1  ;;  %vm295_vm8 = vcmp.gt.s32.totalorder %v4520_v45, 2 }
 0x10e   :  { %v606_v50 = vpop.permute.xlu1 %605  ;;  %3580 = vmatmul.mubr.msk.bf16.gmra.mrb[12].mxu1 %vm723_vm6, %v4451_v47  ;;  %v299_v15 = vsel %vm295_vm8, 0.0, %v3989_v62  ;;  %vm413_vm8 = vcmp.gt.s32.totalorder %v4461_v54, 6 }
 0x10f   :  { %vm614_vm13 = vcmp.eq.s32.totalorder %v606_v50, %v4197_v34  ;;  %v417_v29 = vsel %vm413_vm8, 0.0, %v3989_v62  ;;  %vm505_vm8 = vcmp.gt.s32.totalorder %v4520_v45, 9 }
 0x110   :  { %v618_v55 = vsel %vm614_vm13, 1.0, %v3988_v38 }
 0x111   :  { %v4465_v14 = vpack.c.bf16 %v618_v55, %v617_v53  ;;  %v298_v53 = vsel %vm294_vm15, 0.0, %v3989_v62  ;;  %vm353_vm15 = vcmp.gt.s32.totalorder %v4461_v54, 4 }
 0x112   :  { %v609_v1 = vpop.permute.xlu1 %608  ;;  %1575 = vperm.xlu1 %3818, %v298_v53  }
 0x113   :  { %vm615_vm0 = vcmp.eq.s32.totalorder %v609_v1, %v4197_v34  ;;  %3583 = vmatprep.mubr.msk.bf16.mxu1 %vm723_vm6, %v4465_v14  ;;  %v300_v1 = vsel %vm296_vm1, 0.0, %v3989_v62  ;;  %vm355_vm1 = vcmp.gt.s32.totalorder %v4520_v45, 4 }
 0x114   :  { %v619_v6 = vsel %vm615_vm0, 1.0, %v3988_v38  ;;  %vm235_vm0 = vcmp.gt.s32.totalorder %v4520_v45, 0 }
 0x115   :  { %v4474_v17 = vpack.c.bf16 %v620_v3, %v619_v6  ;;  %v239_v55 = vsel %vm235_vm0, 0.0, %v3989_v62  ;;  %v269_v3 = vsel %vm265_vm2, 0.0, %v3989_v62  ;;  %vm386_vm0 = vcmp.gt.s32.totalorder %v4498_v2, 5 }
 0x116   :  { %1540 = vperm.xlu0 %3819, %v239_v55   ;;  %1585 = vperm.xlu1 %3818, %v300_v1   ;;  %v390_v24 = vsel %vm386_vm0, 0.0, %v3989_v62  ;;  %vm414_vm2 = vcmp.gt.s32.totalorder %v4480_v7, 6  ;;  %vm504_vm0 = vcmp.gt.s32.totalorder %v4480_v7, 9 }
 0x117   :  { %v633_v9 = vpop.permute.xlu1 %632  ;;  %3584 = vmatmul.mubr.msk.bf16.gmra.mrb[16].mxu1 %vm723_vm6, %v4474_v17 }
 0x118   :  { %vm643_vm4 = vcmp.eq.s32.totalorder %v633_v9, %v4197_v34 }
 0x119   :  { %v647_v19 = vsel %vm643_vm4, 1.0, %v3988_v38  ;;  %vm324_vm4 = vcmp.gt.s32.totalorder %v4480_v7, 3 }
 0x11a   :  { %v4490_v21 = vpack.c.bf16 %v648_v8, %v647_v19  ;;  %1560 = vperm.xlu0 %3819, %v269_v3  }
 0x11b   :  { %v639_v12 = vpop.permute.xlu1 %638 }
 0x11c   :  { %vm645_vm5 = vcmp.eq.s32.totalorder %v639_v12, %v4197_v34  ;;  %3587 = vmatprep.mubr.msk.bf16.mxu1 %vm723_vm6, %v4490_v21  ;;  %v357_v12 = vsel %vm353_vm15, 0.0, %v3989_v62  ;;  %vm445_vm15 = vcmp.gt.s32.totalorder %v4520_v45, 7 }
 0x11d   :  { %v649_v25 = vsel %vm645_vm5, 1.0, %v3988_v38  ;;  %vm293_vm5 = vcmp.gt.s32.totalorder %v4461_v54, 2 }
 0x11e   :  { %v297_v8 = vsel %vm293_vm5, 0.0, %v3989_v62  ;;  %vm385_vm5 = vcmp.gt.s32.totalorder %v4520_v45, 5 }
 0x11f   :  { %v642_v26 = vpop.permute.xlu1 %641  ;;  %1570 = vperm.xlu0 %3819, %v297_v8  }
 0x120   :  { %vm646_vm11 = vcmp.eq.s32.totalorder %v642_v26, %v4197_v34 }
 0x121   :  { %v650_v30 = vsel %vm646_vm11, 1.0, %v3988_v38  ;;  %vm323_vm11 = vcmp.gt.s32.totalorder %v4461_v54, 3 }
 0x122   :  { %v4510_v36 = vpack.c.bf16 %v650_v30, %v649_v25  ;;  %v327_v19 = vsel %vm323_vm11, 0.0, %v3989_v62  ;;  %vm415_vm11 = vcmp.gt.s32.totalorder %v4520_v45, 6 }
 0x123   :  { %1580 = vperm.xlu0 %3819, %v299_v15  }
 0x124   :  { %v666_v41 = vpop.permute.xlu1 %665  ;;  %3588 = vmatmul.mubr.msk.bf16.gmra.mrb[20].mxu1 %vm723_vm6, %v4510_v36 }
 0x125   :  { %vm674_vm13 = vcmp.eq.s32.totalorder %v666_v41, %v4197_v34  ;;  %v508_v41 = vsel %vm504_vm0, 0.0, %v3989_v62  ;;  %vm596_vm0 = vcmp.gt.s32.totalorder %v4498_v2, 12 }
 0x126   :  { %v678_v48 = vsel %vm674_vm13, 1.0, %v3988_v38  ;;  %vm325_vm13 = vcmp.gt.s32.totalorder %v4520_v45, 3 }
 0x127   :  { %v4526_v50 = vpack.c.bf16 %v678_v48, %v677_v42  ;;  %1590 = vperm.xlu0 %3819, %v327_v19  }
 0x128   :  { %v669_v60 = vpop.permute.xlu1 %668 }
 0x129   :  { %vm675_vm3 = vcmp.eq.s32.totalorder %v669_v60, %v4197_v34  ;;  %3591 = vmatprep.mubr.msk.bf16.mxu1 %vm723_vm6, %v4526_v50  ;;  %v328_v34 = vsel %vm324_vm4, 0.0, %v3989_v62  ;;  %vm416_vm4 = vcmp.gt.s32.totalorder %v4498_v2, 6 }
 0x12a   :  { %v679_v6 = vsel %vm675_vm3, 1.0, %v3988_v38  ;;  %1595 = vperm.xlu1 %3818, %v328_v34   ;;  %v330_v38 = vsel %vm326_vm7, 0.0, %v3989_v62  ;;  %vm383_vm3 = vcmp.gt.s32.totalorder %v4461_v54, 5  ;;  %v420_v26 = vsel %vm416_vm4, 0.0, %v3989_v62 }
 0x12b   :  { %v4538_v9 = vpack.c.bf16 %v680_v16, %v679_v6  ;;  %v387_v25 = vsel %vm383_vm3, 0.0, %v3989_v62  ;;  %vm444_vm7 = vcmp.gt.s32.totalorder %v4480_v7, 7  ;;  %vm475_vm3 = vcmp.gt.s32.totalorder %v4520_v45, 8 }
 0x12c   :  { %v479_v53 = vsel %vm475_vm3, 0.0, %v3989_v62  ;;  %vm534_vm4 = vcmp.gt.s32.totalorder %v4480_v7, 10  ;;  %v509_v6 = vsel %vm505_vm8, 0.0, %v3989_v62  ;;  %vm593_vm3 = vcmp.gt.s32.totalorder %v4461_v54, 12 }
 0x12d   :  { %3592 = vmatmul.mubr.msk.bf16.gmra.mrb[24].mxu1 %vm723_vm6, %v4538_v9  ;;  %vm623_vm8 = vcmp.gt.s32.totalorder %v4461_v54, 13 }
 0x12e   :  { %3603 = vmatprep.mubr.msk.bf16.mxu1 %vm723_vm6, %v4212_v46  ;;  %1605 = vperm.xlu1 %3818, %v330_v38   ;;  %v358_v46 = vsel %vm354_vm9, 0.0, %v3989_v62  ;;  %vm446_vm9 = vcmp.gt.s32.totalorder %v4498_v2, 7 }
 0x12f   :  { %v450_v0 = vsel %vm446_vm9, 0.0, %v3989_v62  ;;  %vm564_vm9 = vcmp.gt.s32.totalorder %v4480_v7, 11 }
 0x130   :  { %v568_v34 = vsel %vm564_vm9, 0.0, %v3989_v62  ;;  %vm656_vm9 = vcmp.gt.s32.totalorder %v4498_v2, 14 }
 0x132   :  { %1615 = vperm.xlu1 %3818, %v358_v46  }
 0x135   :  { %3604 = vmatmul.mubr.msk.bf16.vlgmr.msra.gmra.mrb[28].mxu1 %vm723_vm6, %v4208_v43  ;;  %v329_v43 = vsel %vm325_vm13, 0.0, %v3989_v62  ;;  %vm443_vm13 = vcmp.gt.s32.totalorder %v4461_v54, 7 }
 0x136   :  { %3607 = vmatprep.mubr.msk.bf16.mxu1 %vm723_vm6, %v4224_v51  ;;  %1625 = vperm.xlu1 %3818, %v360_v20   ;;  %v388_v51 = vsel %vm384_vm14, 0.0, %v3989_v62  ;;  %vm476_vm14 = vcmp.gt.s32.totalorder %v4498_v2, 8  ;;  %v447_v30 = vsel %vm443_vm13, 0.0, %v3989_v62  ;;  %vm535_vm13 = vcmp.gt.s32.totalorder %v4520_v45, 10 }
 0x137   :  { %1600 = vperm.xlu0 %3819, %v329_v43   ;;  %v539_v46 = vsel %vm535_vm13, 0.0, %v3989_v62  ;;  %vm653_vm13 = vcmp.gt.s32.totalorder %v4461_v54, 14 }
 0x13a   :  { %1635 = vperm.xlu1 %3818, %v388_v51  }
 0x13b   :  { %1610 = vperm.xlu0 %3819, %v357_v12   ;;  %v600_v12 = vsel %vm596_vm0, 0.0, %v3989_v62  ;;  %vm683_vm0 = vcmp.gt.s32.totalorder %v4461_v54, 15 }
 0x13d   :  { %3608 = vmatmul.mubr.msk.bf16.gmra.mrb[32].mxu1 %vm723_vm6, %v4232_v56  ;;  %v359_v56 = vsel %vm355_vm1, 0.0, %v3989_v62  ;;  %vm473_vm1 = vcmp.gt.s32.totalorder %v4461_v54, 8 }
 0x13e   :  { %3611 = vmatprep.mubr.msk.bf16.mxu1 %vm723_vm6, %v4243_v61  ;;  %1645 = vperm.xlu1 %3818, %v390_v24   ;;  %v418_v61 = vsel %vm414_vm2, 0.0, %v3989_v62  ;;  %vm506_vm2 = vcmp.gt.s32.totalorder %v4498_v2, 9 }
 0x13f   :  { %1620 = vperm.xlu0 %3819, %v359_v56  }
 0x142   :  { %1655 = vperm.xlu1 %3818, %v418_v61   ;;  %v597_v61 = vsel %vm593_vm3, 0.0, %v3989_v62 }
 0x143   :  { %1630 = vperm.xlu0 %3819, %v387_v25  }
 0x145   :  { %3612 = vmatmul.mubr.msk.bf16.gmra.mrb[36].mxu1 %vm723_vm6, %v4252_v4  ;;  %v389_v4 = vsel %vm385_vm5, 0.0, %v3989_v62  ;;  %vm503_vm5 = vcmp.gt.s32.totalorder %v4461_v54, 9 }
 0x146   :  { %3615 = vmatprep.mubr.msk.bf16.mxu1 %vm723_vm6, %v4261_v10  ;;  %1665 = vperm.xlu1 %3818, %v420_v26   ;;  %v448_v10 = vsel %vm444_vm7, 0.0, %v3989_v62  ;;  %v507_v60 = vsel %vm503_vm5, 0.0, %v3989_v62  ;;  %vm536_vm7 = vcmp.gt.s32.totalorder %v4498_v2, 10  ;;  %vm595_vm5 = vcmp.gt.s32.totalorder %v4520_v45, 12 }
 0x147   :  { %1640 = vperm.xlu0 %3819, %v389_v4   ;;  %v540_v3 = vsel %vm536_vm7, 0.0, %v3989_v62  ;;  %vm654_vm7 = vcmp.gt.s32.totalorder %v4480_v7, 14  ;;  %v599_v25 = vsel %vm595_vm5, 0.0, %v3989_v62 }
 0x14a   :  { %1675 = vperm.xlu1 %3818, %v448_v10  }
 0x14b   :  { %1650 = vperm.xlu0 %3819, %v417_v29  }
 0x14d   :  { %3616 = vmatmul.mubr.msk.bf16.gmra.mrb[40].mxu1 %vm723_vm6, %v4271_v18  ;;  %v419_v18 = vsel %vm415_vm11, 0.0, %v3989_v62  ;;  %vm533_vm11 = vcmp.gt.s32.totalorder %v4461_v54, 10 }
 0x14e   :  { %3619 = vmatprep.mubr.msk.bf16.mxu1 %vm723_vm6, %v4279_v22  ;;  %1685 = vperm.xlu1 %3818, %v450_v0   ;;  %v478_v22 = vsel %vm474_vm12, 0.0, %v3989_v62  ;;  %v537_v8 = vsel %vm533_vm11, 0.0, %v3989_v62  ;;  %vm566_vm12 = vcmp.gt.s32.totalorder %v4498_v2, 11  ;;  %vm625_vm11 = vcmp.gt.s32.totalorder %v4520_v45, 13 }
 0x14f   :  { %1660 = vperm.xlu0 %3819, %v419_v18   ;;  %v570_v15 = vsel %vm566_vm12, 0.0, %v3989_v62  ;;  %v660_v0 = vsel %vm656_vm9, 0.0, %v3989_v62  ;;  %v629_v18 = vsel %vm625_vm11, 0.0, %v3989_v62  ;;  %vm684_vm12 = vcmp.gt.s32.totalorder %v4480_v7, 15 }
 0x152   :  { %1695 = vperm.xlu1 %3818, %v478_v22   ;;  %v688_v22 = vsel %vm684_vm12, 0.0, %v3989_v62 }
 0x153   :  { %1670 = vperm.xlu0 %3819, %v447_v30   ;;  %v657_v30 = vsel %vm653_vm13, 0.0, %v3989_v62 }
 0x155   :  { %3620 = vmatmul.mubr.msk.bf16.gmra.mrb[44].mxu1 %vm723_vm6, %v4289_v27  ;;  %v480_v27 = vsel %vm476_vm14, 0.0, %v3989_v62  ;;  %vm594_vm14 = vcmp.gt.s32.totalorder %v4480_v7, 12 }
 0x156   :  { %3623 = vmatprep.mubr.msk.bf16.mxu1 %vm723_vm6, %v4297_v31  ;;  %v449_v31 = vsel %vm445_vm15, 0.0, %v3989_v62  ;;  %1705 = vperm.xlu1 %3818, %v480_v27   ;;  %vm563_vm15 = vcmp.gt.s32.totalorder %v4461_v54, 11  ;;  %v598_v20 = vsel %vm594_vm14, 0.0, %v3989_v62  ;;  %vm686_vm14 = vcmp.gt.s32.totalorder %v4498_v2, 15 }
 0x157   :  { %1680 = vperm.xlu0 %3819, %v449_v31  }
 0x15a   :  { %1715 = vperm.xlu1 %3818, %v508_v41  }
 0x15d   :  { %3624 = vmatmul.mubr.msk.bf16.gmra.mrb[48].mxu1 %vm723_vm6, %v4305_v39  ;;  %v477_v39 = vsel %vm473_vm1, 0.0, %v3989_v62  ;;  %vm565_vm1 = vcmp.gt.s32.totalorder %v4520_v45, 11 }
 0x15e   :  { %3627 = vmatprep.mubr.msk.bf16.mxu1 %vm723_vm6, %v4312_v44  ;;  %1690 = vperm.xlu0 %3819, %v477_v39   ;;  %v510_v44 = vsel %vm506_vm2, 0.0, %v3989_v62  ;;  %v569_v24 = vsel %vm565_vm1, 0.0, %v3989_v62  ;;  %vm624_vm2 = vcmp.gt.s32.totalorder %v4480_v7, 13  ;;  %v690_v7 = vsel %vm686_vm14, 0.0, %v3989_v62 }
 0x15f   :  { %1725 = vperm.xlu1 %3818, %v510_v44   ;;  %v628_v56 = vsel %vm624_vm2, 0.0, %v3989_v62  ;;  %vm685_vm1 = vcmp.gt.s32.totalorder %v4520_v45, 15 }
 0x160   :  { %v4618_v32 = vpop.f32.mrb[4].mxu0 }
 0x161   :  { %v4620_v37 = vpop.f32.mrb[5].mxu0 }
 0x162   :  { %v4624_v42 = vpop.f32.mrb[6].mxu0  ;;  %1700 = vperm.xlu0 %3819, %v479_v53   ;;  %v133_v53 = vsub.s32 1, %v4330_v58 }
 0x163   :  { %v4626_v48 = vpop.f32.mrb[7].mxu0 }
 0x165   :  { %3628 = vmatmul.mubr.msk.bf16.gmra.mrb[52].mxu1 %vm723_vm6, %v4321_v52 }
 0x166   :  { %3631 = vmatprep.mubr.msk.bf16.mxu1 %vm723_vm6, %v4332_v59  ;;  %v538_v59 = vsel %vm534_vm4, 0.0, %v3989_v62  ;;  %1710 = vperm.xlu0 %3819, %v507_v60   ;;  %vm626_vm4 = vcmp.gt.s32.totalorder %v4498_v2, 13  ;;  %v687_v2 = vsel %vm683_vm0, 0.0, %v3989_v62 }
 0x167   :  { %1735 = vperm.xlu1 %3818, %v538_v59   ;;  %v134_v59 = vrot.slane %v4346_v33, %v133_v53 }
 0x168   :  { %v4638_v55 = vpop.f32.mrb[8].mxu0 }
 0x169   :  { %v4640_v52 = vpop.f32.mrb[9].mxu0 }
 0x16a   :  { %v4644_v16 = vpop.f32.mrb[10].mxu0  ;;  %1720 = vperm.xlu0 %3819, %v509_v6  }
 0x16b   :  { %v4646_v1 = vpop.f32.mrb[11].mxu0  ;;  %1745 = vperm.xlu1 %3818, %v540_v3  }
 0x16d   :  { %3632 = vmatmul.mubr.msk.bf16.gmra.mrb[56].mxu1 %vm723_vm6, %v4341_v5 }
 0x16e   :  { %3635 = vmatprep.mubr.msk.bf16.mxu1 %vm723_vm6, %v4354_v13  ;;  %1730 = vperm.xlu0 %3819, %v537_v8  }
 0x16f   :  { %1755 = vperm.xlu1 %3818, %v568_v34  }
 0x172   :  { %1740 = vperm.xlu0 %3819, %v539_v46  }
 0x173   :  { %v4662_v5 = vpop.f32.mrb[12].mxu0  ;;  %1765 = vperm.xlu1 %3818, %v570_v15  }
 0x174   :  { %v4664_v38 = vpop.f32.mrb[13].mxu0 }
 0x175   :  { %3636 = vmatmul.mubr.msk.bf16.gmra.mrb[60].mxu1 %vm723_vm6, %v4363_v40  ;;  %v4668_v13 = vpop.f32.mrb[14].mxu0  ;;  %v567_v40 = vsel %vm563_vm15, 0.0, %v3989_v62  ;;  %vm655_vm15 = vcmp.gt.s32.totalorder %v4520_v45, 14 }
 0x176   :  { %3639 = vmatprep.mubr.msk.bf16.mxu1 %vm723_vm6, %v4373_v49  ;;  %v4674_v19 = vpop.f32.mrb[15].mxu0  ;;  %1750 = vperm.xlu0 %3819, %v567_v40   ;;  %v659_v41 = vsel %vm655_vm15, 0.0, %v3989_v62 }
 0x177   :  { %1775 = vperm.xlu1 %3818, %v598_v20  }
 0x17a   :  { %1760 = vperm.xlu0 %3819, %v569_v24  }
 0x17b   :  { %1785 = vperm.xlu1 %3818, %v600_v12  }
 0x17c   :  { %v4680_v43 = vpop.f32.mrb[16].mxu0 }
 0x17d   :  { %3640 = vmatmul.mubr.msk.bf16.gmra.mrb[64].mxu1 %vm723_vm6, %v4383_v57  ;;  %v4684_v49 = vpop.f32.mrb[17].mxu0 }
 0x17e   :  { %3643 = vmatprep.mubr.msk.bf16.mxu1 %vm723_vm6, %v4393_v63  ;;  %v4690_v51 = vpop.f32.mrb[18].mxu0  ;;  %1770 = vperm.xlu0 %3819, %v597_v61   ;;  %v630_v63 = vsel %vm626_vm4, 0.0, %v3989_v62 }
 0x17f   :  { %v4696_v57 = vpop.f32.mrb[19].mxu0  ;;  %1795 = vperm.xlu1 %3818, %v628_v56  }
 0x182   :  { %1780 = vperm.xlu0 %3819, %v599_v25  }
 0x183   :  { %1805 = vperm.xlu1 %3818, %v630_v63  }
 0x185   :  { %3644 = vmatmul.mubr.msk.bf16.gmra.mrb[68].mxu1 %vm723_vm6, %v4410_v11  ;;  %v658_v11 = vsel %vm654_vm7, 0.0, %v3989_v62 }
 0x186   :  { %3647 = vmatprep.mubr.msk.bf16.mxu1 %vm723_vm6, %v4424_v23  ;;  %v627_v23 = vsel %vm623_vm8, 0.0, %v3989_v62 }
 0x187   :  { %1815 = vperm.xlu1 %3818, %v658_v11   ;;  %1790 = vperm.xlu0 %3819, %v627_v23  }
 0x189   :  { %v4710_v26 = vpop.f32.mrb[20].mxu0 }
 0x18a   :  { %v4714_v4 = vpop.f32.mrb[21].mxu0 }
 0x18b   :  { %v4716_v10 = vpop.f32.mrb[22].mxu0  ;;  %1825 = vperm.xlu1 %3818, %v660_v0   ;;  %1800 = vperm.xlu0 %3819, %v629_v18  }
 0x18c   :  { %v4720_v29 = vpop.f32.mrb[23].mxu0 }
 0x18d   :  { %3648 = vmatmul.mubr.msk.bf16.gmra.mrb[72].mxu1 %vm723_vm6, %v4432_v28 }
 0x18e   :  { %3651 = vmatprep.mubr.msk.bf16.mxu1 %vm723_vm6, %v4442_v35 }
 0x18f   :  { %1835 = vperm.xlu1 %3818, %v688_v22   ;;  %1810 = vperm.xlu0 %3819, %v657_v30  }
 0x192   :  { %v4732_v27 = vpop.f32.mrb[24].mxu0 }
 0x193   :  { %v4734_v28 = vpop.f32.mrb[25].mxu0  ;;  %1845 = vperm.xlu1 %3818, %v690_v7   ;;  %1820 = vperm.xlu0 %3819, %v659_v41  }
 0x194   :  { %v4738_v31 = vpop.f32.mrb[26].mxu0 }
 0x195   :  { %3652 = vmatmul.mubr.msk.bf16.gmra.mrb[76].mxu1 %vm723_vm6, %v4451_v47  ;;  %v4742_v35 = vpop.f32.mrb[27].mxu0  ;;  %v689_v47 = vsel %vm685_vm1, 0.0, %v3989_v62 }
 0x196   :  { %3655 = vmatprep.mubr.msk.bf16.mxu1 %vm723_vm6, %v4465_v14 }
 0x197   :  { %1830 = vperm.xlu0 %3819, %v687_v2  }
 0x19b   :  { %1840 = vperm.xlu0 %3819, %v689_v47  }
 0x19d   :  { %3656 = vmatmul.mubr.msk.bf16.gmra.mrb[80].mxu1 %vm723_vm6, %v4474_v17 }
 0x19e   :  { %3659 = vmatprep.mubr.msk.bf16.mxu1 %vm723_vm6, %v4490_v21 }
 0x19f   :  { %v4756_v39 = vpop.f32.mrb[28].mxu0 }
 0x1a0   :  { %v4758_v14 = vpop.f32.mrb[29].mxu0 }
 0x1a1   :  { %v4760_v54 = vpop.f32.mrb[30].mxu0 }
 0x1a2   :  { %v4762_v44 = vpop.f32.mrb[31].mxu0 }
 0x1a5   :  { %3660 = vmatmul.mubr.msk.bf16.gmra.mrb[84].mxu1 %vm723_vm6, %v4510_v36 }
 0x1a6   :  { %3663 = vmatprep.mubr.msk.bf16.mxu1 %vm723_vm6, %v4526_v50 }
 0x1a8   :  { %v4768_v17 = vpop.f32.mrb[32].mxu0 }
 0x1a9   :  { %v4770_v62 = vpop.f32.mrb[33].mxu0 }
 0x1aa   :  { %v4772_v21 = vpop.f32.mrb[34].mxu0 }
 0x1ab   :  { %v4774_v45 = vpop.f32.mrb[35].mxu0 }
 0x1ad   :  { %3664 = vmatmul.mubr.msk.bf16.gmra.mrb[88].mxu1 %vm723_vm6, %v4538_v9  ;;  %vm3102_vm6 = vcmask 261120  }
 0x1b5   :  { %v3565_v60 = vpop.f32.mrb[36].mxu0 }
 0x1b6   :  { %v982_v36 = vpop.f32.mrb[37].mxu0 }
 0x1b7   :  { %v3521_v3 = vpop.f32.mrb[0].mxu1  ;;  %v3566_v6 = vpop.f32.mrb[38].mxu0 }
 0x1b8   :  { %v191_v50 = vadd.f32 %v3521_v3, %v134_v59  ;;  %v182_v34 = vpop.f32.mrb[1].mxu1  ;;  %v985_v8 = vpop.f32.mrb[39].mxu0 }
 0x1b9   :  { %v183_v15 = vadd.f32 %v182_v34, %v134_v59  ;;  %v3522_v46 = vpop.f32.mrb[2].mxu1 }
 0x1ba   :  { %v4780_v20 = vmul.f32 0.5, %v191_v50  ;;  %v194_v40 = vadd.f32 %v3522_v46, %v134_v59  ;;  %v185_v12 = vpop.f32.mrb[3].mxu1 }
 0x1bb   :  { %v4782_v24 = vmul.f32 0.5, %v183_v15  ;;  %v186_v9 = vadd.f32 %v185_v12, %v134_v59 }
 0x1bc   :  { %v4784_v56 = vmul.f32 0.5, %v194_v40  ;;  %v4787_v33 = vmul.f32 %v3565_v60, %v4780_v20  ;;  %v1432_v61 = vmul.f32 %v4618_v32, %v4780_v20  ;;  %v4793_v63 = vmul.f32 %v4638_v55, %v4780_v20 }
 0x1bd   :  { %v4795_v25 = vmul.f32 0.5, %v186_v9  ;;  %v4798_v11 = vmul.f32 %v982_v36, %v4782_v24  ;;  %v1430_v23 = vmul.f32 %v4620_v37, %v4782_v24  ;;  %v1434_v0 = vmul.f32 %v4640_v52, %v4782_v24 }
 0x1be   :  { %v4805_v18 = vmul.f32 %v3566_v6, %v4784_v56  ;;  %v3569_v22 = vpop.f32.mrb[40].mxu0  ;;  %v1433_v32 = vmul.f32 %v4624_v42, %v4784_v56  ;;  %v1437_v55 = vmul.f32 %v4644_v16, %v4784_v56  ;;  %v1438_v30 = vmul.f32 %v4664_v38, %v4782_v24 }
 0x1bf   :  { %v4814_v7 = vmul.f32 %v985_v8, %v4795_v25  ;;  %v4817_v37 = vmul.f32 %v3569_v22, %v4780_v20  ;;  %v998_v52 = vpop.f32.mrb[41].mxu0  ;;  %v1431_v41 = vmul.f32 %v4626_v48, %v4795_v25  ;;  %v1435_v2 = vmul.f32 %v4646_v1, %v4795_v25 }
 0x1c0   :  { %v1511_v42 = vpack.c.bf16 %v4805_v18, %v4787_v33  ;;  %v4826_v16 = vmul.f32 %v998_v52, %v4782_v24  ;;  %v3570_v38 = vpop.f32.mrb[42].mxu0  ;;  %v1495_v47 = vpack.c.bf16 %v1433_v32, %v1432_v61  ;;  %v1497_v53 = vpack.c.bf16 %v1437_v55, %v4793_v63 }
 0x1c1   :  { %v1510_v59 = vpack.c.bf16 %v4814_v7, %v4798_v11  ;;  %v4832_v60 = vmul.f32 %v3570_v38, %v4784_v56  ;;  %v1001_v48 = vpop.f32.mrb[43].mxu0  ;;  %v1494_v36 = vpack.c.bf16 %v1431_v41, %v1430_v23  ;;  %v1496_v3 = vpack.c.bf16 %v1435_v2, %v1434_v0 }
 0x1c2   :  { %v4835_v1 = vmul.f32 %v1001_v48, %v4795_v25  ;;  %v1439_v6 = vmul.f32 %v4674_v19, %v4795_v25  ;;  %v1440_v50 = vmul.f32 %v4662_v5, %v4780_v20  ;;  %v1441_v34 = vmul.f32 %v4668_v13, %v4784_v56 }
 0x1c3   :  { %v1513_v8 = vpack.c.bf16 %v4832_v60, %v4817_v37  ;;  %3669 = vmatprep.mubr.msk.bf16.mxu0 %vm141_vm10, %v1494_v36  ;;  %v1442_v15 = vmul.f32 %v4684_v49, %v4782_v24  ;;  %v1443_v46 = vmul.f32 %v4696_v57, %v4795_v25  ;;  %v1444_v19 = vmul.f32 %v4680_v43, %v4780_v20 }
 0x1c4   :  { %v1512_v5 = vpack.c.bf16 %v4835_v1, %v4826_v16  ;;  %3670 = vmatmul.mubr.msk.bf16.vlgmr.msra.gmra.mrb[44].mxu0 %vm141_vm10, %v1495_v47  ;;  %v1498_v13 = vpack.c.bf16 %v1439_v6, %v1438_v30  ;;  %v1499_v40 = vpack.c.bf16 %v1441_v34, %v1440_v50  ;;  %v1445_v12 = vmul.f32 %v4690_v51, %v4784_v56 }
 0x1c5   :  { %3673 = vmatprep.mubr.msk.bf16.mxu0 %vm141_vm10, %v1496_v3  ;;  %v1500_v9 = vpack.c.bf16 %v1443_v46, %v1442_v15  ;;  %v1446_v49 = vmul.f32 %v4714_v4, %v4782_v24  ;;  %v1447_v57 = vmul.f32 %v4720_v29, %v4795_v25  ;;  %v1448_v43 = vmul.f32 %v4710_v26, %v4780_v20 }
 0x1c6   :  { %v1501_v61 = vpack.c.bf16 %v1445_v12, %v1444_v19  ;;  %v1449_v63 = vmul.f32 %v4716_v10, %v4784_v56  ;;  %v1450_v23 = vmul.f32 %v4734_v28, %v4782_v24  ;;  %v1451_v51 = vmul.f32 %v4742_v35, %v4795_v25 }
 0x1c7   :  { %v1502_v0 = vpack.c.bf16 %v1447_v57, %v1446_v49  ;;  %v1452_v4 = vmul.f32 %v4732_v27, %v4780_v20  ;;  %v1453_v29 = vmul.f32 %v4738_v31, %v4784_v56  ;;  %v1454_v26 = vmul.f32 %v4758_v14, %v4782_v24 }
 0x1c8   :  { %v1503_v22 = vpack.c.bf16 %v1449_v63, %v1448_v43  ;;  %v1504_v32 = vpack.c.bf16 %v1451_v51, %v1450_v23  ;;  %v1455_v10 = vmul.f32 %v4762_v44, %v4795_v25  ;;  %v1456_v28 = vmul.f32 %v4756_v39, %v4780_v20 }
 0x1c9   :  { %v1505_v55 = vpack.c.bf16 %v1453_v29, %v1452_v4  ;;  %v1457_v35 = vmul.f32 %v4760_v54, %v4784_v56  ;;  %v1458_v27 = vmul.f32 %v4770_v62, %v4782_v24  ;;  %v1459_v31 = vmul.f32 %v4774_v45, %v4795_v25 }
 0x1ca   :  { %v1506_v30 = vpack.c.bf16 %v1455_v10, %v1454_v26  ;;  %v4888_v14 = vmul.f32 %v4768_v17, %v4780_v20  ;;  %v4892_v44 = vmul.f32 %v4772_v21, %v4784_v56 }
 0x1cb   :  { %v3573_v39 = vpop.f32.mrb[4].mxu1  ;;  %v1507_v52 = vpack.c.bf16 %v1457_v35, %v1456_v28  ;;  %v1508_v41 = vpack.c.bf16 %v1459_v31, %v1458_v27 }
 0x1cc   :  { %v1014_v2 = vpop.f32.mrb[5].mxu1  ;;  %3674 = vmatmul.mubr.msk.bf16.gmra.mrb[48].mxu0 %vm141_vm10, %v1497_v53  ;;  %v1509_v54 = vpack.c.bf16 %v4892_v44, %v4888_v14  ;;  %v4899_v45 = vmul.f32 %v3573_v39, %v4780_v20 }
 0x1cd   :  { %v3574_v62 = vpop.f32.mrb[6].mxu1  ;;  %3677 = vmatprep.mubr.msk.bf16.mxu0 %vm141_vm10, %v1498_v13  ;;  %v4905_v38 = vmul.f32 %v1014_v2, %v4782_v24 }
 0x1ce   :  { %v4902_v17 = vmul.f32 %v3574_v62, %v4784_v56  ;;  %v1017_v21 = vpop.f32.mrb[7].mxu1 }
 0x1cf   :  { %v4908_v47 = vmul.f32 %v1017_v21, %v4795_v25 }
 0x1d0   :  { %v1515_v53 = vpack.c.bf16 %v4902_v17, %v4899_v45 }
 0x1d1   :  { %v1514_v48 = vpack.c.bf16 %v4908_v47, %v4905_v38 }
 0x1d4   :  { %v3577_v36 = vpop.f32.mrb[8].mxu1  ;;  %3678 = vmatmul.mubr.msk.bf16.gmra.mrb[52].mxu0 %vm141_vm10, %v1499_v40 }
 0x1d5   :  { %v1030_v3 = vpop.f32.mrb[9].mxu1  ;;  %3681 = vmatprep.mubr.msk.bf16.mxu0 %vm141_vm10, %v1500_v9  ;;  %v4917_v50 = vmul.f32 %v3577_v36, %v4780_v20 }
 0x1d6   :  { %v3578_v6 = vpop.f32.mrb[10].mxu1  ;;  %v4923_v46 = vmul.f32 %v1030_v3, %v4782_v24 }
 0x1d7   :  { %v4920_v34 = vmul.f32 %v3578_v6, %v4784_v56  ;;  %v1033_v15 = vpop.f32.mrb[11].mxu1 }
 0x1d8   :  { %v4926_v19 = vmul.f32 %v1033_v15, %v4795_v25 }
 0x1d9   :  { %v1517_v13 = vpack.c.bf16 %v4920_v34, %v4917_v50 }
 0x1da   :  { %v1516_v40 = vpack.c.bf16 %v4926_v19, %v4923_v46 }
 0x1dc   :  { %3682 = vmatmul.mubr.msk.bf16.gmra.mrb[56].mxu0 %vm141_vm10, %v1501_v61 }
 0x1dd   :  { %3685 = vmatprep.mubr.msk.bf16.mxu0 %vm141_vm10, %v1502_v0 }
 0x1e1   :  { %v3581_v12 = vpop.f32.mrb[12].mxu1 }
 0x1e2   :  { %v1046_v9 = vpop.f32.mrb[13].mxu1  ;;  %v4935_v57 = vmul.f32 %v3581_v12, %v4780_v20 }
 0x1e3   :  { %v3582_v49 = vpop.f32.mrb[14].mxu1  ;;  %v1478_v23 = vmul.f32 %v1046_v9, %v4782_v24 }
 0x1e4   :  { %v4938_v43 = vmul.f32 %v3582_v49, %v4784_v56  ;;  %v1049_v63 = vpop.f32.mrb[15].mxu1  ;;  %3686 = vmatmul.mubr.msk.bf16.gmra.mrb[60].mxu0 %vm141_vm10, %v1503_v22 }
 0x1e5   :  { %v1479_v51 = vmul.f32 %v1049_v63, %v4795_v25  ;;  %3689 = vmatprep.mubr.msk.bf16.mxu0 %vm141_vm10, %v1504_v32 }
 0x1e6   :  { %v1519_v61 = vpack.c.bf16 %v4938_v43, %v4935_v57 }
 0x1e7   :  { %v1518_v0 = vpack.c.bf16 %v1479_v51, %v1478_v23 }
 0x1ea   :  { %v3585_v4 = vpop.f32.mrb[16].mxu1 }
 0x1eb   :  { %v1062_v29 = vpop.f32.mrb[17].mxu1  ;;  %v4948_v10 = vmul.f32 %v3585_v4, %v4780_v20 }
 0x1ec   :  { %v3586_v26 = vpop.f32.mrb[18].mxu1  ;;  %3690 = vmatmul.mubr.msk.bf16.gmra.mrb[64].mxu0 %vm141_vm10, %v1505_v55  ;;  %v1482_v35 = vmul.f32 %v1062_v29, %v4782_v24 }
 0x1ed   :  { %v1485_v22 = vmul.f32 %v3586_v26, %v4784_v56  ;;  %v1065_v28 = vpop.f32.mrb[19].mxu1  ;;  %3693 = vmatprep.mubr.msk.bf16.mxu0 %vm141_vm10, %v1506_v30 }
 0x1ee   :  { %v1483_v32 = vmul.f32 %v1065_v28, %v4795_v25 }
 0x1ef   :  { %v1521_v27 = vpack.c.bf16 %v1485_v22, %v4948_v10 }
 0x1f0   :  { %v1520_v31 = vpack.c.bf16 %v1483_v32, %v1482_v35  ;;  %v1531_v32 = vpop.permute.xlu1 %1530 }
 0x1f4   :  { %3694 = vmatmul.mubr.msk.bf16.gmra.mrb[68].mxu0 %vm141_vm10, %v1507_v52 }
 0x1f5   :  { %3697 = vmatprep.mubr.msk.bf16.mxu0 %vm141_vm10, %v1508_v41 }
 0x1f7   :  { %v3589_v55 = vpop.f32.mrb[20].mxu1 }
 0x1f8   :  { %v1078_v14 = vpop.f32.mrb[21].mxu1  ;;  %v1488_v39 = vmul.f32 %v3589_v55, %v4780_v20  ;;  %v1551_v55 = vpop.permute.xlu1 %1550 }
 0x1f9   :  { %v3590_v44 = vpop.f32.mrb[22].mxu1  ;;  %v1486_v30 = vmul.f32 %v1078_v14, %v4782_v24 }
 0x1fa   :  { %v1489_v2 = vmul.f32 %v3590_v44, %v4784_v56  ;;  %v1081_v62 = vpop.f32.mrb[23].mxu1  ;;  %v1536_v44 = vpop.permute.xlu0 %1535 }
 0x1fb   :  { %v1487_v21 = vmul.f32 %v1081_v62, %v4795_v25 }
 0x1fc   :  { %v1523_v36 = vpack.c.bf16 %v1489_v2, %v1488_v39  ;;  %3698 = vmatmul.mubr.msk.bf16.gmra.mrb[72].mxu0 %vm141_vm10, %v1509_v54  ;;  %v5094_v2 = vpop.permute.xlu1 %1555 }
 0x1fd   :  { %v1522_v3 = vpack.c.bf16 %v1487_v21, %v1486_v30  ;;  %3701 = vmatprep.mubr.msk.bf16.mxu0 %vm141_vm10, %v1510_v59 }
 0x1fe   :  { %v1541_v30 = vpop.permute.xlu0 %1540 }
 0x200   :  { %v3593_v52 = vpop.f32.mrb[24].mxu1 }
 0x201   :  { %v1094_v41 = vpop.f32.mrb[25].mxu1  ;;  %v1492_v15 = vmul.f32 %v3593_v52, %v4780_v20  ;;  %v1546_v52 = vpop.permute.xlu1 %1545 }
 0x202   :  { %v3594_v6 = vpop.f32.mrb[26].mxu1  ;;  %v1490_v49 = vmul.f32 %v1094_v41, %v4782_v24  ;;  %v1561_v41 = vpop.permute.xlu0 %1560 }
 0x203   :  { %v1493_v12 = vmul.f32 %v3594_v6, %v4784_v56  ;;  %v1097_v9 = vpop.f32.mrb[27].mxu1 }
 0x204   :  { %v1491_v57 = vmul.f32 %v1097_v9, %v4795_v25  ;;  %3702 = vmatmul.mubr.msk.bf16.gmra.mrb[76].mxu0 %vm141_vm10, %v1511_v42 }
 0x205   :  { %v1525_v11 = vpack.c.bf16 %v1493_v12, %v1492_v15  ;;  %3705 = vmatprep.mubr.msk.bf16.mxu0 %vm141_vm10, %v1512_v5 }
 0x206   :  { %v1524_v7 = vpack.c.bf16 %v1491_v57, %v1490_v49  ;;  %v1566_v49 = vpop.permute.xlu1 %1565  ;;  %v5112_v57 = vpop.permute.xlu0 %1570 }
 0x208   :  { %v4978_v20 = vpop.f32.mrb[28].mxu1 }
 0x209   :  { %6400 = vst [vmem:[#allocation3_spill] sm:$0xff] %v4978_v20  ;;  %v4980_v56 = vpop.f32.mrb[29].mxu1 }
 0x20a   :  { %6401 = vst [vmem:[#allocation4_spill] sm:$0xff] %v4980_v56  ;;  %v4982_v59 = vpop.f32.mrb[30].mxu1  ;;  %v5118_v58 = vpop.permute.xlu1 %1575 }
 0x20b   :  { %6402 = vst [vmem:[#allocation5_spill] sm:$0xff] %v4982_v59  ;;  %v4984_v24 = vpop.f32.mrb[31].mxu1 }
 0x20c   :  { %6403 = vst [vmem:[#allocation6_spill] sm:$0xff] %v4984_v24  ;;  %3706 = vmatmul.mubr.msk.bf16.gmra.mrb[80].mxu0 %vm141_vm10, %v1513_v8 }
 0x20d   :  { %3709 = vmatprep.mubr.msk.bf16.mxu0 %vm141_vm10, %v1514_v48 }
 0x210   :  { %v4994_v33 = vpop.f32.mrb[32].mxu1 }
 0x211   :  { %6404 = vst [vmem:[#allocation7_spill] sm:$0xff] %v4994_v33  ;;  %v4996_v25 = vpop.f32.mrb[33].mxu1 }
 0x212   :  { %6405 = vst [vmem:[#allocation8_spill] sm:$0xff] %v4996_v25  ;;  %v4998_v18 = vpop.f32.mrb[34].mxu1 }
 0x213   :  { %6406 = vst [vmem:[#allocation9_spill] sm:$0xff] %v4998_v18  ;;  %v5000_v42 = vpop.f32.mrb[35].mxu1 }
 0x214   :  { %6407 = vst [vmem:[#allocation10_spill] sm:$0xff] %v5000_v42  ;;  %3710 = vmatmul.mubr.msk.bf16.gmra.mrb[84].mxu0 %vm141_vm10, %v1515_v53 }
 0x215   :  { %3713 = vmatprep.mubr.msk.bf16.mxu0 %vm141_vm10, %v1516_v40 }
 0x218   :  { %v5010_v37 = vpop.f32.mrb[36].mxu1 }
 0x219   :  { %6408 = vst [vmem:[#allocation11_spill] sm:$0xff] %v5010_v37  ;;  %v5012_v16 = vpop.f32.mrb[37].mxu1 }
 0x21a   :  { %6409 = vst [vmem:[#allocation12_spill] sm:$0xff] %v5012_v16  ;;  %v5014_v60 = vpop.f32.mrb[38].mxu1 }
 0x21b   :  { %6410 = vst [vmem:[#allocation13_spill] sm:$0xff] %v5014_v60  ;;  %v5016_v1 = vpop.f32.mrb[39].mxu1 }
 0x21c   :  { %6411 = vst [vmem:[#allocation14_spill] sm:$0xff] %v5016_v1  ;;  %3714 = vmatmul.mubr.msk.bf16.gmra.mrb[88].mxu0 %vm141_vm10, %v1517_v13 }
 0x21d   :  { %3717 = vmatprep.mubr.msk.bf16.mxu0 %vm141_vm10, %v1518_v0 }
 0x220   :  { %v5023_v8 = vpop.f32.mrb[40].mxu1 }
 0x221   :  { %6412 = vst [vmem:[#allocation15_spill] sm:$0xff] %v5023_v8  ;;  %v5025_v5 = vpop.f32.mrb[41].mxu1 }
 0x222   :  { %6413 = vst [vmem:[#allocation16_spill] sm:$0xff] %v5025_v5  ;;  %v5027_v54 = vpop.f32.mrb[42].mxu1 }
 0x223   :  { %6414 = vst [vmem:[#allocation17_spill] sm:$0xff] %v5027_v54  ;;  %v5029_v45 = vpop.f32.mrb[43].mxu1 }
 0x224   :  { %6415 = vst [vmem:[#allocation18_spill] sm:$0xff] %v5029_v45  ;;  %3718 = vmatmul.mubr.msk.bf16.gmra.mrb[92].mxu0 %vm141_vm10, %v1519_v61 }
 0x225   :  { %3721 = vmatprep.mubr.msk.bf16.mxu0 %vm141_vm10, %v1520_v31 }
 0x228   :  { %v5033_v17 = vpop.f32.mrb[44].mxu1 }
 0x229   :  { %6416 = vst [vmem:[#allocation19_spill] sm:$0xff] %v5033_v17  ;;  %v5035_v38 = vpop.f32.mrb[45].mxu1 }
 0x22a   :  { %6417 = vst [vmem:[#allocation20_spill] sm:$0xff] %v5035_v38  ;;  %v5037_v47 = vpop.f32.mrb[46].mxu1 }
 0x22b   :  { %6418 = vst [vmem:[#allocation21_spill] sm:$0xff] %v5037_v47  ;;  %v5039_v53 = vpop.f32.mrb[47].mxu1 }
 0x22c   :  { %6419 = vst [vmem:[#allocation22_spill] sm:$0xff] %v5039_v53  ;;  %3722 = vmatmul.mubr.msk.bf16.gmra.mrb[96].mxu0 %vm141_vm10, %v1521_v27 }
 0x22d   :  { %3725 = vmatprep.mubr.msk.bf16.mxu0 %vm141_vm10, %v1522_v3 }
 0x230   :  { %v5043_v48 = vpop.f32.mrb[48].mxu1 }
 0x231   :  { %6420 = vst [vmem:[#allocation23_spill] sm:$0xff] %v5043_v48  ;;  %v5045_v50 = vpop.f32.mrb[49].mxu1 }
 0x232   :  { %6421 = vst [vmem:[#allocation24_spill] sm:$0xff] %v5045_v50  ;;  %v5047_v34 = vpop.f32.mrb[50].mxu1 }
 0x233   :  { %6422 = vst [vmem:[#allocation25_spill] sm:$0xff] %v5047_v34  ;;  %v5049_v46 = vpop.f32.mrb[51].mxu1 }
 0x234   :  { %6423 = vst [vmem:[#allocation26_spill] sm:$0xff] %v5049_v46  ;;  %3726 = vmatmul.mubr.msk.bf16.gmra.mrb[100].mxu0 %vm141_vm10, %v1523_v36 }
 0x235   :  { %3729 = vmatprep.mubr.msk.bf16.mxu0 %vm141_vm10, %v1524_v7 }
 0x238   :  { %v5053_v19 = vpop.f32.mrb[52].mxu1 }
 0x239   :  { %6424 = vst [vmem:[#allocation27_spill] sm:$0xff] %v5053_v19  ;;  %v5055_v13 = vpop.f32.mrb[53].mxu1 }
 0x23a   :  { %6425 = vst [vmem:[#allocation28_spill] sm:$0xff] %v5055_v13  ;;  %v5057_v40 = vpop.f32.mrb[54].mxu1 }
 0x23b   :  { %6426 = vst [vmem:[#allocation29_spill] sm:$0xff] %v5057_v40  ;;  %v5059_v43 = vpop.f32.mrb[55].mxu1 }
 0x23c   :  { %6427 = vst [vmem:[#allocation30_spill] sm:$0xff] %v5059_v43  ;;  %3730 = vmatmul.mubr.msk.bf16.gmra.mrb[104].mxu0 %vm141_vm10, %v1525_v11 }
 0x240   :  { %v5062_v63 = vpop.f32.mrb[56].mxu1 }
 0x241   :  { %6428 = vst [vmem:[#allocation31_spill] sm:$0xff] %v5062_v63  ;;  %v5064_v23 = vpop.f32.mrb[57].mxu1 }
 0x242   :  { %6429 = vst [vmem:[#allocation32_spill] sm:$0xff] %v5064_v23  ;;  %v5066_v51 = vpop.f32.mrb[58].mxu1 }
 0x243   :  { %6430 = vst [vmem:[#allocation33_spill] sm:$0xff] %v5066_v51  ;;  %v5068_v61 = vpop.f32.mrb[59].mxu1 }
 0x244   :  { %6431 = vst [vmem:[#allocation34_spill] sm:$0xff] %v5068_v61  ;;  %v1586_v61 = vpop.permute.xlu1 %1585 }
 0x248   :  { %v5070_v0 = vpop.f32.mrb[60].mxu1  ;;  %v5137_v1 = vpop.permute.xlu1 %1595 }
 0x249   :  { %6432 = vst [vmem:[#allocation35_spill] sm:$0xff] %v5070_v0  ;;  %v5072_v4 = vpop.f32.mrb[61].mxu1 }
 0x24a   :  { %6433 = vst [vmem:[#allocation36_spill] sm:$0xff] %v5072_v4  ;;  %v5074_v29 = vpop.f32.mrb[62].mxu1 }
 0x24b   :  { %6434 = vst [vmem:[#allocation37_spill] sm:$0xff] %v5074_v29  ;;  %v5076_v26 = vpop.f32.mrb[63].mxu1 }
 0x24c   :  { %6435 = vst [vmem:[#allocation38_spill] sm:$0xff] %v5076_v26  ;;  %v3830_v26 = vld [vmem:[%s6344_s8] sm:$0xff]  }
 0x24d   :  { %3733 = vmatprep.subr.bf16.mxu1 %v3830_v26 }
 0x24e   :  { %3734 = vmatpush3.bf16.msra.mxu1 %v3830_v26 }
 0x250   :  { %v5078_v10 = vpop.f32.mrb[64].mxu1 }
 0x251   :  { %6436 = vst [vmem:[#allocation39_spill] sm:$0xff] %v5078_v10  ;;  %v5080_v22 = vpop.f32.mrb[65].mxu1 }
 0x252   :  { %6437 = vst [vmem:[#allocation40_spill] sm:$0xff] %v5080_v22  ;;  %v5082_v28 = vpop.f32.mrb[66].mxu1 }
 0x253   :  { %6438 = vst [vmem:[#allocation41_spill] sm:$0xff] %v5082_v28  ;;  %v5084_v35 = vpop.f32.mrb[67].mxu1 }
 0x254   :  { %6439 = vst [vmem:[#allocation42_spill] sm:$0xff] %v5084_v35 }
 0x258   :  { %v5086_v27 = vpop.f32.mrb[68].mxu1 }
 0x259   :  { %6440 = vst [vmem:[#allocation43_spill] sm:$0xff] %v5086_v27  ;;  %v5088_v31 = vpop.f32.mrb[69].mxu1 }
 0x25a   :  { %6441 = vst [vmem:[#allocation44_spill] sm:$0xff] %v5088_v31  ;;  %v5090_v14 = vpop.f32.mrb[70].mxu1 }
 0x25b   :  { %6442 = vst [vmem:[#allocation45_spill] sm:$0xff] %v5090_v14  ;;  %v5092_v39 = vpop.f32.mrb[71].mxu1 }
 0x25c   :  { %6443 = vst [vmem:[#allocation46_spill] sm:$0xff] %v5092_v39  ;;  %v1581_v39 = vpop.permute.xlu0 %1580 }
 0x260   :  { %v5096_v62 = vpop.f32.mrb[72].mxu1  ;;  %v5129_v43 = vpop.permute.xlu0 %1590 }
 0x261   :  { %6444 = vst [vmem:[#allocation47_spill] sm:$0xff] %v5096_v62  ;;  %v5098_v21 = vpop.f32.mrb[73].mxu1 }
 0x262   :  { %6445 = vst [vmem:[#allocation48_spill] sm:$0xff] %v5098_v21  ;;  %v5100_v36 = vpop.f32.mrb[74].mxu1 }
 0x263   :  { %6446 = vst [vmem:[#allocation49_spill] sm:$0xff] %v5100_v36  ;;  %v5102_v3 = vpop.f32.mrb[75].mxu1 }
 0x264   :  { %6447 = vst [vmem:[#allocation50_spill] sm:$0xff] %v5102_v3 }
 0x268   :  { %v5104_v6 = vpop.f32.mrb[76].mxu1 }
 0x269   :  { %6448 = vst [vmem:[#allocation51_spill] sm:$0xff] %v5104_v6  ;;  %v5106_v15 = vpop.f32.mrb[77].mxu1 }
 0x26a   :  { %6449 = vst [vmem:[#allocation52_spill] sm:$0xff] %v5106_v15  ;;  %v5108_v12 = vpop.f32.mrb[78].mxu1 }
 0x26b   :  { %6450 = vst [vmem:[#allocation53_spill] sm:$0xff] %v5108_v12  ;;  %v5110_v9 = vpop.f32.mrb[79].mxu1 }
 0x26c   :  { %6451 = vst [vmem:[#allocation54_spill] sm:$0xff] %v5110_v9 }
 0x270   :  { %v5114_v11 = vpop.f32.mrb[80].mxu1 }
 0x271   :  { %6452 = vst [vmem:[#allocation55_spill] sm:$0xff] %v5114_v11  ;;  %v5116_v7 = vpop.f32.mrb[81].mxu1  ;;  %v5149_v11 = vpop.permute.xlu1 %1605 }
 0x272   :  { %6453 = vst [vmem:[#allocation56_spill] sm:$0xff] %v5116_v7  ;;  %v5120_v3 = vpop.f32.mrb[82].mxu1 }
 0x273   :  { %6454 = vst [vmem:[#allocation57_spill] sm:$0xff] %v5120_v3  ;;  %v5122_v35 = vpop.f32.mrb[83].mxu1 }
 0x274   :  { %6455 = vst [vmem:[#allocation58_spill] sm:$0xff] %v5122_v35  ;;  %v5139_v35 = vpop.permute.xlu0 %1600 }
 0x278   :  { %v5127_v9 = vpop.f32.mrb[84].mxu1  ;;  %v5151_v12 = vpop.permute.xlu0 %1610 }
 0x279   :  { %6456 = vst [vmem:[#allocation59_spill] sm:$0xff] %v5127_v9  ;;  %v5131_v46 = vpop.f32.mrb[85].mxu1 }
 0x27a   :  { %6457 = vst [vmem:[#allocation60_spill] sm:$0xff] %v5131_v46  ;;  %v5133_v53 = vpop.f32.mrb[86].mxu1 }
 0x27b   :  { %6458 = vst [vmem:[#allocation61_spill] sm:$0xff] %v5133_v53  ;;  %v5135_v45 = vpop.f32.mrb[87].mxu1  ;;  %v5153_v53 = vpop.permute.xlu1 %1615 }
 0x27c   :  { %6459 = vst [vmem:[#allocation62_spill] sm:$0xff] %v5135_v45  ;;  %v5155_v26 = vpop.permute.xlu0 %1620 }
 0x27f   :  { %v5157_v45 = vpop.permute.xlu1 %1625 }
 0x280   :  { %v5141_v42 = vpop.f32.mrb[88].mxu1  ;;  %v5159_v6 = vpop.permute.xlu0 %1630 }
 0x281   :  { %6460 = vst [vmem:[#allocation63_spill] sm:$0xff] %v5141_v42  ;;  %v5143_v24 = vpop.f32.mrb[89].mxu1 }
 0x282   :  { %6461 = vst [vmem:[#allocation64_spill] sm:$0xff] %v5143_v24  ;;  %v5145_v3 = vpop.f32.mrb[90].mxu1 }
 0x283   :  { %6462 = vst [vmem:[#allocation65_spill] sm:$0xff] %v5145_v3  ;;  %v5147_v9 = vpop.f32.mrb[91].mxu1  ;;  %v5161_v36 = vpop.permute.xlu1 %1635 }
 0x284   :  { %6463 = vst [vmem:[#allocation66_spill] sm:$0xff] %v5147_v9  ;;  %v5163_v62 = vpop.permute.xlu0 %1640 }
 0x287   :  { %v5165_v10 = vpop.permute.xlu1 %1645 }
 0x288   :  { %v5167_v29 = vpop.permute.xlu0 %1650 }
 0x28b   :  { %v5181_v54 = vpop.permute.xlu1 %1655 }
 0x28f   :  { %v5206_v60 = vpop.permute.xlu1 %1665 }
 0x293   :  { %v5228_v59 = vpop.permute.xlu1 %1675 }
 0x297   :  { %v3671_v14 = vpop.f32.mrb[44].mxu0 }
 0x298   :  { %v1984_v27 = vpop.f32.mrb[45].mxu0  ;;  %v5169_v0 = vadd.f32 %v3671_v14, %v1541_v30  ;;  %v5189_v14 = vpop.permute.xlu0 %1660 }
 0x299   :  { %v3672_v28 = vpop.f32.mrb[46].mxu0  ;;  %v5171_v51 = vadd.f32 %v1984_v27, %v1531_v32 }
 0x29a   :  { %v1987_v9 = vpop.f32.mrb[47].mxu0  ;;  %v5173_v40 = vadd.f32 %v3672_v28, %v1546_v52  ;;  %v2301_v8 = vsel %vm141_vm10, %v5169_v0, -inf }
 0x29b   :  { %v5177_v48 = vadd.f32 %v1987_v9, %v1536_v44 }
 0x29c   :  { %v2332_v30 = vsel %vm141_vm10, %v5173_v40, -inf  ;;  %v5210_v37 = vpop.permute.xlu0 %1670 }
 0x29d   :  { %6464 = vst [vmem:[#allocation67_spill] sm:$0xff] %v5177_v48 }
 0x29f   :  { %v3675_v63 = vpop.f32.mrb[48].mxu0 }
 0x2a0   :  { %v5175_v19 = vadd.f32 %v3675_v63, %v1561_v41  ;;  %v2000_v34 = vpop.f32.mrb[49].mxu0  ;;  %v2239_v63 = vsel %vm141_vm10, %v5171_v51, -inf  ;;  %v2270_v41 = vsel %vm141_vm10, %v5177_v48, -inf }
 0x2a1   :  { %v5179_v47 = vadd.f32 %v2000_v34, %v1551_v55  ;;  %v3676_v17 = vpop.f32.mrb[50].mxu0 }
 0x2a2   :  { %v2302_v32 = vsel %vm141_vm10, %v5175_v19, -inf  ;;  %v5187_v27 = vadd.f32 %v3676_v17, %v1566_v49  ;;  %v2003_v28 = vpop.f32.mrb[51].mxu0 }
 0x2a3   :  { %v2303_v44 = vmax.f32 %v2301_v8, %v2302_v32  ;;  %v2240_v34 = vsel %vm141_vm10, %v5179_v47, -inf  ;;  %v5196_v55 = vadd.f32 %v2003_v28, %v5094_v2 }
 0x2a4   :  { %v2241_v52 = vmax.f32 %v2239_v63, %v2240_v34  ;;  %v2333_v17 = vsel %vm141_vm10, %v5187_v27, -inf }
 0x2a5   :  { %6465 = vst [vmem:[#allocation68_spill] sm:$0xff] %v5196_v55  ;;  %v2334_v9 = vmax.f32 %v2332_v30, %v2333_v17  ;;  %v2271_v8 = vsel %vm141_vm10, %v5196_v55, -inf }
 0x2a6   :  { %v2272_v49 = vmax.f32 %v2270_v41, %v2271_v8 }
 0x2a7   :  { %v3679_v32 = vpop.f32.mrb[52].mxu0 }
 0x2a8   :  { %v5208_v2 = vadd.f32 %v3679_v32, %v1581_v39  ;;  %v2016_v28 = vpop.f32.mrb[53].mxu0 }
 0x2a9   :  { %v5213_v63 = vadd.f32 %v2016_v28, %v5112_v57  ;;  %v3680_v34 = vpop.f32.mrb[54].mxu0 }
 0x2aa   :  { %v2304_v18 = vsel %vm141_vm10, %v5208_v2, -inf  ;;  %v5217_v30 = vadd.f32 %v3680_v34, %v1586_v61  ;;  %v2019_v17 = vpop.f32.mrb[55].mxu0  ;;  %v5230_v34 = vpop.permute.xlu0 %1680 }
 0x2ab   :  { %v2305_v33 = vmax.f32 %v2303_v44, %v2304_v18  ;;  %v2242_v41 = vsel %vm141_vm10, %v5213_v63, -inf  ;;  %v5222_v39 = vadd.f32 %v2019_v17, %v5118_v58 }
 0x2ac   :  { %v2243_v8 = vmax.f32 %v2241_v52, %v2242_v41  ;;  %v2335_v32 = vsel %vm141_vm10, %v5217_v30, -inf }
 0x2ad   :  { %6466 = vst [vmem:[#allocation69_spill] sm:$0xff] %v5222_v39  ;;  %v2336_v57 = vmax.f32 %v2334_v9, %v2335_v32  ;;  %v2273_v28 = vsel %vm141_vm10, %v5222_v39, -inf }
 0x2ae   :  { %v2274_v61 = vmax.f32 %v2272_v49, %v2273_v28 }
 0x2af   :  { %v3683_v18 = vpop.f32.mrb[56].mxu0 }
 0x2b0   :  { %v5233_v44 = vadd.f32 %v3683_v18, %v5139_v35  ;;  %v2032_v20 = vpop.f32.mrb[57].mxu0  ;;  %v5248_v35 = vpop.permute.xlu1 %1685 }
 0x2b1   :  { %v5236_v58 = vadd.f32 %v2032_v20, %v5129_v43  ;;  %v3684_v52 = vpop.f32.mrb[58].mxu0  ;;  %v5252_v43 = vpop.permute.xlu0 %1690 }
 0x2b2   :  { %v2306_v9 = vsel %vm141_vm10, %v5233_v44, -inf  ;;  %v5241_v17 = vadd.f32 %v3684_v52, %v5149_v11  ;;  %v2035_v41 = vpop.f32.mrb[59].mxu0 }
 0x2b3   :  { %v2307_v32 = vmax.f32 %v2305_v33, %v2306_v9  ;;  %v2244_v49 = vsel %vm141_vm10, %v5236_v58, -inf  ;;  %v5246_v28 = vadd.f32 %v2035_v41, %v5137_v1 }
 0x2b4   :  { %v2245_v18 = vmax.f32 %v2243_v8, %v2244_v49  ;;  %v2337_v20 = vsel %vm141_vm10, %v5241_v17, -inf  ;;  %v5262_v8 = vpop.permute.xlu1 %1695 }
 0x2b5   :  { %6467 = vst [vmem:[#allocation70_spill] sm:$0xff] %v5246_v28  ;;  %v2338_v3 = vmax.f32 %v2336_v57, %v2337_v20  ;;  %v2275_v11 = vsel %vm141_vm10, %v5246_v28, -inf  ;;  %v5269_v46 = vpop.permute.xlu0 %1700 }
 0x2b6   :  { %v2276_v52 = vmax.f32 %v2274_v61, %v2275_v11 }
 0x2b7   :  { %v3687_v33 = vpop.f32.mrb[60].mxu0 }
 0x2b8   :  { %v5257_v9 = vadd.f32 %v3687_v33, %v5155_v26  ;;  %v2048_v24 = vpop.f32.mrb[61].mxu0  ;;  %v5280_v15 = vpop.permute.xlu1 %1705 }
 0x2b9   :  { %v5260_v1 = vadd.f32 %v2048_v24, %v5151_v12  ;;  %v3688_v41 = vpop.f32.mrb[62].mxu0  ;;  %v5285_v21 = vpop.permute.xlu0 %1710 }
 0x2ba   :  { %v2308_v49 = vsel %vm141_vm10, %v5257_v9, -inf  ;;  %v5267_v57 = vadd.f32 %v3688_v41, %v5157_v45  ;;  %v2051_v20 = vpop.f32.mrb[63].mxu0 }
 0x2bb   :  { %v2309_v61 = vmax.f32 %v2307_v32, %v2308_v49  ;;  %v2246_v26 = vsel %vm141_vm10, %v5260_v1, -inf  ;;  %v5274_v11 = vadd.f32 %v2051_v20, %v5153_v53 }
 0x2bc   :  { %v2247_v24 = vmax.f32 %v2245_v18, %v2246_v26  ;;  %v2339_v12 = vsel %vm141_vm10, %v5267_v57, -inf  ;;  %v5304_v31 = vpop.permute.xlu1 %1715 }
 0x2bd   :  { %6468 = vst [vmem:[#allocation71_spill] sm:$0xff] %v5274_v11  ;;  %v2340_v33 = vmax.f32 %v2338_v3, %v2339_v12  ;;  %v2277_v7 = vsel %vm141_vm10, %v5274_v11, -inf }
 0x2be   :  { %v2278_v45 = vmax.f32 %v2276_v52, %v2277_v7 }
 0x2bf   :  { %v3691_v41 = vpop.f32.mrb[64].mxu0 }
 0x2c0   :  { %v5283_v32 = vadd.f32 %v3691_v41, %v5163_v62  ;;  %v2064_v49 = vpop.f32.mrb[65].mxu0 }
 0x2c1   :  { %v5288_v53 = vadd.f32 %v2064_v49, %v5159_v6  ;;  %v3692_v18 = vpop.f32.mrb[66].mxu0 }
 0x2c2   :  { %v2310_v3 = vsel %vm141_vm10, %v5283_v32, -inf  ;;  %v5293_v20 = vadd.f32 %v3692_v18, %v5165_v10  ;;  %v2067_v7 = vpop.f32.mrb[67].mxu0  ;;  %v1721_v18 = vpop.permute.xlu0 %1720 }
 0x2c3   :  { %v2311_v52 = vmax.f32 %v2309_v61, %v2310_v3  ;;  %v2248_v26 = vsel %vm141_vm10, %v5288_v53, -inf  ;;  %v5298_v62 = vadd.f32 %v2067_v7, %v5161_v36 }
 0x2c4   :  { %v2249_v12 = vmax.f32 %v2247_v24, %v2248_v26  ;;  %v2341_v6 = vsel %vm141_vm10, %v5293_v20, -inf }
 0x2c5   :  { %6469 = vst [vmem:[#allocation72_spill] sm:$0xff] %v5298_v62  ;;  %v2342_v41 = vmax.f32 %v2340_v33, %v2341_v6  ;;  %v2279_v49 = vsel %vm141_vm10, %v5298_v62, -inf }
 0x2c6   :  { %v2280_v10 = vmax.f32 %v2278_v45, %v2279_v49 }
 0x2c7   :  { %v3695_v22 = vpop.f32.mrb[68].mxu0 }
 0x2c8   :  { %v5307_v61 = vadd.f32 %v3695_v22, %v5189_v14  ;;  %v2080_v3 = vpop.f32.mrb[69].mxu0  ;;  %v1726_v22 = vpop.permute.xlu1 %1725 }
 0x2c9   :  { %v5310_v36 = vadd.f32 %v2080_v3, %v5167_v29  ;;  %v3696_v24 = vpop.f32.mrb[70].mxu0  ;;  %v5324_v3 = vpop.permute.xlu0 %1730 }
 0x2ca   :  { %v2312_v7 = vsel %vm141_vm10, %v5307_v61, -inf  ;;  %v5315_v33 = vadd.f32 %v3696_v24, %v5206_v60  ;;  %v2083_v26 = vpop.f32.mrb[71].mxu0 }
 0x2cb   :  { %v2313_v6 = vmax.f32 %v2311_v52, %v2312_v7  ;;  %v2250_v45 = vsel %vm141_vm10, %v5310_v36, -inf  ;;  %v5320_v49 = vadd.f32 %v2083_v26, %v5181_v54 }
 0x2cc   :  { %v2251_v14 = vmax.f32 %v2249_v12, %v2250_v45  ;;  %v2343_v29 = vsel %vm141_vm10, %v5315_v33, -inf  ;;  %v5334_v12 = vpop.permute.xlu1 %1735 }
 0x2cd   :  { %6470 = vst [vmem:[#allocation73_spill] sm:$0xff] %v5320_v49  ;;  %v2344_v4 = vmax.f32 %v2342_v41, %v2343_v29  ;;  %v2281_v60 = vsel %vm141_vm10, %v5320_v49, -inf  ;;  %v1741_v13 = vpop.permute.xlu0 %1740 }
 0x2ce   :  { %v2282_v24 = vmax.f32 %v2280_v10, %v2281_v60 }
 0x2cf   :  { %v3699_v23 = vpop.f32.mrb[72].mxu0 }
 0x2d0   :  { %v5329_v52 = vadd.f32 %v3699_v23, %v5230_v34  ;;  %v2096_v7 = vpop.f32.mrb[73].mxu0 }
 0x2d1   :  { %v5332_v54 = vadd.f32 %v2096_v7, %v5210_v37  ;;  %v3700_v26 = vpop.f32.mrb[74].mxu0 }
 0x2d2   :  { %v2314_v45 = vsel %vm141_vm10, %v5329_v52, -inf  ;;  %v5339_v41 = vadd.f32 %v3700_v26, %v5248_v35  ;;  %v2099_v29 = vpop.f32.mrb[75].mxu0  ;;  %v1746_v26 = vpop.permute.xlu1 %1745 }
 0x2d3   :  { %v2315_v10 = vmax.f32 %v2313_v6, %v2314_v45  ;;  %v2252_v23 = vsel %vm141_vm10, %v5332_v54, -inf  ;;  %v5344_v34 = vadd.f32 %v2099_v29, %v5228_v59  ;;  %v1751_v45 = vpop.permute.xlu0 %1750 }
 0x2d4   :  { %v2253_v37 = vmax.f32 %v2251_v14, %v2252_v23  ;;  %v2345_v60 = vsel %vm141_vm10, %v5339_v41, -inf }
 0x2d5   :  { %6471 = vst [vmem:[#allocation74_spill] sm:$0xff] %v5344_v34  ;;  %v2346_v7 = vmax.f32 %v2344_v4, %v2345_v60  ;;  %v2283_v50 = vsel %vm141_vm10, %v5344_v34, -inf }
 0x2d6   :  { %v2284_v38 = vmax.f32 %v2282_v24, %v2283_v50 }
 0x2d7   :  { %v3703_v35 = vpop.f32.mrb[76].mxu0 }
 0x2d8   :  { %v5351_v5 = vadd.f32 %v3703_v35, %v5269_v46  ;;  %v2112_v6 = vpop.f32.mrb[77].mxu0 }
 0x2d9   :  { %v5354_v16 = vadd.f32 %v2112_v6, %v5252_v43  ;;  %v3704_v59 = vpop.f32.mrb[78].mxu0  ;;  %v1756_v6 = vpop.permute.xlu1 %1755 }
 0x2da   :  { %v2316_v14 = vsel %vm141_vm10, %v5351_v5, -inf  ;;  %v5359_v4 = vadd.f32 %v3704_v59, %v5280_v15  ;;  %v2115_v29 = vpop.f32.mrb[79].mxu0  ;;  %v1761_v15 = vpop.permute.xlu0 %1760 }
 0x2db   :  { %v2317_v23 = vmax.f32 %v2315_v10, %v2316_v14  ;;  %v2254_v50 = vsel %vm141_vm10, %v5354_v16, -inf  ;;  %v5364_v46 = vadd.f32 %v2115_v29, %v5262_v8 }
 0x2dc   :  { %v2255_v24 = vmax.f32 %v2253_v37, %v2254_v50  ;;  %v2347_v43 = vsel %vm141_vm10, %v5359_v4, -inf }
 0x2dd   :  { %6472 = vst [vmem:[#allocation75_spill] sm:$0xff] %v5364_v46  ;;  %v2348_v60 = vmax.f32 %v2346_v7, %v2347_v43  ;;  %v2285_v35 = vsel %vm141_vm10, %v5364_v46, -inf }
 0x2de   :  { %v2286_v25 = vmax.f32 %v2284_v38, %v2285_v35 }
 0x2df   :  { %v3707_v59 = vpop.f32.mrb[80].mxu0 }
 0x2e0   :  { %v5370_v56 = vadd.f32 %v3707_v59, %v1721_v18  ;;  %v2128_v10 = vpop.f32.mrb[81].mxu0  ;;  %v1766_v18 = vpop.permute.xlu1 %1765 }
 0x2e1   :  { %v5373_v14 = vadd.f32 %v2128_v10, %v5285_v21  ;;  %v3708_v8 = vpop.f32.mrb[82].mxu0  ;;  %v1771_v59 = vpop.permute.xlu0 %1770 }
 0x2e2   :  { %v2318_v37 = vsel %vm141_vm10, %v5370_v56, -inf  ;;  %v5377_v29 = vadd.f32 %v3708_v8, %v1726_v22  ;;  %v2131_v7 = vpop.f32.mrb[83].mxu0 }
 0x2e3   :  { %v2319_v50 = vmax.f32 %v2317_v23, %v2318_v37  ;;  %v2256_v43 = vsel %vm141_vm10, %v5373_v14, -inf  ;;  %v5382_v38 = vadd.f32 %v2131_v7, %v5304_v31 }
 0x2e4   :  { %v2257_v35 = vmax.f32 %v2255_v24, %v2256_v43  ;;  %v2349_v21 = vsel %vm141_vm10, %v5377_v29, -inf  ;;  %v1776_v7 = vpop.permute.xlu1 %1775 }
 0x2e5   :  { %6473 = vst [vmem:[#allocation76_spill] sm:$0xff] %v5382_v38  ;;  %v2350_v10 = vmax.f32 %v2348_v60, %v2349_v21  ;;  %v2287_v42 = vsel %vm141_vm10, %v5382_v38, -inf  ;;  %v1781_v60 = vpop.permute.xlu0 %1780 }
 0x2e6   :  { %v2288_v22 = vmax.f32 %v2286_v25, %v2287_v42 }
 0x2e7   :  { %v3711_v8 = vpop.f32.mrb[84].mxu0 }
 0x2e8   :  { %v5388_v46 = vadd.f32 %v3711_v8, %v1741_v13  ;;  %v2144_v23 = vpop.f32.mrb[85].mxu0 }
 0x2e9   :  { %v5391_v37 = vadd.f32 %v2144_v23, %v5324_v3  ;;  %v3712_v31 = vpop.f32.mrb[86].mxu0 }
 0x2ea   :  { %v2320_v24 = vsel %vm141_vm10, %v5388_v46, -inf  ;;  %v5395_v43 = vadd.f32 %v3712_v31, %v1746_v26  ;;  %v2147_v34 = vpop.f32.mrb[87].mxu0  ;;  %v1786_v31 = vpop.permute.xlu1 %1785 }
 0x2eb   :  { %v2321_v21 = vmax.f32 %v2319_v50, %v2320_v24  ;;  %v2258_v25 = vsel %vm141_vm10, %v5391_v37, -inf  ;;  %v5400_v42 = vadd.f32 %v2147_v34, %v5334_v12  ;;  %v1791_v24 = vpop.permute.xlu0 %1790 }
 0x2ec   :  { %v2259_v13 = vmax.f32 %v2257_v35, %v2258_v25  ;;  %v2351_v3 = vsel %vm141_vm10, %v5395_v43, -inf }
 0x2ed   :  { %6474 = vst [vmem:[#allocation77_spill] sm:$0xff] %v5400_v42  ;;  %v2352_v8 = vmax.f32 %v2350_v10, %v2351_v3  ;;  %v2289_v23 = vsel %vm141_vm10, %v5400_v42, -inf }
 0x2ee   :  { %v2290_v38 = vmax.f32 %v2288_v22, %v2289_v23 }
 0x2ef   :  { %v3715_v26 = vpop.f32.mrb[88].mxu0  ;;  %v1801_v42 = vpop.permute.xlu0 %1800 }
 0x2f0   :  { %v5406_v49 = vadd.f32 %v3715_v26, %v1761_v15  ;;  %v2160_v50 = vpop.f32.mrb[89].mxu0  ;;  %v1796_v26 = vpop.permute.xlu1 %1795 }
 0x2f1   :  { %v5408_v62 = vadd.f32 %v2160_v50, %v1751_v45  ;;  %v3716_v11 = vpop.f32.mrb[90].mxu0 }
 0x2f2   :  { %v2322_v12 = vsel %vm141_vm10, %v5406_v49, -inf  ;;  %v5412_v34 = vadd.f32 %v3716_v11, %v1766_v18  ;;  %v2163_v35 = vpop.f32.mrb[91].mxu0 }
 0x2f3   :  { %v2323_v10 = vmax.f32 %v2321_v21, %v2322_v12  ;;  %v2260_v25 = vsel %vm141_vm10, %v5408_v62, -inf  ;;  %v5416_v22 = vadd.f32 %v2163_v35, %v1756_v6 }
 0x2f4   :  { %v2261_v3 = vmax.f32 %v2259_v13, %v2260_v25  ;;  %v2353_v15 = vsel %vm141_vm10, %v5412_v34, -inf }
 0x2f5   :  { %6475 = vst [vmem:[#allocation78_spill] sm:$0xff] %v5416_v22  ;;  %v2354_v23 = vmax.f32 %v2352_v8, %v2353_v15  ;;  %v2291_v45 = vsel %vm141_vm10, %v5416_v22, -inf }
 0x2f6   :  { %v2292_v50 = vmax.f32 %v2290_v38, %v2291_v45  ;;  %v1806_v38 = vpop.permute.xlu1 %1805 }
 0x2f7   :  { %v3719_v11 = vpop.f32.mrb[92].mxu0 }
 0x2f8   :  { %v5422_v18 = vadd.f32 %v3719_v11, %v1781_v60  ;;  %v2176_v21 = vpop.f32.mrb[93].mxu0 }
 0x2f9   :  { %v5424_v12 = vadd.f32 %v2176_v21, %v1771_v59  ;;  %v3720_v28 = vpop.f32.mrb[94].mxu0  ;;  %v1811_v59 = vpop.permute.xlu0 %1810 }
 0x2fa   :  { %v2324_v6 = vsel %vm141_vm10, %v5422_v18, -inf  ;;  %v5428_v13 = vadd.f32 %v3720_v28, %v1786_v31  ;;  %v2179_v35 = vpop.f32.mrb[95].mxu0 }
 0x2fb   :  { %v2325_v8 = vmax.f32 %v2323_v10, %v2324_v6  ;;  %v2262_v25 = vsel %vm141_vm10, %v5424_v12, -inf  ;;  %v5432_v15 = vadd.f32 %v2179_v35, %v1776_v7  ;;  %v1816_v7 = vpop.permute.xlu1 %1815 }
 0x2fc   :  { %6476 = vst [vmem:[#allocation79_spill] sm:$0xff] %v5428_v13  ;;  %v2263_v45 = vmax.f32 %v2261_v3, %v2262_v25  ;;  %v2355_v60 = vsel %vm141_vm10, %v5428_v13, -inf }
 0x2fd   :  { %6477 = vst [vmem:[#allocation80_spill] sm:$0xff] %v5432_v15  ;;  %v2356_v11 = vmax.f32 %v2354_v23, %v2355_v60  ;;  %v2293_v21 = vsel %vm141_vm10, %v5432_v15, -inf  ;;  %v1821_v55 = vpop.permute.xlu0 %1820 }
 0x2fe   :  { %v2294_v22 = vmax.f32 %v2292_v50, %v2293_v21 }
 0x2ff   :  { %v3723_v28 = vpop.f32.mrb[96].mxu0 }
 0x300   :  { %v5438_v31 = vadd.f32 %v3723_v28, %v1801_v42  ;;  %v2192_v10 = vpop.f32.mrb[97].mxu0 }
 0x301   :  { %v5440_v6 = vadd.f32 %v2192_v10, %v1791_v24  ;;  %v3724_v39 = vpop.f32.mrb[98].mxu0 }
 0x302   :  { %v2326_v3 = vsel %vm141_vm10, %v5438_v31, -inf  ;;  %v5444_v35 = vadd.f32 %v3724_v39, %v1806_v38  ;;  %v2195_v25 = vpop.f32.mrb[99].mxu0  ;;  %v1826_v39 = vpop.permute.xlu1 %1825 }
 0x303   :  { %v2327_v23 = vmax.f32 %v2325_v8, %v2326_v3  ;;  %v2264_v60 = vsel %vm141_vm10, %v5440_v6, -inf  ;;  %v5448_v50 = vadd.f32 %v2195_v25, %v1796_v26  ;;  %v1831_v8 = vpop.permute.xlu0 %1830 }
 0x304   :  { %v2265_v42 = vmax.f32 %v2263_v45, %v2264_v60  ;;  %v2357_v24 = vsel %vm141_vm10, %v5444_v35, -inf }
 0x305   :  { %6478 = vst [vmem:[#allocation81_spill] sm:$0xff] %v5448_v50  ;;  %v2358_v21 = vmax.f32 %v2356_v11, %v2357_v24  ;;  %v2295_v28 = vsel %vm141_vm10, %v5448_v50, -inf }
 0x306   :  { %v2296_v10 = vmax.f32 %v2294_v22, %v2295_v28 }
 0x307   :  { %v3727_v15 = vpop.f32.mrb[100].mxu0 }
 0x308   :  { %v5454_v38 = vadd.f32 %v3727_v15, %v1821_v55  ;;  %v2208_v48 = vpop.f32.mrb[101].mxu0 }
 0x309   :  { %v5456_v3 = vadd.f32 %v2208_v48, %v1811_v59  ;;  %v3728_v13 = vpop.f32.mrb[102].mxu0 }
 0x30a   :  { %v2328_v26 = vsel %vm141_vm10, %v5454_v38, -inf  ;;  %v5460_v45 = vadd.f32 %v3728_v13, %v1826_v39  ;;  %v2211_v25 = vpop.f32.mrb[103].mxu0  ;;  %v1841_v13 = vpop.permute.xlu0 %1840 }
 0x30b   :  { %v2329_v11 = vmax.f32 %v2327_v23, %v2328_v26  ;;  %v2266_v60 = vsel %vm141_vm10, %v5456_v3, -inf  ;;  %v5464_v22 = vadd.f32 %v2211_v25, %v1816_v7 }
 0x30c   :  { %6479 = vst [vmem:[#allocation82_spill] sm:$0xff] %v5460_v45  ;;  %v2267_v24 = vmax.f32 %v2265_v42, %v2266_v60  ;;  %v2359_v55 = vsel %vm141_vm10, %v5460_v45, -inf }
 0x30d   :  { %6480 = vst [vmem:[#allocation83_spill] sm:$0xff] %v5464_v22  ;;  %v5468_v15 = vmax.f32 %v2358_v21, %v2359_v55  ;;  %v2297_v48 = vsel %vm141_vm10, %v5464_v22, -inf  ;;  %v1836_v55 = vpop.permute.xlu1 %1835 }
 0x30e   :  { %v5472_v59 = vmax.f32 %v2296_v10, %v2297_v48 }
 0x30f   :  { %v3731_v28 = vpop.f32.mrb[104].mxu0 }
 0x310   :  { %6481 = vst [vmem:[#allocation84_spill] sm:$0xff] %v5472_v59  ;;  %v5474_v39 = vadd.f32 %v3731_v28, %v1841_v13  ;;  %v2224_v23 = vpop.f32.mrb[105].mxu0 }
 0x311   :  { %v5476_v26 = vadd.f32 %v2224_v23, %v1831_v8  ;;  %v3732_v7 = vpop.f32.mrb[106].mxu0  ;;  %v1846_v22 = vpop.permute.xlu1 %1845 }
 0x312   :  { %v2330_v42 = vsel %vm141_vm10, %v5474_v39, -inf  ;;  %v2227_v25 = vpop.f32.mrb[107].mxu0 }
 0x313   :  { %v5480_v60 = vmax.f32 %v2329_v11, %v2330_v42  ;;  %v2268_v21 = vsel %vm141_vm10, %v5476_v26, -inf }
 0x314   :  { %v5484_v10 = vmax.f32 %v2267_v24, %v2268_v21 }
 0x315   :  { %v2365_v48 = vsub.f32 %v5169_v0, %v5480_v60  ;;  %v2369_v8 = vsub.f32 %v5175_v19, %v5480_v60  ;;  %v2373_v13 = vsub.f32 %v5208_v2, %v5480_v60  ;;  %v2377_v28 = vsub.f32 %v5233_v44, %v5480_v60 }
 0x316   :  { %v2381_v11 = vsub.f32 %v5257_v9, %v5480_v60  ;;  %v2385_v23 = vsub.f32 %v5283_v32, %v5480_v60  ;;  %v2389_v24 = vsub.f32 %v5307_v61, %v5480_v60  ;;  %v2393_v0 = vsub.f32 %v5329_v52, %v5480_v60 }
 0x317   :  { %v2397_v19 = vsub.f32 %v5351_v5, %v5480_v60  ;;  %v2401_v2 = vsub.f32 %v5370_v56, %v5480_v60  ;;  %v2405_v44 = vsub.f32 %v5388_v46, %v5480_v60  ;;  %v2409_v9 = vsub.f32 %v5406_v49, %v5480_v60 }
 0x318   :  { %v2413_v32 = vsub.f32 %v5422_v18, %v5480_v60  ;;  %v2417_v61 = vsub.f32 %v5438_v31, %v5480_v60  ;;  %v2421_v52 = vsub.f32 %v5454_v38, %v5480_v60  ;;  %v2425_v5 = vsub.f32 %v5474_v39, %v5480_v60 }
 0x319   :  { %v2431_v42 = vmul.f32 1.442695, %v2365_v48  ;;  %v2439_v56 = vmul.f32 1.442695, %v2369_v8  ;;  %v2447_v21 = vmul.f32 1.442695, %v2373_v13  ;;  %v2363_v46 = vsub.f32 %v5171_v51, %v5484_v10 }
 0x31a   :  { %v2455_v49 = vmul.f32 1.442695, %v2377_v28  ;;  %v2367_v18 = vsub.f32 %v5179_v47, %v5484_v10  ;;  %v2463_v50 = vmul.f32 1.442695, %v2381_v11  ;;  %v5522_v31 = vadd.f32 %v3732_v7, %v1846_v22 }
 0x31b   :  { %3835 = vpow2.f32 %v2431_v42  ;;  %v2471_v38 = vmul.f32 1.442695, %v2385_v23  ;;  %v2479_v59 = vmul.f32 1.442695, %v2389_v24  ;;  %v2487_v45 = vmul.f32 1.442695, %v2393_v0 }
 0x31c   :  { %3837 = vpow2.f32 %v2439_v56  ;;  %v2495_v39 = vmul.f32 1.442695, %v2397_v19  ;;  %v2503_v60 = vmul.f32 1.442695, %v2401_v2  ;;  %v2511_v48 = vmul.f32 1.442695, %v2405_v44 }
 0x31d   :  { %3839 = vpow2.f32 %v2447_v21  ;;  %v2519_v8 = vmul.f32 1.442695, %v2409_v9  ;;  %v2371_v51 = vsub.f32 %v5213_v63, %v5484_v10  ;;  %v2375_v47 = vsub.f32 %v5236_v58, %v5484_v10 }
 0x31e   :  { %3841 = vpow2.f32 %v2455_v49  ;;  %v2379_v22 = vsub.f32 %v5260_v1, %v5484_v10  ;;  %v2383_v7 = vsub.f32 %v5288_v53, %v5484_v10  ;;  %v2387_v13 = vsub.f32 %v5310_v36, %v5484_v10 }
 0x31f   :  { %3843 = vpow2.f32 %v2463_v50  ;;  %v2391_v28 = vsub.f32 %v5332_v54, %v5484_v10  ;;  %v2395_v63 = vsub.f32 %v5354_v16, %v5484_v10  ;;  %v2399_v58 = vsub.f32 %v5373_v14, %v5484_v10 }
 0x320   :  { %3845 = vpow2.f32 %v2471_v38  ;;  %v2403_v1 = vsub.f32 %v5391_v37, %v5484_v10  ;;  %v2407_v53 = vsub.f32 %v5408_v62, %v5484_v10  ;;  %v2411_v36 = vsub.f32 %v5424_v12, %v5484_v10 }
 0x321   :  { %3847 = vpow2.f32 %v2479_v59  ;;  %v2415_v54 = vsub.f32 %v5440_v6, %v5484_v10  ;;  %v2419_v16 = vsub.f32 %v5456_v3, %v5484_v10  ;;  %v2423_v14 = vsub.f32 %v5476_v26, %v5484_v10 }
 0x322   :  { %3849 = vpow2.f32 %v2487_v45  ;;  %v2527_v50 = vmul.f32 1.442695, %v2413_v32  ;;  %v2361_v37 = vsel %vm141_vm10, %v5522_v31, -inf  ;;  %v5554_v59 = vadd.f32 %v2227_v25, %v1836_v55 }
 0x323   :  { %3851 = vpow2.f32 %v2495_v39  ;;  %v2535_v62 = vmul.f32 1.442695, %v2417_v61  ;;  %v2543_v12 = vmul.f32 1.442695, %v2421_v52  ;;  %v2551_v45 = vmul.f32 1.442695, %v2425_v5 }
 0x324   :  { %3853 = vpow2.f32 %v2503_v60  ;;  %v2427_v6 = vmul.f32 1.442695, %v2363_v46  ;;  %v2435_v23 = vmul.f32 1.442695, %v2367_v18  ;;  %v2443_v3 = vmul.f32 1.442695, %v2371_v51 }
 0x325   :  { %v5556_v11 = vpop.eup %3835  ;;  %3855 = vpow2.f32 %v2511_v48  ;;  %v2451_v10 = vmul.f32 1.442695, %v2375_v47  ;;  %v2459_v0 = vmul.f32 1.442695, %v2379_v22  ;;  %v2467_v19 = vmul.f32 1.442695, %v2383_v7 }
 0x326   :  { %v5558_v24 = vpop.eup %3837  ;;  %3857 = vpow2.f32 %v2519_v8  ;;  %v2617_v26 = vsel %vm141_vm10, %v5556_v11, 0.0  ;;  %v2475_v2 = vmul.f32 1.442695, %v2387_v13  ;;  %v2483_v32 = vmul.f32 1.442695, %v2391_v28 }
 0x327   :  { %v5562_v25 = vpop.eup %3839  ;;  %3859 = vpow2.f32 %v2527_v50  ;;  %v2618_v55 = vsel %vm141_vm10, %v5558_v24, 0.0  ;;  %v2491_v61 = vmul.f32 1.442695, %v2395_v63  ;;  %v2499_v42 = vmul.f32 1.442695, %v2399_v58 }
 0x328   :  { %v5566_v44 = vpop.eup %3841  ;;  %3861 = vpow2.f32 %v2535_v62  ;;  %v2619_v9 = vadd.f32 %v2618_v55, %v2617_v26  ;;  %v2620_v5 = vsel %vm141_vm10, %v5562_v25, 0.0  ;;  %v2507_v56 = vmul.f32 1.442695, %v2403_v1 }
 0x329   :  { %v5568_v52 = vpop.eup %3843  ;;  %3863 = vpow2.f32 %v2543_v12  ;;  %v2515_v49 = vmul.f32 1.442695, %v2407_v53  ;;  %v5575_v18 = vmax.f32 %v5468_v15, %v2361_v37  ;;  %v2622_v39 = vsel %vm141_vm10, %v5566_v44, 0.0 }
 0x32a   :  { %v5572_v21 = vpop.eup %3845  ;;  %3865 = vpow2.f32 %v2551_v45  ;;  %v2621_v46 = vadd.f32 %v2620_v5, %v2619_v9  ;;  %v2523_v60 = vmul.f32 1.442695, %v2411_v36  ;;  %v5581_v48 = vmul.f32 1.442695, %v2415_v54  ;;  %v6485_v9 = vld [vmem:[#allocation79_spill] sm:$0xff] }
 0x32b   :  { %v5577_v38 = vpop.eup %3847  ;;  %3867 = vpow2.f32 %v2427_v6  ;;  %v5585_v47 = vmul.f32 1.442695, %v2419_v16  ;;  %v2366_v22 = vsub.f32 %v5173_v40, %v5575_v18  ;;  %v2624_v7 = vsel %vm141_vm10, %v5568_v52, 0.0 }
 0x32c   :  { %v5583_v8 = vpop.eup %3849  ;;  %v2623_v51 = vadd.f32 %v2622_v39, %v2621_v46  ;;  %3869 = vpow2.f32 %v2435_v23  ;;  %v2370_v13 = vsub.f32 %v5187_v27, %v5575_v18  ;;  %v2374_v28 = vsub.f32 %v5217_v30, %v5575_v18  ;;  %v6486_v39 = vld [vmem:[#allocation82_spill] sm:$0xff] }
 0x32d   :  { %v5589_v15 = vpop.eup %3851  ;;  %3871 = vpow2.f32 %v2443_v3  ;;  %v2547_v1 = vmul.f32 1.442695, %v2423_v14  ;;  %v2378_v40 = vsub.f32 %v5241_v17, %v5575_v18  ;;  %v2626_v36 = vsel %vm141_vm10, %v5572_v21, 0.0 }
 0x32e   :  { %v5597_v63 = vpop.eup %3853  ;;  %v2625_v58 = vadd.f32 %v2624_v7, %v2623_v51  ;;  %3873 = vpow2.f32 %v2451_v10  ;;  %v2382_v27 = vsub.f32 %v5267_v57, %v5575_v18  ;;  %v2386_v30 = vsub.f32 %v5293_v20, %v5575_v18 }
 0x32f   :  { %v5601_v53 = vpop.eup %3855  ;;  %3875 = vpow2.f32 %v2459_v0  ;;  %v2390_v14 = vsub.f32 %v5315_v33, %v5575_v18  ;;  %v5615_v17 = vsel %vm141_vm10, %v5554_v59, -inf  ;;  %v2628_v37 = vsel %vm141_vm10, %v5577_v38, 0.0 }
 0x330   :  { %v5609_v54 = vpop.eup %3857  ;;  %v2627_v16 = vadd.f32 %v2626_v36, %v2625_v58  ;;  %3877 = vpow2.f32 %v2467_v19  ;;  %v2394_v57 = vsub.f32 %v5339_v41, %v5575_v18  ;;  %v2398_v62 = vsub.f32 %v5359_v4, %v5575_v18 }
 0x331   :  { %v5617_v50 = vpop.eup %3859  ;;  %3879 = vpow2.f32 %v2475_v2  ;;  %v2630_v6 = vsel %vm141_vm10, %v5583_v8, 0.0  ;;  %v2402_v23 = vsub.f32 %v5377_v29, %v5575_v18  ;;  %v2632_v26 = vsel %vm141_vm10, %v5589_v15, 0.0 }
 0x332   :  { %6482 = vst [vmem:[#allocation85_spill] sm:$0xff] %v5617_v50  ;;  %v5625_v12 = vpop.eup %3861  ;;  %v2629_v45 = vadd.f32 %v2628_v37, %v2627_v16  ;;  %3881 = vpow2.f32 %v2483_v32  ;;  %v2406_v10 = vsub.f32 %v5395_v43, %v5575_v18  ;;  %v2634_v2 = vsel %vm141_vm10, %v5597_v63, 0.0 }
 0x333   :  { %6483 = vst [vmem:[#allocation86_spill] sm:$0xff] %v5625_v12  ;;  %v5631_v3 = vpop.eup %3863  ;;  %3883 = vpow2.f32 %v2491_v61  ;;  %v2636_v61 = vsel %vm141_vm10, %v5601_v53, 0.0  ;;  %v2640_v36 = vsel %vm141_vm10, %v5617_v50, 0.0  ;;  %v2449_v46 = vmul.f32 1.442695, %v2374_v28 }
 0x334   :  { %6484 = vst [vmem:[#allocation87_spill] sm:$0xff] %v5631_v3  ;;  %v5639_v55 = vpop.eup %3865  ;;  %v2631_v19 = vadd.f32 %v2630_v6, %v2629_v45  ;;  %3885 = vpow2.f32 %v2499_v42  ;;  %v2433_v45 = vmul.f32 1.442695, %v2366_v22  ;;  %v2489_v20 = vmul.f32 1.442695, %v2394_v57 }
 0x335   :  { %v5645_v5 = vpop.eup %3867  ;;  %3887 = vpow2.f32 %v2507_v56  ;;  %v2638_v56 = vsel %vm141_vm10, %v5609_v54, 0.0  ;;  %v2497_v33 = vmul.f32 1.442695, %v2398_v62  ;;  %v2505_v41 = vmul.f32 1.442695, %v2402_v23 }
 0x336   :  { %v5653_v7 = vpop.eup %3869  ;;  %v2633_v58 = vadd.f32 %v2632_v26, %v2631_v19  ;;  %3889 = vpow2.f32 %v2515_v49  ;;  %v2555_v42 = vsel %vm141_vm10, %v5645_v5, 0.0  ;;  %v2441_v19 = vmul.f32 1.442695, %v2370_v13 }
 0x337   :  { %v5659_v16 = vpop.eup %3871  ;;  %3891 = vpow2.f32 %v2523_v60  ;;  %v2556_v37 = vsel %vm141_vm10, %v5653_v7, 0.0  ;;  %v2642_v13 = vsel %vm141_vm10, %v5625_v12, 0.0  ;;  %v2513_v4 = vmul.f32 1.442695, %v2406_v10 }
 0x338   :  { %v5665_v6 = vpop.eup %3873  ;;  %v2635_v26 = vadd.f32 %v2634_v2, %v2633_v58  ;;  %3893 = vpow2.f32 %v5581_v48  ;;  %v2557_v49 = vadd.f32 %v2556_v37, %v2555_v42  ;;  %v2558_v60 = vsel %vm141_vm10, %v5659_v16, 0.0 }
 0x339   :  { %v5668_v51 = vpop.eup %3875  ;;  %3895 = vpow2.f32 %v5585_v47  ;;  %v2457_v58 = vmul.f32 1.442695, %v2378_v40  ;;  %v2560_v42 = vsel %vm141_vm10, %v5665_v6, 0.0  ;;  %v2465_v47 = vmul.f32 1.442695, %v2382_v27 }
 0x33a   :  { %v5675_v32 = vpop.eup %3877  ;;  %v2637_v22 = vadd.f32 %v2636_v61, %v2635_v26  ;;  %3897 = vpow2.f32 %v2547_v1  ;;  %v2559_v2 = vadd.f32 %v2558_v60, %v2557_v49  ;;  %v2473_v1 = vmul.f32 1.442695, %v2386_v30 }
 0x33b   :  { %v5677_v48 = vpop.eup %3879  ;;  %3899 = vpow2.f32 %v2433_v45  ;;  %v2644_v61 = vsel %vm141_vm10, %v5631_v3, 0.0  ;;  %v2562_v26 = vsel %vm141_vm10, %v5668_v51, 0.0  ;;  %v2481_v27 = vmul.f32 1.442695, %v2390_v14 }
 0x33c   :  { %v5683_v37 = vpop.eup %3881  ;;  %v2639_v0 = vadd.f32 %v2638_v56, %v2637_v22  ;;  %v2561_v28 = vadd.f32 %v2560_v42, %v2559_v2  ;;  %3901 = vpow2.f32 %v2441_v19  ;;  %v2646_v19 = vsel %vm141_vm10, %v5639_v55, 0.0 }
 0x33d   :  { %v5688_v40 = vpop.eup %3883  ;;  %3903 = vpow2.f32 %v2449_v46  ;;  %v2564_v46 = vsel %vm141_vm10, %v5675_v32, 0.0  ;;  %v2566_v60 = vsel %vm141_vm10, %v5677_v48, 0.0  ;;  %v2568_v22 = vsel %vm141_vm10, %v5683_v37, 0.0 }
 0x33e   :  { %v5697_v56 = vpop.eup %3885  ;;  %v2641_v45 = vadd.f32 %v2640_v36, %v2639_v0  ;;  %v2563_v49 = vadd.f32 %v2562_v26, %v2561_v28  ;;  %3905 = vpow2.f32 %v2457_v58  ;;  %v2570_v29 = vsel %vm141_vm10, %v5688_v40, 0.0 }
 0x33f   :  { %v5702_v30 = vpop.eup %3887  ;;  %3907 = vpow2.f32 %v2465_v47  ;;  %v6492_v43 = vsub.f32 %v5412_v34, %v5575_v18 }
 0x340   :  { %6487 = vst [vmem:[#allocation79_spill] sm:$0xff] %v5702_v30  ;;  %v5711_v14 = vpop.eup %3889  ;;  %v2643_v0 = vadd.f32 %v2642_v13, %v2641_v45  ;;  %v2565_v36 = vadd.f32 %v2564_v46, %v2563_v49  ;;  %3909 = vpow2.f32 %v2473_v1  ;;  %v2572_v13 = vsel %vm141_vm10, %v5697_v56, 0.0 }
 0x341   :  { %6488 = vst [vmem:[#allocation82_spill] sm:$0xff] %v5711_v14  ;;  %v5716_v57 = vpop.eup %3891  ;;  %3911 = vpow2.f32 %v2481_v27  ;;  %v2574_v42 = vsel %vm141_vm10, %v5702_v30, 0.0  ;;  %v2521_v10 = vmul.f32 1.442695, %v6492_v43  ;;  %v2576_v45 = vsel %vm141_vm10, %v5711_v14, 0.0 }
 0x342   :  { %6489 = vst [vmem:[#allocation88_spill] sm:$0xff] %v5716_v57  ;;  %v5725_v62 = vpop.eup %3893  ;;  %v2645_v2 = vadd.f32 %v2644_v61, %v2643_v0  ;;  %v2567_v58 = vadd.f32 %v2566_v60, %v2565_v36  ;;  %3913 = vpow2.f32 %v2489_v20  ;;  %v6494_v61 = vsub.f32 %v6485_v9, %v5575_v18  ;;  %v6499_v0 = vld [vmem:[#allocation84_spill] sm:$0xff] }
 0x343   :  { %6490 = vst [vmem:[#allocation89_spill] sm:$0xff] %v5725_v62  ;;  %v5729_v23 = vpop.eup %3895  ;;  %3915 = vpow2.f32 %v2497_v33  ;;  %v6496_v49 = vsub.f32 %v5444_v35, %v5575_v18  ;;  %v6497_v20 = vsub.f32 %v6486_v39, %v5575_v18  ;;  %v5759_v36 = vmax.f32 %v6499_v0, %v5615_v17  ;;  %v6509_v0 = vld [vmem:[#allocation70_spill] sm:$0xff] }
 0x344   :  { %6491 = vst [vmem:[#allocation90_spill] sm:$0xff] %v5729_v23  ;;  %v5738_v47 = vpop.eup %3897  ;;  %v2647_v28 = vadd.f32 %v2646_v19, %v2645_v2  ;;  %v2569_v1 = vadd.f32 %v2568_v22, %v2567_v58  ;;  %3917 = vpow2.f32 %v2505_v41  ;;  %v2529_v26 = vmul.f32 1.442695, %v6494_v61 }
 0x345   :  { %6493 = vst [vmem:[#allocation91_spill] sm:$0xff] %v5738_v47  ;;  %v5743_v27 = vpop.eup %3899  ;;  %3919 = vpow2.f32 %v2513_v4  ;;  %v2537_v34 = vmul.f32 1.442695, %v6496_v49  ;;  %v2545_v19 = vmul.f32 1.442695, %v6497_v20  ;;  %v2578_v35 = vsel %vm141_vm10, %v5716_v57, 0.0 }
 0x346   :  { %6495 = vst [vmem:[#allocation92_spill] sm:$0xff] %v5743_v27  ;;  %v5753_v46 = vpop.eup %3901  ;;  %3921 = vrcp.f32 %v2647_v28  ;;  %v2571_v33 = vadd.f32 %v2570_v29, %v2569_v1  ;;  %v2648_v9 = vsel %vm141_vm10, %v5743_v27, 0.0  ;;  %v2580_v39 = vsel %vm141_vm10, %v5725_v62, 0.0  ;;  %v6505_v1 = vld [vmem:[#allocation68_spill] sm:$0xff] }
 0x347   :  { %6498 = vst [vmem:[#allocation93_spill] sm:$0xff] %v5753_v46  ;;  %v5761_v41 = vpop.eup %3903  ;;  %3923 = vpow2.f32 %v2521_v10  ;;  %v2649_v60 = vsel %vm141_vm10, %v5753_v46, 0.0  ;;  %v6502_v17 = vsub.f32 %v5522_v31, %v5575_v18  ;;  %v6504_v10 = vld [vmem:[#allocation67_spill] sm:$0xff]  ;;  %v2368_v61 = vsub.f32 %v6505_v1, %v5759_v36  ;;  %v6512_v1 = vld [vmem:[#allocation72_spill] sm:$0xff] }
 0x348   :  { %6500 = vst [vmem:[#allocation84_spill] sm:$0xff] %v5761_v41  ;;  %v5769_v22 = vpop.eup %3905  ;;  %v2573_v4 = vadd.f32 %v2572_v13, %v2571_v33  ;;  %3925 = vpow2.f32 %v2529_v26  ;;  %v2650_v58 = vadd.f32 %v2649_v60, %v2648_v9  ;;  %v2651_v43 = vsel %vm141_vm10, %v5761_v41, 0.0  ;;  %v6508_v33 = vld [vmem:[#allocation69_spill] sm:$0xff]  ;;  %v6519_v46 = vld [vmem:[#allocation80_spill] sm:$0xff] }
 0x349   :  { %6501 = vst [vmem:[#allocation94_spill] sm:$0xff] %v5769_v22  ;;  %v2553_v2 = vmul.f32 1.442695, %v6502_v17  ;;  %v5774_v29 = vpop.eup %3907  ;;  %3927 = vpow2.f32 %v2537_v34  ;;  %v2364_v28 = vsub.f32 %v6504_v10, %v5759_v36  ;;  %v2582_v31 = vsel %vm141_vm10, %v5729_v23, 0.0 }
 0x34a   :  { %6503 = vst [vmem:[#allocation95_spill] sm:$0xff] %v5774_v29  ;;  %v5782_v49 = vpop.eup %3909  ;;  %v2575_v13 = vadd.f32 %v2574_v42, %v2573_v4  ;;  %3929 = vpow2.f32 %v2545_v19  ;;  %v2652_v18 = vadd.f32 %v2651_v43, %v2650_v58  ;;  %v2584_v34 = vsel %vm141_vm10, %v5738_v47, 0.0  ;;  %v6511_v58 = vld [vmem:[#allocation71_spill] sm:$0xff] }
 0x34b   :  { %6506 = vst [vmem:[#allocation67_spill] sm:$0xff] %v5782_v49  ;;  %v5786_v26 = vpop.eup %3911  ;;  %v2653_v20 = vsel %vm141_vm10, %v5769_v22, 0.0  ;;  %v2372_v9 = vsub.f32 %v6508_v33, %v5759_v36  ;;  %v2376_v60 = vsub.f32 %v6509_v0, %v5759_v36  ;;  %v2655_v19 = vsel %vm141_vm10, %v5774_v29, 0.0  ;;  %v6513_v33 = vld [vmem:[#allocation73_spill] sm:$0xff]  ;;  %v6514_v0 = vld [vmem:[#allocation74_spill] sm:$0xff] }
 0x34c   :  { %6507 = vst [vmem:[#allocation68_spill] sm:$0xff] %v5786_v26  ;;  %v5796_v42 = vpop.eup %3913  ;;  %v2577_v4 = vadd.f32 %v2576_v45, %v2575_v13  ;;  %v2654_v17 = vadd.f32 %v2653_v20, %v2652_v18  ;;  %v2380_v43 = vsub.f32 %v6511_v58, %v5759_v36  ;;  %3931 = vpow2.f32 %v2553_v2  ;;  %v6515_v58 = vld [vmem:[#allocation75_spill] sm:$0xff] }
 0x34d   :  { %6510 = vst [vmem:[#allocation69_spill] sm:$0xff] %v5796_v42  ;;  %v5802_v10 = vpop.eup %3915  ;;  %v2384_v3 = vsub.f32 %v6512_v1, %v5759_v36  ;;  %v2388_v12 = vsub.f32 %v6513_v33, %v5759_v36  ;;  %v2392_v50 = vsub.f32 %v6514_v0, %v5759_v36  ;;  %v2657_v20 = vsel %vm141_vm10, %v5782_v49, 0.0  ;;  %v6516_v33 = vld [vmem:[#allocation76_spill] sm:$0xff]  ;;  %v6517_v0 = vld [vmem:[#allocation77_spill] sm:$0xff] }
 0x34e   :  { %v5810_v45 = vpop.eup %3917  ;;  %v2579_v13 = vadd.f32 %v2578_v35, %v2577_v4  ;;  %v2656_v18 = vadd.f32 %v2655_v19, %v2654_v17  ;;  %v2396_v29 = vsub.f32 %v6515_v58, %v5759_v36  ;;  %v2659_v1 = vsel %vm141_vm10, %v5786_v26, 0.0  ;;  %v6518_v35 = vld [vmem:[#allocation78_spill] sm:$0xff] }
 0x34f   :  { %v5816_v2 = vpop.eup %3919  ;;  %v2400_v22 = vsub.f32 %v6516_v33, %v5759_v36  ;;  %v2404_v41 = vsub.f32 %v6517_v0, %v5759_v36  ;;  %v2408_v4 = vsub.f32 %v6518_v35, %v5759_v36  ;;  %v2661_v58 = vsel %vm141_vm10, %v5796_v42, 0.0  ;;  %v6520_v0 = vld [vmem:[#allocation81_spill] sm:$0xff]  ;;  %v6521_v35 = vld [vmem:[#allocation83_spill] sm:$0xff] }
 0x350   :  { %v5826_v17 = vpop.eup %3921  ;;  %v2581_v19 = vadd.f32 %v2580_v39, %v2579_v13  ;;  %v2658_v49 = vadd.f32 %v2657_v20, %v2656_v18  ;;  %v2412_v27 = vsub.f32 %v6519_v46, %v5759_v36  ;;  %v2416_v47 = vsub.f32 %v6520_v0, %v5759_v36 }
 0x351   :  { %v5832_v26 = vpop.eup %3923  ;;  %v2745_v33 = vmul.f32 %v5826_v17, %v5639_v55  ;;  %v2420_v23 = vsub.f32 %v6521_v35, %v5759_v36  ;;  %v2424_v39 = vsub.f32 %v5554_v59, %v5759_v36  ;;  %v2663_v46 = vsel %vm141_vm10, %v5802_v10, 0.0  ;;  %v6522_v55 = vld [vmem:[#allocation63_spill] sm:$0xff] }
 0x352   :  { %v5842_v13 = vpop.eup %3925  ;;  %v2583_v18 = vadd.f32 %v2582_v31, %v2581_v19  ;;  %v2660_v20 = vadd.f32 %v2659_v1, %v2658_v49  ;;  %v2429_v42 = vmul.f32 1.442695, %v2364_v28  ;;  %v2665_v0 = vsel %vm141_vm10, %v5810_v45, 0.0 }
 0x353   :  { %v5846_v62 = vpop.eup %3927  ;;  %v5849_v57 = vmul.f32 %v6522_v55, %v2745_v33  ;;  %v2437_v35 = vmul.f32 1.442695, %v2368_v61  ;;  %v2445_v14 = vmul.f32 1.442695, %v2372_v9  ;;  %v2667_v49 = vsel %vm141_vm10, %v5816_v2, 0.0 }
 0x354   :  { %v5853_v30 = vpop.eup %3929  ;;  %v2585_v59 = vadd.f32 %v2584_v34, %v2583_v18  ;;  %v2662_v36 = vadd.f32 %v2661_v58, %v2660_v20  ;;  %3933 = vpow2.f32 %v2429_v42  ;;  %v2669_v28 = vsel %vm141_vm10, %v5832_v26, 0.0 }
 0x355   :  { %6523 = vst [vmem:[#allocation70_spill] sm:$0xff] %v5849_v57  ;;  %6524 = vst [vmem:[#allocation71_spill] sm:$0xff] %v5853_v30  ;;  %v2671_v31 = vsel %vm141_vm10, %v5842_v13, 0.0  ;;  %3935 = vpow2.f32 %v2437_v35  ;;  %v2453_v1 = vmul.f32 1.442695, %v2376_v60  ;;  %v2673_v61 = vsel %vm141_vm10, %v5846_v62, 0.0 }
 0x356   :  { %3937 = vrcp.f32 %v2585_v59  ;;  %v2664_v19 = vadd.f32 %v2663_v46, %v2662_v36  ;;  %v2461_v9 = vmul.f32 1.442695, %v2380_v43  ;;  %v5863_v34 = vpop.eup %3931  ;;  %v2675_v58 = vsel %vm141_vm10, %v5853_v30, 0.0 }
 0x357   :  { %3939 = vpow2.f32 %v2445_v14  ;;  %v2469_v42 = vmul.f32 1.442695, %v2384_v3  ;;  %v2477_v33 = vmul.f32 1.442695, %v2388_v12  ;;  %v2485_v20 = vmul.f32 1.442695, %v2392_v50 }
 0x358   :  { %v2666_v18 = vadd.f32 %v2665_v0, %v2664_v19  ;;  %3941 = vpow2.f32 %v2453_v1  ;;  %v2493_v55 = vmul.f32 1.442695, %v2396_v29  ;;  %v2501_v60 = vmul.f32 1.442695, %v2400_v22 }
 0x359   :  { %3943 = vpow2.f32 %v2461_v9  ;;  %v2509_v35 = vmul.f32 1.442695, %v2404_v41  ;;  %v2517_v46 = vmul.f32 1.442695, %v2408_v4  ;;  %v2525_v36 = vmul.f32 1.442695, %v2412_v27 }
 0x35a   :  { %v2668_v59 = vadd.f32 %v2667_v49, %v2666_v18  ;;  %3945 = vpow2.f32 %v2469_v42  ;;  %v2533_v43 = vmul.f32 1.442695, %v2416_v47  ;;  %v2541_v57 = vmul.f32 1.442695, %v2420_v23 }
 0x35b   :  { %3947 = vpow2.f32 %v2477_v33  ;;  %v5869_v30 = vmul.f32 %v5826_v17, %v5556_v11  ;;  %v5873_v12 = vmul.f32 %v5826_v17, %v5558_v24  ;;  %v2549_v3 = vmul.f32 1.442695, %v2424_v39 }
 0x35c   :  { %v2670_v50 = vadd.f32 %v2669_v28, %v2668_v59  ;;  %v5877_v14 = vmul.f32 %v5826_v17, %v5562_v25  ;;  %v5881_v27 = vmul.f32 %v5826_v17, %v5566_v44  ;;  %3949 = vpow2.f32 %v2485_v20 }
 0x35d   :  { %v5885_v23 = vmul.f32 %v5826_v17, %v5568_v52  ;;  %v5889_v11 = vmul.f32 %v5826_v17, %v5572_v21  ;;  %v5893_v24 = vmul.f32 %v5826_v17, %v5577_v38  ;;  %3951 = vpow2.f32 %v2493_v55 }
 0x35e   :  { %v5895_v47 = vpop.eup %3933  ;;  %v2672_v25 = vadd.f32 %v2671_v31, %v2670_v50  ;;  %v5899_v44 = vmul.f32 %v5826_v17, %v5583_v8  ;;  %v5903_v52 = vmul.f32 %v5826_v17, %v5589_v15  ;;  %3953 = vpow2.f32 %v2501_v60  ;;  %v6530_v50 = vld [vmem:[#allocation88_spill] sm:$0xff] }
 0x35f   :  { %v5905_v41 = vpop.eup %3935  ;;  %v2586_v21 = vsel %vm141_vm10, %v5895_v47, 0.0  ;;  %v5911_v38 = vmul.f32 %v5826_v17, %v5597_v63  ;;  %v5915_v22 = vmul.f32 %v5826_v17, %v5601_v53  ;;  %3955 = vpow2.f32 %v2509_v35 }
 0x360   :  { %v3938_v8 = vpop.eup %3937  ;;  %v2674_v29 = vadd.f32 %v2673_v61, %v2672_v25  ;;  %v2587_v15 = vsel %vm141_vm10, %v5905_v41, 0.0  ;;  %v5921_v4 = vmul.f32 %v5826_v17, %v5609_v54  ;;  %3957 = vpow2.f32 %v2517_v46  ;;  %v6527_v46 = vld [vmem:[#allocation79_spill] sm:$0xff]  ;;  %v6531_v25 = vld [vmem:[#allocation89_spill] sm:$0xff] }
 0x361   :  { %v5923_v39 = vpop.eup %3939  ;;  %v2588_v0 = vadd.f32 %v2587_v15, %v2586_v21  ;;  %v2683_v63 = vmul.f32 %v3938_v8, %v5645_v5  ;;  %v2687_v49 = vmul.f32 %v3938_v8, %v5653_v7  ;;  %3959 = vpow2.f32 %v2525_v36 }
 0x362   :  { %v5927_v53 = vpop.eup %3941  ;;  %v2676_v28 = vadd.f32 %v2675_v58, %v2674_v29  ;;  %v2589_v31 = vsel %vm141_vm10, %v5923_v39, 0.0  ;;  %v2691_v1 = vmul.f32 %v3938_v8, %v5659_v16  ;;  %v2677_v54 = vsel %vm141_vm10, %v5863_v34, 0.0  ;;  %v6533_v29 = vld [vmem:[#allocation90_spill] sm:$0xff] }
 0x363   :  { %v5932_v19 = vpop.eup %3943  ;;  %3961 = vpow2.f32 %v2533_v43  ;;  %v2590_v61 = vadd.f32 %v2589_v31, %v2588_v0  ;;  %v2695_v5 = vmul.f32 %v3938_v8, %v5665_v6  ;;  %v2591_v58 = vsel %vm141_vm10, %v5927_v53, 0.0  ;;  %v6534_v0 = vld [vmem:[#allocation91_spill] sm:$0xff] }
 0x364   :  { %v5937_v9 = vpop.eup %3945  ;;  %v2678_v7 = vadd.f32 %v2677_v54, %v2676_v28  ;;  %3963 = vpow2.f32 %v2541_v57  ;;  %v2699_v42 = vmul.f32 %v3938_v8, %v5668_v51  ;;  %v2703_v18 = vmul.f32 %v3938_v8, %v5675_v32  ;;  %v6535_v54 = vld [vmem:[#allocation4_spill] sm:$0xff] }
 0x365   :  { %6525 = vst [vmem:[#allocation72_spill] sm:$0xff] %v5937_v9  ;;  %v5942_v33 = vpop.eup %3947  ;;  %3965 = vpow2.f32 %v2549_v3  ;;  %v2592_v16 = vadd.f32 %v2591_v58, %v2590_v61  ;;  %v2707_v20 = vmul.f32 %v3938_v8, %v5677_v48  ;;  %v2593_v6 = vsel %vm141_vm10, %v5932_v19, 0.0  ;;  %v6529_v48 = vld [vmem:[#allocation82_spill] sm:$0xff] }
 0x366   :  { %6526 = vst [vmem:[#allocation73_spill] sm:$0xff] %v5942_v33  ;;  %3967 = vrcp.f32 %v2678_v7  ;;  %v2711_v55 = vmul.f32 %v3938_v8, %v5683_v37  ;;  %v2715_v57 = vmul.f32 %v3938_v8, %v5688_v40  ;;  %v5950_v60 = vpop.eup %3949  ;;  %v2719_v51 = vmul.f32 %v3938_v8, %v5697_v56  ;;  %v6536_v7 = vld [vmem:[#allocation8_spill] sm:$0xff] }
 0x367   :  { %v2594_v35 = vadd.f32 %v2593_v6, %v2592_v16  ;;  %v2723_v59 = vmul.f32 %v3938_v8, %v6527_v46  ;;  %v5954_v36 = vpop.eup %3951  ;;  %v2595_v32 = vsel %vm141_vm10, %v5937_v9, 0.0  ;;  %v2727_v43 = vmul.f32 %v3938_v8, %v6529_v48  ;;  %v6537_v16 = vld [vmem:[#allocation12_spill] sm:$0xff] }
 0x368   :  { %6528 = vst [vmem:[#allocation74_spill] sm:$0xff] %v5954_v36  ;;  %v2731_v3 = vmul.f32 %v3938_v8, %v6530_v50  ;;  %v2735_v37 = vmul.f32 %v3938_v8, %v6531_v25  ;;  %v5961_v21 = vpop.eup %3953  ;;  %v2739_v15 = vmul.f32 %v3938_v8, %v6533_v29  ;;  %v2743_v56 = vmul.f32 %v3938_v8, %v6534_v0  ;;  %v6539_v50 = vld [vmem:[#allocation16_spill] sm:$0xff] }
 0x369   :  { %6532 = vst [vmem:[#allocation75_spill] sm:$0xff] %v5961_v21  ;;  %v2596_v40 = vadd.f32 %v2595_v32, %v2594_v35  ;;  %v5965_v28 = vpop.eup %3955  ;;  %v2597_v31 = vsel %vm141_vm10, %v5942_v33, 0.0  ;;  %v2747_v61 = vmul.f32 %v2683_v63, %v6535_v54  ;;  %v2751_v58 = vmul.f32 %v2687_v49, %v6536_v7  ;;  %v6540_v32 = vld [vmem:[#allocation20_spill] sm:$0xff] }
 0x36a   :  { %v2755_v6 = vmul.f32 %v2691_v1, %v6537_v16  ;;  %v5972_v46 = vpop.eup %3957  ;;  %v2759_v35 = vmul.f32 %v2695_v5, %v6539_v50  ;;  %v2763_v25 = vmul.f32 %v2699_v42, %v6540_v32  ;;  %v2599_v8 = vsel %vm141_vm10, %v5950_v60, 0.0  ;;  %v6542_v0 = vld [vmem:[#allocation24_spill] sm:$0xff] }
 0x36b   :  { %6538 = vst [vmem:[#allocation76_spill] sm:$0xff] %v5972_v46  ;;  %v2598_v48 = vadd.f32 %v2597_v31, %v2596_v40  ;;  %v5976_v29 = vpop.eup %3959  ;;  %v2767_v33 = vmul.f32 %v2703_v18, %v6542_v0  ;;  %v6543_v9 = vld [vmem:[#allocation28_spill] sm:$0xff]  ;;  %v2601_v40 = vsel %vm141_vm10, %v5954_v36, 0.0  ;;  %v2603_v32 = vsel %vm141_vm10, %v5961_v21, 0.0 }
 0x36c   :  { %6541 = vst [vmem:[#allocation77_spill] sm:$0xff] %v5976_v29  ;;  %v2771_v63 = vmul.f32 %v2707_v20, %v6543_v9  ;;  %v6544_v54 = vld [vmem:[#allocation32_spill] sm:$0xff] }
 0x36d   :  { %v2775_v49 = vmul.f32 %v2711_v55, %v6544_v54  ;;  %v5983_v7 = vpop.eup %3961  ;;  %v2600_v1 = vadd.f32 %v2599_v8, %v2598_v48  ;;  %v6546_v5 = vld [vmem:[#allocation36_spill] sm:$0xff] }
 0x36e   :  { %6545 = vst [vmem:[#allocation78_spill] sm:$0xff] %v5983_v7  ;;  %v2779_v31 = vmul.f32 %v2715_v57, %v6546_v5  ;;  %v6547_v42 = vld [vmem:[#allocation40_spill] sm:$0xff]  ;;  %v5989_v50 = vpop.eup %3963  ;;  %v2605_v57 = vsel %vm141_vm10, %v5965_v28, 0.0 }
 0x36f   :  { %v2783_v16 = vmul.f32 %v2719_v51, %v6547_v42  ;;  %6548 = vst [vmem:[#allocation80_spill] sm:$0xff] %v5989_v50  ;;  %v6549_v18 = vld [vmem:[#allocation44_spill] sm:$0xff]  ;;  %v5998_v48 = vpop.eup %3965  ;;  %v2602_v8 = vadd.f32 %v2601_v40, %v2600_v1  ;;  %v2812_v1 = vsel %vm141_vm10, %v2751_v58, 0.0 }
 0x370   :  { %v2787_v0 = vmul.f32 %v2723_v59, %v6549_v18  ;;  %v6550_v9 = vld [vmem:[#allocation48_spill] sm:$0xff]  ;;  %6552 = vst [vmem:[#allocation81_spill] sm:$0xff] %v5998_v48  ;;  %v3968_v21 = vpop.eup %3967  ;;  %v2607_v59 = vsel %vm141_vm10, %v5972_v46, 0.0 }
 0x371   :  { %v2791_v20 = vmul.f32 %v2727_v43, %v6550_v9  ;;  %v6551_v55 = vld [vmem:[#allocation52_spill] sm:$0xff]  ;;  %v2746_v40 = vmul.f32 %v3968_v21, %v5863_v34  ;;  %v2604_v9 = vadd.f32 %v2603_v32, %v2602_v8  ;;  %v2816_v8 = vsel %vm141_vm10, %v2759_v35, 0.0 }
 0x372   :  { %v5996_v54 = vmul.f32 %v2731_v3, %v6551_v55  ;;  %v6553_v5 = vld [vmem:[#allocation56_spill] sm:$0xff]  ;;  %v2811_v3 = vsel %vm141_vm10, %v2747_v61, 0.0  ;;  %v2814_v61 = vsel %vm141_vm10, %v2755_v6, 0.0  ;;  %v2828_v6 = vsel %vm141_vm10, %v2783_v16, 0.0 }
 0x373   :  { %v6003_v51 = vmul.f32 %v2735_v37, %v6553_v5  ;;  %v6554_v42 = vld [vmem:[#allocation60_spill] sm:$0xff]  ;;  %v2609_v37 = vsel %vm141_vm10, %v5976_v29, 0.0  ;;  %v2813_v55 = vadd.f32 %v2812_v1, %v2811_v3  ;;  %v2613_v5 = vsel %vm141_vm10, %v5989_v50, 0.0  ;;  %v6566_v29 = vld [vmem:[#allocation69_spill] sm:$0xff] }
 0x374   :  { %v6006_v36 = vmul.f32 %v2739_v15, %v6554_v42  ;;  %v6555_v43 = vld [vmem:[#allocation64_spill] sm:$0xff]  ;;  %v2611_v15 = vsel %vm141_vm10, %v5983_v7, 0.0  ;;  %v6557_v42 = vld [vmem:[#allocation65_spill] sm:$0xff]  ;;  %v2606_v34 = vadd.f32 %v2605_v57, %v2604_v9  ;;  %v2820_v3 = vsel %vm141_vm10, %v2767_v33, 0.0 }
 0x375   :  { %v6011_v18 = vmul.f32 %v2743_v56, %v6555_v43  ;;  %v2615_v56 = vsel %vm141_vm10, %v5998_v48, 0.0  ;;  %v6026_v58 = vmul.f32 %v6557_v42, %v2746_v40  ;;  %v2815_v32 = vadd.f32 %v2814_v61, %v2813_v55  ;;  %v6559_v9 = vld [vmem:[#allocation92_spill] sm:$0xff]  ;;  %v6560_v55 = vld [vmem:[#allocation93_spill] sm:$0xff] }
 0x376   :  { %v2818_v43 = vsel %vm141_vm10, %v2763_v25, 0.0  ;;  %v2822_v1 = vsel %vm141_vm10, %v2771_v63, 0.0  ;;  %v2608_v50 = vadd.f32 %v2607_v59, %v2606_v34  ;;  %v2826_v48 = vsel %vm141_vm10, %v2779_v31, 0.0  ;;  %v6561_v42 = vld [vmem:[#allocation84_spill] sm:$0xff]  ;;  %v6563_v59 = vld [vmem:[#allocation95_spill] sm:$0xff] }
 0x377   :  { %6556 = vst [vmem:[#allocation83_spill] sm:$0xff] %v6011_v18  ;;  %6558 = vst [vmem:[#allocation63_spill] sm:$0xff] %v6026_v58  ;;  %v2824_v18 = vsel %vm141_vm10, %v2775_v49, 0.0  ;;  %v2817_v7 = vadd.f32 %v2816_v8, %v2815_v32  ;;  %v2830_v40 = vsel %vm141_vm10, %v2787_v0, 0.0  ;;  %v2832_v57 = vsel %vm141_vm10, %v2791_v20, 0.0  ;;  %v6562_v58 = vld [vmem:[#allocation94_spill] sm:$0xff] }
 0x378   :  { %v2686_v35 = vmul.f32 %v3968_v21, %v6559_v9  ;;  %v2690_v25 = vmul.f32 %v3968_v21, %v6560_v55  ;;  %v2610_v61 = vadd.f32 %v2609_v37, %v2608_v50  ;;  %v2694_v63 = vmul.f32 %v3968_v21, %v6561_v42  ;;  %v6564_v32 = vld [vmem:[#allocation67_spill] sm:$0xff]  ;;  %v6565_v8 = vld [vmem:[#allocation68_spill] sm:$0xff]  ;;  %v6567_v37 = vld [vmem:[#allocation85_spill] sm:$0xff] }
 0x379   :  { %v2819_v33 = vadd.f32 %v2818_v43, %v2817_v7  ;;  %v2698_v49 = vmul.f32 %v3968_v21, %v6562_v58  ;;  %v2702_v34 = vmul.f32 %v3968_v21, %v6563_v59  ;;  %v2706_v31 = vmul.f32 %v3968_v21, %v6564_v32  ;;  %v6568_v32 = vld [vmem:[#allocation86_spill] sm:$0xff] }
 0x37a   :  { %v2710_v16 = vmul.f32 %v3968_v21, %v6565_v8  ;;  %v2714_v0 = vmul.f32 %v3968_v21, %v6566_v29  ;;  %v2612_v46 = vadd.f32 %v2611_v15, %v2610_v61  ;;  %v2718_v9 = vmul.f32 %v3968_v21, %v5802_v10 }
 0x37b   :  { %v2821_v20 = vadd.f32 %v2820_v3, %v2819_v33  ;;  %v2722_v55 = vmul.f32 %v3968_v21, %v5810_v45  ;;  %v2726_v7 = vmul.f32 %v3968_v21, %v5816_v2  ;;  %v2730_v50 = vmul.f32 %v3968_v21, %v5832_v26  ;;  %v6569_v3 = vld [vmem:[#allocation87_spill] sm:$0xff]  ;;  %v6572_v33 = vld [vmem:[#allocation5_spill] sm:$0xff] }
 0x37c   :  { %v2733_v58 = vmul.f32 %v5826_v17, %v6567_v37  ;;  %v2734_v43 = vmul.f32 %v3968_v21, %v5842_v13  ;;  %v2614_v42 = vadd.f32 %v2613_v5, %v2612_v46  ;;  %v2737_v29 = vmul.f32 %v5826_v17, %v6568_v32  ;;  %v6570_v45 = vld [vmem:[#allocation71_spill] sm:$0xff] }
 0x37d   :  { %v2823_v59 = vadd.f32 %v2822_v1, %v2821_v20  ;;  %v2738_v15 = vmul.f32 %v3968_v21, %v5846_v62  ;;  %v2741_v10 = vmul.f32 %v5826_v17, %v6569_v3  ;;  %v2742_v61 = vmul.f32 %v3968_v21, %v6570_v45  ;;  %v6571_v2 = vld [vmem:[#allocation3_spill] sm:$0xff]  ;;  %v6574_v1 = vld [vmem:[#allocation9_spill] sm:$0xff] }
 0x37e   :  { %v2749_v26 = vmul.f32 %v6571_v2, %v5869_v30  ;;  %v6061_v8 = vmul.f32 %v6572_v33, %v2686_v35  ;;  %v2616_v37 = vadd.f32 %v2615_v56, %v2614_v42  ;;  %v6573_v46 = vld [vmem:[#allocation7_spill] sm:$0xff]  ;;  %v6066_v20 = vmul.f32 %v6574_v1, %v2690_v25  ;;  %v6576_v17 = vld [vmem:[#allocation13_spill] sm:$0xff] }
 0x37f   :  { %v2825_v13 = vadd.f32 %v2824_v18, %v2823_v59  ;;  %v2753_v5 = vmul.f32 %v6573_v46, %v5873_v12  ;;  %v6575_v62 = vld [vmem:[#allocation11_spill] sm:$0xff]  ;;  %v6071_v3 = vmul.f32 %v6576_v17, %v2694_v63  ;;  %v6578_v35 = vld [vmem:[#allocation17_spill] sm:$0xff] }
 0x380   :  { %v2757_v32 = vmul.f32 %v6575_v62, %v5877_v14  ;;  %v6577_v21 = vld [vmem:[#allocation15_spill] sm:$0xff]  ;;  %v6078_v45 = vmul.f32 %v6578_v35, %v2698_v49  ;;  %3969 = vrcp.f32 %v2616_v37  ;;  %v6580_v25 = vld [vmem:[#allocation21_spill] sm:$0xff] }
 0x381   :  { %v6075_v30 = vmul.f32 %v6577_v21, %v5881_v27  ;;  %v2827_v18 = vadd.f32 %v2826_v48, %v2825_v13  ;;  %v6579_v12 = vld [vmem:[#allocation19_spill] sm:$0xff]  ;;  %v6085_v42 = vmul.f32 %v6580_v25, %v2702_v34  ;;  %v6582_v59 = vld [vmem:[#allocation25_spill] sm:$0xff] }
 0x382   :  { %v6082_v56 = vmul.f32 %v6579_v12, %v5885_v23  ;;  %v6581_v14 = vld [vmem:[#allocation23_spill] sm:$0xff]  ;;  %v6092_v2 = vmul.f32 %v6582_v59, %v2706_v31  ;;  %v6584_v33 = vld [vmem:[#allocation29_spill] sm:$0xff] }
 0x383   :  { %v6089_v63 = vmul.f32 %v6581_v14, %v5889_v11  ;;  %v6583_v27 = vld [vmem:[#allocation27_spill] sm:$0xff]  ;;  %v6099_v48 = vmul.f32 %v6584_v33, %v2710_v16  ;;  %v2829_v37 = vadd.f32 %v2828_v6, %v2827_v18  ;;  %v6586_v34 = vld [vmem:[#allocation33_spill] sm:$0xff] }
 0x384   :  { %v6096_v49 = vmul.f32 %v6583_v27, %v5893_v24  ;;  %v6585_v23 = vld [vmem:[#allocation31_spill] sm:$0xff]  ;;  %v6106_v46 = vmul.f32 %v6586_v34, %v2714_v0  ;;  %v6588_v31 = vld [vmem:[#allocation37_spill] sm:$0xff] }
 0x385   :  { %v6103_v13 = vmul.f32 %v6585_v23, %v5899_v44  ;;  %v6587_v11 = vld [vmem:[#allocation35_spill] sm:$0xff]  ;;  %v6113_v62 = vmul.f32 %v6588_v31, %v2718_v9  ;;  %v6590_v16 = vld [vmem:[#allocation41_spill] sm:$0xff]  ;;  %v2831_v0 = vadd.f32 %v2830_v40, %v2829_v37 }
 0x386   :  { %v6110_v1 = vmul.f32 %v6587_v11, %v5903_v52  ;;  %v6589_v24 = vld [vmem:[#allocation39_spill] sm:$0xff]  ;;  %v6120_v6 = vmul.f32 %v6590_v16, %v2722_v55  ;;  %v6592_v35 = vld [vmem:[#allocation45_spill] sm:$0xff] }
 0x387   :  { %v6117_v17 = vmul.f32 %v6589_v24, %v5911_v38  ;;  %v6591_v44 = vld [vmem:[#allocation43_spill] sm:$0xff]  ;;  %v6127_v18 = vmul.f32 %v6592_v35, %v2726_v7  ;;  %v6594_v9 = vld [vmem:[#allocation49_spill] sm:$0xff]  ;;  %v2833_v7 = vadd.f32 %v2832_v57, %v2831_v0  ;;  %v2876_v57 = vsel %vm141_vm10, %v2757_v32, 0.0  ;;  %v6604_v0 = vld [vmem:[#allocation72_spill] sm:$0xff] }
 0x388   :  { %v6124_v21 = vmul.f32 %v6591_v44, %v5915_v22  ;;  %v6593_v52 = vld [vmem:[#allocation47_spill] sm:$0xff]  ;;  %v6134_v25 = vmul.f32 %v6594_v9, %v2730_v50  ;;  %v6596_v55 = vld [vmem:[#allocation53_spill] sm:$0xff]  ;;  %v2873_v50 = vsel %vm141_vm10, %v2749_v26, 0.0  ;;  %v6606_v9 = vld [vmem:[#allocation74_spill] sm:$0xff] }
 0x389   :  { %v6131_v12 = vmul.f32 %v6593_v52, %v5921_v4  ;;  %v6595_v38 = vld [vmem:[#allocation51_spill] sm:$0xff]  ;;  %v6140_v59 = vmul.f32 %v6596_v55, %v2734_v43  ;;  %v6599_v40 = vld [vmem:[#allocation57_spill] sm:$0xff]  ;;  %v2874_v43 = vsel %vm141_vm10, %v2753_v5, 0.0 }
 0x38a   :  { %v6137_v14 = vmul.f32 %v6595_v38, %v2733_v58  ;;  %v6598_v27 = vld [vmem:[#allocation55_spill] sm:$0xff]  ;;  %v6146_v33 = vmul.f32 %v6599_v40, %v2738_v15  ;;  %v6602_v4 = vld [vmem:[#allocation61_spill] sm:$0xff]  ;;  %v2834_v58 = vsel %vm141_vm10, %v5996_v54, 0.0  ;;  %v2836_v15 = vsel %vm141_vm10, %v6003_v51, 0.0  ;;  %v3970_v31 = vpop.eup %3969 }
 0x38b   :  { %6597 = vst [vmem:[#allocation79_spill] sm:$0xff] %v6140_v59  ;;  %v6143_v22 = vmul.f32 %v6598_v27, %v2737_v29  ;;  %v6601_v37 = vld [vmem:[#allocation59_spill] sm:$0xff]  ;;  %v6152_v34 = vmul.f32 %v6602_v4, %v2742_v61  ;;  %v2835_v11 = vadd.f32 %v2834_v58, %v2833_v7  ;;  %v2875_v29 = vadd.f32 %v2874_v43, %v2873_v50  ;;  %v6605_v35 = vld [vmem:[#allocation73_spill] sm:$0xff]  ;;  %v6608_v27 = vld [vmem:[#allocation76_spill] sm:$0xff] }
 0x38c   :  { %6600 = vst [vmem:[#allocation82_spill] sm:$0xff] %v6146_v33  ;;  %v6149_v23 = vmul.f32 %v6601_v37, %v2741_v10  ;;  %v2838_v61 = vsel %vm141_vm10, %v6006_v36, 0.0  ;;  %v2684_v26 = vmul.f32 %v3970_v31, %v5895_v47  ;;  %v2688_v16 = vmul.f32 %v3970_v31, %v5905_v41  ;;  %v6607_v36 = vld [vmem:[#allocation75_spill] sm:$0xff]  ;;  %v6609_v40 = vld [vmem:[#allocation77_spill] sm:$0xff]  ;;  %v6610_v7 = vld [vmem:[#allocation78_spill] sm:$0xff] }
 0x38d   :  { %6603 = vst [vmem:[#allocation88_spill] sm:$0xff] %v6152_v34  ;;  %v2837_v10 = vadd.f32 %v2836_v15, %v2835_v11  ;;  %v2877_v24 = vadd.f32 %v2876_v57, %v2875_v29  ;;  %v2692_v54 = vmul.f32 %v3970_v31, %v5923_v39  ;;  %v2696_v5 = vmul.f32 %v3970_v31, %v5927_v53  ;;  %v6611_v37 = vld [vmem:[#allocation80_spill] sm:$0xff]  ;;  %v6612_v4 = vld [vmem:[#allocation81_spill] sm:$0xff]  ;;  %v6613_v58 = vld [vmem:[#allocation6_spill] sm:$0xff] }
 0x38e   :  { %v2700_v44 = vmul.f32 %v3970_v31, %v5932_v19  ;;  %v2704_v51 = vmul.f32 %v3970_v31, %v6604_v0  ;;  %v2708_v32 = vmul.f32 %v3970_v31, %v6605_v35  ;;  %v2712_v52 = vmul.f32 %v3970_v31, %v5950_v60  ;;  %v6614_v11 = vld [vmem:[#allocation10_spill] sm:$0xff] }
 0x38f   :  { %v2716_v38 = vmul.f32 %v3970_v31, %v6606_v9  ;;  %v2720_v55 = vmul.f32 %v3970_v31, %v6607_v36  ;;  %v2724_v47 = vmul.f32 %v3970_v31, %v5965_v28  ;;  %v2728_v41 = vmul.f32 %v3970_v31, %v6608_v27  ;;  %v6615_v29 = vld [vmem:[#allocation14_spill] sm:$0xff] }
 0x390   :  { %v2732_v39 = vmul.f32 %v3970_v31, %v6609_v40  ;;  %v2736_v53 = vmul.f32 %v3970_v31, %v6610_v7  ;;  %v2740_v19 = vmul.f32 %v3970_v31, %v6611_v37  ;;  %v2744_v50 = vmul.f32 %v3970_v31, %v6612_v4  ;;  %v6616_v57 = vld [vmem:[#allocation18_spill] sm:$0xff] }
 0x391   :  { %v2748_v43 = vmul.f32 %v2684_v26, %v6613_v58  ;;  %v2752_v60 = vmul.f32 %v2688_v16, %v6614_v11  ;;  %v2756_v15 = vmul.f32 %v2692_v54, %v6615_v29  ;;  %v2760_v0 = vmul.f32 %v2696_v5, %v6616_v57  ;;  %v6617_v35 = vld [vmem:[#allocation22_spill] sm:$0xff] }
 0x392   :  { %v2764_v28 = vmul.f32 %v2700_v44, %v6617_v35  ;;  %v6618_v9 = vld [vmem:[#allocation26_spill] sm:$0xff]  ;;  %v2905_v35 = vsel %vm141_vm10, %v6066_v20, 0.0  ;;  %v2909_v20 = vsel %vm141_vm10, %v6078_v45, 0.0  ;;  %v2913_v45 = vsel %vm141_vm10, %v6092_v2, 0.0 }
 0x393   :  { %v2768_v36 = vmul.f32 %v2704_v51, %v6618_v9  ;;  %v6619_v27 = vld [vmem:[#allocation30_spill] sm:$0xff]  ;;  %v2917_v2 = vsel %vm141_vm10, %v6106_v46, 0.0  ;;  %v2896_v46 = vsel %vm141_vm10, %v6137_v14, 0.0 }
 0x394   :  { %v2772_v40 = vmul.f32 %v2708_v32, %v6619_v27  ;;  %v6620_v34 = vld [vmem:[#allocation34_spill] sm:$0xff] }
 0x395   :  { %v2776_v7 = vmul.f32 %v2712_v52, %v6620_v34  ;;  %v6621_v33 = vld [vmem:[#allocation38_spill] sm:$0xff]  ;;  %v2839_v34 = vadd.f32 %v2838_v61, %v2837_v10  ;;  %v6629_v52 = vld [vmem:[#allocation83_spill] sm:$0xff]  ;;  %v2849_v61 = vsel %vm141_vm10, %v2764_v28, 0.0 }
 0x396   :  { %v2780_v37 = vmul.f32 %v2716_v38, %v6621_v33  ;;  %v6622_v59 = vld [vmem:[#allocation42_spill] sm:$0xff]  ;;  %v2842_v33 = vsel %vm141_vm10, %v2748_v43, 0.0  ;;  %v2840_v38 = vsel %vm141_vm10, %v6629_v52, 0.0  ;;  %v2880_v43 = vsel %vm141_vm10, %v6082_v56, 0.0 }
 0x397   :  { %v2784_v31 = vmul.f32 %v2720_v55, %v6622_v59  ;;  %v6623_v4 = vld [vmem:[#allocation46_spill] sm:$0xff]  ;;  %v2843_v59 = vsel %vm141_vm10, %v2752_v60, 0.0  ;;  %v2904_v60 = vsel %vm141_vm10, %v6061_v8, 0.0  ;;  %v2884_v8 = vsel %vm141_vm10, %v6096_v49, 0.0 }
 0x398   :  { %v2788_v26 = vmul.f32 %v2724_v47, %v6623_v4  ;;  %v6624_v58 = vld [vmem:[#allocation50_spill] sm:$0xff]  ;;  %v2844_v55 = vadd.f32 %v2843_v59, %v2842_v33  ;;  %v6207_v47 = vadd.f32 %v2840_v38, %v2839_v34  ;;  %v2906_v27 = vadd.f32 %v2905_v35, %v2904_v60 }
 0x399   :  { %v2792_v16 = vmul.f32 %v2728_v41, %v6624_v58  ;;  %v6625_v11 = vld [vmem:[#allocation54_spill] sm:$0xff]  ;;  %v2845_v41 = vsel %vm141_vm10, %v2756_v15, 0.0  ;;  %v2853_v58 = vsel %vm141_vm10, %v2772_v40, 0.0  ;;  %v2857_v33 = vsel %vm141_vm10, %v2780_v37, 0.0 }
 0x39a   :  { %v6192_v54 = vmul.f32 %v2732_v39, %v6625_v11  ;;  %v6626_v5 = vld [vmem:[#allocation58_spill] sm:$0xff]  ;;  %v2846_v39 = vadd.f32 %v2845_v41, %v2844_v55  ;;  %v2888_v49 = vsel %vm141_vm10, %v6110_v1, 0.0  ;;  %v2859_v38 = vsel %vm141_vm10, %v2784_v31, 0.0 }
 0x39b   :  { %v6195_v29 = vmul.f32 %v2736_v53, %v6626_v5  ;;  %v6627_v44 = vld [vmem:[#allocation62_spill] sm:$0xff]  ;;  %v2847_v53 = vsel %vm141_vm10, %v2760_v0, 0.0  ;;  %v2851_v0 = vsel %vm141_vm10, %v2768_v36, 0.0  ;;  %v2892_v1 = vsel %vm141_vm10, %v6124_v21, 0.0 }
 0x39c   :  { %v6198_v51 = vmul.f32 %v2740_v19, %v6627_v44  ;;  %v6628_v32 = vld [vmem:[#allocation66_spill] sm:$0xff]  ;;  %v2878_v19 = vsel %vm141_vm10, %v6075_v30, 0.0  ;;  %v2882_v30 = vsel %vm141_vm10, %v6089_v63, 0.0  ;;  %v2855_v44 = vsel %vm141_vm10, %v2776_v7, 0.0 }
 0x39d   :  { %v6201_v57 = vmul.f32 %v2744_v50, %v6628_v32  ;;  %v2848_v50 = vadd.f32 %v2847_v53, %v2846_v39  ;;  %v2879_v10 = vadd.f32 %v2878_v19, %v2877_v24  ;;  %v2907_v24 = vsel %vm141_vm10, %v6071_v3, 0.0 }
 0x39e   :  { %v2908_v56 = vadd.f32 %v2907_v24, %v2906_v27  ;;  %v2886_v63 = vsel %vm141_vm10, %v6103_v13, 0.0  ;;  %v2911_v3 = vsel %vm141_vm10, %v6085_v42, 0.0  ;;  %v2890_v13 = vsel %vm141_vm10, %v6117_v17, 0.0 }
 0x39f   :  { %v2850_v15 = vadd.f32 %v2849_v61, %v2848_v50  ;;  %v2881_v9 = vadd.f32 %v2880_v43, %v2879_v10  ;;  %v2915_v42 = vsel %vm141_vm10, %v6099_v48, 0.0  ;;  %v2861_v39 = vsel %vm141_vm10, %v2788_v26, 0.0 }
 0x3a0   :  { %v2910_v36 = vadd.f32 %v2909_v20, %v2908_v56  ;;  %v2863_v50 = vsel %vm141_vm10, %v2792_v16, 0.0  ;;  %v2894_v17 = vsel %vm141_vm10, %v6131_v12, 0.0  ;;  %v2919_v48 = vsel %vm141_vm10, %v6113_v62, 0.0  ;;  %v6632_v20 = vld [vmem:[#allocation82_spill] sm:$0xff] }
 0x3a1   :  { %v2852_v28 = vadd.f32 %v2851_v0, %v2850_v15  ;;  %v2883_v4 = vadd.f32 %v2882_v30, %v2881_v9  ;;  %v2865_v21 = vsel %vm141_vm10, %v6192_v54, 0.0  ;;  %v2921_v43 = vsel %vm141_vm10, %v6120_v6, 0.0 }
 0x3a2   :  { %v2912_v40 = vadd.f32 %v2911_v3, %v2910_v36  ;;  %v2867_v12 = vsel %vm141_vm10, %v6195_v29, 0.0  ;;  %v2898_v62 = vsel %vm141_vm10, %v6143_v22, 0.0  ;;  %v2923_v15 = vsel %vm141_vm10, %v6127_v18, 0.0 }
 0x3a3   :  { %v2854_v11 = vadd.f32 %v2853_v58, %v2852_v28  ;;  %v2885_v5 = vadd.f32 %v2884_v8, %v2883_v4  ;;  %v2869_v14 = vsel %vm141_vm10, %v6198_v51, 0.0  ;;  %v2900_v6 = vsel %vm141_vm10, %v6149_v23, 0.0  ;;  %v6630_v28 = vld [vmem:[#allocation70_spill] sm:$0xff]  ;;  %v6631_v4 = vld [vmem:[#allocation79_spill] sm:$0xff] }
 0x3a4   :  { %v2914_v7 = vadd.f32 %v2913_v45, %v2912_v40  ;;  %v2925_v0 = vsel %vm141_vm10, %v6134_v25, 0.0  ;;  %v2902_v22 = vsel %vm141_vm10, %v6630_v28, 0.0  ;;  %v2871_v18 = vsel %vm141_vm10, %v6201_v57, 0.0 }
 0x3a5   :  { %v2856_v32 = vadd.f32 %v2855_v44, %v2854_v11  ;;  %v2887_v34 = vadd.f32 %v2886_v63, %v2885_v5  ;;  %v2927_v56 = vsel %vm141_vm10, %v6631_v4, 0.0  ;;  %v2929_v23 = vsel %vm141_vm10, %v6632_v20, 0.0  ;;  %v6633_v5 = vld [vmem:[#allocation88_spill] sm:$0xff]  ;;  %v6634_v63 = vld [vmem:[#allocation63_spill] sm:$0xff] }
 0x3a6   :  { %v2916_v37 = vadd.f32 %v2915_v42, %v2914_v7  ;;  %v2931_v36 = vsel %vm141_vm10, %v6633_v5, 0.0  ;;  %v2933_v57 = vsel %vm141_vm10, %v6634_v63, 0.0 }
 0x3a7   :  { %v2858_v59 = vadd.f32 %v2857_v33, %v2856_v32  ;;  %v2889_v52 = vadd.f32 %v2888_v49, %v2887_v34  ;;  %v3831_v34 = vld [vmem:[%s6345_s9] sm:$0xff]  }
 0x3a8   :  { %v2918_v31 = vadd.f32 %v2917_v2, %v2916_v37  ;;  %3739 = vmatprep.subr.bf16.mxu1 %v3831_v34  ;;  %v3971_v33 = vld [vmem:[%s6341_s12] sm:$0xff] }
 0x3a9   :  { %v2860_v55 = vadd.f32 %v2859_v38, %v2858_v59  ;;  %v2891_v41 = vadd.f32 %v2890_v13, %v2889_v52  ;;  %v3375_v2 = vld [vmem:[%s6347_s13] ss:$0 sm:$0xff] }
 0x3aa   :  { %v2920_v26 = vadd.f32 %v2919_v48, %v2918_v31 }
 0x3ab   :  { %v2862_v53 = vadd.f32 %v2861_v39, %v2860_v55  ;;  %v2893_v19 = vadd.f32 %v2892_v1, %v2891_v41  ;;  %v3832_v39 = vld [vmem:[%s6346_s10] sm:$0xff]   ;;  %v3833_v1 = vld [vmem:[%s6346_s10 + $0x8] sm:$0xff]  }
 0x3ac   :  { %v2922_v35 = vadd.f32 %v2921_v43, %v2920_v26 }
 0x3ad   :  { %v2864_v10 = vadd.f32 %v2863_v50, %v2862_v53  ;;  %v2895_v61 = vadd.f32 %v2894_v17, %v2893_v19 }
 0x3ae   :  { %v2924_v27 = vadd.f32 %v2923_v15, %v2922_v35  ;;  %v3834_v35 = vld [vmem:[%s6348_s11] sm:$0xff]  }
 0x3af   :  { %v2866_v60 = vadd.f32 %v2865_v21, %v2864_v10  ;;  %v2897_v16 = vadd.f32 %v2896_v46, %v2895_v61 }
 0x3b0   :  { %v2926_v24 = vadd.f32 %v2925_v0, %v2924_v27 }
 0x3b1   :  { %v2868_v9 = vadd.f32 %v2867_v12, %v2866_v60  ;;  %v2899_v54 = vadd.f32 %v2898_v62, %v2897_v16 }
 0x3b2   :  { %v2928_v8 = vadd.f32 %v2927_v56, %v2926_v24 }
 0x3b3   :  { %v2870_v30 = vadd.f32 %v2869_v14, %v2868_v9  ;;  %v2901_v29 = vadd.f32 %v2900_v6, %v2899_v54 }
 0x3b4   :  { %v2930_v11 = vadd.f32 %v2929_v23, %v2928_v8 }
 0x3b5   :  { %v2872_v58 = vadd.f32 %v2871_v18, %v2870_v30  ;;  %v2903_v51 = vadd.f32 %v2902_v22, %v2901_v29 }
 0x3b6   :  { %v2932_v44 = vadd.f32 %v2931_v36, %v2930_v11 }
 0x3b7   :  { %v2935_v25 = vpack.c.bf16 %v2872_v58, %v6207_v47  ;;  %v6635_v47 = vld [vmem:[#allocation2_spill] sm:$0xff] }
 0x3b8   :  { %v2934_v3 = vadd.f32 %v2933_v57, %v2932_v44  ;;  %v2941_v40 = vsub.s32 2, %v6635_v47  ;;  %v3088_v12 = vsub.s32 3, %v6635_v47  ;;  %v3164_v15 = vsub.s32 4, %v6635_v47  ;;  %v3383_v57 = vld [vmem:[%s6349_s14] ss:$0 sm:$0xff] }
 0x3b9   :  { %3735 = vmatprep.mubr.msk.bf16.mxu1 %vm141_vm10, %v2935_v25  ;;  %v3172_v14 = vsub.s32 5, %v6635_v47 }
 0x3ba   :  { %v2936_v32 = vpack.c.bf16 %v2934_v3, %v2903_v51  ;;  %v2942_v49 = vrot.slane %v3971_v33, %v2941_v40  ;;  %v3089_v62 = vrot.slane %v3971_v33, %v3088_v12  ;;  %v3165_v27 = vrot.slane %v3971_v33, %v3164_v15 }
 0x3bb   :  { %v3173_v56 = vrot.slane %v3971_v33, %v3172_v14 }
 0x3bc   :  { %3736 = vmatmul.mubr.msk.bf16.vlgmr.msra.gmra.mrb[92].mxu1 %vm141_vm10, %v2936_v32 }
 0x3bd   :  { %3740 = vmatpush3.bf16.msra.mxu1 %v3831_v34 }
 0x3be   :  { %3745 = vmatprep.subr.bf16.mxu1 %v3832_v39 }
 0x48f   :  { %v3737_v45 = vpop.f32.mrb[92].mxu1 }
 0x490   :  { %v2989_v59 = vpop.f32.mrb[93].mxu1  ;;  %v2998_v55 = vadd.f32 %v3737_v45, %v2942_v49 }
 0x491   :  { %v3738_v52 = vpop.f32.mrb[94].mxu1  ;;  %v2990_v13 = vadd.f32 %v2989_v59, %v2942_v49 }
 0x492   :  { %v3001_v7 = vadd.f32 %v3738_v52, %v2942_v49  ;;  %v2992_v38 = vpop.f32.mrb[95].mxu1 }
 0x493   :  { %v2993_v42 = vadd.f32 %v2992_v38, %v2942_v49 }
 0x494   :  { %v3005_v37 = vpack.c.bf16 %v3001_v7, %v2998_v55 }
 0x495   :  { %v3004_v41 = vpack.c.bf16 %v2993_v42, %v2990_v13 }
 0x497   :  { %3741 = vmatprep.mubr.msk.bf16.mxu1 %vm141_vm10, %v3004_v41 }
 0x498   :  { %3742 = vmatmul.mubr.msk.bf16.vlgmr.msra.gmra.mrb[96].mxu1 %vm141_vm10, %v3005_v37 }
 0x499   :  { %3746 = vmatpush3.bf16.msra.mxu1 %v3832_v39 }
 0x49a   :  { %3747 = vmatprep.subr.bf16.mxu1 %v3833_v1 }
 0x49d   :  { %3748 = vmatpush3.bf16.msra.mxu1 %v3833_v1 }
 0x49e   :  { %3753 = vmatprep.subr.bf16.mxu1 %v3834_v35 }
 0x56b   :  { %v3743_v53 = vpop.f32.mrb[96].mxu1 }
 0x56c   :  { %v3070_v19 = vadd.f32 %v3743_v53, %v3375_v2  ;;  %v3061_v31 = vpop.f32.mrb[97].mxu1 }
 0x56d   :  { %v3062_v50 = vadd.f32 %v3375_v2, %v3061_v31  ;;  %v3744_v17 = vpop.f32.mrb[98].mxu1 }
 0x56e   :  { %v3073_v48 = vadd.f32 %v3744_v17, %v3375_v2  ;;  %v3064_v10 = vpop.f32.mrb[99].mxu1  ;;  %v3078_v26 = vmax.f32 %v3070_v19, 0.0 }
 0x56f   :  { %v3065_v61 = vadd.f32 %v3375_v2, %v3064_v10  ;;  %v3076_v46 = vmax.f32 %v3062_v50, 0.0 }
 0x570   :  { %v3079_v21 = vmax.f32 %v3073_v48, 0.0 }
 0x571   :  { %v3077_v43 = vmax.f32 %v3065_v61, 0.0 }
 0x572   :  { %v3081_v60 = vpack.c.bf16 %v3079_v21, %v3078_v26 }
 0x573   :  { %v3080_v16 = vpack.c.bf16 %v3077_v43, %v3076_v46 }
 0x575   :  { %3749 = vmatprep.mubr.msk.bf16.mxu1 %vm3102_vm6, %v3080_v16 }
 0x576   :  { %3750 = vmatmul.mubr.msk.bf16.vlgmr.msra.gmra.mrb[100].mxu1 %vm3102_vm6, %v3081_v60 }
 0x577   :  { %3754 = vmatpush3.bf16.msra.mxu1 %v3834_v35 }
 0x649   :  { %v3751_v9 = vpop.f32.mrb[100].mxu1 }
 0x64a   :  { %v3152_v54 = vadd.f32 %v3751_v9, %v3089_v62  ;;  %v3143_v6 = vpop.f32.mrb[101].mxu1 }
 0x64b   :  { %v3144_v0 = vadd.f32 %v3143_v6, %v3089_v62  ;;  %v3752_v30 = vpop.f32.mrb[102].mxu1 }
 0x64c   :  { %v3160_v29 = vadd.f32 %v3152_v54, %v2998_v55  ;;  %v3155_v24 = vadd.f32 %v3752_v30, %v3089_v62  ;;  %v3146_v28 = vpop.f32.mrb[103].mxu1 }
 0x64d   :  { %v3158_v22 = vadd.f32 %v3144_v0, %v2990_v13  ;;  %v3147_v18 = vadd.f32 %v3146_v28, %v3089_v62 }
 0x64e   :  { %v3168_v4 = vmul.f32 %v3165_v27, %v3160_v29  ;;  %v3161_v58 = vadd.f32 %v3155_v24, %v3001_v7 }
 0x64f   :  { %v3166_v51 = vmul.f32 %v3165_v27, %v3158_v22  ;;  %v3159_v8 = vadd.f32 %v3147_v18, %v2993_v42 }
 0x650   :  { %v3169_v20 = vmul.f32 %v3165_v27, %v3161_v58  ;;  %v3176_v25 = vadd.f32 %v3173_v56, %v3168_v4 }
 0x651   :  { %v3167_v23 = vmul.f32 %v3165_v27, %v3159_v8  ;;  %v3174_v5 = vadd.f32 %v3173_v56, %v3166_v51 }
 0x652   :  { %v3177_v11 = vadd.f32 %v3173_v56, %v3169_v20 }
 0x653   :  { %v3175_v36 = vadd.f32 %v3173_v56, %v3167_v23 }
 0x654   :  { %v3179_v44 = vpack.c.bf16 %v3177_v11, %v3176_v25 }
 0x655   :  { %v3178_v63 = vpack.c.bf16 %v3175_v36, %v3174_v5 }
 0x657   :  { %3755 = vmatprep.mubr.msk.bf16.mxu1 %vm141_vm10, %v3178_v63 }
 0x658   :  { %3756 = vmatmul.mubr.msk.bf16.vlgmr.msra.gmra.mrb[104].mxu1 %vm141_vm10, %v3179_v44 }
 0x72b   :  { %v3757_v3 = vpop.f32.mrb[104].mxu1 }
 0x72c   :  { %v3244_v32 = vadd.f32 %v3757_v3, %v3383_v57  ;;  %v3235_v34 = vpop.f32.mrb[105].mxu1 }
 0x72d   :  { %v3236_v47 = vadd.f32 %v3383_v57, %v3235_v34  ;;  %v3758_v40 = vpop.f32.mrb[106].mxu1 }
 0x72e   :  { %v3252_v33 = vmax.f32 %v3244_v32, 0.0  ;;  %v3247_v49 = vadd.f32 %v3758_v40, %v3383_v57  ;;  %v3238_v45 = vpop.f32.mrb[107].mxu1 }
 0x72f   :  { %v3250_v59 = vmax.f32 %v3236_v47, 0.0  ;;  %v3239_v52 = vadd.f32 %v3383_v57, %v3238_v45 }
 0x730   :  { %3256 = vst.msk [vmem:[%s6350_s15 + $0x10] sm:$0xff] %vm3102_vm6, %v3252_v33  ;;  %v3253_v7 = vmax.f32 %v3247_v49, 0.0 }
 0x731   :  { %3254 = vst.msk [vmem:[%s6350_s15] sm:$0xff] %vm3102_vm6, %v3250_v59  ;;  %v3251_v38 = vmax.f32 %v3239_v52, 0.0 }
 0x732   :  { %3257 = vst.msk [vmem:[%s6350_s15 + $0x18] sm:$0xff] %vm3102_vm6, %v3253_v7 }
 0x733   :  { %3255 = vst.msk [vmem:[%s6350_s15 + $0x8] sm:$0xff] %vm3102_vm6, %v3251_v38 }

// kernel: run_model.6
= control target key start
LH: loop header
LB: loop body
LE: loop exit
PB: predicated region body
PF: predicated region fallthrough
CT: control target
= control target key end

     0   :  { %vm73_vm0 = vcmask 1043456   ;;  %v4041_v0 = vmov 0   ;;  %vm66_vm1 = vcmask 64512   ;;  %v4042_v13 = vmov 1   ;;  %s6453_s6 = inlined_call_operand.vmem [shape: bf16[8,32], index: 6, kind: input, shape index: {}]   ;;  %s6454_s2 = inlined_call_operand.vmem [shape: s32[32,16], index: 2, kind: input, shape index: {}]   ;;  %s6455_s1 = inlined_call_operand.vmem [shape: f32[32,8], index: 1, kind: input, shape index: {}]   ;;  %s6456_s4 = inlined_call_operand.vmem [shape: bf16[32,32], index: 4, kind: input, shape index: {}]   ;;  %s6457_s7 = inlined_call_operand.vmem [shape: bf16[32,32], index: 7, kind: input, shape index: {}]   ;;  %s6458_s5 = inlined_call_operand.vmem [shape: bf16[32,32], index: 5, kind: input, shape index: {}]   ;;  %s6459_s13 = inlined_call_operand.vmem [shape: f32[8,32], index: 13, kind: input, shape index: {}]   ;;  %s6460_s0 = inlined_call_operand.vmem [shape: f32[32,32], index: 0, kind: input, shape index: {}]   ;;  %s6461_s8 = inlined_call_operand.vmem [shape: bf16[32,32], index: 8, kind: input, shape index: {}]   ;;  %s6462_s3 = inlined_call_operand.vmem [shape: s32[32,1], index: 3, kind: input, shape index: {}]   ;;  %s6463_s9 = inlined_call_operand.vmem [shape: bf16[32,32], index: 9, kind: input, shape index: {}]   ;;  %s6464_s10 = inlined_call_operand.vmem [shape: bf16[32,64], index: 10, kind: input, shape index: {}]   ;;  %s6465_s11 = inlined_call_operand.vmem [shape: bf16[64,32], index: 11, kind: input, shape index: {}]   ;;  %s6466_s14 = inlined_call_operand.vmem [shape: f32[1,64], index: 14, kind: input, shape index: {}]   ;;  %s6467_s12 = inlined_call_operand.vmem [shape: bf16[32,32], index: 12, kind: input, shape index: {}]   ;;  %s6468_s15 = inlined_call_operand.vmem [shape: f32[1,32], index: 15, kind: input, shape index: {}]   ;;  %s6469_s16 = inlined_call_operand.vmem [shape: f32[32,32], index: 16, kind: output, shape index: {}]  }
   0x1   :  { %6518 = sst [smem:[#allocation96_spill]] %s6453_s6  ;;  %3849 = vset.pattern.permute.xlu1 %v4041_v0  ;;  %v4151_v2 = vld [vmem:[%s6454_s2 + $0x10] sm:$0xff]  ;;  %v55_v3 = vld [vmem:[%s6455_s1] sm:$0xff]  ;;  %3848 = vset.pattern.permute.xlu0 %v4041_v0  ;;  %v56_v5 = vld [vmem:[%s6455_s1 + $0x8] sm:$0xff]  ;;  %v4043_v14 = vmov 2   ;;  %v4044_v16 = vmov 3   ;;  %v62_v32 = vlaneseq }
   0x2   :  { %s6519_s23 = sld [smem:[#allocation96_spill]]  ;;  %237 = vperm.xlu1 %3849, %v4151_v2   ;;  %v57_v6 = vld [vmem:[%s6455_s1 + $0x10] sm:$0xff]  ;;  %v59_v7 = vpack.c.bf16 %v56_v5, %v55_v3  ;;  %v4167_v8 = vld [vmem:[%s6454_s2 + $0x18] sm:$0xff]  ;;  %v4175_v10 = vld [vmem:[%s6454_s2] sm:$0xff]  ;;  %v4045_v18 = vmov 4   ;;  %v4046_v19 = vmov 5  }
   0x3   :  { %v58_v9 = vld [vmem:[%s6455_s1 + $0x18] sm:$0xff]  ;;  %231 = vperm.xlu0 %3848, %v4175_v10   ;;  %v4182_v12 = vld [vmem:[%s6454_s2 + $0x8] sm:$0xff]  ;;  %v4195_v15 = vld [vmem:[%s6456_s4] sm:$0xff]   ;;  %v4047_v20 = vmov 6   ;;  %v4048_v21 = vmov 7   ;;  %v4049_v22 = vmov 8  }
   0x4   :  { %v60_v11 = vpack.c.bf16 %v58_v9, %v57_v6  ;;  %3573 = vmatprep.mubr.msk.bf16.mxu0 %vm66_vm1, %v59_v7  ;;  %v4204_v17 = vld [vmem:[%s6456_s4 + $0x8] sm:$0xff]   ;;  %v4050_v23 = vmov 9   ;;  %v4051_v24 = vmov 10   ;;  %v4052_v25 = vmov 11   ;;  %v3884_v27 = vld [vmem:[%s6457_s7] sm:$0xff]  }
   0x5   :  { %v4053_v26 = vmov 12   ;;  %3577 = vmatprep.subr.bf16.mxu1 %v3884_v27  ;;  %v4054_v28 = vmov 13   ;;  %v3885_v29 = vld [vmem:[%s6457_s7 + $0x8] sm:$0xff]   ;;  %v4055_v30 = vmov 14   ;;  %v4056_v31 = vmov 15  }
   0x6   :  { %240 = vperm.xlu1 %3849, %v4167_v8   ;;  %3578 = vmatpush3.bf16.msra.mxu1 %v3884_v27  ;;  %v4260_v33 = vand.u32 127, %v62_v32  ;;  %v4057_v37 = vmov 0.0   ;;  %vm160_vm6 = vcmask 261120  }
   0x7   :  { %234 = vperm.xlu0 %3848, %v4182_v12   ;;  %3579 = vmatprep.subr.bf16.mxu1 %v3885_v29 }
   0x8   :  { %v61_v1 = vld [vmem:[%s6519_s23] sm:$0xf] }
   0x9   :  { %3829 = vmatprep.subr.msk.bf16.mxu0 %vm73_vm0, %v61_v1  ;;  %v75_v4 = vsel %vm73_vm0, %v61_v1, 0 }
   0xa   :  { %3572 = vmatpush3.bf16.msra.mxu0 %v75_v4  ;;  %3851 = vset.pattern.permute.xlu1 %v4042_v13 }
   0xb   :  { %264 = vperm.xlu1 %3851, %v4182_v12   ;;  %3850 = vset.pattern.permute.xlu0 %v4042_v13 }
   0xc   :  { %261 = vperm.xlu0 %3850, %v4175_v10   ;;  %3585 = vmatprep.subr.bf16.mxu0 %v4195_v15 }
   0xd   :  { %3574 = vmatmul.mubr.msk.bf16.vlgmr.msra.gmra.mrb[0].mxu0 %vm66_vm1, %v60_v11  ;;  %3580 = vmatpush3.bf16.msra.mxu1 %v3885_v29 }
   0xe   :  { %3586 = vmatpush3.bf16.msra.mxu0 %v4195_v15  ;;  %3825 = vmatprep.subr.bf16.mxu1 %v4195_v15 }
   0xf   :  { %267 = vperm.xlu1 %3851, %v4151_v2   ;;  %3587 = vmatprep.subr.bf16.mxu0 %v4204_v17 }
  0x10   :  { %270 = vperm.xlu0 %3850, %v4167_v8  }
  0x12   :  { %3588 = vmatpush3.bf16.msra.mxu0 %v4204_v17 }
  0x13   :  { %3852 = vset.pattern.permute.xlu1 %v4043_v14 }
  0x14   :  { %291 = vperm.xlu1 %3852, %v4175_v10   ;;  %3853 = vset.pattern.permute.xlu0 %v4043_v14 }
  0x15   :  { %294 = vperm.xlu0 %3853, %v4182_v12  }
  0x18   :  { %297 = vperm.xlu1 %3852, %v4151_v2  }
  0x19   :  { %3854 = vset.pattern.permute.xlu0 %v4044_v16 }
  0x1a   :  { %321 = vperm.xlu0 %3854, %v4175_v10  }
  0x1c   :  { %300 = vperm.xlu1 %3852, %v4167_v8  }
  0x1e   :  { %330 = vperm.xlu0 %3854, %v4167_v8  }
  0x20   :  { %3855 = vset.pattern.permute.xlu1 %v4044_v16 }
  0x21   :  { %324 = vperm.xlu1 %3855, %v4182_v12  }
  0x22   :  { %3857 = vset.pattern.permute.xlu0 %v4045_v18 }
  0x23   :  { %354 = vperm.xlu0 %3857, %v4182_v12  }
  0x25   :  { %327 = vperm.xlu1 %3855, %v4151_v2  }
  0x27   :  { %3858 = vset.pattern.permute.xlu0 %v4046_v19 }
  0x28   :  { %381 = vperm.xlu0 %3858, %v4175_v10  }
  0x29   :  { %3856 = vset.pattern.permute.xlu1 %v4045_v18 }
  0x2a   :  { %351 = vperm.xlu1 %3856, %v4175_v10  }
  0x2c   :  { %390 = vperm.xlu0 %3858, %v4167_v8  }
  0x2e   :  { %357 = vperm.xlu1 %3856, %v4151_v2  }
  0x30   :  { %3861 = vset.pattern.permute.xlu0 %v4047_v20 }
  0x31   :  { %414 = vperm.xlu0 %3861, %v4182_v12  }
  0x32   :  { %360 = vperm.xlu1 %3856, %v4167_v8  }
  0x35   :  { %3862 = vset.pattern.permute.xlu0 %v4048_v21 }
  0x36   :  { %3859 = vset.pattern.permute.xlu1 %v4046_v19  ;;  %441 = vperm.xlu0 %3862, %v4175_v10  }
  0x37   :  { %384 = vperm.xlu1 %3859, %v4182_v12  }
  0x3a   :  { %450 = vperm.xlu0 %3862, %v4167_v8  }
  0x3b   :  { %387 = vperm.xlu1 %3859, %v4151_v2  }
  0x3e   :  { %3865 = vset.pattern.permute.xlu0 %v4049_v22 }
  0x3f   :  { %3860 = vset.pattern.permute.xlu1 %v4047_v20  ;;  %474 = vperm.xlu0 %3865, %v4182_v12  }
  0x40   :  { %411 = vperm.xlu1 %3860, %v4175_v10  }
  0x43   :  { %3866 = vset.pattern.permute.xlu0 %v4050_v23 }
  0x44   :  { %417 = vperm.xlu1 %3860, %v4151_v2   ;;  %501 = vperm.xlu0 %3866, %v4175_v10  }
  0x48   :  { %420 = vperm.xlu1 %3860, %v4167_v8   ;;  %510 = vperm.xlu0 %3866, %v4167_v8  }
  0x4c   :  { %3863 = vset.pattern.permute.xlu1 %v4048_v21  ;;  %3869 = vset.pattern.permute.xlu0 %v4051_v24 }
  0x4d   :  { %444 = vperm.xlu1 %3863, %v4182_v12   ;;  %534 = vperm.xlu0 %3869, %v4182_v12  }
  0x51   :  { %447 = vperm.xlu1 %3863, %v4151_v2   ;;  %3870 = vset.pattern.permute.xlu0 %v4052_v25 }
  0x52   :  { %561 = vperm.xlu0 %3870, %v4175_v10  }
  0x55   :  { %3864 = vset.pattern.permute.xlu1 %v4049_v22 }
  0x56   :  { %471 = vperm.xlu1 %3864, %v4175_v10   ;;  %570 = vperm.xlu0 %3870, %v4167_v8  }
  0x5a   :  { %477 = vperm.xlu1 %3864, %v4151_v2   ;;  %3873 = vset.pattern.permute.xlu0 %v4053_v26 }
  0x5b   :  { %594 = vperm.xlu0 %3873, %v4182_v12  }
  0x5e   :  { %480 = vperm.xlu1 %3864, %v4167_v8  }
  0x5f   :  { %3874 = vset.pattern.permute.xlu0 %v4054_v28 }
  0x60   :  { %621 = vperm.xlu0 %3874, %v4175_v10  }
  0x62   :  { %3867 = vset.pattern.permute.xlu1 %v4050_v23 }
  0x63   :  { %504 = vperm.xlu1 %3867, %v4182_v12  }
  0x64   :  { %630 = vperm.xlu0 %3874, %v4167_v8  }
  0x67   :  { %507 = vperm.xlu1 %3867, %v4151_v2  }
  0x68   :  { %3877 = vset.pattern.permute.xlu0 %v4055_v30 }
  0x69   :  { %654 = vperm.xlu0 %3877, %v4182_v12  }
  0x6b   :  { %3868 = vset.pattern.permute.xlu1 %v4051_v24 }
  0x6c   :  { %531 = vperm.xlu1 %3868, %v4175_v10  }
  0x6d   :  { %3878 = vset.pattern.permute.xlu0 %v4056_v31 }
  0x6e   :  { %681 = vperm.xlu0 %3878, %v4175_v10  }
  0x70   :  { %537 = vperm.xlu1 %3868, %v4151_v2  }
  0x72   :  { %690 = vperm.xlu0 %3878, %v4167_v8  }
  0x74   :  { %540 = vperm.xlu1 %3868, %v4167_v8  }
  0x76   :  { %3881 = vset.pattern.permute.xlu0 %v4041_v0 }
  0x78   :  { %3871 = vset.pattern.permute.xlu1 %v4052_v25 }
  0x79   :  { %564 = vperm.xlu1 %3871, %v4182_v12  }
  0x7d   :  { %567 = vperm.xlu1 %3871, %v4151_v2  }
  0x81   :  { %3872 = vset.pattern.permute.xlu1 %v4053_v26  ;;  %v238_v34 = vpop.permute.xlu1 %237 }
  0x82   :  { %591 = vperm.xlu1 %3872, %v4175_v10   ;;  %vm244_vm2 = vcmp.eq.s32.totalorder %v238_v34, %v4260_v33  ;;  %v232_v35 = vpop.permute.xlu0 %231 }
  0x83   :  { %vm242_vm3 = vcmp.eq.s32.totalorder %v232_v35, %v4260_v33  ;;  %v248_v38 = vsel %vm244_vm2, 1.0, %v4057_v37 }
  0x84   :  { %v246_v40 = vsel %vm242_vm3, 1.0, %v4057_v37 }
  0x85   :  { %v241_v36 = vpop.permute.xlu1 %240 }
  0x86   :  { %597 = vperm.xlu1 %3872, %v4151_v2   ;;  %vm245_vm4 = vcmp.eq.s32.totalorder %v241_v36, %v4260_v33  ;;  %v235_v41 = vpop.permute.xlu0 %234 }
  0x87   :  { %v249_v39 = vsel %vm245_vm4, 1.0, %v4057_v37  ;;  %vm243_vm5 = vcmp.eq.s32.totalorder %v235_v41, %v4260_v33 }
  0x88   :  { %v4271_v42 = vpack.c.bf16 %v249_v39, %v248_v38  ;;  %v247_v43 = vsel %vm243_vm5, 1.0, %v4057_v37 }
  0x89   :  { %v4275_v45 = vpack.c.bf16 %v247_v43, %v246_v40 }
  0x8a   :  { %600 = vperm.xlu1 %3872, %v4167_v8   ;;  %v265_v44 = vpop.permute.xlu1 %264 }
  0x8b   :  { %vm273_vm7 = vcmp.eq.s32.totalorder %v265_v44, %v4260_v33  ;;  %v262_v47 = vpop.permute.xlu0 %261  ;;  %3589 = vmatprep.mubr.msk.bf16.mxu0 %vm160_vm6, %v4275_v45 }
  0x8c   :  { %v277_v46 = vsel %vm273_vm7, 1.0, %v4057_v37  ;;  %vm272_vm8 = vcmp.eq.s32.totalorder %v262_v47, %v4260_v33  ;;  %3590 = vmatmul.mubr.msk.bf16.vlgmr.msra.gmra.mrb[4].mxu0 %vm160_vm6, %v4271_v42 }
  0x8d   :  { %v276_v49 = vsel %vm272_vm8, 1.0, %v4057_v37 }
  0x8e   :  { %3875 = vset.pattern.permute.xlu1 %v4054_v28  ;;  %v268_v48 = vpop.permute.xlu1 %267  ;;  %v4287_v50 = vpack.c.bf16 %v277_v46, %v276_v49 }
  0x8f   :  { %624 = vperm.xlu1 %3875, %v4182_v12   ;;  %vm274_vm9 = vcmp.eq.s32.totalorder %v268_v48, %v4260_v33  ;;  %v271_v52 = vpop.permute.xlu0 %270 }
  0x90   :  { %v278_v51 = vsel %vm274_vm9, 1.0, %v4057_v37  ;;  %vm275_vm10 = vcmp.eq.s32.totalorder %v271_v52, %v4260_v33  ;;  %3593 = vmatprep.mubr.msk.bf16.mxu0 %vm160_vm6, %v4287_v50 }
  0x91   :  { %v279_v53 = vsel %vm275_vm10, 1.0, %v4057_v37 }
  0x92   :  { %v4295_v55 = vpack.c.bf16 %v279_v53, %v278_v51 }
  0x93   :  { %627 = vperm.xlu1 %3875, %v4151_v2   ;;  %v292_v54 = vpop.permute.xlu1 %291 }
  0x94   :  { %vm302_vm11 = vcmp.eq.s32.totalorder %v292_v54, %v4260_v33  ;;  %3594 = vmatmul.mubr.msk.bf16.gmra.mrb[8].mxu0 %vm160_vm6, %v4295_v55  ;;  %v295_v57 = vpop.permute.xlu0 %294  ;;  %v4393_v54 = vshrl.u32 %v62_v32, 7  ;;  %v4409_v32 = vld [vmem:[%s6459_s13] sm:$0xff] }
  0x95   :  { %v306_v56 = vsel %vm302_vm11, 1.0, %v4057_v37  ;;  %vm303_vm12 = vcmp.eq.s32.totalorder %v295_v57, %v4260_v33 }
  0x96   :  { %v307_v59 = vsel %vm303_vm12, 1.0, %v4057_v37  ;;  %6520 = vst [vmem:[#allocation2_spill] sm:$0xff] %v4393_v54 }
  0x97   :  { %3876 = vset.pattern.permute.xlu1 %v4055_v30  ;;  %v298_v58 = vpop.permute.xlu1 %297  ;;  %v4306_v60 = vpack.c.bf16 %v307_v59, %v306_v56 }
  0x98   :  { %651 = vperm.xlu1 %3876, %v4175_v10   ;;  %vm304_vm13 = vcmp.eq.s32.totalorder %v298_v58, %v4260_v33 }
  0x99   :  { %v322_v61 = vpop.permute.xlu0 %321  ;;  %3597 = vmatprep.mubr.msk.bf16.mxu0 %vm160_vm6, %v4306_v60  ;;  %v308_v62 = vsel %vm304_vm13, 1.0, %v4057_v37 }
  0x9a   :  { %vm332_vm15 = vcmp.eq.s32.totalorder %v322_v61, %v4260_v33 }
  0x9b   :  { %v301_v63 = vpop.permute.xlu1 %300  ;;  %v336_v6 = vsel %vm332_vm15, 1.0, %v4057_v37 }
  0x9c   :  { %657 = vperm.xlu1 %3876, %v4151_v2   ;;  %vm305_vm14 = vcmp.eq.s32.totalorder %v301_v63, %v4260_v33 }
  0x9d   :  { %v309_v1 = vsel %vm305_vm14, 1.0, %v4057_v37  ;;  %v331_v4 = vpop.permute.xlu0 %330 }
  0x9e   :  { %v4315_v3 = vpack.c.bf16 %v309_v1, %v308_v62  ;;  %vm335_vm1 = vcmp.eq.s32.totalorder %v331_v4, %v4260_v33  ;;  %v64_v62 = vsub.s32 0, %v4393_v54 }
  0xa0   :  { %660 = vperm.xlu1 %3876, %v4167_v8   ;;  %v325_v5 = vpop.permute.xlu1 %324  ;;  %3598 = vmatmul.mubr.msk.bf16.gmra.mrb[12].mxu0 %vm160_vm6, %v4315_v3  ;;  %v339_v8 = vsel %vm335_vm1, 1.0, %v4057_v37 }
  0xa1   :  { %vm333_vm0 = vcmp.eq.s32.totalorder %v325_v5, %v4260_v33  ;;  %v65_v5 = vrot.slane %v4409_v32, %v64_v62 }
  0xa2   :  { %v337_v7 = vsel %vm333_vm0, 1.0, %v4057_v37  ;;  %v355_v10 = vpop.permute.xlu0 %354 }
  0xa3   :  { %v4324_v9 = vpack.c.bf16 %v337_v7, %v336_v6  ;;  %vm363_vm3 = vcmp.eq.s32.totalorder %v355_v10, %v4260_v33 }
  0xa4   :  { %3879 = vset.pattern.permute.xlu1 %v4056_v31  ;;  %v328_v11 = vpop.permute.xlu1 %327  ;;  %v367_v18 = vsel %vm363_vm3, 1.0, %v4057_v37 }
  0xa5   :  { %684 = vperm.xlu1 %3879, %v4182_v12   ;;  %vm334_vm2 = vcmp.eq.s32.totalorder %v328_v11, %v4260_v33  ;;  %3601 = vmatprep.mubr.msk.bf16.mxu0 %vm160_vm6, %v4324_v9 }
  0xa6   :  { %v338_v13 = vsel %vm334_vm2, 1.0, %v4057_v37 }
  0xa7   :  { %v4334_v14 = vpack.c.bf16 %v339_v8, %v338_v13  ;;  %v382_v21 = vpop.permute.xlu0 %381 }
  0xa8   :  { %vm392_vm8 = vcmp.eq.s32.totalorder %v382_v21, %v4260_v33 }
  0xa9   :  { %687 = vperm.xlu1 %3879, %v4151_v2   ;;  %v352_v16 = vpop.permute.xlu1 %351  ;;  %3602 = vmatmul.mubr.msk.bf16.gmra.mrb[16].mxu0 %vm160_vm6, %v4334_v14 }
  0xaa   :  { %vm362_vm4 = vcmp.eq.s32.totalorder %v352_v16, %v4260_v33 }
  0xab   :  { %v366_v12 = vsel %vm362_vm4, 1.0, %v4057_v37  ;;  %v391_v25 = vpop.permute.xlu0 %390 }
  0xac   :  { %v4342_v19 = vpack.c.bf16 %v367_v18, %v366_v12  ;;  %vm395_vm10 = vcmp.eq.s32.totalorder %v391_v25, %v4260_v33 }
  0xad   :  { %v358_v20 = vpop.permute.xlu1 %357  ;;  %3880 = vset.pattern.permute.xlu1 %v4041_v0  ;;  %v396_v0 = vsel %vm392_vm8, 1.0, %v4057_v37  ;;  %v399_v31 = vsel %vm395_vm10, 1.0, %v4057_v37 }
  0xae   :  { %vm364_vm5 = vcmp.eq.s32.totalorder %v358_v20, %v4260_v33  ;;  %3605 = vmatprep.mubr.msk.bf16.mxu0 %vm160_vm6, %v4342_v19 }
  0xaf   :  { %v368_v2 = vsel %vm364_vm5, 1.0, %v4057_v37 }
  0xb0   :  { %v415_v29 = vpop.permute.xlu0 %414 }
  0xb1   :  { %v361_v22 = vpop.permute.xlu1 %360  ;;  %vm423_vm12 = vcmp.eq.s32.totalorder %v415_v29, %v4260_v33  ;;  %v130_v29 = vld [vmem:[%s6460_s0] sm:$0xff] }
  0xb2   :  { %vm365_vm7 = vcmp.eq.s32.totalorder %v361_v22, %v4260_v33  ;;  %v427_v38 = vsel %vm423_vm12, 1.0, %v4057_v37  ;;  %v132_v22 = vld [vmem:[%s6460_s0 + $0x10] sm:$0xff] }
  0xb3   :  { %v369_v23 = vsel %vm365_vm7, 1.0, %v4057_v37 }
  0xb4   :  { %v4352_v24 = vpack.c.bf16 %v369_v23, %v368_v2 }
  0xb5   :  { %v442_v43 = vpop.permute.xlu0 %441 }
  0xb6   :  { %v385_v26 = vpop.permute.xlu1 %384  ;;  %3606 = vmatmul.mubr.msk.bf16.gmra.mrb[20].mxu0 %vm160_vm6, %v4352_v24  ;;  %vm452_vm0 = vcmp.eq.s32.totalorder %v442_v43, %v4260_v33 }
  0xb7   :  { %vm393_vm9 = vcmp.eq.s32.totalorder %v385_v26, %v4260_v33  ;;  %v456_v52 = vsel %vm452_vm0, 1.0, %v4057_v37  ;;  %v133_v26 = vld [vmem:[%s6460_s0 + $0x18] sm:$0xff] }
  0xb8   :  { %v397_v27 = vsel %vm393_vm9, 1.0, %v4057_v37 }
  0xb9   :  { %v4360_v28 = vpack.c.bf16 %v397_v27, %v396_v0  ;;  %v451_v49 = vpop.permute.xlu0 %450 }
  0xba   :  { %v388_v30 = vpop.permute.xlu1 %387  ;;  %vm455_vm2 = vcmp.eq.s32.totalorder %v451_v49, %v4260_v33 }
  0xbb   :  { %vm394_vm11 = vcmp.eq.s32.totalorder %v388_v30, %v4260_v33  ;;  %3609 = vmatprep.mubr.msk.bf16.mxu0 %vm160_vm6, %v4360_v28  ;;  %v459_v59 = vsel %vm455_vm2, 1.0, %v4057_v37 }
  0xbc   :  { %v398_v34 = vsel %vm394_vm11, 1.0, %v4057_v37 }
  0xbd   :  { %v4368_v35 = vpack.c.bf16 %v399_v31, %v398_v34  ;;  %v131_v31 = vld [vmem:[%s6460_s0 + $0x8] sm:$0xff] }
  0xbe   :  { %v475_v57 = vpop.permute.xlu0 %474 }
  0xbf   :  { %v412_v36 = vpop.permute.xlu1 %411  ;;  %3610 = vmatmul.mubr.msk.bf16.gmra.mrb[24].mxu0 %vm160_vm6, %v4368_v35  ;;  %vm483_vm4 = vcmp.eq.s32.totalorder %v475_v57, %v4260_v33 }
  0xc0   :  { %vm422_vm13 = vcmp.eq.s32.totalorder %v412_v36, %v4260_v33  ;;  %v487_v4 = vsel %vm483_vm4, 1.0, %v4057_v37 }
  0xc1   :  { %v426_v39 = vsel %vm422_vm13, 1.0, %v4057_v37 }
  0xc2   :  { %v4375_v40 = vpack.c.bf16 %v427_v38, %v426_v39 }
  0xc3   :  { %v418_v41 = vpop.permute.xlu1 %417  ;;  %v502_v16 = vpop.permute.xlu0 %501 }
  0xc4   :  { %vm424_vm14 = vcmp.eq.s32.totalorder %v418_v41, %v4260_v33  ;;  %3613 = vmatprep.mubr.msk.bf16.mxu0 %vm160_vm6, %v4375_v40  ;;  %vm512_vm9 = vcmp.eq.s32.totalorder %v502_v16, %v4260_v33 }
  0xc5   :  { %v428_v44 = vsel %vm424_vm14, 1.0, %v4057_v37 }
  0xc7   :  { %v421_v46 = vpop.permute.xlu1 %420  ;;  %v511_v43 = vpop.permute.xlu0 %510 }
  0xc8   :  { %vm425_vm15 = vcmp.eq.s32.totalorder %v421_v46, %v4260_v33  ;;  %vm515_vm11 = vcmp.eq.s32.totalorder %v511_v43, %v4260_v33 }
  0xc9   :  { %v429_v47 = vsel %vm425_vm15, 1.0, %v4057_v37 }
  0xca   :  { %v4384_v48 = vpack.c.bf16 %v429_v47, %v428_v44 }
  0xcc   :  { %v445_v51 = vpop.permute.xlu1 %444  ;;  %3614 = vmatmul.mubr.msk.bf16.gmra.mrb[28].mxu0 %vm160_vm6, %v4384_v48 }
  0xcd   :  { %vm453_vm1 = vcmp.eq.s32.totalorder %v445_v51, %v4260_v33  ;;  %v516_v51 = vsel %vm512_vm9, 1.0, %v4057_v37 }
  0xce   :  { %v457_v53 = vsel %vm453_vm1, 1.0, %v4057_v37 }
  0xcf   :  { %v4395_v56 = vpack.c.bf16 %v457_v53, %v456_v52 }
  0xd0   :  { %v448_v58 = vpop.permute.xlu1 %447 }
  0xd1   :  { %vm454_vm3 = vcmp.eq.s32.totalorder %v448_v58, %v4260_v33  ;;  %3617 = vmatprep.mubr.msk.bf16.mxu0 %vm160_vm6, %v4395_v56  ;;  %v535_v58 = vpop.permute.xlu0 %534 }
  0xd2   :  { %v458_v61 = vsel %vm454_vm3, 1.0, %v4057_v37  ;;  %vm543_vm13 = vcmp.eq.s32.totalorder %v535_v58, %v4260_v33 }
  0xd3   :  { %v4404_v63 = vpack.c.bf16 %v459_v59, %v458_v61  ;;  %v519_v61 = vsel %vm515_vm11, 1.0, %v4057_v37 }
  0xd5   :  { %v472_v1 = vpop.permute.xlu1 %471  ;;  %3618 = vmatmul.mubr.msk.bf16.gmra.mrb[32].mxu0 %vm160_vm6, %v4404_v63 }
  0xd6   :  { %vm482_vm5 = vcmp.eq.s32.totalorder %v472_v1, %v4260_v33  ;;  %v3886_v1 = vld [vmem:[%s6458_s5] sm:$0xff]  }
  0xd7   :  { %v486_v6 = vsel %vm482_vm5, 1.0, %v4057_v37 }
  0xd8   :  { %v4417_v7 = vpack.c.bf16 %v487_v4, %v486_v6  ;;  %v547_v6 = vsel %vm543_vm13, 1.0, %v4057_v37 }
  0xd9   :  { %v478_v11 = vpop.permute.xlu1 %477 }
  0xda   :  { %vm484_vm7 = vcmp.eq.s32.totalorder %v478_v11, %v4260_v33  ;;  %3621 = vmatprep.mubr.msk.bf16.mxu0 %vm160_vm6, %v4417_v7  ;;  %v3888_v11 = vld [vmem:[%s6461_s8] sm:$0xff]  }
  0xdb   :  { %v488_v23 = vsel %vm484_vm7, 1.0, %v4057_v37  ;;  %3721 = vmatprep.subr.bf16.mxu0 %v3888_v11 }
  0xdc   :  { %3722 = vmatpush3.bf16.msra.mxu0 %v3888_v11  ;;  %v4058_v11 = vmov -1e+30  }
  0xdd   :  { %v481_v27 = vpop.permute.xlu1 %480 }
  0xde   :  { %vm485_vm8 = vcmp.eq.s32.totalorder %v481_v27, %v4260_v33 }
  0xdf   :  { %v489_v36 = vsel %vm485_vm8, 1.0, %v4057_v37 }
  0xe0   :  { %v3575_v10 = vpop.f32.mrb[0].mxu0  ;;  %v4438_v41 = vpack.c.bf16 %v489_v36, %v488_v23 }
  0xe1   :  { %v120_v8 = vadd.f32 %v3575_v10, %v65_v5  ;;  %v111_v13 = vpop.f32.mrb[1].mxu0 }
  0xe2   :  { %v112_v18 = vadd.f32 %v111_v13, %v65_v5  ;;  %v3576_v12 = vpop.f32.mrb[2].mxu0  ;;  %v505_v49 = vpop.permute.xlu1 %504  ;;  %3622 = vmatmul.mubr.msk.bf16.gmra.mrb[36].mxu0 %vm160_vm6, %v4438_v41 }
  0xe3   :  { %v128_v20 = vmax.f32 %v120_v8, 0.0  ;;  %v123_v21 = vadd.f32 %v3576_v12, %v65_v5  ;;  %v114_v2 = vpop.f32.mrb[3].mxu0  ;;  %vm513_vm10 = vcmp.eq.s32.totalorder %v505_v49, %v4260_v33  ;;  %v562_v13 = vpop.permute.xlu0 %561 }
  0xe4   :  { %v126_v25 = vmax.f32 %v112_v18, 0.0  ;;  %v115_v0 = vadd.f32 %v114_v2, %v65_v5  ;;  %v517_v53 = vsel %vm513_vm10, 1.0, %v4057_v37  ;;  %vm572_vm1 = vcmp.eq.s32.totalorder %v562_v13, %v4260_v33  ;;  %v3889_v13 = vld [vmem:[%s6461_s8 + $0x8] sm:$0xff]  }
  0xe5   :  { %v129_v30 = vmax.f32 %v123_v21, 0.0  ;;  %v136_v38 = vadd.f32 %v132_v22, %v128_v20  ;;  %v4446_v57 = vpack.c.bf16 %v517_v53, %v516_v51  ;;  %v576_v2 = vsel %vm572_vm1, 1.0, %v4057_v37  ;;  %3723 = vmatprep.subr.bf16.mxu0 %v3889_v13 }
  0xe6   :  { %v127_v34 = vmax.f32 %v115_v0, 0.0  ;;  %v134_v44 = vadd.f32 %v130_v29, %v126_v25  ;;  %v508_v59 = vpop.permute.xlu1 %507  ;;  %3724 = vmatpush3.bf16.msra.mxu0 %v3889_v13 }
  0xe7   :  { %v137_v39 = vadd.f32 %v133_v26, %v129_v30  ;;  %vm514_vm12 = vcmp.eq.s32.totalorder %v508_v59, %v4260_v33  ;;  %3625 = vmatprep.mubr.msk.bf16.mxu0 %vm160_vm6, %v4446_v57  ;;  %v571_v20 = vpop.permute.xlu0 %570  ;;  %v3887_v30 = vld [vmem:[%s6458_s5 + $0x8] sm:$0xff]  }
  0xe8   :  { %v135_v46 = vadd.f32 %v131_v31, %v127_v34  ;;  %v518_v62 = vsel %vm514_vm12, 1.0, %v4057_v37  ;;  %vm575_vm3 = vcmp.eq.s32.totalorder %v571_v20, %v4260_v33 }
  0xe9   :  { %v139_v47 = vpack.c.bf16 %v137_v39, %v136_v38  ;;  %v4461_v4 = vpack.c.bf16 %v519_v61, %v518_v62  ;;  %v579_v0 = vsel %vm575_vm3, 1.0, %v4057_v37 }
  0xea   :  { %v138_v52 = vpack.c.bf16 %v135_v46, %v134_v44 }
  0xeb   :  { %v532_v5 = vpop.permute.xlu1 %531  ;;  %3626 = vmatmul.mubr.msk.bf16.gmra.mrb[40].mxu0 %vm160_vm6, %v4461_v4  ;;  %v595_v25 = vpop.permute.xlu0 %594 }
  0xec   :  { %3581 = vmatprep.mubr.msk.bf16.mxu1 %vm160_vm6, %v138_v52  ;;  %vm542_vm14 = vcmp.eq.s32.totalorder %v532_v5, %v4260_v33  ;;  %vm603_vm5 = vcmp.eq.s32.totalorder %v595_v25, %v4260_v33  ;;  %v4533_v5 = vld [vmem:[%s6462_s3] sm:$0xff] }
  0xed   :  { %3582 = vmatmul.mubr.msk.bf16.vlgmr.msra.gmra.mrb[0].mxu1 %vm160_vm6, %v139_v47  ;;  %v607_v34 = vsel %vm603_vm5, 1.0, %v4057_v37 }
  0xee   :  { %3827 = vmatpush3.bf16.msra.mxu1 %v4195_v15  ;;  %v546_v15 = vsel %vm542_vm14, 1.0, %v4057_v37 }
  0xef   :  { %3826 = vmatprep.subr.bf16.mxu1 %v4204_v17  ;;  %v4469_v10 = vpack.c.bf16 %v547_v6, %v546_v15  ;;  %v538_v8 = vpop.permute.xlu1 %537  ;;  %v622_v43 = vpop.permute.xlu0 %621 }
  0xf0   :  { %vm544_vm15 = vcmp.eq.s32.totalorder %v538_v8, %v4260_v33  ;;  %vm632_vm10 = vcmp.eq.s32.totalorder %v622_v43, %v4260_v33 }
  0xf1   :  { %3629 = vmatprep.mubr.msk.bf16.mxu0 %vm160_vm6, %v4469_v10  ;;  %v636_v53 = vsel %vm632_vm10, 1.0, %v4057_v37 }
  0xf2   :  { %3828 = vmatpush3.bf16.msra.mxu1 %v4204_v17  ;;  %v548_v17 = vsel %vm544_vm15, 1.0, %v4057_v37  ;;  %vm252_vm15 = vcmp.gt.s32.totalorder %v4533_v5, 0 }
  0xf3   :  { %3653 = vmatprep.subr.bf16.mxu1 %v3886_v1  ;;  %v541_v16 = vpop.permute.xlu1 %540  ;;  %v631_v51 = vpop.permute.xlu0 %630  ;;  %v256_v8 = vsel %vm252_vm15, 0.0, %v4058_v11 }
  0xf4   :  { %vm545_vm0 = vcmp.eq.s32.totalorder %v541_v16, %v4260_v33  ;;  %vm635_vm12 = vcmp.eq.s32.totalorder %v631_v51, %v4260_v33  ;;  %1518 = vperm.xlu1 %3880, %v256_v8  }
  0xf5   :  { %v549_v18 = vsel %vm545_vm0, 1.0, %v4057_v37  ;;  %vm282_vm0 = vcmp.gt.s32.totalorder %v4533_v5, 1 }
  0xf6   :  { %v4481_v12 = vpack.c.bf16 %v549_v18, %v548_v17  ;;  %v286_v18 = vsel %vm282_vm0, 0.0, %v4058_v11 }
  0xf7   :  { %v655_v61 = vpop.permute.xlu0 %654 }
  0xf8   :  { %v565_v21 = vpop.permute.xlu1 %564  ;;  %3630 = vmatmul.mubr.msk.bf16.gmra.mrb[44].mxu0 %vm160_vm6, %v4481_v12  ;;  %vm663_vm14 = vcmp.eq.s32.totalorder %v655_v61, %v4260_v33  ;;  %1538 = vperm.xlu1 %3880, %v286_v18  }
  0xf9   :  { %vm573_vm2 = vcmp.eq.s32.totalorder %v565_v21, %v4260_v33  ;;  %v667_v16 = vsel %vm663_vm14, 1.0, %v4057_v37 }
  0xfa   :  { %v577_v22 = vsel %vm573_vm2, 1.0, %v4057_v37 }
  0xfb   :  { %v4489_v23 = vpack.c.bf16 %v577_v22, %v576_v2  ;;  %v4556_v22 = vld [vmem:[%s6462_s3 + $0x8] sm:$0xff]  ;;  %v682_v25 = vpop.permute.xlu0 %681 }
  0xfc   :  { %v568_v26 = vpop.permute.xlu1 %567  ;;  %vm283_vm3 = vcmp.gt.s32.totalorder %v4556_v22, 1 }
  0xfd   :  { %vm574_vm4 = vcmp.eq.s32.totalorder %v568_v26, %v4260_v33  ;;  %3633 = vmatprep.mubr.msk.bf16.mxu1 %vm160_vm6, %v4489_v23  ;;  %v287_v26 = vsel %vm283_vm3, 0.0, %v4058_v11 }
  0xfe   :  { %v578_v27 = vsel %vm574_vm4, 1.0, %v4057_v37  ;;  %1543 = vperm.xlu1 %3880, %v287_v26  }
  0xff   :  { %v4497_v29 = vpack.c.bf16 %v579_v0, %v578_v27  ;;  %v4566_v0 = vld [vmem:[%s6462_s3 + $0x18] sm:$0xff] }
 0x100   :  { %vm255_vm4 = vcmp.gt.s32.totalorder %v4566_v0, 0  ;;  %vm315_vm15 = vcmp.gt.s32.totalorder %v4566_v0, 2  ;;  %vm345_vm3 = vcmp.gt.s32.totalorder %v4566_v0, 3 }
 0x101   :  { %v592_v31 = vpop.permute.xlu1 %591  ;;  %3634 = vmatmul.mubr.msk.bf16.vlgmr.msra.gmra.mrb[4].mxu1 %vm160_vm6, %v4497_v29  ;;  %v319_v13 = vsel %vm315_vm15, 0.0, %v4058_v11  ;;  %vm402_vm15 = vcmp.gt.s32.totalorder %v4533_v5, 5 }
 0x102   :  { %vm602_vm7 = vcmp.eq.s32.totalorder %v592_v31, %v4260_v33  ;;  %3654 = vmatpush3.bf16.msra.mxu1 %v3886_v1  ;;  %v639_v1 = vsel %vm635_vm12, 1.0, %v4057_v37  ;;  %v259_v31 = vsel %vm255_vm4, 0.0, %v4058_v11  ;;  %vm313_vm12 = vcmp.gt.s32.totalorder %v4556_v22, 2 }
 0x103   :  { %v606_v36 = vsel %vm602_vm7, 1.0, %v4057_v37  ;;  %3655 = vmatprep.subr.bf16.mxu1 %v3887_v30  ;;  %vm692_vm7 = vcmp.eq.s32.totalorder %v682_v25, %v4260_v33  ;;  %1533 = vperm.xlu1 %3880, %v259_v31  }
 0x104   :  { %v4507_v38 = vpack.c.bf16 %v607_v34, %v606_v36 }
 0x105   :  { %v598_v39 = vpop.permute.xlu1 %597 }
 0x106   :  { %vm604_vm8 = vcmp.eq.s32.totalorder %v598_v39, %v4260_v33  ;;  %3637 = vmatprep.mubr.msk.bf16.mxu1 %vm160_vm6, %v4507_v38  ;;  %3656 = vmatpush3.bf16.msra.mxu1 %v3887_v30  ;;  %v691_v39 = vpop.permute.xlu0 %690 }
 0x107   :  { %v608_v44 = vsel %vm604_vm8, 1.0, %v4057_v37  ;;  %vm285_vm8 = vcmp.gt.s32.totalorder %v4566_v0, 1 }
 0x109   :  { %v601_v46 = vpop.permute.xlu1 %600 }
 0x10a   :  { %vm605_vm9 = vcmp.eq.s32.totalorder %v601_v46, %v4260_v33  ;;  %v289_v46 = vsel %vm285_vm8, 0.0, %v4058_v11  ;;  %vm375_vm8 = vcmp.gt.s32.totalorder %v4566_v0, 4 }
 0x10b   :  { %v609_v47 = vsel %vm605_vm9, 1.0, %v4057_v37  ;;  %vm253_vm9 = vcmp.gt.s32.totalorder %v4556_v22, 0  ;;  %1553 = vperm.xlu1 %3880, %v289_v46  }
 0x10c   :  { %v4516_v49 = vpack.c.bf16 %v609_v47, %v608_v44  ;;  %v696_v44 = vsel %vm692_vm7, 1.0, %v4057_v37  ;;  %v257_v47 = vsel %vm253_vm9, 0.0, %v4058_v11  ;;  %vm342_vm7 = vcmp.gt.s32.totalorder %v4533_v5, 3 }
 0x10d   :  { %1523 = vperm.xlu0 %3881, %v257_v47  }
 0x10e   :  { %v625_v52 = vpop.permute.xlu1 %624  ;;  %3638 = vmatmul.mubr.msk.bf16.gmra.mrb[8].mxu1 %vm160_vm6, %v4516_v49 }
 0x10f   :  { %vm633_vm11 = vcmp.eq.s32.totalorder %v625_v52, %v4260_v33  ;;  %v4590_v52 = vld [vmem:[%s6462_s3 + $0x10] sm:$0xff] }
 0x110   :  { %v637_v58 = vsel %vm633_vm11, 1.0, %v4057_v37  ;;  %vm695_vm11 = vcmp.eq.s32.totalorder %v691_v39, %v4260_v33  ;;  %vm284_vm0 = vcmp.gt.s32.totalorder %v4590_v52, 1  ;;  %vm314_vm4 = vcmp.gt.s32.totalorder %v4590_v52, 2 }
 0x111   :  { %v4524_v59 = vpack.c.bf16 %v637_v58, %v636_v53  ;;  %v317_v58 = vsel %vm313_vm12, 0.0, %v4058_v11  ;;  %v318_v18 = vsel %vm314_vm4, 0.0, %v4058_v11  ;;  %vm344_vm9 = vcmp.gt.s32.totalorder %v4590_v52, 3 }
 0x112   :  { %v628_v62 = vpop.permute.xlu1 %627  ;;  %1563 = vperm.xlu1 %3880, %v317_v58   ;;  %vm405_vm12 = vcmp.gt.s32.totalorder %v4566_v0, 5  ;;  %vm465_vm4 = vcmp.gt.s32.totalorder %v4566_v0, 7 }
 0x113   :  { %vm634_vm13 = vcmp.eq.s32.totalorder %v628_v62, %v4260_v33  ;;  %3641 = vmatprep.mubr.msk.bf16.mxu1 %vm160_vm6, %v4524_v59  ;;  %v699_v62 = vsel %vm695_vm11, 1.0, %v4057_v37  ;;  %vm372_vm11 = vcmp.gt.s32.totalorder %v4533_v5, 4 }
 0x114   :  { %v638_v6 = vsel %vm634_vm13, 1.0, %v4057_v37  ;;  %vm254_vm13 = vcmp.gt.s32.totalorder %v4590_v52, 0  ;;  %v376_v25 = vsel %vm372_vm11, 0.0, %v4058_v11  ;;  %vm523_vm11 = vcmp.gt.s32.totalorder %v4556_v22, 9 }
 0x115   :  { %v4538_v15 = vpack.c.bf16 %v639_v1, %v638_v6  ;;  %v258_v1 = vsel %vm254_vm13, 0.0, %v4058_v11  ;;  %vm374_vm13 = vcmp.gt.s32.totalorder %v4590_v52, 4  ;;  %v527_v47 = vsel %vm523_vm11, 0.0, %v4058_v11 }
 0x116   :  { %1528 = vperm.xlu0 %3881, %v258_v1   ;;  %1573 = vperm.xlu1 %3880, %v319_v13   ;;  %vm584_vm11 = vcmp.gt.s32.totalorder %v4590_v52, 11 }
 0x117   :  { %v652_v17 = vpop.permute.xlu1 %651  ;;  %3642 = vmatmul.mubr.msk.bf16.gmra.mrb[12].mxu1 %vm160_vm6, %v4538_v15 }
 0x118   :  { %vm662_vm1 = vcmp.eq.s32.totalorder %v652_v17, %v4260_v33 }
 0x119   :  { %v666_v20 = vsel %vm662_vm1, 1.0, %v4057_v37  ;;  %vm343_vm1 = vcmp.gt.s32.totalorder %v4556_v22, 3 }
 0x11a   :  { %v4551_v21 = vpack.c.bf16 %v667_v16, %v666_v20  ;;  %v349_v16 = vsel %vm345_vm3, 0.0, %v4058_v11  ;;  %v346_v20 = vsel %vm342_vm7, 0.0, %v4058_v11  ;;  %vm432_vm3 = vcmp.gt.s32.totalorder %v4533_v5, 6 }
 0x11b   :  { %v658_v2 = vpop.permute.xlu1 %657  ;;  %vm493_vm7 = vcmp.gt.s32.totalorder %v4556_v22, 8 }
 0x11c   :  { %vm664_vm2 = vcmp.eq.s32.totalorder %v658_v2, %v4260_v33  ;;  %3645 = vmatprep.mubr.msk.bf16.mxu1 %vm160_vm6, %v4551_v21 }
 0x11d   :  { %v668_v27 = vsel %vm664_vm2, 1.0, %v4057_v37  ;;  %vm312_vm2 = vcmp.gt.s32.totalorder %v4533_v5, 2 }
 0x11e   :  { %v316_v17 = vsel %vm312_vm2, 0.0, %v4058_v11  ;;  %vm463_vm2 = vcmp.gt.s32.totalorder %v4556_v22, 7 }
 0x11f   :  { %v661_v30 = vpop.permute.xlu1 %660 }
 0x120   :  { %vm665_vm5 = vcmp.eq.s32.totalorder %v661_v30, %v4260_v33  ;;  %v467_v30 = vsel %vm463_vm2, 0.0, %v4058_v11  ;;  %vm524_vm2 = vcmp.gt.s32.totalorder %v4590_v52, 9 }
 0x121   :  { %v669_v34 = vsel %vm665_vm5, 1.0, %v4057_v37  ;;  %vm373_vm5 = vcmp.gt.s32.totalorder %v4556_v22, 4 }
 0x122   :  { %v4574_v36 = vpack.c.bf16 %v669_v34, %v668_v27  ;;  %v406_v27 = vsel %vm402_vm15, 0.0, %v4058_v11  ;;  %vm553_vm15 = vcmp.gt.s32.totalorder %v4556_v22, 10 }
 0x124   :  { %v685_v43 = vpop.permute.xlu1 %684  ;;  %3646 = vmatmul.mubr.msk.bf16.gmra.mrb[16].mxu1 %vm160_vm6, %v4574_v36 }
 0x125   :  { %vm693_vm10 = vcmp.eq.s32.totalorder %v685_v43, %v4260_v33 }
 0x126   :  { %v697_v51 = vsel %vm693_vm10, 1.0, %v4057_v37  ;;  %vm403_vm10 = vcmp.gt.s32.totalorder %v4556_v22, 5 }
 0x127   :  { %v4592_v53 = vpack.c.bf16 %v697_v51, %v696_v44  ;;  %v407_v2 = vsel %vm403_vm10, 0.0, %v4058_v11  ;;  %vm464_vm10 = vcmp.gt.s32.totalorder %v4590_v52, 7 }
 0x128   :  { %v688_v61 = vpop.permute.xlu1 %687  ;;  %v468_v39 = vsel %vm464_vm10, 0.0, %v4058_v11  ;;  %vm615_vm10 = vcmp.gt.s32.totalorder %v4566_v0, 12 }
 0x129   :  { %vm694_vm14 = vcmp.eq.s32.totalorder %v688_v61, %v4260_v33  ;;  %3649 = vmatprep.mubr.msk.bf16.mxu1 %vm160_vm6, %v4592_v53  ;;  %v288_v33 = vsel %vm284_vm0, 0.0, %v4058_v11  ;;  %vm435_vm0 = vcmp.gt.s32.totalorder %v4566_v0, 6 }
 0x12a   :  { %v698_v6 = vsel %vm694_vm14, 1.0, %v4057_v37  ;;  %1548 = vperm.xlu0 %3881, %v288_v33   ;;  %v347_v37 = vsel %vm343_vm1, 0.0, %v4058_v11  ;;  %vm433_vm14 = vcmp.gt.s32.totalorder %v4556_v22, 6  ;;  %vm404_vm1 = vcmp.gt.s32.totalorder %v4590_v52, 5 }
 0x12b   :  { %v4602_v8 = vpack.c.bf16 %v699_v62, %v698_v6  ;;  %1583 = vperm.xlu1 %3880, %v347_v37   ;;  %v437_v26 = vsel %vm433_vm14, 0.0, %v4058_v11  ;;  %vm494_vm14 = vcmp.gt.s32.totalorder %v4590_v52, 8  ;;  %v528_v33 = vsel %vm524_vm2, 0.0, %v4058_v11 }
 0x12c   :  { %v498_v61 = vsel %vm494_vm14, 0.0, %v4058_v11  ;;  %vm645_vm14 = vcmp.gt.s32.totalorder %v4566_v0, 13  ;;  %vm675_vm2 = vcmp.gt.s32.totalorder %v4566_v0, 14 }
 0x12d   :  { %3650 = vmatmul.mubr.msk.bf16.gmra.mrb[20].mxu1 %vm160_vm6, %v4602_v8 }
 0x12e   :  { %3657 = vmatprep.mubr.msk.bf16.mxu1 %vm160_vm6, %v4275_v45  ;;  %1558 = vperm.xlu0 %3881, %v316_v17   ;;  %v377_v45 = vsel %vm373_vm5, 0.0, %v4058_v11  ;;  %vm434_vm5 = vcmp.gt.s32.totalorder %v4590_v52, 6 }
 0x12f   :  { %1593 = vperm.xlu1 %3880, %v349_v16   ;;  %v438_v31 = vsel %vm434_vm5, 0.0, %v4058_v11  ;;  %vm585_vm5 = vcmp.gt.s32.totalorder %v4566_v0, 11 }
 0x132   :  { %1568 = vperm.xlu0 %3881, %v318_v18  }
 0x133   :  { %1603 = vperm.xlu1 %3880, %v377_v45   ;;  %v589_v45 = vsel %vm585_vm5, 0.0, %v4058_v11  ;;  %vm672_vm5 = vcmp.gt.s32.totalorder %v4533_v5, 14 }
 0x135   :  { %3658 = vmatmul.mubr.msk.bf16.vlgmr.msra.gmra.mrb[24].mxu1 %vm160_vm6, %v4271_v42  ;;  %v379_v42 = vsel %vm375_vm8, 0.0, %v4058_v11  ;;  %vm462_vm8 = vcmp.gt.s32.totalorder %v4533_v5, 7 }
 0x136   :  { %3661 = vmatprep.mubr.msk.bf16.mxu1 %vm160_vm6, %v4287_v50  ;;  %1578 = vperm.xlu0 %3881, %v346_v20   ;;  %v348_v50 = vsel %vm344_vm9, 0.0, %v4058_v11  ;;  %vm495_vm9 = vcmp.gt.s32.totalorder %v4566_v0, 8 }
 0x137   :  { %1613 = vperm.xlu1 %3880, %v379_v42   ;;  %v499_v34 = vsel %vm495_vm9, 0.0, %v4058_v11  ;;  %vm582_vm9 = vcmp.gt.s32.totalorder %v4533_v5, 11 }
 0x13a   :  { %1588 = vperm.xlu0 %3881, %v348_v50   ;;  %v586_v50 = vsel %vm582_vm9, 0.0, %v4058_v11  ;;  %vm702_vm9 = vcmp.gt.s32.totalorder %v4533_v5, 15 }
 0x13b   :  { %1623 = vperm.xlu1 %3880, %v407_v2  }
 0x13d   :  { %3662 = vmatmul.mubr.msk.bf16.gmra.mrb[28].mxu1 %vm160_vm6, %v4295_v55  ;;  %v409_v55 = vsel %vm405_vm12, 0.0, %v4058_v11  ;;  %vm492_vm12 = vcmp.gt.s32.totalorder %v4533_v5, 8 }
 0x13e   :  { %3665 = vmatprep.mubr.msk.bf16.mxu1 %vm160_vm6, %v4306_v60  ;;  %1598 = vperm.xlu0 %3881, %v376_v25   ;;  %v378_v60 = vsel %vm374_vm13, 0.0, %v4058_v11  ;;  %v496_v51 = vsel %vm492_vm12, 0.0, %v4058_v11  ;;  %vm525_vm13 = vcmp.gt.s32.totalorder %v4566_v0, 9  ;;  %vm643_vm12 = vcmp.gt.s32.totalorder %v4556_v22, 13 }
 0x13f   :  { %1633 = vperm.xlu1 %3880, %v409_v55   ;;  %v529_v58 = vsel %vm525_vm13, 0.0, %v4058_v11  ;;  %v588_v55 = vsel %vm584_vm11, 0.0, %v4058_v11  ;;  %vm612_vm13 = vcmp.gt.s32.totalorder %v4533_v5, 12  ;;  %vm3148_vm11 = vcmask 523264  }
 0x142   :  { %1608 = vperm.xlu0 %3881, %v378_v60   ;;  %v647_v60 = vsel %vm643_vm12, 0.0, %v4058_v11 }
 0x143   :  { %1643 = vperm.xlu1 %3880, %v437_v26   ;;  %v649_v26 = vsel %vm645_vm14, 0.0, %v4058_v11 }
 0x145   :  { %3666 = vmatmul.mubr.msk.bf16.gmra.mrb[32].mxu1 %vm160_vm6, %v4315_v3  ;;  %v439_v3 = vsel %vm435_vm0, 0.0, %v4058_v11  ;;  %vm522_vm0 = vcmp.gt.s32.totalorder %v4533_v5, 9 }
 0x146   :  { %3669 = vmatprep.mubr.msk.bf16.mxu1 %vm160_vm6, %v4324_v9  ;;  %1618 = vperm.xlu0 %3881, %v406_v27   ;;  %v408_v9 = vsel %vm404_vm1, 0.0, %v4058_v11  ;;  %v526_v6 = vsel %vm522_vm0, 0.0, %v4058_v11  ;;  %vm555_vm1 = vcmp.gt.s32.totalorder %v4566_v0, 10  ;;  %vm673_vm0 = vcmp.gt.s32.totalorder %v4556_v22, 14 }
 0x147   :  { %1653 = vperm.xlu1 %3880, %v439_v3   ;;  %v559_v13 = vsel %vm555_vm1, 0.0, %v4058_v11  ;;  %vm642_vm1 = vcmp.gt.s32.totalorder %v4533_v5, 13 }
 0x14a   :  { %1628 = vperm.xlu0 %3881, %v408_v9   ;;  %v677_v9 = vsel %vm673_vm0, 0.0, %v4058_v11 }
 0x14b   :  { %1663 = vperm.xlu1 %3880, %v467_v30  }
 0x14d   :  { %3670 = vmatmul.mubr.msk.bf16.gmra.mrb[36].mxu1 %vm160_vm6, %v4334_v14  ;;  %v436_v14 = vsel %vm432_vm3, 0.0, %v4058_v11  ;;  %vm583_vm3 = vcmp.gt.s32.totalorder %v4556_v22, 11 }
 0x14e   :  { %3673 = vmatprep.mubr.msk.bf16.mxu1 %vm160_vm6, %v4342_v19  ;;  %1638 = vperm.xlu0 %3881, %v436_v14   ;;  %v469_v19 = vsel %vm465_vm4, 0.0, %v4058_v11  ;;  %vm552_vm4 = vcmp.gt.s32.totalorder %v4533_v5, 10  ;;  %v587_v37 = vsel %vm583_vm3, 0.0, %v4058_v11  ;;  %v646_v14 = vsel %vm642_vm1, 0.0, %v4058_v11 }
 0x14f   :  { %1673 = vperm.xlu1 %3880, %v469_v19   ;;  %v556_v17 = vsel %vm552_vm4, 0.0, %v4058_v11  ;;  %vm644_vm3 = vcmp.gt.s32.totalorder %v4590_v52, 13  ;;  %v679_v19 = vsel %vm675_vm2, 0.0, %v4058_v11  ;;  %vm703_vm4 = vcmp.gt.s32.totalorder %v4556_v22, 15 }
 0x152   :  { %1648 = vperm.xlu0 %3881, %v438_v31   ;;  %v648_v31 = vsel %vm644_vm3, 0.0, %v4058_v11 }
 0x155   :  { %3674 = vmatmul.mubr.msk.bf16.gmra.mrb[40].mxu1 %vm160_vm6, %v4352_v24  ;;  %v497_v24 = vsel %vm493_vm7, 0.0, %v4058_v11  ;;  %vm554_vm7 = vcmp.gt.s32.totalorder %v4590_v52, 10 }
 0x156   :  { %3677 = vmatprep.mubr.msk.bf16.mxu1 %vm160_vm6, %v4360_v28  ;;  %v466_v28 = vsel %vm462_vm8, 0.0, %v4058_v11  ;;  %1683 = vperm.xlu1 %3880, %v497_v24   ;;  %v558_v20 = vsel %vm554_vm7, 0.0, %v4058_v11  ;;  %vm613_vm8 = vcmp.gt.s32.totalorder %v4556_v22, 12  ;;  %vm705_vm7 = vcmp.gt.s32.totalorder %v4566_v0, 15 }
 0x157   :  { %1658 = vperm.xlu0 %3881, %v466_v28   ;;  %v706_v0 = vsel %vm702_vm9, 0.0, %v4058_v11 }
 0x15a   :  { %1693 = vperm.xlu1 %3880, %v499_v34  }
 0x15b   :  { %1668 = vperm.xlu0 %3881, %v468_v39   ;;  %v709_v39 = vsel %vm705_vm7, 0.0, %v4058_v11 }
 0x15d   :  { %3678 = vmatmul.mubr.msk.bf16.gmra.mrb[44].mxu1 %vm160_vm6, %v4368_v35 }
 0x15e   :  { %3681 = vmatprep.mubr.msk.bf16.mxu1 %vm160_vm6, %v4375_v40  ;;  %1703 = vperm.xlu1 %3880, %v527_v47  }
 0x15f   :  { %v4684_v43 = vpop.f32.mrb[4].mxu0  ;;  %1678 = vperm.xlu0 %3881, %v496_v51  }
 0x160   :  { %v4686_v44 = vpop.f32.mrb[5].mxu0 }
 0x161   :  { %v4688_v46 = vpop.f32.mrb[6].mxu0 }
 0x162   :  { %v4692_v35 = vpop.f32.mrb[7].mxu0  ;;  %1713 = vperm.xlu1 %3880, %v529_v58  }
 0x163   :  { %1688 = vperm.xlu0 %3881, %v498_v61  }
 0x165   :  { %3682 = vmatmul.mubr.msk.bf16.gmra.mrb[48].mxu1 %vm160_vm6, %v4384_v48 }
 0x166   :  { %3685 = vmatprep.mubr.msk.bf16.mxu1 %vm160_vm6, %v4395_v56  ;;  %v557_v56 = vsel %vm553_vm15, 0.0, %v4058_v11  ;;  %vm614_vm15 = vcmp.gt.s32.totalorder %v4590_v52, 12 }
 0x167   :  { %v4703_v40 = vpop.f32.mrb[8].mxu0  ;;  %1723 = vperm.xlu1 %3880, %v557_v56   ;;  %1698 = vperm.xlu0 %3881, %v526_v6   ;;  %v618_v27 = vsel %vm614_vm15, 0.0, %v4058_v11 }
 0x168   :  { %v4708_v62 = vpop.f32.mrb[9].mxu0 }
 0x169   :  { %v4710_v48 = vpop.f32.mrb[10].mxu0 }
 0x16a   :  { %v4713_v1 = vpop.f32.mrb[11].mxu0 }
 0x16b   :  { %1733 = vperm.xlu1 %3880, %v559_v13   ;;  %1708 = vperm.xlu0 %3881, %v528_v33  }
 0x16d   :  { %3686 = vmatmul.mubr.msk.bf16.gmra.mrb[52].mxu1 %vm160_vm6, %v4404_v63 }
 0x16e   :  { %3689 = vmatprep.mubr.msk.bf16.mxu1 %vm160_vm6, %v4417_v7 }
 0x16f   :  { %1743 = vperm.xlu1 %3880, %v587_v37   ;;  %1718 = vperm.xlu0 %3881, %v556_v17  }
 0x173   :  { %v4726_v63 = vpop.f32.mrb[12].mxu0  ;;  %1753 = vperm.xlu1 %3880, %v589_v45   ;;  %1728 = vperm.xlu0 %3881, %v558_v20  }
 0x174   :  { %v4729_v7 = vpop.f32.mrb[13].mxu0 }
 0x175   :  { %3690 = vmatmul.mubr.msk.bf16.gmra.mrb[56].mxu1 %vm160_vm6, %v4438_v41  ;;  %v4735_v16 = vpop.f32.mrb[14].mxu0 }
 0x176   :  { %3693 = vmatprep.mubr.msk.bf16.mxu1 %vm160_vm6, %v4446_v57  ;;  %v4740_v18 = vpop.f32.mrb[15].mxu0  ;;  %v617_v57 = vsel %vm613_vm8, 0.0, %v4058_v11  ;;  %vm674_vm8 = vcmp.gt.s32.totalorder %v4590_v52, 14 }
 0x177   :  { %1763 = vperm.xlu1 %3880, %v617_v57   ;;  %1738 = vperm.xlu0 %3881, %v586_v50   ;;  %v678_v47 = vsel %vm674_vm8, 0.0, %v4058_v11 }
 0x17b   :  { %1748 = vperm.xlu0 %3881, %v588_v55  }
 0x17c   :  { %v4744_v42 = vpop.f32.mrb[16].mxu0 }
 0x17d   :  { %3694 = vmatmul.mubr.msk.bf16.gmra.mrb[60].mxu1 %vm160_vm6, %v4461_v4  ;;  %v4750_v41 = vpop.f32.mrb[17].mxu0  ;;  %v619_v4 = vsel %vm615_vm10, 0.0, %v4058_v11  ;;  %vm704_vm10 = vcmp.gt.s32.totalorder %v4590_v52, 15 }
 0x17e   :  { %3697 = vmatprep.mubr.msk.bf16.mxu1 %vm160_vm6, %v4469_v10  ;;  %v4758_v2 = vpop.f32.mrb[18].mxu0  ;;  %1773 = vperm.xlu1 %3880, %v619_v4   ;;  %v616_v10 = vsel %vm612_vm13, 0.0, %v4058_v11  ;;  %v708_v51 = vsel %vm704_vm10, 0.0, %v4058_v11 }
 0x17f   :  { %v4760_v25 = vpop.f32.mrb[19].mxu0  ;;  %1758 = vperm.xlu0 %3881, %v616_v10  }
 0x182   :  { %1783 = vperm.xlu1 %3880, %v647_v60  }
 0x183   :  { %1768 = vperm.xlu0 %3881, %v618_v27  }
 0x185   :  { %3698 = vmatmul.mubr.msk.bf16.gmra.mrb[64].mxu1 %vm160_vm6, %v4481_v12 }
 0x186   :  { %3701 = vmatprep.mubr.msk.bf16.mxu1 %vm160_vm6, %v4489_v23  ;;  %1793 = vperm.xlu1 %3880, %v649_v26  }
 0x187   :  { %1778 = vperm.xlu0 %3881, %v646_v14  }
 0x189   :  { %v4776_v3 = vpop.f32.mrb[20].mxu0 }
 0x18a   :  { %v4780_v12 = vpop.f32.mrb[21].mxu0  ;;  %1803 = vperm.xlu1 %3880, %v677_v9  }
 0x18b   :  { %v4782_v23 = vpop.f32.mrb[22].mxu0  ;;  %1788 = vperm.xlu0 %3881, %v648_v31  }
 0x18c   :  { %v4785_v30 = vpop.f32.mrb[23].mxu0 }
 0x18d   :  { %3702 = vmatmul.mubr.msk.bf16.gmra.mrb[68].mxu1 %vm160_vm6, %v4497_v29  ;;  %v707_v29 = vsel %vm703_vm4, 0.0, %v4058_v11 }
 0x18e   :  { %3705 = vmatprep.mubr.msk.bf16.mxu1 %vm160_vm6, %v4507_v38  ;;  %1813 = vperm.xlu1 %3880, %v679_v19   ;;  %v676_v38 = vsel %vm672_vm5, 0.0, %v4058_v11  ;;  %v146_v11 = vsub.s32 1, %v4393_v54 }
 0x18f   :  { %1798 = vperm.xlu0 %3881, %v676_v38  }
 0x190   :  { %v147_v6 = vrot.slane %v4409_v32, %v146_v11 }
 0x192   :  { %v4798_v24 = vpop.f32.mrb[24].mxu0  ;;  %1823 = vperm.xlu1 %3880, %v707_v29  }
 0x193   :  { %v4800_v28 = vpop.f32.mrb[25].mxu0  ;;  %1808 = vperm.xlu0 %3881, %v678_v47  }
 0x194   :  { %v4803_v34 = vpop.f32.mrb[26].mxu0 }
 0x195   :  { %3706 = vmatmul.mubr.msk.bf16.gmra.mrb[72].mxu1 %vm160_vm6, %v4516_v49  ;;  %v4809_v22 = vpop.f32.mrb[27].mxu0 }
 0x196   :  { %3709 = vmatprep.mubr.msk.bf16.mxu1 %vm160_vm6, %v4524_v59  ;;  %1833 = vperm.xlu1 %3880, %v709_v39  }
 0x197   :  { %1818 = vperm.xlu0 %3881, %v706_v0  }
 0x19b   :  { %1828 = vperm.xlu0 %3881, %v708_v51  }
 0x19d   :  { %3710 = vmatmul.mubr.msk.bf16.gmra.mrb[76].mxu1 %vm160_vm6, %v4538_v15 }
 0x19e   :  { %3713 = vmatprep.mubr.msk.bf16.mxu1 %vm160_vm6, %v4551_v21 }
 0x19f   :  { %v4823_v49 = vpop.f32.mrb[28].mxu0 }
 0x1a0   :  { %v4825_v59 = vpop.f32.mrb[29].mxu0 }
 0x1a1   :  { %v4828_v5 = vpop.f32.mrb[30].mxu0 }
 0x1a2   :  { %v4830_v58 = vpop.f32.mrb[31].mxu0 }
 0x1a5   :  { %3714 = vmatmul.mubr.msk.bf16.gmra.mrb[80].mxu1 %vm160_vm6, %v4574_v36 }
 0x1a6   :  { %3717 = vmatprep.mubr.msk.bf16.mxu1 %vm160_vm6, %v4592_v53 }
 0x1a8   :  { %v4836_v15 = vpop.f32.mrb[32].mxu0 }
 0x1a9   :  { %v4838_v21 = vpop.f32.mrb[33].mxu0 }
 0x1aa   :  { %v4840_v52 = vpop.f32.mrb[34].mxu0 }
 0x1ab   :  { %v4842_v61 = vpop.f32.mrb[35].mxu0 }
 0x1ad   :  { %3718 = vmatmul.mubr.msk.bf16.gmra.mrb[84].mxu1 %vm160_vm6, %v4602_v8 }
 0x1b5   :  { %v3623_v56 = vpop.f32.mrb[36].mxu0 }
 0x1b6   :  { %v984_v36 = vpop.f32.mrb[37].mxu0 }
 0x1b7   :  { %v3624_v13 = vpop.f32.mrb[38].mxu0 }
 0x1b8   :  { %v987_v33 = vpop.f32.mrb[39].mxu0 }
 0x1be   :  { %v3627_v32 = vpop.f32.mrb[40].mxu0 }
 0x1bf   :  { %v1000_v31 = vpop.f32.mrb[41].mxu0 }
 0x1c0   :  { %v3583_v53 = vpop.f32.mrb[0].mxu1 }
 0x1c1   :  { %v210_v37 = vadd.f32 %v3583_v53, %v147_v6  ;;  %v201_v17 = vpop.f32.mrb[1].mxu1 }
 0x1c2   :  { %v202_v45 = vadd.f32 %v201_v17, %v147_v6  ;;  %v3584_v20 = vpop.f32.mrb[2].mxu1 }
 0x1c3   :  { %v4848_v57 = vmul.f32 0.35355338, %v210_v37  ;;  %v213_v50 = vadd.f32 %v3584_v20, %v147_v6  ;;  %v204_v4 = vpop.f32.mrb[3].mxu1 }
 0x1c4   :  { %v4850_v55 = vmul.f32 0.35355338, %v202_v45  ;;  %v205_v8 = vadd.f32 %v204_v4, %v147_v6 }
 0x1c5   :  { %v4853_v60 = vmul.f32 %v3623_v56, %v4848_v57  ;;  %v4855_v10 = vmul.f32 0.35355338, %v213_v50  ;;  %v1418_v26 = vmul.f32 %v4684_v43, %v4848_v57  ;;  %v4861_v27 = vmul.f32 %v4703_v40, %v4848_v57  ;;  %v3628_v40 = vpop.f32.mrb[42].mxu0 }
 0x1c6   :  { %v4864_v9 = vmul.f32 %v984_v36, %v4850_v55  ;;  %v4866_v14 = vmul.f32 0.35355338, %v205_v8  ;;  %v4869_v19 = vmul.f32 %v3627_v32, %v4848_v57  ;;  %v1416_v29 = vmul.f32 %v4686_v44, %v4850_v55  ;;  %v1003_v44 = vpop.f32.mrb[43].mxu0 }
 0x1c7   :  { %v4874_v38 = vmul.f32 %v3624_v13, %v4855_v10  ;;  %v4877_v43 = vmul.f32 %v1000_v31, %v4850_v55  ;;  %v1419_v39 = vmul.f32 %v4688_v46, %v4855_v10  ;;  %v1420_v47 = vmul.f32 %v4708_v62, %v4850_v55 }
 0x1c8   :  { %v4884_v0 = vmul.f32 %v987_v33, %v4866_v14  ;;  %v4887_v51 = vmul.f32 %v3628_v40, %v4855_v10  ;;  %v1417_v11 = vmul.f32 %v4692_v35, %v4866_v14  ;;  %v1421_v56 = vmul.f32 %v4713_v1, %v4866_v14 }
 0x1c9   :  { %v1497_v6 = vpack.c.bf16 %v4874_v38, %v4853_v60  ;;  %v4896_v46 = vmul.f32 %v1003_v44, %v4866_v14  ;;  %v1481_v62 = vpack.c.bf16 %v1419_v39, %v1418_v26  ;;  %v1423_v36 = vmul.f32 %v4710_v48, %v4855_v10 }
 0x1ca   :  { %v1496_v13 = vpack.c.bf16 %v4884_v0, %v4864_v9  ;;  %v1499_v33 = vpack.c.bf16 %v4887_v51, %v4869_v19  ;;  %v1480_v35 = vpack.c.bf16 %v1417_v11, %v1416_v29  ;;  %v1482_v53 = vpack.c.bf16 %v1421_v56, %v1420_v47 }
 0x1cb   :  { %v1498_v1 = vpack.c.bf16 %v4896_v46, %v4877_v43  ;;  %v1483_v37 = vpack.c.bf16 %v1423_v36, %v4861_v27  ;;  %v1424_v17 = vmul.f32 %v4729_v7, %v4850_v55  ;;  %v1425_v45 = vmul.f32 %v4740_v18, %v4866_v14  ;;  %v3631_v40 = vpop.f32.mrb[44].mxu0 }
 0x1cc   :  { %3725 = vmatprep.mubr.msk.bf16.mxu0 %vm160_vm6, %v1480_v35  ;;  %v1426_v48 = vmul.f32 %v4726_v63, %v4848_v57  ;;  %v1427_v20 = vmul.f32 %v4735_v16, %v4855_v10  ;;  %v1428_v50 = vmul.f32 %v4750_v41, %v4850_v55  ;;  %v1429_v4 = vmul.f32 %v4760_v25, %v4866_v14  ;;  %v1016_v47 = vpop.f32.mrb[45].mxu0 }
 0x1cd   :  { %3726 = vmatmul.mubr.msk.bf16.vlgmr.msra.gmra.mrb[48].mxu0 %vm160_vm6, %v1481_v62  ;;  %v1484_v7 = vpack.c.bf16 %v1425_v45, %v1424_v17  ;;  %v1430_v18 = vmul.f32 %v4744_v42, %v4848_v57  ;;  %v1431_v8 = vmul.f32 %v4758_v2, %v4855_v10  ;;  %v1432_v63 = vmul.f32 %v4780_v12, %v4850_v55  ;;  %v3632_v11 = vpop.f32.mrb[46].mxu0 }
 0x1ce   :  { %3729 = vmatprep.mubr.msk.bf16.mxu0 %vm160_vm6, %v1482_v53  ;;  %v1485_v16 = vpack.c.bf16 %v1427_v20, %v1426_v48  ;;  %v1486_v32 = vpack.c.bf16 %v1429_v4, %v1428_v50  ;;  %v1433_v41 = vmul.f32 %v4785_v30, %v4866_v14  ;;  %v1434_v25 = vmul.f32 %v4776_v3, %v4848_v57 }
 0x1cf   :  { %v1487_v26 = vpack.c.bf16 %v1431_v8, %v1430_v18  ;;  %v1435_v42 = vmul.f32 %v4782_v23, %v4855_v10  ;;  %v1436_v2 = vmul.f32 %v4800_v28, %v4850_v55  ;;  %v1437_v12 = vmul.f32 %v4809_v22, %v4866_v14 }
 0x1d0   :  { %v1488_v27 = vpack.c.bf16 %v1433_v41, %v1432_v63  ;;  %v4940_v31 = vmul.f32 %v4798_v24, %v4848_v57  ;;  %v4944_v30 = vmul.f32 %v4803_v34, %v4855_v10  ;;  %v4948_v3 = vmul.f32 %v4825_v59, %v4850_v55 }
 0x1d1   :  { %v1489_v23 = vpack.c.bf16 %v1435_v42, %v1434_v25  ;;  %v1490_v29 = vpack.c.bf16 %v1437_v12, %v1436_v2  ;;  %v1441_v28 = vmul.f32 %v4830_v58, %v4866_v14  ;;  %v1442_v22 = vmul.f32 %v4823_v49, %v4848_v57 }
 0x1d2   :  { %v1491_v24 = vpack.c.bf16 %v4944_v30, %v4940_v31  ;;  %v1443_v34 = vmul.f32 %v4828_v5, %v4855_v10  ;;  %v1444_v39 = vmul.f32 %v4838_v21, %v4850_v55  ;;  %v1445_v59 = vmul.f32 %v4842_v61, %v4866_v14  ;;  %v1019_v61 = vpop.f32.mrb[47].mxu0 }
 0x1d3   :  { %v1492_v44 = vpack.c.bf16 %v1441_v28, %v4948_v3  ;;  %v4965_v58 = vmul.f32 %v4836_v15, %v4848_v57  ;;  %v4969_v49 = vmul.f32 %v4840_v52, %v4855_v10  ;;  %v4972_v62 = vmul.f32 %v3631_v40, %v4848_v57 }
 0x1d4   :  { %v1493_v56 = vpack.c.bf16 %v1443_v34, %v1442_v22  ;;  %v1494_v5 = vpack.c.bf16 %v1445_v59, %v1444_v39  ;;  %v4975_v21 = vmul.f32 %v3632_v11, %v4855_v10  ;;  %v4981_v36 = vmul.f32 %v1016_v47, %v4850_v55  ;;  %v3635_v17 = vpop.f32.mrb[4].mxu1 }
 0x1d5   :  { %3730 = vmatmul.mubr.msk.bf16.gmra.mrb[52].mxu0 %vm160_vm6, %v1483_v37  ;;  %v1495_v15 = vpack.c.bf16 %v4969_v49, %v4965_v58  ;;  %v4984_v52 = vmul.f32 %v1019_v61, %v4866_v14  ;;  %v1032_v45 = vpop.f32.mrb[5].mxu1  ;;  %v4993_v48 = vmul.f32 %v3635_v17, %v4848_v57 }
 0x1d6   :  { %3733 = vmatprep.mubr.msk.bf16.mxu0 %vm160_vm6, %v1484_v7  ;;  %v1501_v35 = vpack.c.bf16 %v4975_v21, %v4972_v62  ;;  %v3636_v37 = vpop.f32.mrb[6].mxu1  ;;  %v5000_v4 = vmul.f32 %v1032_v45, %v4850_v55 }
 0x1d7   :  { %v1500_v53 = vpack.c.bf16 %v4984_v52, %v4981_v36  ;;  %v4996_v20 = vmul.f32 %v3636_v37, %v4855_v10  ;;  %v1035_v50 = vpop.f32.mrb[7].mxu1 }
 0x1d8   :  { %v5003_v7 = vmul.f32 %v1035_v50, %v4866_v14 }
 0x1d9   :  { %v1503_v18 = vpack.c.bf16 %v4996_v20, %v4993_v48 }
 0x1da   :  { %v1502_v8 = vpack.c.bf16 %v5003_v7, %v5000_v4 }
 0x1dd   :  { %3734 = vmatmul.mubr.msk.bf16.gmra.mrb[56].mxu0 %vm160_vm6, %v1485_v16 }
 0x1de   :  { %3737 = vmatprep.mubr.msk.bf16.mxu0 %vm160_vm6, %v1486_v32 }
 0x1e1   :  { %v3639_v63 = vpop.f32.mrb[8].mxu1 }
 0x1e2   :  { %v1048_v16 = vpop.f32.mrb[9].mxu1  ;;  %v5012_v32 = vmul.f32 %v3639_v63, %v4848_v57 }
 0x1e3   :  { %v3640_v41 = vpop.f32.mrb[10].mxu1  ;;  %v1464_v2 = vmul.f32 %v1048_v16, %v4850_v55 }
 0x1e4   :  { %v5015_v25 = vmul.f32 %v3640_v41, %v4855_v10  ;;  %v1051_v42 = vpop.f32.mrb[11].mxu1 }
 0x1e5   :  { %3738 = vmatmul.mubr.msk.bf16.gmra.mrb[60].mxu0 %vm160_vm6, %v1487_v26  ;;  %v1465_v12 = vmul.f32 %v1051_v42, %v4866_v14 }
 0x1e6   :  { %3741 = vmatprep.mubr.msk.bf16.mxu0 %vm160_vm6, %v1488_v27  ;;  %v1505_v31 = vpack.c.bf16 %v5015_v25, %v5012_v32 }
 0x1e7   :  { %v1504_v26 = vpack.c.bf16 %v1465_v12, %v1464_v2 }
 0x1ea   :  { %v3643_v27 = vpop.f32.mrb[12].mxu1 }
 0x1eb   :  { %v1064_v30 = vpop.f32.mrb[13].mxu1  ;;  %v5024_v28 = vmul.f32 %v3643_v27, %v4848_v57 }
 0x1ec   :  { %v3644_v3 = vpop.f32.mrb[14].mxu1  ;;  %v1468_v34 = vmul.f32 %v1064_v30, %v4850_v55 }
 0x1ed   :  { %3742 = vmatmul.mubr.msk.bf16.gmra.mrb[64].mxu0 %vm160_vm6, %v1489_v23  ;;  %v5027_v22 = vmul.f32 %v3644_v3, %v4855_v10  ;;  %v1067_v40 = vpop.f32.mrb[15].mxu1 }
 0x1ee   :  { %3745 = vmatprep.mubr.msk.bf16.mxu0 %vm160_vm6, %v1490_v29  ;;  %v1469_v39 = vmul.f32 %v1067_v40, %v4866_v14 }
 0x1ef   :  { %v1507_v23 = vpack.c.bf16 %v5027_v22, %v5024_v28 }
 0x1f0   :  { %v1506_v29 = vpack.c.bf16 %v1469_v39, %v1468_v34  ;;  %v1519_v39 = vpop.permute.xlu1 %1518 }
 0x1f5   :  { %3746 = vmatmul.mubr.msk.bf16.gmra.mrb[68].mxu0 %vm160_vm6, %v1491_v24 }
 0x1f6   :  { %3749 = vmatprep.mubr.msk.bf16.mxu0 %vm160_vm6, %v1492_v44 }
 0x1f7   :  { %v3647_v59 = vpop.f32.mrb[16].mxu1 }
 0x1f8   :  { %v1080_v47 = vpop.f32.mrb[17].mxu1  ;;  %v1474_v49 = vmul.f32 %v3647_v59, %v4848_v57 }
 0x1f9   :  { %v3648_v58 = vpop.f32.mrb[18].mxu1  ;;  %v1472_v24 = vmul.f32 %v1080_v47, %v4850_v55 }
 0x1fa   :  { %v1475_v11 = vmul.f32 %v3648_v58, %v4855_v10  ;;  %v1083_v61 = vpop.f32.mrb[19].mxu1  ;;  %v1539_v58 = vpop.permute.xlu1 %1538 }
 0x1fb   :  { %v1473_v17 = vmul.f32 %v1083_v61, %v4866_v14 }
 0x1fc   :  { %v1509_v45 = vpack.c.bf16 %v1475_v11, %v1474_v49  ;;  %v1524_v49 = vpop.permute.xlu0 %1523 }
 0x1fd   :  { %3750 = vmatmul.mubr.msk.bf16.gmra.mrb[72].mxu0 %vm160_vm6, %v1493_v56  ;;  %v1508_v37 = vpack.c.bf16 %v1473_v17, %v1472_v24 }
 0x1fe   :  { %3753 = vmatprep.mubr.msk.bf16.mxu0 %vm160_vm6, %v1494_v5  ;;  %v5181_v24 = vpop.permute.xlu1 %1543 }
 0x200   :  { %v3651_v44 = vpop.f32.mrb[20].mxu1 }
 0x201   :  { %v1096_v56 = vpop.f32.mrb[21].mxu1  ;;  %v1478_v50 = vmul.f32 %v3651_v44, %v4848_v57 }
 0x202   :  { %v3652_v5 = vpop.f32.mrb[22].mxu1  ;;  %v1476_v41 = vmul.f32 %v1096_v56, %v4850_v55  ;;  %v1534_v44 = vpop.permute.xlu1 %1533 }
 0x203   :  { %v1479_v63 = vmul.f32 %v3652_v5, %v4855_v10  ;;  %v1099_v16 = vpop.f32.mrb[23].mxu1 }
 0x204   :  { %v1477_v42 = vmul.f32 %v1099_v16, %v4866_v14 }
 0x205   :  { %3754 = vmatmul.mubr.msk.bf16.gmra.mrb[76].mxu0 %vm160_vm6, %v1495_v15  ;;  %v1511_v2 = vpack.c.bf16 %v1479_v63, %v1478_v50 }
 0x206   :  { %3757 = vmatprep.mubr.msk.bf16.mxu0 %vm160_vm6, %v1496_v13  ;;  %v1510_v12 = vpack.c.bf16 %v1477_v42, %v1476_v41  ;;  %v1554_v41 = vpop.permute.xlu1 %1553 }
 0x208   :  { %v5058_v57 = vpop.f32.mrb[24].mxu1 }
 0x209   :  { %6521 = vst [vmem:[#allocation3_spill] sm:$0xff] %v5058_v57  ;;  %v5060_v10 = vpop.f32.mrb[25].mxu1 }
 0x20a   :  { %6522 = vst [vmem:[#allocation4_spill] sm:$0xff] %v5060_v10  ;;  %v5062_v9 = vpop.f32.mrb[26].mxu1 }
 0x20b   :  { %6523 = vst [vmem:[#allocation5_spill] sm:$0xff] %v5062_v9  ;;  %v5064_v55 = vpop.f32.mrb[27].mxu1 }
 0x20c   :  { %6524 = vst [vmem:[#allocation6_spill] sm:$0xff] %v5064_v55 }
 0x20d   :  { %3758 = vmatmul.mubr.msk.bf16.gmra.mrb[80].mxu0 %vm160_vm6, %v1497_v6 }
 0x20e   :  { %3761 = vmatprep.mubr.msk.bf16.mxu0 %vm160_vm6, %v1498_v1 }
 0x210   :  { %v5074_v60 = vpop.f32.mrb[28].mxu1 }
 0x211   :  { %6525 = vst [vmem:[#allocation7_spill] sm:$0xff] %v5074_v60  ;;  %v5076_v14 = vpop.f32.mrb[29].mxu1 }
 0x212   :  { %6526 = vst [vmem:[#allocation8_spill] sm:$0xff] %v5076_v14  ;;  %v5078_v38 = vpop.f32.mrb[30].mxu1 }
 0x213   :  { %6527 = vst [vmem:[#allocation9_spill] sm:$0xff] %v5078_v38  ;;  %v5080_v43 = vpop.f32.mrb[31].mxu1 }
 0x214   :  { %6528 = vst [vmem:[#allocation10_spill] sm:$0xff] %v5080_v43 }
 0x215   :  { %3762 = vmatmul.mubr.msk.bf16.gmra.mrb[84].mxu0 %vm160_vm6, %v1499_v33 }
 0x216   :  { %3765 = vmatprep.mubr.msk.bf16.mxu0 %vm160_vm6, %v1500_v53 }
 0x218   :  { %v5090_v19 = vpop.f32.mrb[32].mxu1 }
 0x219   :  { %6529 = vst [vmem:[#allocation11_spill] sm:$0xff] %v5090_v19  ;;  %v5092_v0 = vpop.f32.mrb[33].mxu1 }
 0x21a   :  { %6530 = vst [vmem:[#allocation12_spill] sm:$0xff] %v5092_v0  ;;  %v5094_v51 = vpop.f32.mrb[34].mxu1 }
 0x21b   :  { %6531 = vst [vmem:[#allocation13_spill] sm:$0xff] %v5094_v51  ;;  %v5096_v6 = vpop.f32.mrb[35].mxu1 }
 0x21c   :  { %6532 = vst [vmem:[#allocation14_spill] sm:$0xff] %v5096_v6 }
 0x21d   :  { %3766 = vmatmul.mubr.msk.bf16.gmra.mrb[88].mxu0 %vm160_vm6, %v1501_v35 }
 0x21e   :  { %3769 = vmatprep.mubr.msk.bf16.mxu0 %vm160_vm6, %v1502_v8 }
 0x220   :  { %v5103_v46 = vpop.f32.mrb[36].mxu1 }
 0x221   :  { %6533 = vst [vmem:[#allocation15_spill] sm:$0xff] %v5103_v46  ;;  %v5105_v13 = vpop.f32.mrb[37].mxu1 }
 0x222   :  { %6534 = vst [vmem:[#allocation16_spill] sm:$0xff] %v5105_v13  ;;  %v5107_v33 = vpop.f32.mrb[38].mxu1 }
 0x223   :  { %6535 = vst [vmem:[#allocation17_spill] sm:$0xff] %v5107_v33  ;;  %v5109_v1 = vpop.f32.mrb[39].mxu1 }
 0x224   :  { %6536 = vst [vmem:[#allocation18_spill] sm:$0xff] %v5109_v1 }
 0x225   :  { %3770 = vmatmul.mubr.msk.bf16.gmra.mrb[92].mxu0 %vm160_vm6, %v1503_v18 }
 0x226   :  { %3773 = vmatprep.mubr.msk.bf16.mxu0 %vm160_vm6, %v1504_v26 }
 0x228   :  { %v5116_v62 = vpop.f32.mrb[40].mxu1 }
 0x229   :  { %6537 = vst [vmem:[#allocation19_spill] sm:$0xff] %v5116_v62  ;;  %v5118_v21 = vpop.f32.mrb[41].mxu1 }
 0x22a   :  { %6538 = vst [vmem:[#allocation20_spill] sm:$0xff] %v5118_v21  ;;  %v5120_v15 = vpop.f32.mrb[42].mxu1 }
 0x22b   :  { %6539 = vst [vmem:[#allocation21_spill] sm:$0xff] %v5120_v15  ;;  %v5122_v36 = vpop.f32.mrb[43].mxu1 }
 0x22c   :  { %6540 = vst [vmem:[#allocation22_spill] sm:$0xff] %v5122_v36 }
 0x22d   :  { %3774 = vmatmul.mubr.msk.bf16.gmra.mrb[96].mxu0 %vm160_vm6, %v1505_v31 }
 0x22e   :  { %3777 = vmatprep.mubr.msk.bf16.mxu0 %vm160_vm6, %v1506_v29 }
 0x230   :  { %v5126_v52 = vpop.f32.mrb[44].mxu1 }
 0x231   :  { %6541 = vst [vmem:[#allocation23_spill] sm:$0xff] %v5126_v52  ;;  %v5128_v35 = vpop.f32.mrb[45].mxu1 }
 0x232   :  { %6542 = vst [vmem:[#allocation24_spill] sm:$0xff] %v5128_v35  ;;  %v5130_v53 = vpop.f32.mrb[46].mxu1 }
 0x233   :  { %6543 = vst [vmem:[#allocation25_spill] sm:$0xff] %v5130_v53  ;;  %v5132_v48 = vpop.f32.mrb[47].mxu1 }
 0x234   :  { %6544 = vst [vmem:[#allocation26_spill] sm:$0xff] %v5132_v48 }
 0x235   :  { %3778 = vmatmul.mubr.msk.bf16.gmra.mrb[100].mxu0 %vm160_vm6, %v1507_v23 }
 0x236   :  { %3781 = vmatprep.mubr.msk.bf16.mxu0 %vm160_vm6, %v1508_v37 }
 0x238   :  { %v5136_v20 = vpop.f32.mrb[48].mxu1 }
 0x239   :  { %6545 = vst [vmem:[#allocation27_spill] sm:$0xff] %v5136_v20  ;;  %v5138_v4 = vpop.f32.mrb[49].mxu1 }
 0x23a   :  { %6546 = vst [vmem:[#allocation28_spill] sm:$0xff] %v5138_v4  ;;  %v5140_v7 = vpop.f32.mrb[50].mxu1 }
 0x23b   :  { %6547 = vst [vmem:[#allocation29_spill] sm:$0xff] %v5140_v7  ;;  %v5142_v18 = vpop.f32.mrb[51].mxu1 }
 0x23c   :  { %6548 = vst [vmem:[#allocation30_spill] sm:$0xff] %v5142_v18 }
 0x23d   :  { %3782 = vmatmul.mubr.msk.bf16.gmra.mrb[104].mxu0 %vm160_vm6, %v1509_v45  ;;  %v1529_v45 = vpop.permute.xlu0 %1528 }
 0x23e   :  { %3785 = vmatprep.mubr.msk.bf16.mxu0 %vm160_vm6, %v1510_v12 }
 0x240   :  { %v5145_v8 = vpop.f32.mrb[52].mxu1 }
 0x241   :  { %6549 = vst [vmem:[#allocation31_spill] sm:$0xff] %v5145_v8  ;;  %v5147_v32 = vpop.f32.mrb[53].mxu1  ;;  %v1549_v5 = vpop.permute.xlu0 %1548 }
 0x242   :  { %6550 = vst [vmem:[#allocation32_spill] sm:$0xff] %v5147_v32  ;;  %v5149_v25 = vpop.f32.mrb[54].mxu1 }
 0x243   :  { %6551 = vst [vmem:[#allocation33_spill] sm:$0xff] %v5149_v25  ;;  %v5151_v31 = vpop.f32.mrb[55].mxu1 }
 0x244   :  { %6552 = vst [vmem:[#allocation34_spill] sm:$0xff] %v5151_v31 }
 0x245   :  { %3786 = vmatmul.mubr.msk.bf16.gmra.mrb[108].mxu0 %vm160_vm6, %v1511_v2  ;;  %v5195_v42 = vpop.permute.xlu0 %1558 }
 0x248   :  { %v5153_v26 = vpop.f32.mrb[56].mxu1 }
 0x249   :  { %6553 = vst [vmem:[#allocation35_spill] sm:$0xff] %v5153_v26  ;;  %v5155_v27 = vpop.f32.mrb[57].mxu1 }
 0x24a   :  { %6554 = vst [vmem:[#allocation36_spill] sm:$0xff] %v5155_v27  ;;  %v5157_v30 = vpop.f32.mrb[58].mxu1 }
 0x24b   :  { %6555 = vst [vmem:[#allocation37_spill] sm:$0xff] %v5157_v30  ;;  %v5159_v3 = vpop.f32.mrb[59].mxu1 }
 0x24c   :  { %6556 = vst [vmem:[#allocation38_spill] sm:$0xff] %v5159_v3 }
 0x250   :  { %v5161_v28 = vpop.f32.mrb[60].mxu1 }
 0x251   :  { %6557 = vst [vmem:[#allocation39_spill] sm:$0xff] %v5161_v28  ;;  %v5163_v22 = vpop.f32.mrb[61].mxu1 }
 0x252   :  { %6558 = vst [vmem:[#allocation40_spill] sm:$0xff] %v5163_v22  ;;  %v5165_v40 = vpop.f32.mrb[62].mxu1 }
 0x253   :  { %6559 = vst [vmem:[#allocation41_spill] sm:$0xff] %v5165_v40  ;;  %v5167_v34 = vpop.f32.mrb[63].mxu1 }
 0x254   :  { %6560 = vst [vmem:[#allocation42_spill] sm:$0xff] %v5167_v34  ;;  %v1569_v34 = vpop.permute.xlu0 %1568 }
 0x258   :  { %v5169_v23 = vpop.f32.mrb[64].mxu1  ;;  %v5216_v36 = vpop.permute.xlu0 %1578 }
 0x259   :  { %6561 = vst [vmem:[#allocation43_spill] sm:$0xff] %v5169_v23  ;;  %v5171_v29 = vpop.f32.mrb[65].mxu1 }
 0x25a   :  { %6562 = vst [vmem:[#allocation44_spill] sm:$0xff] %v5171_v29  ;;  %v5173_v59 = vpop.f32.mrb[66].mxu1 }
 0x25b   :  { %6563 = vst [vmem:[#allocation45_spill] sm:$0xff] %v5173_v59  ;;  %v5175_v47 = vpop.f32.mrb[67].mxu1 }
 0x25c   :  { %6564 = vst [vmem:[#allocation46_spill] sm:$0xff] %v5175_v47  ;;  %v5205_v47 = vpop.permute.xlu1 %1563  ;;  %v5224_v43 = vpop.permute.xlu0 %1588 }
 0x260   :  { %v5177_v11 = vpop.f32.mrb[68].mxu1  ;;  %v1574_v18 = vpop.permute.xlu1 %1573 }
 0x261   :  { %6565 = vst [vmem:[#allocation47_spill] sm:$0xff] %v5177_v11  ;;  %v5179_v61 = vpop.f32.mrb[69].mxu1 }
 0x262   :  { %6566 = vst [vmem:[#allocation48_spill] sm:$0xff] %v5179_v61  ;;  %v5183_v17 = vpop.f32.mrb[70].mxu1 }
 0x263   :  { %6567 = vst [vmem:[#allocation49_spill] sm:$0xff] %v5183_v17  ;;  %v5185_v37 = vpop.f32.mrb[71].mxu1 }
 0x264   :  { %6568 = vst [vmem:[#allocation50_spill] sm:$0xff] %v5185_v37 }
 0x268   :  { %v5187_v56 = vpop.f32.mrb[72].mxu1 }
 0x269   :  { %6569 = vst [vmem:[#allocation51_spill] sm:$0xff] %v5187_v56  ;;  %v5189_v50 = vpop.f32.mrb[73].mxu1 }
 0x26a   :  { %6570 = vst [vmem:[#allocation52_spill] sm:$0xff] %v5189_v50  ;;  %v5191_v63 = vpop.f32.mrb[74].mxu1 }
 0x26b   :  { %6571 = vst [vmem:[#allocation53_spill] sm:$0xff] %v5191_v63  ;;  %v5193_v16 = vpop.f32.mrb[75].mxu1 }
 0x26c   :  { %6572 = vst [vmem:[#allocation54_spill] sm:$0xff] %v5193_v16  ;;  %v3890_v16 = vld [vmem:[%s6463_s9] sm:$0xff]  }
 0x26d   :  { %3789 = vmatprep.subr.bf16.mxu1 %v3890_v16 }
 0x26e   :  { %3790 = vmatpush3.bf16.msra.mxu1 %v3890_v16 }
 0x270   :  { %v5197_v2 = vpop.f32.mrb[76].mxu1 }
 0x271   :  { %6573 = vst [vmem:[#allocation55_spill] sm:$0xff] %v5197_v2  ;;  %v5199_v12 = vpop.f32.mrb[77].mxu1 }
 0x272   :  { %6574 = vst [vmem:[#allocation56_spill] sm:$0xff] %v5199_v12  ;;  %v5201_v54 = vpop.f32.mrb[78].mxu1 }
 0x273   :  { %6575 = vst [vmem:[#allocation57_spill] sm:$0xff] %v5201_v54  ;;  %v5203_v37 = vpop.f32.mrb[79].mxu1 }
 0x274   :  { %6576 = vst [vmem:[#allocation58_spill] sm:$0xff] %v5203_v37  ;;  %v5220_v37 = vpop.permute.xlu1 %1583 }
 0x278   :  { %v5207_v3 = vpop.f32.mrb[80].mxu1  ;;  %v5232_v2 = vpop.permute.xlu1 %1593 }
 0x279   :  { %6577 = vst [vmem:[#allocation59_spill] sm:$0xff] %v5207_v3  ;;  %v5209_v31 = vpop.f32.mrb[81].mxu1 }
 0x27a   :  { %6578 = vst [vmem:[#allocation60_spill] sm:$0xff] %v5209_v31  ;;  %v5214_v48 = vpop.f32.mrb[82].mxu1 }
 0x27b   :  { %6579 = vst [vmem:[#allocation61_spill] sm:$0xff] %v5214_v48  ;;  %v5218_v1 = vpop.f32.mrb[83].mxu1  ;;  %v5234_v48 = vpop.permute.xlu0 %1598 }
 0x27c   :  { %6580 = vst [vmem:[#allocation62_spill] sm:$0xff] %v5218_v1  ;;  %v5236_v63 = vpop.permute.xlu1 %1603 }
 0x27f   :  { %v5238_v1 = vpop.permute.xlu0 %1608 }
 0x280   :  { %v5222_v6 = vpop.f32.mrb[84].mxu1  ;;  %v5240_v16 = vpop.permute.xlu1 %1613 }
 0x281   :  { %6581 = vst [vmem:[#allocation63_spill] sm:$0xff] %v5222_v6  ;;  %v5226_v55 = vpop.f32.mrb[85].mxu1 }
 0x282   :  { %6582 = vst [vmem:[#allocation64_spill] sm:$0xff] %v5226_v55  ;;  %v5228_v3 = vpop.f32.mrb[86].mxu1 }
 0x283   :  { %6583 = vst [vmem:[#allocation65_spill] sm:$0xff] %v5228_v3  ;;  %v5230_v54 = vpop.f32.mrb[87].mxu1  ;;  %v5242_v56 = vpop.permute.xlu0 %1618 }
 0x284   :  { %6584 = vst [vmem:[#allocation66_spill] sm:$0xff] %v5230_v54  ;;  %v5244_v17 = vpop.permute.xlu1 %1623 }
 0x287   :  { %v5246_v11 = vpop.permute.xlu0 %1628 }
 0x288   :  { %v5248_v28 = vpop.permute.xlu1 %1633 }
 0x28b   :  { %v5250_v30 = vpop.permute.xlu0 %1638 }
 0x28c   :  { %v5264_v33 = vpop.permute.xlu1 %1643 }
 0x290   :  { %v5289_v51 = vpop.permute.xlu1 %1653 }
 0x294   :  { %v5311_v9 = vpop.permute.xlu1 %1663 }
 0x2a0   :  { %v3727_v59 = vpop.f32.mrb[48].mxu0 }
 0x2a1   :  { %v1978_v23 = vpop.f32.mrb[49].mxu0  ;;  %v5252_v26 = vadd.f32 %v3727_v59, %v1529_v45  ;;  %v5272_v59 = vpop.permute.xlu0 %1648 }
 0x2a2   :  { %v3728_v40 = vpop.f32.mrb[50].mxu0  ;;  %v5254_v25 = vadd.f32 %v1978_v23, %v1519_v39 }
 0x2a3   :  { %v1981_v54 = vpop.f32.mrb[51].mxu0  ;;  %v5256_v7 = vadd.f32 %v3728_v40, %v1534_v44  ;;  %v2295_v46 = vsel %vm160_vm6, %v5252_v26, -inf }
 0x2a4   :  { %v5260_v52 = vadd.f32 %v1981_v54, %v1524_v49  ;;  %v2233_v54 = vsel %vm160_vm6, %v5254_v25, -inf }
 0x2a5   :  { %v2326_v49 = vsel %vm160_vm6, %v5256_v7, -inf  ;;  %v5293_v19 = vpop.permute.xlu0 %1658 }
 0x2a6   :  { %6585 = vst [vmem:[#allocation67_spill] sm:$0xff] %v5260_v52  ;;  %v2264_v44 = vsel %vm160_vm6, %v5260_v52, -inf }
 0x2a8   :  { %v3731_v8 = vpop.f32.mrb[52].mxu0 }
 0x2a9   :  { %v5258_v20 = vadd.f32 %v3731_v8, %v1549_v5  ;;  %v1994_v53 = vpop.f32.mrb[53].mxu0 }
 0x2aa   :  { %v5262_v15 = vadd.f32 %v1994_v53, %v1539_v58  ;;  %v3732_v62 = vpop.f32.mrb[54].mxu0 }
 0x2ab   :  { %v2296_v39 = vsel %vm160_vm6, %v5258_v20, -inf  ;;  %v5270_v23 = vadd.f32 %v3732_v62, %v1554_v41  ;;  %v1997_v40 = vpop.f32.mrb[55].mxu0 }
 0x2ac   :  { %v2297_v8 = vmax.f32 %v2295_v46, %v2296_v39  ;;  %v2234_v53 = vsel %vm160_vm6, %v5262_v15, -inf  ;;  %v5279_v58 = vadd.f32 %v1997_v40, %v5181_v24 }
 0x2ad   :  { %v2235_v45 = vmax.f32 %v2233_v54, %v2234_v53  ;;  %v2327_v62 = vsel %vm160_vm6, %v5270_v23, -inf }
 0x2ae   :  { %6586 = vst [vmem:[#allocation68_spill] sm:$0xff] %v5279_v58  ;;  %v2328_v5 = vmax.f32 %v2326_v49, %v2327_v62  ;;  %v2265_v46 = vsel %vm160_vm6, %v5279_v58, -inf }
 0x2af   :  { %v2266_v41 = vmax.f32 %v2264_v44, %v2265_v46 }
 0x2b0   :  { %v3735_v39 = vpop.f32.mrb[56].mxu0 }
 0x2b1   :  { %v5291_v24 = vadd.f32 %v3735_v39, %v1569_v34  ;;  %v2010_v40 = vpop.f32.mrb[57].mxu0 }
 0x2b2   :  { %v5296_v54 = vadd.f32 %v2010_v40, %v5195_v42  ;;  %v3736_v53 = vpop.f32.mrb[58].mxu0 }
 0x2b3   :  { %v2298_v38 = vsel %vm160_vm6, %v5291_v24, -inf  ;;  %v5300_v49 = vadd.f32 %v3736_v53, %v1574_v18  ;;  %v2013_v62 = vpop.f32.mrb[59].mxu0  ;;  %v5313_v53 = vpop.permute.xlu0 %1668 }
 0x2b4   :  { %v2299_v60 = vmax.f32 %v2297_v8, %v2298_v38  ;;  %v2236_v44 = vsel %vm160_vm6, %v5296_v54, -inf  ;;  %v5305_v34 = vadd.f32 %v2013_v62, %v5205_v47 }
 0x2b5   :  { %v2237_v46 = vmax.f32 %v2235_v45, %v2236_v44  ;;  %v2329_v39 = vsel %vm160_vm6, %v5300_v49, -inf }
 0x2b6   :  { %6587 = vst [vmem:[#allocation69_spill] sm:$0xff] %v5305_v34  ;;  %v2330_v42 = vmax.f32 %v2328_v5, %v2329_v39  ;;  %v2267_v40 = vsel %vm160_vm6, %v5305_v34, -inf }
 0x2b7   :  { %v2268_v18 = vmax.f32 %v2266_v41, %v2267_v40 }
 0x2b8   :  { %v3739_v38 = vpop.f32.mrb[60].mxu0 }
 0x2b9   :  { %v5316_v8 = vadd.f32 %v3739_v38, %v5224_v43  ;;  %v2026_v57 = vpop.f32.mrb[61].mxu0  ;;  %v5331_v43 = vpop.permute.xlu1 %1673 }
 0x2ba   :  { %v5319_v47 = vadd.f32 %v2026_v57, %v5216_v36  ;;  %v3740_v45 = vpop.f32.mrb[62].mxu0  ;;  %v5335_v36 = vpop.permute.xlu0 %1678 }
 0x2bb   :  { %v2300_v5 = vsel %vm160_vm6, %v5316_v8, -inf  ;;  %v5324_v62 = vadd.f32 %v3740_v45, %v5232_v2  ;;  %v2029_v44 = vpop.f32.mrb[63].mxu0 }
 0x2bc   :  { %v2301_v39 = vmax.f32 %v2299_v60, %v2300_v5  ;;  %v2238_v41 = vsel %vm160_vm6, %v5319_v47, -inf  ;;  %v5329_v40 = vadd.f32 %v2029_v44, %v5220_v37 }
 0x2bd   :  { %v2239_v38 = vmax.f32 %v2237_v46, %v2238_v41  ;;  %v2331_v57 = vsel %vm160_vm6, %v5324_v62, -inf  ;;  %v5345_v46 = vpop.permute.xlu1 %1683 }
 0x2be   :  { %6588 = vst [vmem:[#allocation70_spill] sm:$0xff] %v5329_v40  ;;  %v2332_v3 = vmax.f32 %v2330_v42, %v2331_v57  ;;  %v2269_v2 = vsel %vm160_vm6, %v5329_v40, -inf  ;;  %v5352_v31 = vpop.permute.xlu0 %1688 }
 0x2bf   :  { %v2270_v45 = vmax.f32 %v2268_v18, %v2269_v2 }
 0x2c0   :  { %v3743_v60 = vpop.f32.mrb[64].mxu0 }
 0x2c1   :  { %v5340_v5 = vadd.f32 %v3743_v60, %v5238_v1  ;;  %v2042_v55 = vpop.f32.mrb[65].mxu0  ;;  %v5363_v50 = vpop.permute.xlu1 %1693 }
 0x2c2   :  { %v5343_v37 = vadd.f32 %v2042_v55, %v5234_v48  ;;  %v3744_v44 = vpop.f32.mrb[66].mxu0  ;;  %v5368_v61 = vpop.permute.xlu0 %1698 }
 0x2c3   :  { %v2302_v41 = vsel %vm160_vm6, %v5340_v5, -inf  ;;  %v5350_v42 = vadd.f32 %v3744_v44, %v5240_v16  ;;  %v2045_v57 = vpop.f32.mrb[67].mxu0 }
 0x2c4   :  { %v2303_v18 = vmax.f32 %v2301_v39, %v2302_v41  ;;  %v2240_v1 = vsel %vm160_vm6, %v5343_v37, -inf  ;;  %v5357_v2 = vadd.f32 %v2045_v57, %v5236_v63 }
 0x2c5   :  { %v2241_v55 = vmax.f32 %v2239_v38, %v2240_v1  ;;  %v2333_v48 = vsel %vm160_vm6, %v5350_v42, -inf  ;;  %v5387_v29 = vpop.permute.xlu1 %1703 }
 0x2c6   :  { %6589 = vst [vmem:[#allocation71_spill] sm:$0xff] %v5357_v2  ;;  %v2334_v60 = vmax.f32 %v2332_v3, %v2333_v48  ;;  %v2271_v12 = vsel %vm160_vm6, %v5357_v2, -inf }
 0x2c7   :  { %v2272_v16 = vmax.f32 %v2270_v45, %v2271_v12 }
 0x2c8   :  { %v3747_v44 = vpop.f32.mrb[68].mxu0 }
 0x2c9   :  { %v5366_v39 = vadd.f32 %v3747_v44, %v5246_v11  ;;  %v2058_v41 = vpop.f32.mrb[69].mxu0 }
 0x2ca   :  { %v5371_v63 = vadd.f32 %v2058_v41, %v5242_v56  ;;  %v3748_v38 = vpop.f32.mrb[70].mxu0 }
 0x2cb   :  { %v2304_v3 = vsel %vm160_vm6, %v5366_v39, -inf  ;;  %v5376_v57 = vadd.f32 %v3748_v38, %v5248_v28  ;;  %v2061_v12 = vpop.f32.mrb[71].mxu0  ;;  %v1709_v38 = vpop.permute.xlu0 %1708 }
 0x2cc   :  { %v2305_v45 = vmax.f32 %v2303_v18, %v2304_v3  ;;  %v2242_v1 = vsel %vm160_vm6, %v5371_v63, -inf  ;;  %v5381_v11 = vadd.f32 %v2061_v12, %v5244_v17 }
 0x2cd   :  { %v2243_v48 = vmax.f32 %v2241_v55, %v2242_v1  ;;  %v2335_v56 = vsel %vm160_vm6, %v5376_v57, -inf }
 0x2ce   :  { %6590 = vst [vmem:[#allocation72_spill] sm:$0xff] %v5381_v11  ;;  %v2336_v44 = vmax.f32 %v2334_v60, %v2335_v56  ;;  %v2273_v41 = vsel %vm160_vm6, %v5381_v11, -inf }
 0x2cf   :  { %v2274_v28 = vmax.f32 %v2272_v16, %v2273_v41 }
 0x2d0   :  { %v3751_v22 = vpop.f32.mrb[72].mxu0 }
 0x2d1   :  { %v5390_v18 = vadd.f32 %v3751_v22, %v5272_v59  ;;  %v2074_v3 = vpop.f32.mrb[73].mxu0  ;;  %v1714_v22 = vpop.permute.xlu1 %1713 }
 0x2d2   :  { %v5393_v17 = vadd.f32 %v2074_v3, %v5250_v30  ;;  %v3752_v55 = vpop.f32.mrb[74].mxu0  ;;  %v5407_v3 = vpop.permute.xlu0 %1718 }
 0x2d3   :  { %v2306_v12 = vsel %vm160_vm6, %v5390_v18, -inf  ;;  %v5398_v60 = vadd.f32 %v3752_v55, %v5289_v51  ;;  %v2077_v1 = vpop.f32.mrb[75].mxu0 }
 0x2d4   :  { %v2307_v56 = vmax.f32 %v2305_v45, %v2306_v12  ;;  %v2244_v16 = vsel %vm160_vm6, %v5393_v17, -inf  ;;  %v5403_v41 = vadd.f32 %v2077_v1, %v5264_v33 }
 0x2d5   :  { %v2245_v59 = vmax.f32 %v2243_v48, %v2244_v16  ;;  %v2337_v30 = vsel %vm160_vm6, %v5398_v60, -inf  ;;  %v5417_v48 = vpop.permute.xlu1 %1723 }
 0x2d6   :  { %6591 = vst [vmem:[#allocation73_spill] sm:$0xff] %v5403_v41  ;;  %v2338_v27 = vmax.f32 %v2336_v44, %v2337_v30  ;;  %v2275_v51 = vsel %vm160_vm6, %v5403_v41, -inf  ;;  %v1729_v4 = vpop.permute.xlu0 %1728 }
 0x2d7   :  { %v2276_v55 = vmax.f32 %v2274_v28, %v2275_v51 }
 0x2d8   :  { %v3755_v32 = vpop.f32.mrb[76].mxu0 }
 0x2d9   :  { %v5412_v45 = vadd.f32 %v3755_v32, %v5313_v53  ;;  %v2090_v12 = vpop.f32.mrb[77].mxu0 }
 0x2da   :  { %v5415_v33 = vadd.f32 %v2090_v12, %v5293_v19  ;;  %v3756_v1 = vpop.f32.mrb[78].mxu0 }
 0x2db   :  { %v2308_v16 = vsel %vm160_vm6, %v5412_v45, -inf  ;;  %v5422_v44 = vadd.f32 %v3756_v1, %v5331_v43  ;;  %v2093_v30 = vpop.f32.mrb[79].mxu0  ;;  %v1734_v1 = vpop.permute.xlu1 %1733 }
 0x2dc   :  { %v2309_v28 = vmax.f32 %v2307_v56, %v2308_v16  ;;  %v2246_v32 = vsel %vm160_vm6, %v5415_v33, -inf  ;;  %v5427_v53 = vadd.f32 %v2093_v30, %v5311_v9  ;;  %v1739_v16 = vpop.permute.xlu0 %1738 }
 0x2dd   :  { %v2247_v19 = vmax.f32 %v2245_v59, %v2246_v32  ;;  %v2339_v51 = vsel %vm160_vm6, %v5422_v44, -inf }
 0x2de   :  { %6592 = vst [vmem:[#allocation74_spill] sm:$0xff] %v5427_v53  ;;  %v2340_v12 = vmax.f32 %v2338_v27, %v2339_v51  ;;  %v2277_v35 = vsel %vm160_vm6, %v5427_v53, -inf }
 0x2df   :  { %v2278_v21 = vmax.f32 %v2276_v55, %v2277_v35 }
 0x2e0   :  { %v3759_v43 = vpop.f32.mrb[80].mxu0 }
 0x2e1   :  { %v5434_v13 = vadd.f32 %v3759_v43, %v5352_v31  ;;  %v2106_v56 = vpop.f32.mrb[81].mxu0 }
 0x2e2   :  { %v5437_v0 = vadd.f32 %v2106_v56, %v5335_v36  ;;  %v3760_v9 = vpop.f32.mrb[82].mxu0  ;;  %v1744_v56 = vpop.permute.xlu1 %1743 }
 0x2e3   :  { %v2310_v59 = vsel %vm160_vm6, %v5434_v13, -inf  ;;  %v5442_v27 = vadd.f32 %v3760_v9, %v5363_v50  ;;  %v2109_v30 = vpop.f32.mrb[83].mxu0  ;;  %v1749_v50 = vpop.permute.xlu0 %1748 }
 0x2e4   :  { %v2311_v32 = vmax.f32 %v2309_v28, %v2310_v59  ;;  %v2248_v35 = vsel %vm160_vm6, %v5437_v0, -inf  ;;  %v5447_v31 = vadd.f32 %v2109_v30, %v5345_v46 }
 0x2e5   :  { %v2249_v55 = vmax.f32 %v2247_v19, %v2248_v35  ;;  %v2341_v36 = vsel %vm160_vm6, %v5442_v27, -inf }
 0x2e6   :  { %6593 = vst [vmem:[#allocation75_spill] sm:$0xff] %v5447_v31  ;;  %v2342_v51 = vmax.f32 %v2340_v12, %v2341_v36  ;;  %v2279_v43 = vsel %vm160_vm6, %v5447_v31, -inf }
 0x2e7   :  { %v2280_v14 = vmax.f32 %v2278_v21, %v2279_v43 }
 0x2e8   :  { %v3763_v9 = vpop.f32.mrb[84].mxu0 }
 0x2e9   :  { %v5453_v10 = vadd.f32 %v3763_v9, %v1709_v38  ;;  %v2122_v28 = vpop.f32.mrb[85].mxu0  ;;  %v1754_v38 = vpop.permute.xlu1 %1753 }
 0x2ea   :  { %v5456_v59 = vadd.f32 %v2122_v28, %v5368_v61  ;;  %v3764_v46 = vpop.f32.mrb[86].mxu0  ;;  %v1759_v9 = vpop.permute.xlu0 %1758 }
 0x2eb   :  { %v2312_v19 = vsel %vm160_vm6, %v5453_v10, -inf  ;;  %v5460_v30 = vadd.f32 %v3764_v46, %v1714_v22  ;;  %v2125_v12 = vpop.f32.mrb[87].mxu0 }
 0x2ec   :  { %v2313_v35 = vmax.f32 %v2311_v32, %v2312_v19  ;;  %v2250_v36 = vsel %vm160_vm6, %v5456_v59, -inf  ;;  %v5465_v21 = vadd.f32 %v2125_v12, %v5387_v29 }
 0x2ed   :  { %v2251_v43 = vmax.f32 %v2249_v55, %v2250_v36  ;;  %v2343_v61 = vsel %vm160_vm6, %v5460_v30, -inf  ;;  %v1764_v12 = vpop.permute.xlu1 %1763 }
 0x2ee   :  { %6594 = vst [vmem:[#allocation76_spill] sm:$0xff] %v5465_v21  ;;  %v2344_v28 = vmax.f32 %v2342_v51, %v2343_v61  ;;  %v2281_v6 = vsel %vm160_vm6, %v5465_v21, -inf  ;;  %v1769_v51 = vpop.permute.xlu0 %1768 }
 0x2ef   :  { %v2282_v22 = vmax.f32 %v2280_v14, %v2281_v6 }
 0x2f0   :  { %v3767_v46 = vpop.f32.mrb[88].mxu0 }
 0x2f1   :  { %v5471_v31 = vadd.f32 %v3767_v46, %v1729_v4  ;;  %v2138_v32 = vpop.f32.mrb[89].mxu0 }
 0x2f2   :  { %v5474_v19 = vadd.f32 %v2138_v32, %v5407_v3  ;;  %v3768_v29 = vpop.f32.mrb[90].mxu0 }
 0x2f3   :  { %v2314_v55 = vsel %vm160_vm6, %v5471_v31, -inf  ;;  %v5478_v36 = vadd.f32 %v3768_v29, %v1734_v1  ;;  %v2141_v53 = vpop.f32.mrb[91].mxu0  ;;  %v1774_v29 = vpop.permute.xlu1 %1773 }
 0x2f4   :  { %v2315_v61 = vmax.f32 %v2313_v35, %v2314_v55  ;;  %v2252_v14 = vsel %vm160_vm6, %v5474_v19, -inf  ;;  %v5483_v6 = vadd.f32 %v2141_v53, %v5417_v48  ;;  %v1779_v55 = vpop.permute.xlu0 %1778 }
 0x2f5   :  { %v2253_v4 = vmax.f32 %v2251_v43, %v2252_v14  ;;  %v2345_v3 = vsel %vm160_vm6, %v5478_v36, -inf }
 0x2f6   :  { %6595 = vst [vmem:[#allocation77_spill] sm:$0xff] %v5483_v6  ;;  %v2346_v46 = vmax.f32 %v2344_v28, %v2345_v3  ;;  %v2283_v32 = vsel %vm160_vm6, %v5483_v6, -inf }
 0x2f7   :  { %v2284_v21 = vmax.f32 %v2282_v22, %v2283_v32 }
 0x2f8   :  { %v3771_v1 = vpop.f32.mrb[92].mxu0  ;;  %v1789_v6 = vpop.permute.xlu0 %1788 }
 0x2f9   :  { %v5489_v41 = vadd.f32 %v3771_v1, %v1749_v50  ;;  %v2154_v35 = vpop.f32.mrb[93].mxu0  ;;  %v1784_v1 = vpop.permute.xlu1 %1783 }
 0x2fa   :  { %v5491_v11 = vadd.f32 %v2154_v35, %v1739_v16  ;;  %v3772_v2 = vpop.f32.mrb[94].mxu0 }
 0x2fb   :  { %v2316_v48 = vsel %vm160_vm6, %v5489_v41, -inf  ;;  %v5495_v53 = vadd.f32 %v3772_v2, %v1754_v38  ;;  %v2157_v43 = vpop.f32.mrb[95].mxu0 }
 0x2fc   :  { %v2317_v28 = vmax.f32 %v2315_v61, %v2316_v48  ;;  %v2254_v14 = vsel %vm160_vm6, %v5491_v11, -inf  ;;  %v5499_v22 = vadd.f32 %v2157_v43, %v1744_v56 }
 0x2fd   :  { %v2255_v3 = vmax.f32 %v2253_v4, %v2254_v14  ;;  %v2347_v50 = vsel %vm160_vm6, %v5495_v53, -inf }
 0x2fe   :  { %6596 = vst [vmem:[#allocation78_spill] sm:$0xff] %v5499_v22  ;;  %v2348_v32 = vmax.f32 %v2346_v46, %v2347_v50  ;;  %v2285_v16 = vsel %vm160_vm6, %v5499_v22, -inf }
 0x2ff   :  { %v2286_v35 = vmax.f32 %v2284_v21, %v2285_v16  ;;  %v1794_v21 = vpop.permute.xlu1 %1793 }
 0x300   :  { %v3775_v2 = vpop.f32.mrb[96].mxu0 }
 0x301   :  { %v5505_v38 = vadd.f32 %v3775_v2, %v1769_v51  ;;  %v2170_v61 = vpop.f32.mrb[97].mxu0 }
 0x302   :  { %v5507_v48 = vadd.f32 %v2170_v61, %v1759_v9  ;;  %v3776_v40 = vpop.f32.mrb[98].mxu0  ;;  %v1799_v9 = vpop.permute.xlu0 %1798 }
 0x303   :  { %v2318_v56 = vsel %vm160_vm6, %v5505_v38, -inf  ;;  %v5511_v4 = vadd.f32 %v3776_v40, %v1774_v29  ;;  %v2173_v43 = vpop.f32.mrb[99].mxu0  ;;  %v3891_v29 = vld [vmem:[%s6463_s9 + $0x8] sm:$0xff]  }
 0x304   :  { %v2319_v46 = vmax.f32 %v2317_v28, %v2318_v56  ;;  %v2256_v14 = vsel %vm160_vm6, %v5507_v48, -inf  ;;  %v5515_v50 = vadd.f32 %v2173_v43, %v1764_v12  ;;  %3791 = vmatprep.subr.bf16.mxu1 %v3891_v29  ;;  %v1804_v43 = vpop.permute.xlu1 %1803 }
 0x305   :  { %6597 = vst [vmem:[#allocation79_spill] sm:$0xff] %v5511_v4  ;;  %v2257_v16 = vmax.f32 %v2255_v3, %v2256_v14  ;;  %v2349_v51 = vsel %vm160_vm6, %v5511_v4, -inf  ;;  %3792 = vmatpush3.bf16.msra.mxu1 %v3891_v29 }
 0x306   :  { %6598 = vst [vmem:[#allocation80_spill] sm:$0xff] %v5515_v50  ;;  %v2350_v2 = vmax.f32 %v2348_v32, %v2349_v51  ;;  %v2287_v61 = vsel %vm160_vm6, %v5515_v50, -inf }
 0x307   :  { %v2288_v22 = vmax.f32 %v2286_v35, %v2287_v61  ;;  %v1809_v35 = vpop.permute.xlu0 %1808 }
 0x308   :  { %v3779_v40 = vpop.f32.mrb[100].mxu0 }
 0x309   :  { %v5524_v28 = vadd.f32 %v3779_v40, %v1789_v6  ;;  %v2186_v12 = vpop.f32.mrb[101].mxu0 }
 0x30a   :  { %v5526_v56 = vadd.f32 %v2186_v12, %v1779_v55  ;;  %v3780_v3 = vpop.f32.mrb[102].mxu0 }
 0x30b   :  { %v2320_v32 = vsel %vm160_vm6, %v5524_v28, -inf  ;;  %v5530_v14 = vadd.f32 %v3780_v3, %v1794_v21  ;;  %v2189_v51 = vpop.f32.mrb[103].mxu0  ;;  %v1814_v3 = vpop.permute.xlu1 %1813 }
 0x30c   :  { %v2321_v61 = vmax.f32 %v2319_v46, %v2320_v32  ;;  %v2258_v50 = vsel %vm160_vm6, %v5526_v56, -inf  ;;  %v5534_v6 = vadd.f32 %v2189_v51, %v1784_v1  ;;  %v1819_v46 = vpop.permute.xlu0 %1818 }
 0x30d   :  { %v2259_v40 = vmax.f32 %v2257_v16, %v2258_v50  ;;  %v2351_v55 = vsel %vm160_vm6, %v5530_v14, -inf }
 0x30e   :  { %6599 = vst [vmem:[#allocation81_spill] sm:$0xff] %v5534_v6  ;;  %v2352_v12 = vmax.f32 %v2350_v2, %v2351_v55  ;;  %v2289_v34 = vsel %vm160_vm6, %v5534_v6, -inf }
 0x30f   :  { %v2290_v58 = vmax.f32 %v2288_v22, %v2289_v34 }
 0x310   :  { %v3783_v21 = vpop.f32.mrb[104].mxu0 }
 0x311   :  { %v5540_v52 = vadd.f32 %v3783_v21, %v1809_v35  ;;  %v2202_v29 = vpop.f32.mrb[105].mxu0 }
 0x312   :  { %v5542_v32 = vadd.f32 %v2202_v29, %v1799_v9  ;;  %v3784_v4 = vpop.f32.mrb[106].mxu0 }
 0x313   :  { %v2322_v1 = vsel %vm160_vm6, %v5540_v52, -inf  ;;  %v5546_v50 = vadd.f32 %v3784_v4, %v1814_v3  ;;  %v2205_v16 = vpop.f32.mrb[107].mxu0  ;;  %v1829_v4 = vpop.permute.xlu0 %1828 }
 0x314   :  { %v2323_v2 = vmax.f32 %v2321_v61, %v2322_v1  ;;  %v2260_v51 = vsel %vm160_vm6, %v5542_v32, -inf  ;;  %v5550_v34 = vadd.f32 %v2205_v16, %v1804_v43 }
 0x315   :  { %6600 = vst [vmem:[#allocation82_spill] sm:$0xff] %v5546_v50  ;;  %v2261_v22 = vmax.f32 %v2259_v40, %v2260_v51  ;;  %v2353_v35 = vsel %vm160_vm6, %v5546_v50, -inf }
 0x316   :  { %6601 = vst [vmem:[#allocation83_spill] sm:$0xff] %v5550_v34  ;;  %v5554_v55 = vmax.f32 %v2352_v12, %v2353_v35  ;;  %v2291_v9 = vsel %vm160_vm6, %v5550_v34, -inf  ;;  %v1824_v35 = vpop.permute.xlu1 %1823 }
 0x317   :  { %v5558_v21 = vmax.f32 %v2290_v58, %v2291_v9 }
 0x318   :  { %v3787_v3 = vpop.f32.mrb[108].mxu0 }
 0x319   :  { %6602 = vst [vmem:[#allocation84_spill] sm:$0xff] %v5558_v21  ;;  %v5560_v29 = vadd.f32 %v3787_v3, %v1829_v4  ;;  %v2218_v61 = vpop.f32.mrb[109].mxu0 }
 0x31a   :  { %v5562_v1 = vadd.f32 %v2218_v61, %v1819_v46  ;;  %v3788_v43 = vpop.f32.mrb[110].mxu0  ;;  %v1834_v34 = vpop.permute.xlu1 %1833 }
 0x31b   :  { %v2324_v40 = vsel %vm160_vm6, %v5560_v29, -inf  ;;  %v2221_v16 = vpop.f32.mrb[111].mxu0 }
 0x31c   :  { %v5566_v51 = vmax.f32 %v2323_v2, %v2324_v40  ;;  %v2262_v12 = vsel %vm160_vm6, %v5562_v1, -inf }
 0x31d   :  { %v5570_v58 = vmax.f32 %v2261_v22, %v2262_v12 }
 0x31e   :  { %v2359_v9 = vsub.f32 %v5252_v26, %v5566_v51  ;;  %v2363_v46 = vsub.f32 %v5258_v20, %v5566_v51  ;;  %v2367_v4 = vsub.f32 %v5291_v24, %v5566_v51  ;;  %v2371_v3 = vsub.f32 %v5316_v8, %v5566_v51 }
 0x31f   :  { %v2375_v2 = vsub.f32 %v5340_v5, %v5566_v51  ;;  %v2379_v61 = vsub.f32 %v5366_v39, %v5566_v51  ;;  %v2383_v22 = vsub.f32 %v5390_v18, %v5566_v51  ;;  %v2387_v26 = vsub.f32 %v5412_v45, %v5566_v51 }
 0x320   :  { %v2391_v20 = vsub.f32 %v5434_v13, %v5566_v51  ;;  %v2395_v24 = vsub.f32 %v5453_v10, %v5566_v51  ;;  %v2399_v8 = vsub.f32 %v5471_v31, %v5566_v51  ;;  %v2403_v5 = vsub.f32 %v5489_v41, %v5566_v51 }
 0x321   :  { %v2407_v39 = vsub.f32 %v5505_v38, %v5566_v51  ;;  %v2411_v18 = vsub.f32 %v5524_v28, %v5566_v51  ;;  %v2415_v45 = vsub.f32 %v5540_v52, %v5566_v51  ;;  %v2419_v13 = vsub.f32 %v5560_v29, %v5566_v51 }
 0x322   :  { %v2425_v40 = vmul.f32 1.442695, %v2359_v9  ;;  %v2433_v10 = vmul.f32 1.442695, %v2363_v46  ;;  %v2441_v12 = vmul.f32 1.442695, %v2367_v4  ;;  %v2357_v31 = vsub.f32 %v5254_v25, %v5570_v58 }
 0x323   :  { %v2449_v41 = vmul.f32 1.442695, %v2371_v3  ;;  %v2361_v38 = vsub.f32 %v5262_v15, %v5570_v58  ;;  %v2457_v6 = vmul.f32 1.442695, %v2375_v2  ;;  %v5608_v28 = vadd.f32 %v3788_v43, %v1834_v34 }
 0x324   :  { %3900 = vpow2.f32 %v2425_v40  ;;  %v2465_v52 = vmul.f32 1.442695, %v2379_v61  ;;  %v2473_v21 = vmul.f32 1.442695, %v2383_v22  ;;  %v2481_v50 = vmul.f32 1.442695, %v2387_v26 }
 0x325   :  { %3902 = vpow2.f32 %v2433_v10  ;;  %v2489_v29 = vmul.f32 1.442695, %v2391_v20  ;;  %v2497_v51 = vmul.f32 1.442695, %v2395_v24  ;;  %v2505_v9 = vmul.f32 1.442695, %v2399_v8 }
 0x326   :  { %3904 = vpow2.f32 %v2441_v12  ;;  %v2513_v46 = vmul.f32 1.442695, %v2403_v5  ;;  %v2365_v25 = vsub.f32 %v5296_v54, %v5570_v58  ;;  %v2369_v15 = vsub.f32 %v5319_v47, %v5570_v58 }
 0x327   :  { %3906 = vpow2.f32 %v2449_v41  ;;  %v2373_v34 = vsub.f32 %v5343_v37, %v5570_v58  ;;  %v2377_v43 = vsub.f32 %v5371_v63, %v5570_v58  ;;  %v2381_v4 = vsub.f32 %v5393_v17, %v5570_v58 }
 0x328   :  { %3908 = vpow2.f32 %v2457_v6  ;;  %v2385_v3 = vsub.f32 %v5415_v33, %v5570_v58  ;;  %v2389_v54 = vsub.f32 %v5437_v0, %v5570_v58  ;;  %v2393_v47 = vsub.f32 %v5456_v59, %v5570_v58 }
 0x329   :  { %3910 = vpow2.f32 %v2465_v52  ;;  %v2397_v37 = vsub.f32 %v5474_v19, %v5570_v58  ;;  %v2401_v63 = vsub.f32 %v5491_v11, %v5570_v58  ;;  %v2405_v17 = vsub.f32 %v5507_v48, %v5570_v58 }
 0x32a   :  { %3912 = vpow2.f32 %v2473_v21  ;;  %v2409_v33 = vsub.f32 %v5526_v56, %v5570_v58  ;;  %v2413_v0 = vsub.f32 %v5542_v32, %v5570_v58  ;;  %v2417_v59 = vsub.f32 %v5562_v1, %v5570_v58 }
 0x32b   :  { %3914 = vpow2.f32 %v2481_v50  ;;  %v2521_v6 = vmul.f32 1.442695, %v2407_v39  ;;  %v2355_v19 = vsel %vm160_vm6, %v5608_v28, -inf  ;;  %v5640_v21 = vadd.f32 %v2221_v16, %v1824_v35 }
 0x32c   :  { %3916 = vpow2.f32 %v2489_v29  ;;  %v2529_v11 = vmul.f32 1.442695, %v2411_v18  ;;  %v2537_v48 = vmul.f32 1.442695, %v2415_v45  ;;  %v2545_v50 = vmul.f32 1.442695, %v2419_v13 }
 0x32d   :  { %3918 = vpow2.f32 %v2497_v51  ;;  %v2421_v56 = vmul.f32 1.442695, %v2357_v31  ;;  %v2429_v61 = vmul.f32 1.442695, %v2361_v38  ;;  %v2437_v32 = vmul.f32 1.442695, %v2365_v25 }
 0x32e   :  { %v5642_v2 = vpop.eup %3900  ;;  %3920 = vpow2.f32 %v2505_v9  ;;  %v2445_v58 = vmul.f32 1.442695, %v2369_v15  ;;  %v2453_v26 = vmul.f32 1.442695, %v2373_v34  ;;  %v2461_v20 = vmul.f32 1.442695, %v2377_v43 }
 0x32f   :  { %v5644_v22 = vpop.eup %3902  ;;  %3922 = vpow2.f32 %v2513_v46  ;;  %v2611_v1 = vsel %vm160_vm6, %v5642_v2, 0.0  ;;  %v2469_v24 = vmul.f32 1.442695, %v2381_v4  ;;  %v2477_v39 = vmul.f32 1.442695, %v2385_v3 }
 0x330   :  { %v5648_v16 = vpop.eup %3904  ;;  %3924 = vpow2.f32 %v2521_v6  ;;  %v2612_v35 = vsel %vm160_vm6, %v5644_v22, 0.0  ;;  %v2485_v18 = vmul.f32 1.442695, %v2389_v54  ;;  %v2493_v40 = vmul.f32 1.442695, %v2393_v47 }
 0x331   :  { %v5652_v8 = vpop.eup %3906  ;;  %3926 = vpow2.f32 %v2529_v11  ;;  %v2613_v5 = vadd.f32 %v2612_v35, %v2611_v1  ;;  %v2614_v13 = vsel %vm160_vm6, %v5648_v16, 0.0  ;;  %v2501_v10 = vmul.f32 1.442695, %v2397_v37 }
 0x332   :  { %v5654_v45 = vpop.eup %3908  ;;  %3928 = vpow2.f32 %v2537_v48  ;;  %v2509_v41 = vmul.f32 1.442695, %v2401_v63  ;;  %v5661_v38 = vmax.f32 %v5554_v55, %v2355_v19  ;;  %v2616_v29 = vsel %vm160_vm6, %v5652_v8, 0.0 }
 0x333   :  { %v5658_v12 = vpop.eup %3910  ;;  %3930 = vpow2.f32 %v2545_v50  ;;  %v2615_v31 = vadd.f32 %v2614_v13, %v2613_v5  ;;  %v2517_v51 = vmul.f32 1.442695, %v2405_v17  ;;  %v5667_v9 = vmul.f32 1.442695, %v2409_v33  ;;  %v6606_v5 = vld [vmem:[#allocation79_spill] sm:$0xff] }
 0x334   :  { %v5663_v52 = vpop.eup %3912  ;;  %3932 = vpow2.f32 %v2421_v56  ;;  %v5671_v15 = vmul.f32 1.442695, %v2413_v0  ;;  %v2360_v34 = vsub.f32 %v5256_v7, %v5661_v38  ;;  %v2618_v43 = vsel %vm160_vm6, %v5654_v45, 0.0 }
 0x335   :  { %v5669_v46 = vpop.eup %3914  ;;  %v2617_v25 = vadd.f32 %v2616_v29, %v2615_v31  ;;  %3934 = vpow2.f32 %v2429_v61  ;;  %v2364_v4 = vsub.f32 %v5270_v23, %v5661_v38  ;;  %v2368_v3 = vsub.f32 %v5300_v49, %v5661_v38  ;;  %v6607_v29 = vld [vmem:[#allocation82_spill] sm:$0xff] }
 0x336   :  { %v5675_v55 = vpop.eup %3916  ;;  %3936 = vpow2.f32 %v2437_v32  ;;  %v2541_v37 = vmul.f32 1.442695, %v2417_v59  ;;  %v2372_v7 = vsub.f32 %v5324_v62, %v5661_v38  ;;  %v2620_v17 = vsel %vm160_vm6, %v5658_v12, 0.0 }
 0x337   :  { %v5683_v54 = vpop.eup %3918  ;;  %v2619_v47 = vadd.f32 %v2618_v43, %v2617_v25  ;;  %3938 = vpow2.f32 %v2445_v58  ;;  %v2376_v23 = vsub.f32 %v5350_v42, %v5661_v38  ;;  %v2380_v49 = vsub.f32 %v5376_v57, %v5661_v38 }
 0x338   :  { %v5687_v63 = vpop.eup %3920  ;;  %3940 = vpow2.f32 %v2453_v26  ;;  %v2384_v59 = vsub.f32 %v5398_v60, %v5661_v38  ;;  %v5701_v62 = vsel %vm160_vm6, %v5640_v21, -inf  ;;  %v2622_v19 = vsel %vm160_vm6, %v5663_v52, 0.0 }
 0x339   :  { %v5695_v33 = vpop.eup %3922  ;;  %v2621_v0 = vadd.f32 %v2620_v17, %v2619_v47  ;;  %3942 = vpow2.f32 %v2461_v20  ;;  %v2388_v42 = vsub.f32 %v5422_v44, %v5661_v38  ;;  %v2392_v11 = vsub.f32 %v5442_v27, %v5661_v38 }
 0x33a   :  { %v5703_v6 = vpop.eup %3924  ;;  %3944 = vpow2.f32 %v2469_v24  ;;  %v2624_v56 = vsel %vm160_vm6, %v5669_v46, 0.0  ;;  %v2396_v61 = vsub.f32 %v5460_v30, %v5661_v38  ;;  %v2626_v1 = vsel %vm160_vm6, %v5675_v55, 0.0 }
 0x33b   :  { %6603 = vst [vmem:[#allocation85_spill] sm:$0xff] %v5703_v6  ;;  %v5711_v48 = vpop.eup %3926  ;;  %v2623_v50 = vadd.f32 %v2622_v19, %v2621_v0  ;;  %3946 = vpow2.f32 %v2477_v39  ;;  %v2400_v58 = vsub.f32 %v5478_v36, %v5661_v38  ;;  %v2628_v24 = vsel %vm160_vm6, %v5683_v54, 0.0 }
 0x33c   :  { %6604 = vst [vmem:[#allocation86_spill] sm:$0xff] %v5711_v48  ;;  %v5717_v32 = vpop.eup %3928  ;;  %3948 = vpow2.f32 %v2485_v18  ;;  %v2630_v18 = vsel %vm160_vm6, %v5687_v63, 0.0  ;;  %v2634_v17 = vsel %vm160_vm6, %v5703_v6, 0.0  ;;  %v2443_v31 = vmul.f32 1.442695, %v2368_v3 }
 0x33d   :  { %6605 = vst [vmem:[#allocation87_spill] sm:$0xff] %v5717_v32  ;;  %v5725_v35 = vpop.eup %3930  ;;  %v2625_v20 = vadd.f32 %v2624_v56, %v2623_v50  ;;  %3950 = vpow2.f32 %v2493_v40  ;;  %v2427_v50 = vmul.f32 1.442695, %v2360_v34  ;;  %v2483_v57 = vmul.f32 1.442695, %v2388_v42 }
 0x33e   :  { %v5731_v13 = vpop.eup %3932  ;;  %3952 = vpow2.f32 %v2501_v10  ;;  %v2632_v10 = vsel %vm160_vm6, %v5695_v33, 0.0  ;;  %v2491_v60 = vmul.f32 1.442695, %v2392_v11  ;;  %v2499_v44 = vmul.f32 1.442695, %v2396_v61 }
 0x33f   :  { %v5739_v43 = vpop.eup %3934  ;;  %v2627_v47 = vadd.f32 %v2626_v1, %v2625_v20  ;;  %3954 = vpow2.f32 %v2509_v41  ;;  %v2549_v40 = vsel %vm160_vm6, %v5731_v13, 0.0  ;;  %v2435_v20 = vmul.f32 1.442695, %v2364_v4 }
 0x340   :  { %v5745_v0 = vpop.eup %3936  ;;  %3956 = vpow2.f32 %v2517_v51  ;;  %v2550_v19 = vsel %vm160_vm6, %v5739_v43, 0.0  ;;  %v2636_v4 = vsel %vm160_vm6, %v5711_v48, 0.0  ;;  %v2507_v27 = vmul.f32 1.442695, %v2400_v58 }
 0x341   :  { %v5751_v56 = vpop.eup %3938  ;;  %v2629_v1 = vadd.f32 %v2628_v24, %v2627_v47  ;;  %3958 = vpow2.f32 %v5667_v9  ;;  %v2551_v41 = vadd.f32 %v2550_v19, %v2549_v40  ;;  %v2552_v51 = vsel %vm160_vm6, %v5745_v0, 0.0 }
 0x342   :  { %v5754_v25 = vpop.eup %3940  ;;  %3960 = vpow2.f32 %v5671_v15  ;;  %v2451_v47 = vmul.f32 1.442695, %v2372_v7  ;;  %v2554_v40 = vsel %vm160_vm6, %v5751_v56, 0.0  ;;  %v2459_v15 = vmul.f32 1.442695, %v2376_v23 }
 0x343   :  { %v5761_v39 = vpop.eup %3942  ;;  %v2631_v34 = vadd.f32 %v2630_v18, %v2629_v1  ;;  %3962 = vpow2.f32 %v2541_v37  ;;  %v2553_v24 = vadd.f32 %v2552_v51, %v2551_v41  ;;  %v2467_v37 = vmul.f32 1.442695, %v2380_v49 }
 0x344   :  { %v5763_v9 = vpop.eup %3944  ;;  %3964 = vpow2.f32 %v2427_v50  ;;  %v2638_v18 = vsel %vm160_vm6, %v5717_v32, 0.0  ;;  %v2556_v1 = vsel %vm160_vm6, %v5754_v25, 0.0  ;;  %v2475_v23 = vmul.f32 1.442695, %v2384_v59 }
 0x345   :  { %v5769_v19 = vpop.eup %3946  ;;  %v2633_v26 = vadd.f32 %v2632_v10, %v2631_v34  ;;  %v2555_v3 = vadd.f32 %v2554_v40, %v2553_v24  ;;  %3966 = vpow2.f32 %v2435_v20  ;;  %v2640_v20 = vsel %vm160_vm6, %v5725_v35, 0.0 }
 0x346   :  { %v5774_v7 = vpop.eup %3948  ;;  %3968 = vpow2.f32 %v2443_v31  ;;  %v2558_v31 = vsel %vm160_vm6, %v5761_v39, 0.0  ;;  %v2560_v51 = vsel %vm160_vm6, %v5763_v9, 0.0  ;;  %v2562_v34 = vsel %vm160_vm6, %v5769_v19, 0.0 }
 0x347   :  { %v5783_v10 = vpop.eup %3950  ;;  %v2635_v50 = vadd.f32 %v2634_v17, %v2633_v26  ;;  %v2557_v41 = vadd.f32 %v2556_v1, %v2555_v3  ;;  %3970 = vpow2.f32 %v2451_v47  ;;  %v2564_v30 = vsel %vm160_vm6, %v5774_v7, 0.0 }
 0x348   :  { %v5788_v49 = vpop.eup %3952  ;;  %3972 = vpow2.f32 %v2459_v15  ;;  %v6613_v36 = vsub.f32 %v5495_v53, %v5661_v38 }
 0x349   :  { %6608 = vst [vmem:[#allocation79_spill] sm:$0xff] %v5788_v49  ;;  %v5797_v59 = vpop.eup %3954  ;;  %v2637_v26 = vadd.f32 %v2636_v4, %v2635_v50  ;;  %v2559_v17 = vadd.f32 %v2558_v31, %v2557_v41  ;;  %3974 = vpow2.f32 %v2467_v37  ;;  %v2566_v4 = vsel %vm160_vm6, %v5783_v10, 0.0 }
 0x34a   :  { %6609 = vst [vmem:[#allocation82_spill] sm:$0xff] %v5797_v59  ;;  %v5802_v42 = vpop.eup %3956  ;;  %3976 = vpow2.f32 %v2475_v23  ;;  %v2568_v40 = vsel %vm160_vm6, %v5788_v49, 0.0  ;;  %v2515_v58 = vmul.f32 1.442695, %v6613_v36  ;;  %v2570_v50 = vsel %vm160_vm6, %v5797_v59, 0.0 }
 0x34b   :  { %6610 = vst [vmem:[#allocation88_spill] sm:$0xff] %v5802_v42  ;;  %v5811_v11 = vpop.eup %3958  ;;  %v2639_v24 = vadd.f32 %v2638_v18, %v2637_v26  ;;  %v2561_v47 = vadd.f32 %v2560_v51, %v2559_v17  ;;  %3978 = vpow2.f32 %v2483_v57  ;;  %v6615_v18 = vsub.f32 %v6606_v5, %v5661_v38  ;;  %v6620_v26 = vld [vmem:[#allocation84_spill] sm:$0xff] }
 0x34c   :  { %6611 = vst [vmem:[#allocation89_spill] sm:$0xff] %v5811_v11  ;;  %v5815_v61 = vpop.eup %3960  ;;  %3980 = vpow2.f32 %v2491_v60  ;;  %v6617_v41 = vsub.f32 %v5530_v14, %v5661_v38  ;;  %v6618_v57 = vsub.f32 %v6607_v29, %v5661_v38  ;;  %v5845_v17 = vmax.f32 %v6620_v26, %v5701_v62  ;;  %v6630_v26 = vld [vmem:[#allocation70_spill] sm:$0xff] }
 0x34d   :  { %6612 = vst [vmem:[#allocation90_spill] sm:$0xff] %v5815_v61  ;;  %v5824_v15 = vpop.eup %3962  ;;  %v2641_v3 = vadd.f32 %v2640_v20, %v2639_v24  ;;  %v2563_v37 = vadd.f32 %v2562_v34, %v2561_v47  ;;  %3982 = vpow2.f32 %v2499_v44  ;;  %v2523_v1 = vmul.f32 1.442695, %v6615_v18 }
 0x34e   :  { %6614 = vst [vmem:[#allocation91_spill] sm:$0xff] %v5824_v15  ;;  %v5829_v23 = vpop.eup %3964  ;;  %3984 = vpow2.f32 %v2507_v27  ;;  %v2531_v53 = vmul.f32 1.442695, %v6617_v41  ;;  %v2539_v20 = vmul.f32 1.442695, %v6618_v57  ;;  %v2572_v14 = vsel %vm160_vm6, %v5802_v42, 0.0 }
 0x34f   :  { %6616 = vst [vmem:[#allocation92_spill] sm:$0xff] %v5829_v23  ;;  %v5839_v31 = vpop.eup %3966  ;;  %3986 = vrcp.f32 %v2641_v3  ;;  %v2565_v60 = vadd.f32 %v2564_v30, %v2563_v37  ;;  %v2642_v5 = vsel %vm160_vm6, %v5829_v23, 0.0  ;;  %v2574_v29 = vsel %vm160_vm6, %v5811_v11, 0.0  ;;  %v6626_v37 = vld [vmem:[#allocation68_spill] sm:$0xff] }
 0x350   :  { %6619 = vst [vmem:[#allocation93_spill] sm:$0xff] %v5839_v31  ;;  %v5847_v44 = vpop.eup %3968  ;;  %3988 = vpow2.f32 %v2515_v58  ;;  %v2643_v51 = vsel %vm160_vm6, %v5839_v31, 0.0  ;;  %v6623_v62 = vsub.f32 %v5608_v28, %v5661_v38  ;;  %v6625_v58 = vld [vmem:[#allocation67_spill] sm:$0xff]  ;;  %v2362_v18 = vsub.f32 %v6626_v37, %v5845_v17  ;;  %v6633_v37 = vld [vmem:[#allocation72_spill] sm:$0xff] }
 0x351   :  { %6621 = vst [vmem:[#allocation84_spill] sm:$0xff] %v5847_v44  ;;  %v5855_v34 = vpop.eup %3970  ;;  %v2567_v27 = vadd.f32 %v2566_v4, %v2565_v60  ;;  %3990 = vpow2.f32 %v2523_v1  ;;  %v2644_v47 = vadd.f32 %v2643_v51, %v2642_v5  ;;  %v2645_v36 = vsel %vm160_vm6, %v5847_v44, 0.0  ;;  %v6629_v60 = vld [vmem:[#allocation69_spill] sm:$0xff]  ;;  %v6640_v31 = vld [vmem:[#allocation80_spill] sm:$0xff] }
 0x352   :  { %6622 = vst [vmem:[#allocation94_spill] sm:$0xff] %v5855_v34  ;;  %v2547_v24 = vmul.f32 1.442695, %v6623_v62  ;;  %v5860_v30 = vpop.eup %3972  ;;  %3992 = vpow2.f32 %v2531_v53  ;;  %v2358_v3 = vsub.f32 %v6625_v58, %v5845_v17  ;;  %v2576_v28 = vsel %vm160_vm6, %v5815_v61, 0.0 }
 0x353   :  { %6624 = vst [vmem:[#allocation95_spill] sm:$0xff] %v5860_v30  ;;  %v5868_v41 = vpop.eup %3974  ;;  %v2569_v4 = vadd.f32 %v2568_v40, %v2567_v27  ;;  %3994 = vpow2.f32 %v2539_v20  ;;  %v2646_v38 = vadd.f32 %v2645_v36, %v2644_v47  ;;  %v2578_v53 = vsel %vm160_vm6, %v5824_v15, 0.0  ;;  %v6632_v47 = vld [vmem:[#allocation71_spill] sm:$0xff] }
 0x354   :  { %6627 = vst [vmem:[#allocation67_spill] sm:$0xff] %v5868_v41  ;;  %v5872_v1 = vpop.eup %3976  ;;  %v2647_v57 = vsel %vm160_vm6, %v5855_v34, 0.0  ;;  %v2366_v5 = vsub.f32 %v6629_v60, %v5845_v17  ;;  %v2370_v51 = vsub.f32 %v6630_v26, %v5845_v17  ;;  %v2649_v20 = vsel %vm160_vm6, %v5860_v30, 0.0  ;;  %v6634_v60 = vld [vmem:[#allocation73_spill] sm:$0xff]  ;;  %v6635_v26 = vld [vmem:[#allocation74_spill] sm:$0xff] }
 0x355   :  { %6628 = vst [vmem:[#allocation68_spill] sm:$0xff] %v5872_v1  ;;  %v5882_v40 = vpop.eup %3978  ;;  %v2571_v27 = vadd.f32 %v2570_v50, %v2569_v4  ;;  %v2648_v62 = vadd.f32 %v2647_v57, %v2646_v38  ;;  %v2374_v36 = vsub.f32 %v6632_v47, %v5845_v17  ;;  %3996 = vpow2.f32 %v2547_v24  ;;  %v6636_v47 = vld [vmem:[#allocation75_spill] sm:$0xff] }
 0x356   :  { %6631 = vst [vmem:[#allocation69_spill] sm:$0xff] %v5882_v40  ;;  %v5888_v58 = vpop.eup %3980  ;;  %v2378_v32 = vsub.f32 %v6633_v37, %v5845_v17  ;;  %v2382_v48 = vsub.f32 %v6634_v60, %v5845_v17  ;;  %v2386_v6 = vsub.f32 %v6635_v26, %v5845_v17  ;;  %v2651_v57 = vsel %vm160_vm6, %v5868_v41, 0.0  ;;  %v6637_v60 = vld [vmem:[#allocation76_spill] sm:$0xff]  ;;  %v6638_v26 = vld [vmem:[#allocation77_spill] sm:$0xff] }
 0x357   :  { %v5896_v50 = vpop.eup %3982  ;;  %v2573_v4 = vadd.f32 %v2572_v14, %v2571_v27  ;;  %v2650_v38 = vadd.f32 %v2649_v20, %v2648_v62  ;;  %v2390_v30 = vsub.f32 %v6636_v47, %v5845_v17  ;;  %v2653_v37 = vsel %vm160_vm6, %v5872_v1, 0.0  ;;  %v6639_v14 = vld [vmem:[#allocation78_spill] sm:$0xff] }
 0x358   :  { %v5902_v24 = vpop.eup %3984  ;;  %v2394_v34 = vsub.f32 %v6637_v60, %v5845_v17  ;;  %v2398_v44 = vsub.f32 %v6638_v26, %v5845_v17  ;;  %v2402_v27 = vsub.f32 %v6639_v14, %v5845_v17  ;;  %v2655_v47 = vsel %vm160_vm6, %v5882_v40, 0.0  ;;  %v6641_v26 = vld [vmem:[#allocation81_spill] sm:$0xff]  ;;  %v6642_v14 = vld [vmem:[#allocation83_spill] sm:$0xff] }
 0x359   :  { %v5912_v62 = vpop.eup %3986  ;;  %v2575_v20 = vadd.f32 %v2574_v29, %v2573_v4  ;;  %v2652_v41 = vadd.f32 %v2651_v57, %v2650_v38  ;;  %v2406_v23 = vsub.f32 %v6640_v31, %v5845_v17  ;;  %v2410_v15 = vsub.f32 %v6641_v26, %v5845_v17 }
 0x35a   :  { %v5918_v1 = vpop.eup %3988  ;;  %v2739_v60 = vmul.f32 %v5912_v62, %v5725_v35  ;;  %v2414_v61 = vsub.f32 %v6642_v14, %v5845_v17  ;;  %v2418_v29 = vsub.f32 %v5640_v21, %v5845_v17  ;;  %v2657_v31 = vsel %vm160_vm6, %v5888_v58, 0.0  ;;  %v6643_v35 = vld [vmem:[#allocation63_spill] sm:$0xff] }
 0x35b   :  { %v5928_v4 = vpop.eup %3990  ;;  %v2577_v38 = vadd.f32 %v2576_v28, %v2575_v20  ;;  %v2654_v57 = vadd.f32 %v2653_v37, %v2652_v41  ;;  %v2423_v40 = vmul.f32 1.442695, %v2358_v3  ;;  %v2659_v26 = vsel %vm160_vm6, %v5896_v50, 0.0 }
 0x35c   :  { %v5932_v11 = vpop.eup %3992  ;;  %v5935_v42 = vmul.f32 %v6643_v35, %v2739_v60  ;;  %v2431_v14 = vmul.f32 1.442695, %v2362_v18  ;;  %v2439_v59 = vmul.f32 1.442695, %v2366_v5  ;;  %v2661_v41 = vsel %vm160_vm6, %v5902_v24, 0.0 }
 0x35d   :  { %v5939_v49 = vpop.eup %3994  ;;  %v2579_v21 = vadd.f32 %v2578_v53, %v2577_v38  ;;  %v2656_v17 = vadd.f32 %v2655_v47, %v2654_v57  ;;  %3998 = vpow2.f32 %v2423_v40  ;;  %v2663_v3 = vsel %vm160_vm6, %v5918_v1, 0.0 }
 0x35e   :  { %6644 = vst [vmem:[#allocation70_spill] sm:$0xff] %v5935_v42  ;;  %6645 = vst [vmem:[#allocation71_spill] sm:$0xff] %v5939_v49  ;;  %v2665_v28 = vsel %vm160_vm6, %v5928_v4, 0.0  ;;  %4000 = vpow2.f32 %v2431_v14  ;;  %v2447_v37 = vmul.f32 1.442695, %v2370_v51  ;;  %v2667_v18 = vsel %vm160_vm6, %v5932_v11, 0.0 }
 0x35f   :  { %4002 = vrcp.f32 %v2579_v21  ;;  %v2658_v20 = vadd.f32 %v2657_v31, %v2656_v17  ;;  %v2455_v5 = vmul.f32 1.442695, %v2374_v36  ;;  %v5949_v53 = vpop.eup %3996  ;;  %v2669_v47 = vsel %vm160_vm6, %v5939_v49, 0.0 }
 0x360   :  { %4004 = vpow2.f32 %v2439_v59  ;;  %v2463_v40 = vmul.f32 1.442695, %v2378_v32  ;;  %v2471_v60 = vmul.f32 1.442695, %v2382_v48  ;;  %v2479_v57 = vmul.f32 1.442695, %v2386_v6 }
 0x361   :  { %v2660_v38 = vadd.f32 %v2659_v26, %v2658_v20  ;;  %4006 = vpow2.f32 %v2447_v37  ;;  %v2487_v35 = vmul.f32 1.442695, %v2390_v30  ;;  %v2495_v51 = vmul.f32 1.442695, %v2394_v34 }
 0x362   :  { %4008 = vpow2.f32 %v2455_v5  ;;  %v2503_v14 = vmul.f32 1.442695, %v2398_v44  ;;  %v2511_v31 = vmul.f32 1.442695, %v2402_v27  ;;  %v2519_v17 = vmul.f32 1.442695, %v2406_v23 }
 0x363   :  { %v2662_v21 = vadd.f32 %v2661_v41, %v2660_v38  ;;  %4010 = vpow2.f32 %v2463_v40  ;;  %v2527_v36 = vmul.f32 1.442695, %v2410_v15  ;;  %v2535_v42 = vmul.f32 1.442695, %v2414_v61 }
 0x364   :  { %4012 = vpow2.f32 %v2471_v60  ;;  %v5955_v49 = vmul.f32 %v5912_v62, %v5642_v2  ;;  %v5959_v48 = vmul.f32 %v5912_v62, %v5644_v22  ;;  %v2543_v32 = vmul.f32 1.442695, %v2418_v29 }
 0x365   :  { %v2664_v6 = vadd.f32 %v2663_v3, %v2662_v21  ;;  %v5963_v59 = vmul.f32 %v5912_v62, %v5648_v16  ;;  %v5967_v23 = vmul.f32 %v5912_v62, %v5652_v8  ;;  %4014 = vpow2.f32 %v2479_v57 }
 0x366   :  { %v5971_v61 = vmul.f32 %v5912_v62, %v5654_v45  ;;  %v5975_v2 = vmul.f32 %v5912_v62, %v5658_v12  ;;  %v5979_v22 = vmul.f32 %v5912_v62, %v5663_v52  ;;  %4016 = vpow2.f32 %v2487_v35 }
 0x367   :  { %v5981_v15 = vpop.eup %3998  ;;  %v2666_v16 = vadd.f32 %v2665_v28, %v2664_v6  ;;  %v5985_v8 = vmul.f32 %v5912_v62, %v5669_v46  ;;  %v5989_v45 = vmul.f32 %v5912_v62, %v5675_v55  ;;  %4018 = vpow2.f32 %v2495_v51  ;;  %v6651_v6 = vld [vmem:[#allocation88_spill] sm:$0xff] }
 0x368   :  { %v5991_v44 = vpop.eup %4000  ;;  %v2580_v12 = vsel %vm160_vm6, %v5981_v15, 0.0  ;;  %v5997_v52 = vmul.f32 %v5912_v62, %v5683_v54  ;;  %v6001_v34 = vmul.f32 %v5912_v62, %v5687_v63  ;;  %4020 = vpow2.f32 %v2503_v14 }
 0x369   :  { %v4003_v46 = vpop.eup %4002  ;;  %v2668_v30 = vadd.f32 %v2667_v18, %v2666_v16  ;;  %v2581_v55 = vsel %vm160_vm6, %v5991_v44, 0.0  ;;  %v6007_v27 = vmul.f32 %v5912_v62, %v5695_v33  ;;  %4022 = vpow2.f32 %v2511_v31  ;;  %v6648_v31 = vld [vmem:[#allocation79_spill] sm:$0xff]  ;;  %v6652_v16 = vld [vmem:[#allocation89_spill] sm:$0xff] }
 0x36a   :  { %v6009_v29 = vpop.eup %4004  ;;  %v2582_v26 = vadd.f32 %v2581_v55, %v2580_v12  ;;  %v2677_v54 = vmul.f32 %v4003_v46, %v5731_v13  ;;  %v2681_v41 = vmul.f32 %v4003_v46, %v5739_v43  ;;  %4024 = vpow2.f32 %v2519_v17 }
 0x36b   :  { %v6013_v63 = vpop.eup %4006  ;;  %v2670_v3 = vadd.f32 %v2669_v47, %v2668_v30  ;;  %v2583_v28 = vsel %vm160_vm6, %v6009_v29, 0.0  ;;  %v2685_v37 = vmul.f32 %v4003_v46, %v5745_v0  ;;  %v2671_v33 = vsel %vm160_vm6, %v5949_v53, 0.0  ;;  %v6654_v30 = vld [vmem:[#allocation90_spill] sm:$0xff] }
 0x36c   :  { %v6018_v20 = vpop.eup %4008  ;;  %4026 = vpow2.f32 %v2527_v36  ;;  %v2584_v18 = vadd.f32 %v2583_v28, %v2582_v26  ;;  %v2689_v13 = vmul.f32 %v4003_v46, %v5751_v56  ;;  %v2585_v47 = vsel %vm160_vm6, %v6013_v63, 0.0  ;;  %v6655_v26 = vld [vmem:[#allocation91_spill] sm:$0xff] }
 0x36d   :  { %v6023_v5 = vpop.eup %4010  ;;  %v2672_v43 = vadd.f32 %v2671_v33, %v2670_v3  ;;  %4028 = vpow2.f32 %v2535_v42  ;;  %v2693_v40 = vmul.f32 %v4003_v46, %v5754_v25  ;;  %v2697_v38 = vmul.f32 %v4003_v46, %v5761_v39  ;;  %v6656_v33 = vld [vmem:[#allocation4_spill] sm:$0xff] }
 0x36e   :  { %6646 = vst [vmem:[#allocation72_spill] sm:$0xff] %v6023_v5  ;;  %v6028_v60 = vpop.eup %4012  ;;  %4030 = vpow2.f32 %v2543_v32  ;;  %v2586_v0 = vadd.f32 %v2585_v47, %v2584_v18  ;;  %v2701_v57 = vmul.f32 %v4003_v46, %v5763_v9  ;;  %v2587_v56 = vsel %vm160_vm6, %v6018_v20, 0.0  ;;  %v6650_v9 = vld [vmem:[#allocation82_spill] sm:$0xff] }
 0x36f   :  { %6647 = vst [vmem:[#allocation73_spill] sm:$0xff] %v6028_v60  ;;  %4032 = vrcp.f32 %v2672_v43  ;;  %v2705_v35 = vmul.f32 %v4003_v46, %v5769_v19  ;;  %v2709_v42 = vmul.f32 %v4003_v46, %v5774_v7  ;;  %v6036_v51 = vpop.eup %4014  ;;  %v2713_v25 = vmul.f32 %v4003_v46, %v5783_v10  ;;  %v6657_v43 = vld [vmem:[#allocation8_spill] sm:$0xff] }
 0x370   :  { %v2588_v14 = vadd.f32 %v2587_v56, %v2586_v0  ;;  %v2717_v21 = vmul.f32 %v4003_v46, %v6648_v31  ;;  %v6040_v17 = vpop.eup %4016  ;;  %v2589_v39 = vsel %vm160_vm6, %v6023_v5, 0.0  ;;  %v2721_v36 = vmul.f32 %v4003_v46, %v6650_v9  ;;  %v6658_v0 = vld [vmem:[#allocation12_spill] sm:$0xff] }
 0x371   :  { %6649 = vst [vmem:[#allocation74_spill] sm:$0xff] %v6040_v17  ;;  %v2725_v32 = vmul.f32 %v4003_v46, %v6651_v6  ;;  %v2729_v19 = vmul.f32 %v4003_v46, %v6652_v16  ;;  %v6047_v12 = vpop.eup %4018  ;;  %v2733_v55 = vmul.f32 %v4003_v46, %v6654_v30  ;;  %v2737_v10 = vmul.f32 %v4003_v46, %v6655_v26  ;;  %v6660_v6 = vld [vmem:[#allocation16_spill] sm:$0xff] }
 0x372   :  { %6653 = vst [vmem:[#allocation75_spill] sm:$0xff] %v6047_v12  ;;  %v2590_v7 = vadd.f32 %v2589_v39, %v2588_v14  ;;  %v6051_v3 = vpop.eup %4020  ;;  %v2591_v28 = vsel %vm160_vm6, %v6028_v60, 0.0  ;;  %v2741_v18 = vmul.f32 %v2677_v54, %v6656_v33  ;;  %v2745_v47 = vmul.f32 %v2681_v41, %v6657_v43  ;;  %v6661_v39 = vld [vmem:[#allocation20_spill] sm:$0xff] }
 0x373   :  { %v2749_v56 = vmul.f32 %v2685_v37, %v6658_v0  ;;  %v6058_v31 = vpop.eup %4022  ;;  %v2753_v14 = vmul.f32 %v2689_v13, %v6660_v6  ;;  %v2757_v16 = vmul.f32 %v2693_v40, %v6661_v39  ;;  %v2593_v46 = vsel %vm160_vm6, %v6036_v51, 0.0  ;;  %v6663_v26 = vld [vmem:[#allocation24_spill] sm:$0xff] }
 0x374   :  { %6659 = vst [vmem:[#allocation76_spill] sm:$0xff] %v6058_v31  ;;  %v2592_v9 = vadd.f32 %v2591_v28, %v2590_v7  ;;  %v6062_v30 = vpop.eup %4024  ;;  %v2761_v60 = vmul.f32 %v2697_v38, %v6663_v26  ;;  %v6664_v5 = vld [vmem:[#allocation28_spill] sm:$0xff]  ;;  %v2595_v7 = vsel %vm160_vm6, %v6040_v17, 0.0  ;;  %v2597_v39 = vsel %vm160_vm6, %v6047_v12, 0.0 }
 0x375   :  { %6662 = vst [vmem:[#allocation77_spill] sm:$0xff] %v6062_v30  ;;  %v2765_v54 = vmul.f32 %v2701_v57, %v6664_v5  ;;  %v6665_v33 = vld [vmem:[#allocation32_spill] sm:$0xff] }
 0x376   :  { %v2769_v41 = vmul.f32 %v2705_v35, %v6665_v33  ;;  %v6069_v43 = vpop.eup %4026  ;;  %v2594_v37 = vadd.f32 %v2593_v46, %v2592_v9  ;;  %v6667_v13 = vld [vmem:[#allocation36_spill] sm:$0xff] }
 0x377   :  { %6666 = vst [vmem:[#allocation78_spill] sm:$0xff] %v6069_v43  ;;  %v2773_v28 = vmul.f32 %v2709_v42, %v6667_v13  ;;  %v6668_v40 = vld [vmem:[#allocation40_spill] sm:$0xff]  ;;  %v6075_v6 = vpop.eup %4028  ;;  %v2599_v42 = vsel %vm160_vm6, %v6051_v3, 0.0 }
 0x378   :  { %v2777_v0 = vmul.f32 %v2713_v25, %v6668_v40  ;;  %6669 = vst [vmem:[#allocation80_spill] sm:$0xff] %v6075_v6  ;;  %v6670_v38 = vld [vmem:[#allocation44_spill] sm:$0xff]  ;;  %v6084_v9 = vpop.eup %4030  ;;  %v2596_v46 = vadd.f32 %v2595_v7, %v2594_v37  ;;  %v2806_v37 = vsel %vm160_vm6, %v2745_v47, 0.0 }
 0x379   :  { %v2781_v26 = vmul.f32 %v2717_v21, %v6670_v38  ;;  %v6671_v5 = vld [vmem:[#allocation48_spill] sm:$0xff]  ;;  %6673 = vst [vmem:[#allocation81_spill] sm:$0xff] %v6084_v9  ;;  %v4033_v12 = vpop.eup %4032  ;;  %v2601_v21 = vsel %vm160_vm6, %v6058_v31, 0.0 }
 0x37a   :  { %v2785_v57 = vmul.f32 %v2721_v36, %v6671_v5  ;;  %v6672_v35 = vld [vmem:[#allocation52_spill] sm:$0xff]  ;;  %v2740_v7 = vmul.f32 %v4033_v12, %v5949_v53  ;;  %v2598_v5 = vadd.f32 %v2597_v39, %v2596_v46  ;;  %v2810_v46 = vsel %vm160_vm6, %v2753_v14, 0.0 }
 0x37b   :  { %v6082_v33 = vmul.f32 %v2725_v32, %v6672_v35  ;;  %v6674_v13 = vld [vmem:[#allocation56_spill] sm:$0xff]  ;;  %v2805_v32 = vsel %vm160_vm6, %v2741_v18, 0.0  ;;  %v2808_v18 = vsel %vm160_vm6, %v2749_v56, 0.0  ;;  %v2822_v56 = vsel %vm160_vm6, %v2777_v0, 0.0 }
 0x37c   :  { %v6089_v25 = vmul.f32 %v2729_v19, %v6674_v13  ;;  %v6675_v40 = vld [vmem:[#allocation60_spill] sm:$0xff]  ;;  %v2603_v19 = vsel %vm160_vm6, %v6062_v30, 0.0  ;;  %v2807_v35 = vadd.f32 %v2806_v37, %v2805_v32  ;;  %v2607_v13 = vsel %vm160_vm6, %v6075_v6, 0.0  ;;  %v6687_v30 = vld [vmem:[#allocation69_spill] sm:$0xff] }
 0x37d   :  { %v6092_v17 = vmul.f32 %v2733_v55, %v6675_v40  ;;  %v6676_v36 = vld [vmem:[#allocation64_spill] sm:$0xff]  ;;  %v2605_v55 = vsel %vm160_vm6, %v6069_v43, 0.0  ;;  %v6678_v40 = vld [vmem:[#allocation65_spill] sm:$0xff]  ;;  %v2600_v53 = vadd.f32 %v2599_v42, %v2598_v5  ;;  %v2814_v32 = vsel %vm160_vm6, %v2761_v60, 0.0 }
 0x37e   :  { %v6097_v38 = vmul.f32 %v2737_v10, %v6676_v36  ;;  %v2609_v10 = vsel %vm160_vm6, %v6084_v9, 0.0  ;;  %v6112_v47 = vmul.f32 %v6678_v40, %v2740_v7  ;;  %v2809_v39 = vadd.f32 %v2808_v18, %v2807_v35  ;;  %v6680_v5 = vld [vmem:[#allocation92_spill] sm:$0xff]  ;;  %v6681_v35 = vld [vmem:[#allocation93_spill] sm:$0xff] }
 0x37f   :  { %v2812_v36 = vsel %vm160_vm6, %v2757_v16, 0.0  ;;  %v2816_v37 = vsel %vm160_vm6, %v2765_v54, 0.0  ;;  %v2602_v6 = vadd.f32 %v2601_v21, %v2600_v53  ;;  %v2820_v9 = vsel %vm160_vm6, %v2773_v28, 0.0  ;;  %v6682_v40 = vld [vmem:[#allocation84_spill] sm:$0xff]  ;;  %v6684_v21 = vld [vmem:[#allocation95_spill] sm:$0xff] }
 0x380   :  { %6677 = vst [vmem:[#allocation83_spill] sm:$0xff] %v6097_v38  ;;  %6679 = vst [vmem:[#allocation63_spill] sm:$0xff] %v6112_v47  ;;  %v2818_v38 = vsel %vm160_vm6, %v2769_v41, 0.0  ;;  %v2811_v43 = vadd.f32 %v2810_v46, %v2809_v39  ;;  %v2824_v7 = vsel %vm160_vm6, %v2781_v26, 0.0  ;;  %v2826_v42 = vsel %vm160_vm6, %v2785_v57, 0.0  ;;  %v6683_v47 = vld [vmem:[#allocation94_spill] sm:$0xff] }
 0x381   :  { %v2680_v14 = vmul.f32 %v4033_v12, %v6680_v5  ;;  %v2684_v16 = vmul.f32 %v4033_v12, %v6681_v35  ;;  %v2604_v18 = vadd.f32 %v2603_v19, %v2602_v6  ;;  %v2688_v54 = vmul.f32 %v4033_v12, %v6682_v40  ;;  %v6685_v39 = vld [vmem:[#allocation67_spill] sm:$0xff]  ;;  %v6686_v46 = vld [vmem:[#allocation68_spill] sm:$0xff]  ;;  %v6688_v19 = vld [vmem:[#allocation85_spill] sm:$0xff] }
 0x382   :  { %v2813_v60 = vadd.f32 %v2812_v36, %v2811_v43  ;;  %v2692_v41 = vmul.f32 %v4033_v12, %v6683_v47  ;;  %v2696_v53 = vmul.f32 %v4033_v12, %v6684_v21  ;;  %v2700_v28 = vmul.f32 %v4033_v12, %v6685_v39  ;;  %v6689_v39 = vld [vmem:[#allocation86_spill] sm:$0xff] }
 0x383   :  { %v2704_v0 = vmul.f32 %v4033_v12, %v6686_v46  ;;  %v2708_v26 = vmul.f32 %v4033_v12, %v6687_v30  ;;  %v2606_v31 = vadd.f32 %v2605_v55, %v2604_v18  ;;  %v2712_v5 = vmul.f32 %v4033_v12, %v5888_v58 }
 0x384   :  { %v2815_v57 = vadd.f32 %v2814_v32, %v2813_v60  ;;  %v2716_v35 = vmul.f32 %v4033_v12, %v5896_v50  ;;  %v2720_v43 = vmul.f32 %v4033_v12, %v5902_v24  ;;  %v2724_v6 = vmul.f32 %v4033_v12, %v5918_v1  ;;  %v6690_v32 = vld [vmem:[#allocation87_spill] sm:$0xff]  ;;  %v6693_v60 = vld [vmem:[#allocation5_spill] sm:$0xff] }
 0x385   :  { %v2727_v47 = vmul.f32 %v5912_v62, %v6688_v19  ;;  %v2728_v36 = vmul.f32 %v4033_v12, %v5928_v4  ;;  %v2608_v40 = vadd.f32 %v2607_v13, %v2606_v31  ;;  %v2731_v30 = vmul.f32 %v5912_v62, %v6689_v39  ;;  %v6691_v50 = vld [vmem:[#allocation71_spill] sm:$0xff] }
 0x386   :  { %v2817_v21 = vadd.f32 %v2816_v37, %v2815_v57  ;;  %v2732_v55 = vmul.f32 %v4033_v12, %v5932_v11  ;;  %v2735_v58 = vmul.f32 %v5912_v62, %v6690_v32  ;;  %v2736_v18 = vmul.f32 %v4033_v12, %v6691_v50  ;;  %v6692_v24 = vld [vmem:[#allocation3_spill] sm:$0xff]  ;;  %v6695_v37 = vld [vmem:[#allocation9_spill] sm:$0xff] }
 0x387   :  { %v2743_v1 = vmul.f32 %v6692_v24, %v5955_v49  ;;  %v6147_v46 = vmul.f32 %v6693_v60, %v2680_v14  ;;  %v2610_v19 = vadd.f32 %v2609_v10, %v2608_v40  ;;  %v6694_v31 = vld [vmem:[#allocation7_spill] sm:$0xff]  ;;  %v6152_v57 = vmul.f32 %v6695_v37, %v2684_v16  ;;  %v6697_v62 = vld [vmem:[#allocation13_spill] sm:$0xff] }
 0x388   :  { %v2819_v4 = vadd.f32 %v2818_v38, %v2817_v21  ;;  %v2747_v13 = vmul.f32 %v6694_v31, %v5959_v48  ;;  %v6696_v11 = vld [vmem:[#allocation11_spill] sm:$0xff]  ;;  %v6157_v32 = vmul.f32 %v6697_v62, %v2688_v54  ;;  %v6699_v14 = vld [vmem:[#allocation17_spill] sm:$0xff] }
 0x389   :  { %v2751_v39 = vmul.f32 %v6696_v11, %v5963_v59  ;;  %v6698_v12 = vld [vmem:[#allocation15_spill] sm:$0xff]  ;;  %v6164_v50 = vmul.f32 %v6699_v14, %v2692_v41  ;;  %4034 = vrcp.f32 %v2610_v19  ;;  %v6701_v16 = vld [vmem:[#allocation21_spill] sm:$0xff] }
 0x38a   :  { %v6161_v49 = vmul.f32 %v6698_v12, %v5967_v23  ;;  %v2821_v38 = vadd.f32 %v2820_v9, %v2819_v4  ;;  %v6700_v48 = vld [vmem:[#allocation19_spill] sm:$0xff]  ;;  %v6171_v40 = vmul.f32 %v6701_v16, %v2696_v53  ;;  %v6703_v21 = vld [vmem:[#allocation25_spill] sm:$0xff] }
 0x38b   :  { %v6168_v10 = vmul.f32 %v6700_v48, %v5971_v61  ;;  %v6702_v59 = vld [vmem:[#allocation23_spill] sm:$0xff]  ;;  %v6178_v24 = vmul.f32 %v6703_v21, %v2700_v28  ;;  %v6705_v60 = vld [vmem:[#allocation29_spill] sm:$0xff] }
 0x38c   :  { %v6175_v54 = vmul.f32 %v6702_v59, %v5975_v2  ;;  %v6704_v23 = vld [vmem:[#allocation27_spill] sm:$0xff]  ;;  %v6185_v9 = vmul.f32 %v6705_v60, %v2704_v0  ;;  %v2823_v19 = vadd.f32 %v2822_v56, %v2821_v38  ;;  %v6707_v53 = vld [vmem:[#allocation33_spill] sm:$0xff] }
 0x38d   :  { %v6182_v41 = vmul.f32 %v6704_v23, %v5979_v22  ;;  %v6706_v61 = vld [vmem:[#allocation31_spill] sm:$0xff]  ;;  %v6192_v31 = vmul.f32 %v6707_v53, %v2708_v26  ;;  %v6709_v28 = vld [vmem:[#allocation37_spill] sm:$0xff] }
 0x38e   :  { %v6189_v4 = vmul.f32 %v6706_v61, %v5985_v8  ;;  %v6708_v2 = vld [vmem:[#allocation35_spill] sm:$0xff]  ;;  %v6199_v11 = vmul.f32 %v6709_v28, %v2712_v5  ;;  %v6711_v0 = vld [vmem:[#allocation41_spill] sm:$0xff]  ;;  %v2825_v26 = vadd.f32 %v2824_v7, %v2823_v19 }
 0x38f   :  { %v6196_v37 = vmul.f32 %v6708_v2, %v5989_v45  ;;  %v6710_v22 = vld [vmem:[#allocation39_spill] sm:$0xff]  ;;  %v6206_v56 = vmul.f32 %v6711_v0, %v2716_v35  ;;  %v6713_v14 = vld [vmem:[#allocation45_spill] sm:$0xff] }
 0x390   :  { %v6203_v62 = vmul.f32 %v6710_v22, %v5997_v52  ;;  %v6712_v8 = vld [vmem:[#allocation43_spill] sm:$0xff]  ;;  %v6213_v38 = vmul.f32 %v6713_v14, %v2720_v43  ;;  %v6715_v5 = vld [vmem:[#allocation49_spill] sm:$0xff]  ;;  %v2827_v43 = vadd.f32 %v2826_v42, %v2825_v26  ;;  %v2870_v42 = vsel %vm160_vm6, %v2751_v39, 0.0  ;;  %v6725_v26 = vld [vmem:[#allocation72_spill] sm:$0xff] }
 0x391   :  { %v6210_v12 = vmul.f32 %v6712_v8, %v6001_v34  ;;  %v6714_v45 = vld [vmem:[#allocation47_spill] sm:$0xff]  ;;  %v6220_v16 = vmul.f32 %v6715_v5, %v2724_v6  ;;  %v6717_v35 = vld [vmem:[#allocation53_spill] sm:$0xff]  ;;  %v2867_v6 = vsel %vm160_vm6, %v2743_v1, 0.0  ;;  %v6727_v5 = vld [vmem:[#allocation74_spill] sm:$0xff] }
 0x392   :  { %v6217_v48 = vmul.f32 %v6714_v45, %v6007_v27  ;;  %v6716_v52 = vld [vmem:[#allocation51_spill] sm:$0xff]  ;;  %v6226_v21 = vmul.f32 %v6717_v35, %v2728_v36  ;;  %v6720_v7 = vld [vmem:[#allocation57_spill] sm:$0xff]  ;;  %v2868_v36 = vsel %vm160_vm6, %v2747_v13, 0.0 }
 0x393   :  { %v6223_v59 = vmul.f32 %v6716_v52, %v2727_v47  ;;  %v6719_v23 = vld [vmem:[#allocation55_spill] sm:$0xff]  ;;  %v6232_v60 = vmul.f32 %v6720_v7, %v2732_v55  ;;  %v6723_v27 = vld [vmem:[#allocation61_spill] sm:$0xff]  ;;  %v2828_v47 = vsel %vm160_vm6, %v6082_v33, 0.0  ;;  %v2830_v55 = vsel %vm160_vm6, %v6089_v25, 0.0  ;;  %v4035_v28 = vpop.eup %4034 }
 0x394   :  { %6718 = vst [vmem:[#allocation79_spill] sm:$0xff] %v6226_v21  ;;  %v6229_v34 = vmul.f32 %v6719_v23, %v2731_v30  ;;  %v6722_v19 = vld [vmem:[#allocation59_spill] sm:$0xff]  ;;  %v6238_v53 = vmul.f32 %v6723_v27, %v2736_v18  ;;  %v2829_v2 = vadd.f32 %v2828_v47, %v2827_v43  ;;  %v2869_v30 = vadd.f32 %v2868_v36, %v2867_v6  ;;  %v6726_v14 = vld [vmem:[#allocation73_spill] sm:$0xff]  ;;  %v6729_v23 = vld [vmem:[#allocation76_spill] sm:$0xff] }
 0x395   :  { %6721 = vst [vmem:[#allocation82_spill] sm:$0xff] %v6232_v60  ;;  %v6235_v61 = vmul.f32 %v6722_v19, %v2735_v58  ;;  %v2832_v18 = vsel %vm160_vm6, %v6092_v17, 0.0  ;;  %v2678_v1 = vmul.f32 %v4035_v28, %v5981_v15  ;;  %v2682_v0 = vmul.f32 %v4035_v28, %v5991_v44  ;;  %v6728_v17 = vld [vmem:[#allocation75_spill] sm:$0xff]  ;;  %v6730_v7 = vld [vmem:[#allocation77_spill] sm:$0xff]  ;;  %v6731_v43 = vld [vmem:[#allocation78_spill] sm:$0xff] }
 0x396   :  { %6724 = vst [vmem:[#allocation88_spill] sm:$0xff] %v6238_v53  ;;  %v2831_v58 = vadd.f32 %v2830_v55, %v2829_v2  ;;  %v2871_v22 = vadd.f32 %v2870_v42, %v2869_v30  ;;  %v2686_v33 = vmul.f32 %v4035_v28, %v6009_v29  ;;  %v2690_v13 = vmul.f32 %v4035_v28, %v6013_v63  ;;  %v6732_v19 = vld [vmem:[#allocation80_spill] sm:$0xff]  ;;  %v6733_v27 = vld [vmem:[#allocation81_spill] sm:$0xff]  ;;  %v6734_v47 = vld [vmem:[#allocation6_spill] sm:$0xff] }
 0x397   :  { %v2694_v8 = vmul.f32 %v4035_v28, %v6018_v20  ;;  %v2698_v25 = vmul.f32 %v4035_v28, %v6725_v26  ;;  %v2702_v39 = vmul.f32 %v4035_v28, %v6726_v14  ;;  %v2706_v45 = vmul.f32 %v4035_v28, %v6036_v51  ;;  %v6735_v2 = vld [vmem:[#allocation10_spill] sm:$0xff] }
 0x398   :  { %v2710_v52 = vmul.f32 %v4035_v28, %v6727_v5  ;;  %v2714_v35 = vmul.f32 %v4035_v28, %v6728_v17  ;;  %v2718_v15 = vmul.f32 %v4035_v28, %v6051_v3  ;;  %v2722_v44 = vmul.f32 %v4035_v28, %v6729_v23  ;;  %v6736_v30 = vld [vmem:[#allocation14_spill] sm:$0xff] }
 0x399   :  { %v2726_v29 = vmul.f32 %v4035_v28, %v6730_v7  ;;  %v2730_v63 = vmul.f32 %v4035_v28, %v6731_v43  ;;  %v2734_v20 = vmul.f32 %v4035_v28, %v6732_v19  ;;  %v2738_v6 = vmul.f32 %v4035_v28, %v6733_v27  ;;  %v6737_v42 = vld [vmem:[#allocation18_spill] sm:$0xff] }
 0x39a   :  { %v2742_v36 = vmul.f32 %v2678_v1, %v6734_v47  ;;  %v2746_v51 = vmul.f32 %v2682_v0, %v6735_v2  ;;  %v2750_v55 = vmul.f32 %v2686_v33, %v6736_v30  ;;  %v2754_v26 = vmul.f32 %v2690_v13, %v6737_v42  ;;  %v6738_v14 = vld [vmem:[#allocation22_spill] sm:$0xff] }
 0x39b   :  { %v2758_v3 = vmul.f32 %v2694_v8, %v6738_v14  ;;  %v6739_v5 = vld [vmem:[#allocation26_spill] sm:$0xff]  ;;  %v2899_v14 = vsel %vm160_vm6, %v6152_v57, 0.0  ;;  %v2903_v57 = vsel %vm160_vm6, %v6164_v50, 0.0  ;;  %v2907_v50 = vsel %vm160_vm6, %v6178_v24, 0.0 }
 0x39c   :  { %v2762_v17 = vmul.f32 %v2698_v25, %v6739_v5  ;;  %v6740_v23 = vld [vmem:[#allocation30_spill] sm:$0xff]  ;;  %v2911_v24 = vsel %vm160_vm6, %v6192_v31, 0.0  ;;  %v2890_v31 = vsel %vm160_vm6, %v6223_v59, 0.0 }
 0x39d   :  { %v2766_v7 = vmul.f32 %v2702_v39, %v6740_v23  ;;  %v6741_v53 = vld [vmem:[#allocation34_spill] sm:$0xff] }
 0x39e   :  { %v2770_v43 = vmul.f32 %v2706_v45, %v6741_v53  ;;  %v6742_v60 = vld [vmem:[#allocation38_spill] sm:$0xff]  ;;  %v2833_v53 = vadd.f32 %v2832_v18, %v2831_v58  ;;  %v6750_v45 = vld [vmem:[#allocation83_spill] sm:$0xff]  ;;  %v2843_v18 = vsel %vm160_vm6, %v2758_v3, 0.0 }
 0x39f   :  { %v2774_v19 = vmul.f32 %v2710_v52, %v6742_v60  ;;  %v6743_v21 = vld [vmem:[#allocation42_spill] sm:$0xff]  ;;  %v2836_v60 = vsel %vm160_vm6, %v2742_v36, 0.0  ;;  %v2834_v52 = vsel %vm160_vm6, %v6750_v45, 0.0  ;;  %v2874_v36 = vsel %vm160_vm6, %v6168_v10, 0.0 }
 0x3a0   :  { %v2778_v28 = vmul.f32 %v2714_v35, %v6743_v21  ;;  %v6744_v27 = vld [vmem:[#allocation46_spill] sm:$0xff]  ;;  %v2837_v21 = vsel %vm160_vm6, %v2746_v51, 0.0  ;;  %v2898_v51 = vsel %vm160_vm6, %v6147_v46, 0.0  ;;  %v2878_v46 = vsel %vm160_vm6, %v6182_v41, 0.0 }
 0x3a1   :  { %v2782_v1 = vmul.f32 %v2718_v15, %v6744_v27  ;;  %v6745_v47 = vld [vmem:[#allocation50_spill] sm:$0xff]  ;;  %v2838_v35 = vadd.f32 %v2837_v21, %v2836_v60  ;;  %v6293_v15 = vadd.f32 %v2834_v52, %v2833_v53  ;;  %v2900_v23 = vadd.f32 %v2899_v14, %v2898_v51 }
 0x3a2   :  { %v2786_v0 = vmul.f32 %v2722_v44, %v6745_v47  ;;  %v6746_v2 = vld [vmem:[#allocation54_spill] sm:$0xff]  ;;  %v2839_v44 = vsel %vm160_vm6, %v2750_v55, 0.0  ;;  %v2847_v47 = vsel %vm160_vm6, %v2766_v7, 0.0  ;;  %v2851_v60 = vsel %vm160_vm6, %v2774_v19, 0.0 }
 0x3a3   :  { %v6278_v33 = vmul.f32 %v2726_v29, %v6746_v2  ;;  %v6747_v13 = vld [vmem:[#allocation58_spill] sm:$0xff]  ;;  %v2840_v29 = vadd.f32 %v2839_v44, %v2838_v35  ;;  %v2882_v41 = vsel %vm160_vm6, %v6196_v37, 0.0  ;;  %v2853_v52 = vsel %vm160_vm6, %v2778_v28, 0.0 }
 0x3a4   :  { %v6281_v30 = vmul.f32 %v2730_v63, %v6747_v13  ;;  %v6748_v8 = vld [vmem:[#allocation62_spill] sm:$0xff]  ;;  %v2841_v63 = vsel %vm160_vm6, %v2754_v26, 0.0  ;;  %v2845_v26 = vsel %vm160_vm6, %v2762_v17, 0.0  ;;  %v2886_v37 = vsel %vm160_vm6, %v6210_v12, 0.0 }
 0x3a5   :  { %v6284_v25 = vmul.f32 %v2734_v20, %v6748_v8  ;;  %v6749_v39 = vld [vmem:[#allocation66_spill] sm:$0xff]  ;;  %v2872_v20 = vsel %vm160_vm6, %v6161_v49, 0.0  ;;  %v2876_v49 = vsel %vm160_vm6, %v6175_v54, 0.0  ;;  %v2849_v8 = vsel %vm160_vm6, %v2770_v43, 0.0 }
 0x3a6   :  { %v6287_v42 = vmul.f32 %v2738_v6, %v6749_v39  ;;  %v2842_v6 = vadd.f32 %v2841_v63, %v2840_v29  ;;  %v2873_v58 = vadd.f32 %v2872_v20, %v2871_v22  ;;  %v2901_v22 = vsel %vm160_vm6, %v6157_v32, 0.0 }
 0x3a7   :  { %v2902_v10 = vadd.f32 %v2901_v22, %v2900_v23  ;;  %v2880_v54 = vsel %vm160_vm6, %v6189_v4, 0.0  ;;  %v2905_v32 = vsel %vm160_vm6, %v6171_v40, 0.0  ;;  %v2884_v4 = vsel %vm160_vm6, %v6203_v62, 0.0 }
 0x3a8   :  { %v2844_v55 = vadd.f32 %v2843_v18, %v2842_v6  ;;  %v2875_v5 = vadd.f32 %v2874_v36, %v2873_v58  ;;  %v2909_v40 = vsel %vm160_vm6, %v6185_v9, 0.0  ;;  %v2855_v29 = vsel %vm160_vm6, %v2782_v1, 0.0 }
 0x3a9   :  { %v2904_v17 = vadd.f32 %v2903_v57, %v2902_v10  ;;  %v2857_v6 = vsel %vm160_vm6, %v2786_v0, 0.0  ;;  %v2888_v62 = vsel %vm160_vm6, %v6217_v48, 0.0  ;;  %v2913_v9 = vsel %vm160_vm6, %v6199_v11, 0.0  ;;  %v6753_v57 = vld [vmem:[#allocation82_spill] sm:$0xff] }
 0x3aa   :  { %v2846_v3 = vadd.f32 %v2845_v26, %v2844_v55  ;;  %v2877_v27 = vadd.f32 %v2876_v49, %v2875_v5  ;;  %v2859_v12 = vsel %vm160_vm6, %v6278_v33, 0.0  ;;  %v2915_v36 = vsel %vm160_vm6, %v6206_v56, 0.0 }
 0x3ab   :  { %v2906_v7 = vadd.f32 %v2905_v32, %v2904_v17  ;;  %v2861_v48 = vsel %vm160_vm6, %v6281_v30, 0.0  ;;  %v2892_v11 = vsel %vm160_vm6, %v6229_v34, 0.0  ;;  %v2917_v55 = vsel %vm160_vm6, %v6213_v38, 0.0 }
 0x3ac   :  { %v2848_v2 = vadd.f32 %v2847_v47, %v2846_v3  ;;  %v2879_v13 = vadd.f32 %v2878_v46, %v2877_v27  ;;  %v2863_v59 = vsel %vm160_vm6, %v6284_v25, 0.0  ;;  %v2894_v56 = vsel %vm160_vm6, %v6235_v61, 0.0  ;;  %v6751_v3 = vld [vmem:[#allocation70_spill] sm:$0xff]  ;;  %v6752_v27 = vld [vmem:[#allocation79_spill] sm:$0xff] }
 0x3ad   :  { %v2908_v43 = vadd.f32 %v2907_v50, %v2906_v7  ;;  %v2919_v26 = vsel %vm160_vm6, %v6220_v16, 0.0  ;;  %v2896_v34 = vsel %vm160_vm6, %v6751_v3, 0.0  ;;  %v2865_v38 = vsel %vm160_vm6, %v6287_v42, 0.0  ;;  %v3894_v7 = vld [vmem:[%s6465_s11] sm:$0xff]  }
 0x3ae   :  { %v2850_v39 = vadd.f32 %v2849_v8, %v2848_v2  ;;  %v2881_v53 = vadd.f32 %v2880_v54, %v2879_v13  ;;  %v2921_v10 = vsel %vm160_vm6, %v6752_v27, 0.0  ;;  %v2923_v61 = vsel %vm160_vm6, %v6753_v57, 0.0  ;;  %v6754_v13 = vld [vmem:[#allocation88_spill] sm:$0xff]  ;;  %v6755_v54 = vld [vmem:[#allocation63_spill] sm:$0xff]  ;;  %v6387_v50 = vld [vmem:[%s6459_s13] sm:$0xff] }
 0x3af   :  { %v2910_v19 = vadd.f32 %v2909_v40, %v2908_v43  ;;  %v2925_v17 = vsel %vm160_vm6, %v6754_v13, 0.0  ;;  %v2927_v42 = vsel %vm160_vm6, %v6755_v54, 0.0 }
 0x3b0   :  { %v2852_v21 = vadd.f32 %v2851_v60, %v2850_v39  ;;  %v2883_v45 = vadd.f32 %v2882_v41, %v2881_v53  ;;  %v3892_v53 = vld [vmem:[%s6464_s10] sm:$0xff]  }
 0x3b1   :  { %v2912_v28 = vadd.f32 %v2911_v24, %v2910_v19  ;;  %3797 = vmatprep.subr.bf16.mxu1 %v3892_v53  ;;  %v6756_v60 = vld [vmem:[#allocation2_spill] sm:$0xff] }
 0x3b2   :  { %v2854_v35 = vadd.f32 %v2853_v52, %v2852_v21  ;;  %v2885_v44 = vadd.f32 %v2884_v4, %v2883_v45  ;;  %v2937_v41 = vsub.s32 2, %v6756_v60  ;;  %v3012_v45 = vsub.s32 6, %v6756_v60 }
 0x3b3   :  { %v2914_v1 = vadd.f32 %v2913_v9, %v2912_v28  ;;  %v3122_v13 = vsub.s32 3, %v6756_v60 }
 0x3b4   :  { %v2856_v63 = vadd.f32 %v2855_v29, %v2854_v35  ;;  %v2887_v20 = vadd.f32 %v2886_v37, %v2885_v44  ;;  %v2938_v21 = vrot.slane %v6387_v50, %v2937_v41  ;;  %v3013_v40 = vrot.slane %v6387_v50, %v3012_v45  ;;  %v4037_v29 = vld [vmem:[%s6460_s0 + $0x10] sm:$0xff] }
 0x3b5   :  { %v2916_v14 = vadd.f32 %v2915_v36, %v2914_v1  ;;  %v3020_v35 = vsub.s32 7, %v6756_v60  ;;  %v4040_v1 = vld [vmem:[%s6460_s0 + $0x8] sm:$0xff] }
 0x3b6   :  { %v2858_v58 = vadd.f32 %v2857_v6, %v2856_v63  ;;  %v2889_v18 = vadd.f32 %v2888_v62, %v2887_v20  ;;  %v4038_v20 = vld [vmem:[%s6460_s0] sm:$0xff]  ;;  %v4039_v62 = vld [vmem:[%s6460_s0 + $0x18] sm:$0xff] }
 0x3b7   :  { %v2918_v23 = vadd.f32 %v2917_v55, %v2916_v14 }
 0x3b8   :  { %v2860_v51 = vadd.f32 %v2859_v12, %v2858_v58  ;;  %v2891_v0 = vadd.f32 %v2890_v31, %v2889_v18  ;;  %v3021_v58 = vrot.slane %v6387_v50, %v3020_v35 }
 0x3b9   :  { %v2920_v22 = vadd.f32 %v2919_v26, %v2918_v23  ;;  %v3896_v23 = vld [vmem:[%s6465_s11 + $0x10] sm:$0xff]  }
 0x3ba   :  { %v2862_v5 = vadd.f32 %v2861_v48, %v2860_v51  ;;  %v2893_v33 = vadd.f32 %v2892_v11, %v2891_v0 }
 0x3bb   :  { %v2922_v46 = vadd.f32 %v2921_v10, %v2920_v22 }
 0x3bc   :  { %v2864_v49 = vadd.f32 %v2863_v59, %v2862_v5  ;;  %v2895_v30 = vadd.f32 %v2894_v56, %v2893_v33  ;;  %v3895_v33 = vld [vmem:[%s6465_s11 + $0x8] sm:$0xff]   ;;  %v3897_v59 = vld [vmem:[%s6465_s11 + $0x18] sm:$0xff]   ;;  %v3428_v56 = vld [vmem:[%s6466_s14] ss:$0 sm:$0xff] }
 0x3bd   :  { %v2924_v2 = vadd.f32 %v2923_v61, %v2922_v46 }
 0x3be   :  { %v2866_v47 = vadd.f32 %v2865_v38, %v2864_v49  ;;  %v2897_v25 = vadd.f32 %v2896_v34, %v2895_v30 }
 0x3bf   :  { %v2926_v8 = vadd.f32 %v2925_v17, %v2924_v2  ;;  %v3899_v2 = vld [vmem:[%s6467_s12 + $0x8] sm:$0xff]   ;;  %v3123_v17 = vrot.slane %v6387_v50, %v3122_v13 }
 0x3c0   :  { %v2929_v16 = vpack.c.bf16 %v2866_v47, %v6293_v15  ;;  %v3893_v15 = vld [vmem:[%s6464_s10 + $0x8] sm:$0xff]  }
 0x3c1   :  { %v2928_v32 = vadd.f32 %v2927_v42, %v2926_v8  ;;  %v3210_v8 = vsub.s32 4, %v6756_v60 }
 0x3c2   :  { %3793 = vmatprep.mubr.msk.bf16.mxu1 %vm160_vm6, %v2929_v16  ;;  %v3898_v16 = vld [vmem:[%s6467_s12] sm:$0xff]  }
 0x3c3   :  { %v2930_v39 = vpack.c.bf16 %v2928_v32, %v2897_v25  ;;  %v3211_v32 = vrot.slane %v6387_v50, %v3210_v8 }
 0x3c5   :  { %3794 = vmatmul.mubr.msk.bf16.vlgmr.msra.gmra.mrb[88].mxu1 %vm160_vm6, %v2930_v39  ;;  %v3218_v39 = vsub.s32 5, %v6756_v60 }
 0x3c6   :  { %3798 = vmatpush3.bf16.msra.mxu1 %v3892_v53 }
 0x3c7   :  { %3799 = vmatprep.subr.bf16.mxu1 %v3893_v15 }
 0x3ca   :  { %3800 = vmatpush3.bf16.msra.mxu1 %v3893_v15 }
 0x3cb   :  { %3805 = vmatprep.subr.bf16.mxu1 %v3894_v7 }
 0x498   :  { %v3795_v43 = vpop.f32.mrb[88].mxu1 }
 0x499   :  { %v3000_v52 = vadd.f32 %v3795_v43, %v2938_v21  ;;  %v2991_v4 = vpop.f32.mrb[89].mxu1 }
 0x49a   :  { %v2992_v44 = vadd.f32 %v2991_v4, %v2938_v21  ;;  %v3796_v19 = vpop.f32.mrb[90].mxu1 }
 0x49b   :  { %v3008_v37 = vadd.f32 %v4037_v29, %v3000_v52  ;;  %v3003_v24 = vadd.f32 %v3796_v19, %v2938_v21  ;;  %v2994_v63 = vpop.f32.mrb[91].mxu1 }
 0x49c   :  { %v3006_v28 = vadd.f32 %v4038_v20, %v2992_v44  ;;  %v2995_v6 = vadd.f32 %v2994_v63, %v2938_v21 }
 0x49d   :  { %v3009_v9 = vadd.f32 %v4039_v62, %v3003_v24  ;;  %v3016_v31 = vmul.f32 %v3013_v40, %v3008_v37  ;;  %v3439_v62 = vld [vmem:[%s6468_s15] ss:$0 sm:$0xff] }
 0x49e   :  { %v3014_v18 = vmul.f32 %v3013_v40, %v3006_v28  ;;  %v3007_v12 = vadd.f32 %v4040_v1, %v2995_v6 }
 0x49f   :  { %v3017_v36 = vmul.f32 %v3013_v40, %v3009_v9  ;;  %v3024_v11 = vadd.f32 %v3021_v58, %v3016_v31 }
 0x4a0   :  { %v3015_v51 = vmul.f32 %v3013_v40, %v3007_v12  ;;  %v3022_v14 = vadd.f32 %v3021_v58, %v3014_v18  ;;  %v3219_v40 = vrot.slane %v6387_v50, %v3218_v39 }
 0x4a1   :  { %v3025_v0 = vadd.f32 %v3021_v58, %v3017_v36 }
 0x4a2   :  { %v3023_v48 = vadd.f32 %v3021_v58, %v3015_v51 }
 0x4a3   :  { %v3027_v5 = vpack.c.bf16 %v3025_v0, %v3024_v11 }
 0x4a4   :  { %v3026_v55 = vpack.c.bf16 %v3023_v48, %v3022_v14 }
 0x4a6   :  { %3801 = vmatprep.mubr.msk.bf16.mxu1 %vm160_vm6, %v3026_v55 }
 0x4a7   :  { %3802 = vmatmul.mubr.msk.bf16.vlgmr.msra.gmra.mrb[92].mxu1 %vm160_vm6, %v3027_v5 }
 0x4a8   :  { %3806 = vmatpush3.bf16.msra.mxu1 %v3894_v7 }
 0x4a9   :  { %3807 = vmatprep.subr.bf16.mxu1 %v3895_v33 }
 0x4ac   :  { %3808 = vmatpush3.bf16.msra.mxu1 %v3895_v33 }
 0x4ad   :  { %3809 = vmatprep.subr.bf16.mxu1 %v3896_v23 }
 0x4b0   :  { %3810 = vmatpush3.bf16.msra.mxu1 %v3896_v23 }
 0x4b1   :  { %3811 = vmatprep.subr.bf16.mxu1 %v3897_v59 }
 0x4b4   :  { %3812 = vmatpush3.bf16.msra.mxu1 %v3897_v59 }
 0x4b5   :  { %3817 = vmatprep.subr.bf16.mxu1 %v3898_v16 }
 0x57a   :  { %v3803_v26 = vpop.f32.mrb[92].mxu1 }
 0x57b   :  { %v3100_v49 = vadd.f32 %v3803_v26, %v3428_v56  ;;  %v3091_v30 = vpop.f32.mrb[93].mxu1 }
 0x57c   :  { %v3092_v22 = vadd.f32 %v3428_v56, %v3091_v30  ;;  %v3804_v3 = vpop.f32.mrb[94].mxu1 }
 0x57d   :  { %v3103_v34 = vadd.f32 %v3804_v3, %v3428_v56  ;;  %v3094_v38 = vpop.f32.mrb[95].mxu1  ;;  %v3108_v10 = vmax.f32 %v3100_v49, 0.0 }
 0x57e   :  { %v3095_v27 = vadd.f32 %v3428_v56, %v3094_v38  ;;  %v3106_v25 = vmax.f32 %v3092_v22, 0.0 }
 0x57f   :  { %v3109_v47 = vmax.f32 %v3103_v34, 0.0 }
 0x580   :  { %v3107_v46 = vmax.f32 %v3095_v27, 0.0 }
 0x581   :  { %v3111_v57 = vpack.c.bf16 %v3109_v47, %v3108_v10 }
 0x582   :  { %v3110_v61 = vpack.c.bf16 %v3107_v46, %v3106_v25 }
 0x584   :  { %3813 = vmatprep.mubr.msk.bf16.mxu1 %vm3148_vm11, %v3110_v61 }
 0x585   :  { %3814 = vmatmul.mubr.msk.bf16.vlgmr.msra.gmra.mrb[96].mxu1 %vm3148_vm11, %v3111_v57 }
 0x586   :  { %3818 = vmatpush3.bf16.msra.mxu1 %v3898_v16 }
 0x587   :  { %3819 = vmatprep.subr.bf16.mxu1 %v3899_v2 }
 0x58a   :  { %3820 = vmatpush3.bf16.msra.mxu1 %v3899_v2 }
 0x658   :  { %v3815_v54 = vpop.f32.mrb[96].mxu1 }
 0x659   :  { %v3198_v42 = vadd.f32 %v3815_v54, %v3123_v17  ;;  %v3189_v53 = vpop.f32.mrb[97].mxu1 }
 0x65a   :  { %v3190_v15 = vadd.f32 %v3189_v53, %v3123_v17  ;;  %v3816_v7 = vpop.f32.mrb[98].mxu1 }
 0x65b   :  { %v3206_v41 = vadd.f32 %v3198_v42, %v3024_v11  ;;  %v3201_v21 = vadd.f32 %v3816_v7, %v3123_v17  ;;  %v3192_v45 = vpop.f32.mrb[99].mxu1 }
 0x65c   :  { %v3204_v43 = vadd.f32 %v3190_v15, %v3022_v14  ;;  %v3193_v52 = vadd.f32 %v3192_v45, %v3123_v17 }
 0x65d   :  { %v3214_v4 = vmul.f32 %v3211_v32, %v3206_v41  ;;  %v3207_v35 = vadd.f32 %v3201_v21, %v3025_v0 }
 0x65e   :  { %v3212_v44 = vmul.f32 %v3211_v32, %v3204_v43  ;;  %v3205_v19 = vadd.f32 %v3193_v52, %v3023_v48 }
 0x65f   :  { %v3215_v29 = vmul.f32 %v3211_v32, %v3207_v35  ;;  %v3222_v24 = vadd.f32 %v3219_v40, %v3214_v4 }
 0x660   :  { %v3213_v37 = vmul.f32 %v3211_v32, %v3205_v19  ;;  %v3220_v20 = vadd.f32 %v3219_v40, %v3212_v44 }
 0x661   :  { %v3223_v63 = vadd.f32 %v3219_v40, %v3215_v29 }
 0x662   :  { %v3221_v60 = vadd.f32 %v3219_v40, %v3213_v37 }
 0x663   :  { %v3225_v28 = vpack.c.bf16 %v3223_v63, %v3222_v24 }
 0x664   :  { %v3224_v6 = vpack.c.bf16 %v3221_v60, %v3220_v20 }
 0x666   :  { %3821 = vmatprep.mubr.msk.bf16.mxu1 %vm160_vm6, %v3224_v6 }
 0x667   :  { %3822 = vmatmul.mubr.msk.bf16.vlgmr.msra.gmra.mrb[100].mxu1 %vm160_vm6, %v3225_v28 }
 0x73a   :  { %v3823_v50 = vpop.f32.mrb[100].mxu1 }
 0x73b   :  { %v3298_v9 = vadd.f32 %v3823_v50, %v3439_v62  ;;  %v3289_v58 = vpop.f32.mrb[101].mxu1 }
 0x73c   :  { %v3290_v18 = vadd.f32 %v3439_v62, %v3289_v58  ;;  %v3824_v1 = vpop.f32.mrb[102].mxu1 }
 0x73d   :  { %v3306_v12 = vmax.f32 %v3298_v9, 0.0  ;;  %v3301_v31 = vadd.f32 %v3824_v1, %v3439_v62  ;;  %v3292_v36 = vpop.f32.mrb[103].mxu1 }
 0x73e   :  { %v3304_v51 = vmax.f32 %v3290_v18, 0.0  ;;  %v3293_v0 = vadd.f32 %v3439_v62, %v3292_v36 }
 0x73f   :  { %3310 = vst.msk [vmem:[%s6469_s16 + $0x10] sm:$0xff] %vm160_vm6, %v3306_v12  ;;  %v3307_v14 = vmax.f32 %v3301_v31, 0.0 }
 0x740   :  { %3308 = vst.msk [vmem:[%s6469_s16] sm:$0xff] %vm160_vm6, %v3304_v51  ;;  %v3305_v48 = vmax.f32 %v3293_v0, 0.0 }
 0x741   :  { %3311 = vst.msk [vmem:[%s6469_s16 + $0x18] sm:$0xff] %vm160_vm6, %v3307_v14 }
 0x742   :  { %3309 = vst.msk [vmem:[%s6469_s16 + $0x8] sm:$0xff] %vm160_vm6, %v3305_v48 }

</bundles_post_ra>
